<compile_context>
chip_gen: v6e
topology: v6e:2x2x1
jax: 0.10.0
libtpu: 0.0.40
codegen_flags: <defaults>
</compile_context>

<pallas_src>
import functools

import jax
import jax.numpy as jnp
from jax import lax
from jax.experimental import pallas as pl
from jax.experimental.pallas import tpu as pltpu


# ----------------------------------------------------------------------------
# Fused LeNet kernel: one grid step == block_b batch samples, all in VMEM.
# ----------------------------------------------------------------------------
def _lenet_kernel(x_ref,
                  bd1_ref, bb1_ref, q1_ref, p1_ref,
                  bd2_ref, bb2_ref, q2_ref, p2_ref,
                  w3_ref, b3_ref, wfc_ref, bfc_ref, wout_ref, bout_ref,
                  out_ref, a2_scr):
    f32, bf16 = jnp.float32, jnp.bfloat16
    bsz = x_ref.shape[0]

    def conv_rows(a_f32, w_ref, bias_ref, oh, kh=5):
        # Valid 5x5 conv as 5 pre-summed block-diagonal slabs (one per kernel
        # row offset i); the kernel-column offset j is baked into the slab.
        acc = None
        for i in range(kh):
            lhs = a_f32[i:i + oh, :].astype(bf16)              # (oh, W*Cin)
            d = jnp.dot(lhs, w_ref[i], preferred_element_type=f32)
            acc = d if acc is None else acc + d
        return acc + bias_ref[...]                             # (oh, ow*Cout)

    def pool2x2(a_f32, q_ref, p_ref):
        # AvgPool2d(2,2) == (0.5*row-select) @ a @ (0.5*col-select)
        t = jnp.dot(a_f32.astype(bf16), p_ref[...], preferred_element_type=f32)
        return jnp.dot(q_ref[...], t.astype(bf16), preferred_element_type=f32)

    # --- Per-sample conv stack (statically unrolled over the B samples of the
    # block; independent samples give the scheduler MXU pushes to interleave).
    for b in range(bsz):
        a0 = x_ref[b].astype(f32)                              # (32, 32*C)
        a1 = jnp.maximum(conv_rows(a0, bd1_ref, bb1_ref, 28), 0.0)   # (28, 168)
        a1 = pool2x2(a1, q1_ref, p1_ref)                       # (14, 84)
        a2 = jnp.maximum(conv_rows(a1, bd2_ref, bb2_ref, 10), 0.0)   # (10, 160)
        a2 = pool2x2(a2, q2_ref, p2_ref)                       # (5, 80) f32
        for y in range(5):                                     # stage row-split
            a2_scr[y, b:b + 1, :] = a2[y:y + 1, :]

    # --- Batched classifier tail: M = bsz matmuls instead of per-sample M = 1.
    acc3 = None
    for y in range(5):
        d = jnp.dot(a2_scr[y].astype(bf16), w3_ref[y],
                    preferred_element_type=f32)                # (bsz, 120)
        acc3 = d if acc3 is None else acc3 + d
    h = jnp.maximum(acc3 + b3_ref[...], 0.0)                   # conv3 + ReLU
    h = jnp.maximum(jnp.dot(h.astype(bf16), wfc_ref[...],
                            preferred_element_type=f32) + bfc_ref[...], 0.0)
    out_ref[...] = (jnp.dot(h.astype(bf16), wout_ref[...],
                            preferred_element_type=f32) + bout_ref[...])


def _const_index_map(ndim):
    return lambda n: (0,) * ndim


_WEIGHT_ORDER = ("bd1", "bb1", "q1", "p1",
                 "bd2", "bb2", "q2", "p2",
                 "w3", "b3", "wfc", "bfc", "wout", "bout")


@functools.partial(jax.jit, static_argnames=("num_classes", "block_b"))
def lenet_forward(x, kparams, *, num_classes, block_b=8):
    """x: (N, C_in, 32, 32) float32 NCHW  ->  (N, num_classes) float32."""
    N, C, H, W = x.shape
    out_dim = kparams["bout"].shape[1]          # lane-dense padded logits width

    # Per-forward glue (tiny): channels-last 2D layout, bf16, batch padding.
    x2 = jnp.transpose(x, (0, 2, 3, 1)).reshape(N, H, W * C).astype(jnp.bfloat16)
    n_pad = pl.cdiv(N, block_b) * block_b
    if n_pad != N:
        x2 = jnp.pad(x2, ((0, n_pad - N), (0, 0), (0, 0)))

    weights = [kparams[k] for k in _WEIGHT_ORDER]
    in_specs = [pl.BlockSpec((block_b, H, W * C), lambda n: (n, 0, 0))]
    in_specs += [pl.BlockSpec(w.shape, _const_index_map(w.ndim)) for w in weights]

    out = pl.pallas_call(
        _lenet_kernel,
        out_shape=jax.ShapeDtypeStruct((n_pad, out_dim), jnp.float32),
        grid=(n_pad // block_b,),
        in_specs=in_specs,
        out_specs=pl.BlockSpec((block_b, out_dim), lambda n: (n, 0)),
        scratch_shapes=[pltpu.VMEM((5, block_b, 80), jnp.float32)],
        compiler_params=pltpu.CompilerParams(
            dimension_semantics=("parallel",)),
    )(x2, *weights)
    return out[:N, :num_classes]


# ----------------------------------------------------------------------------
# One-time parameter preparation (outside the jitted forward)
# ----------------------------------------------------------------------------
def _pool_matrices(oh, ow, c):
    """AvgPool2d(2,2) as Q @ X @ P with X in (oh, ow*c) channels-last layout."""
    ohp, owp = oh // 2, ow // 2
    sel_h = (jnp.arange(oh)[:, None] // 2 ==
             jnp.arange(ohp)[None, :]).astype(jnp.float32)        # (oh, ohp)
    sel_w = (jnp.arange(ow)[:, None] // 2 ==
             jnp.arange(owp)[None, :]).astype(jnp.float32)        # (ow, owp)
    q = 0.5 * sel_h.T                                             # (ohp, oh)
    p = 0.5 * jnp.kron(sel_w, jnp.eye(c, dtype=jnp.float32))      # (ow*c, owp*c)
    return q.astype(jnp.bfloat16), p.astype(jnp.bfloat16)


def _conv_rowsum_weights(w, in_w):
    """PyTorch (O,C,KH,KW) conv weights -> (KH, in_w*C, ow*O) bf16 slabs.

    For kernel-row offset i the slab satisfies
        (a[i:i+oh, :] @ slab[i])[y, x*O + o]
            = sum_{j,c} a[y+i, (x+j)*C + c] * w[o, c, i, j]
    i.e. the kernel-column offset j is pre-summed into the (zero-padded) K dim.
    """
    o, c, kh, kw = w.shape
    ow = in_w - kw + 1
    eye = jnp.eye(ow, dtype=jnp.float32)
    slabs = []
    for i in range(kh):
        acc = jnp.zeros((in_w * c, ow * o), jnp.float32)
        for j in range(kw):
            blk = jnp.kron(eye, w[:, :, i, j].astype(jnp.float32).T)  # (ow*c, ow*o)
            acc = acc.at[j * c:(j + ow) * c, :].add(blk)
        slabs.append(acc)
    return jnp.stack(slabs, axis=0).astype(jnp.bfloat16)


def prepare_params(params):
    """Convert PyTorch-layout params to the kernel's VMEM layout (run once)."""
    f32, bf16 = jnp.float32, jnp.bfloat16
    kp = {}
    # conv1: (32, 32*C) -> (28, 28*6); pool1 -> (14, 84)
    kp["bd1"] = _conv_rowsum_weights(params["w1"], 32)
    kp["bb1"] = jnp.tile(params["b1"], 28).reshape(1, 28 * 6).astype(f32)
    kp["q1"], kp["p1"] = _pool_matrices(28, 28, 6)
    # conv2: (14, 84) -> (10, 10*16); pool2 -> (5, 80)
    kp["bd2"] = _conv_rowsum_weights(params["w2"], 14)
    kp["bb2"] = jnp.tile(params["b2"], 10).reshape(1, 10 * 16).astype(f32)
    kp["q2"], kp["p2"] = _pool_matrices(10, 10, 16)
    # conv3: 5x5x16 -> 120, row-split as (5, 80, 120) in (y, x*16+c, o) order
    kp["w3"] = jnp.transpose(params["w3"], (2, 3, 1, 0)).reshape(5, 80, 120) \
                  .astype(bf16)
    kp["b3"] = params["b3"].reshape(1, 120).astype(f32)
    # FC layers: pre-transposed bf16; output padded to a lane-dense 128 multiple.
    kp["wfc"] = params["wfc"].T.astype(bf16)                  # (120, 84)
    kp["bfc"] = params["bfc"].reshape(1, -1).astype(f32)
    nc, hid = params["wout"].shape                            # (num_classes, 84)
    out_dim = pl.cdiv(nc, 128) * 128
    kp["wout"] = jnp.zeros((hid, out_dim), bf16).at[:, :nc].set(
        params["wout"].T.astype(bf16))
    kp["bout"] = jnp.zeros((1, out_dim), f32).at[:, :nc].set(
        params["bout"].reshape(1, -1).astype(f32))
    return kp


def init_params(key, in_channels=1, num_classes=10):
    ks = jax.random.split(key, 10)

    def w_init(k, shape, fan_in):
        return jax.random.normal(k, shape, jnp.float32) / jnp.sqrt(fan_in)

    return {
        "w1": w_init(ks[0], (6, in_channels, 5, 5), in_channels * 25),
        "b1": w_init(ks[1], (6,), in_channels * 25),
        "w2": w_init(ks[2], (16, 6, 5, 5), 6 * 25),
        "b2": w_init(ks[3], (16,), 6 * 25),
        "w3": w_init(ks[4], (120, 16, 5, 5), 16 * 25),
        "b3": w_init(ks[5], (120,), 16 * 25),
        "wfc": w_init(ks[6], (84, 120), 120),    # PyTorch Linear: (out, in)
        "bfc": w_init(ks[7], (84,), 120),
        "wout": w_init(ks[8], (num_classes, 84), 84),
        "bout": w_init(ks[9], (num_classes,), 84),
    }


# ----------------------------------------------------------------------------
# Pure-JAX reference (correctness check only)
# ----------------------------------------------------------------------------
def lenet_reference(x, params):
    dn = ("NCHW", "OIHW", "NCHW")
    hi = lax.Precision.HIGHEST

    def conv(h, w, b):
        y = lax.conv_general_dilated(h, w, (1, 1), "VALID",
                                     dimension_numbers=dn, precision=hi)
        return y + b.reshape(1, -1, 1, 1)

    def pool(h):
        return 0.25 * (h[:, :, 0::2, 0::2] + h[:, :, 0::2, 1::2]
                       + h[:, :, 1::2, 0::2] + h[:, :, 1::2, 1::2])

    r = jax.nn.relu
    h = pool(r(conv(x, params["w1"], params["b1"])))
    h = pool(r(conv(h, params["w2"], params["b2"])))
    h = r(conv(h, params["w3"], params["b3"])).reshape(x.shape[0], -1)
    h = r(jnp.dot(h, params["wfc"].T, precision=hi) + params["bfc"])
    return jnp.dot(h, params["wout"].T, precision=hi) + params["bout"]


# ----------------------------------------------------------------------------
if __name__ == "__main__":
    key = jax.random.PRNGKey(0)
    k_x, k_p = jax.random.split(key)

    # LeNet's layer sizes imply 32x32 spatial input (28->14->10->5->1).
    # batch=18 with block_b=8 exercises batch padding and a grid of length 3.
    batch, in_channels, num_classes = 18, 3, 10
    x = jax.random.normal(k_x, (batch, in_channels, 32, 32), jnp.float32)
    params = init_params(k_p, in_channels=in_channels, num_classes=num_classes)
    kparams = prepare_params(params)          # one-time weight re-layout

    out = lenet_forward(x, kparams, num_classes=num_classes)
    out = jax.block_until_ready(out)

    assert out.shape == (batch, num_classes), out.shape
    assert bool(jnp.all(jnp.isfinite(out)))

    ref = jax.block_until_ready(lenet_reference(x, params))
    max_err = float(jnp.max(jnp.abs(out - ref)))
    # bf16 MXU weights/activations vs. f32 HIGHEST-precision reference.
    assert bool(jnp.allclose(out, ref, rtol=2e-2, atol=2e-2)), max_err

    print("KERNEL_OK")
</pallas_src>

<mosaic_0001>
module attributes {stable_mosaic.version = 11 : i64} {
  func.func @_lenet_kernel(%arg0: i32, %arg1: memref<8x32x96xbf16, #tpu.memory_space<vmem>>, %arg2: memref<5x96x168xbf16, #tpu.memory_space<vmem>>, %arg3: memref<1x168xf32, #tpu.memory_space<vmem>>, %arg4: memref<14x28xbf16, #tpu.memory_space<vmem>>, %arg5: memref<168x84xbf16, #tpu.memory_space<vmem>>, %arg6: memref<5x84x160xbf16, #tpu.memory_space<vmem>>, %arg7: memref<1x160xf32, #tpu.memory_space<vmem>>, %arg8: memref<5x10xbf16, #tpu.memory_space<vmem>>, %arg9: memref<160x80xbf16, #tpu.memory_space<vmem>>, %arg10: memref<5x80x120xbf16, #tpu.memory_space<vmem>>, %arg11: memref<1x120xf32, #tpu.memory_space<vmem>>, %arg12: memref<120x84xbf16, #tpu.memory_space<vmem>>, %arg13: memref<1x84xf32, #tpu.memory_space<vmem>>, %arg14: memref<84x128xbf16, #tpu.memory_space<vmem>>, %arg15: memref<1x128xf32, #tpu.memory_space<vmem>>, %arg16: memref<8x128xf32, #tpu.memory_space<vmem>>, %arg17: memref<5x8x80xf32, #tpu.memory_space<vmem>>) attributes {dimension_semantics = [#tpu.dimension_semantics<parallel>], iteration_bounds = array<i64: 3>, scalar_prefetch = 0 : i64, scratch_operands = 1 : i64, tpu.core_type = #tpu.core_type<tc>, window_params = [{transform_indices = @transform_0, window_bounds = array<i64: 8, 32, 96>}, {pipeline_mode = #tpu.pipeline_mode<synchronous>, transform_indices = @transform_1, window_bounds = array<i64: 5, 96, 168>}, {pipeline_mode = #tpu.pipeline_mode<synchronous>, transform_indices = @transform_2, window_bounds = array<i64: 1, 168>}, {pipeline_mode = #tpu.pipeline_mode<synchronous>, transform_indices = @transform_3, window_bounds = array<i64: 14, 28>}, {pipeline_mode = #tpu.pipeline_mode<synchronous>, transform_indices = @transform_4, window_bounds = array<i64: 168, 84>}, {pipeline_mode = #tpu.pipeline_mode<synchronous>, transform_indices = @transform_5, window_bounds = array<i64: 5, 84, 160>}, {pipeline_mode = #tpu.pipeline_mode<synchronous>, transform_indices = @transform_6, window_bounds = array<i64: 1, 160>}, {pipeline_mode = #tpu.pipeline_mode<synchronous>, transform_indices = @transform_7, window_bounds = array<i64: 5, 10>}, {pipeline_mode = #tpu.pipeline_mode<synchronous>, transform_indices = @transform_8, window_bounds = array<i64: 160, 80>}, {pipeline_mode = #tpu.pipeline_mode<synchronous>, transform_indices = @transform_9, window_bounds = array<i64: 5, 80, 120>}, {pipeline_mode = #tpu.pipeline_mode<synchronous>, transform_indices = @transform_10, window_bounds = array<i64: 1, 120>}, {pipeline_mode = #tpu.pipeline_mode<synchronous>, transform_indices = @transform_11, window_bounds = array<i64: 120, 84>}, {pipeline_mode = #tpu.pipeline_mode<synchronous>, transform_indices = @transform_12, window_bounds = array<i64: 1, 84>}, {pipeline_mode = #tpu.pipeline_mode<synchronous>, transform_indices = @transform_13, window_bounds = array<i64: 84, 128>}, {pipeline_mode = #tpu.pipeline_mode<synchronous>, transform_indices = @transform_14, window_bounds = array<i64: 1, 128>}, {transform_indices = @transform_15, window_bounds = array<i64: 8, 128>}]} {
    %c0 = arith.constant 0 : index
    %c0_0 = arith.constant 0 : index
    %c0_1 = arith.constant 0 : index
    %0 = vector.load %arg1[%c0, %c0_0, %c0_1] : memref<8x32x96xbf16, #tpu.memory_space<vmem>>, vector<1x32x96xbf16>
    %1 = vector.shape_cast %0 : vector<1x32x96xbf16> to vector<32x96xbf16>
    %2 = arith.extf %1 : vector<32x96xbf16> to vector<32x96xf32>
    %3 = vector.extract_strided_slice %2 {offsets = [0, 0], sizes = [28, 96], strides = [1, 1]} : vector<32x96xf32> to vector<28x96xf32>
    %4 = arith.truncf %3 : vector<28x96xf32> to vector<28x96xbf16>
    %c0_2 = arith.constant 0 : index
    %c0_3 = arith.constant 0 : index
    %c0_4 = arith.constant 0 : index
    %5 = vector.load %arg2[%c0_2, %c0_3, %c0_4] : memref<5x96x168xbf16, #tpu.memory_space<vmem>>, vector<1x96x168xbf16>
    %6 = vector.shape_cast %5 : vector<1x96x168xbf16> to vector<96x168xbf16>
    %cst = arith.constant dense<0.000000e+00> : vector<28x168xf32>
    %7 = tpu.matmul %4, %6, %cst {dimension_numbers = #tpu.dot_dimension_numbers<[1], [0], [0], [1], [0, 0, 1, 1], [], []>} : vector<28x96xbf16>, vector<96x168xbf16>, vector<28x168xf32> -> vector<28x168xf32>
    %8 = vector.extract_strided_slice %2 {offsets = [1, 0], sizes = [28, 96], strides = [1, 1]} : vector<32x96xf32> to vector<28x96xf32>
    %9 = arith.truncf %8 : vector<28x96xf32> to vector<28x96xbf16>
    %c1 = arith.constant 1 : index
    %c0_5 = arith.constant 0 : index
    %c0_6 = arith.constant 0 : index
    %10 = vector.load %arg2[%c1, %c0_5, %c0_6] : memref<5x96x168xbf16, #tpu.memory_space<vmem>>, vector<1x96x168xbf16>
    %11 = vector.shape_cast %10 : vector<1x96x168xbf16> to vector<96x168xbf16>
    %cst_7 = arith.constant dense<0.000000e+00> : vector<28x168xf32>
    %12 = tpu.matmul %9, %11, %cst_7 {dimension_numbers = #tpu.dot_dimension_numbers<[1], [0], [0], [1], [0, 0, 1, 1], [], []>} : vector<28x96xbf16>, vector<96x168xbf16>, vector<28x168xf32> -> vector<28x168xf32>
    %13 = arith.addf %7, %12 : vector<28x168xf32>
    %14 = vector.extract_strided_slice %2 {offsets = [2, 0], sizes = [28, 96], strides = [1, 1]} : vector<32x96xf32> to vector<28x96xf32>
    %15 = arith.truncf %14 : vector<28x96xf32> to vector<28x96xbf16>
    %c2 = arith.constant 2 : index
    %c0_8 = arith.constant 0 : index
    %c0_9 = arith.constant 0 : index
    %16 = vector.load %arg2[%c2, %c0_8, %c0_9] : memref<5x96x168xbf16, #tpu.memory_space<vmem>>, vector<1x96x168xbf16>
    %17 = vector.shape_cast %16 : vector<1x96x168xbf16> to vector<96x168xbf16>
    %cst_10 = arith.constant dense<0.000000e+00> : vector<28x168xf32>
    %18 = tpu.matmul %15, %17, %cst_10 {dimension_numbers = #tpu.dot_dimension_numbers<[1], [0], [0], [1], [0, 0, 1, 1], [], []>} : vector<28x96xbf16>, vector<96x168xbf16>, vector<28x168xf32> -> vector<28x168xf32>
    %19 = arith.addf %13, %18 : vector<28x168xf32>
    %20 = vector.extract_strided_slice %2 {offsets = [3, 0], sizes = [28, 96], strides = [1, 1]} : vector<32x96xf32> to vector<28x96xf32>
    %21 = arith.truncf %20 : vector<28x96xf32> to vector<28x96xbf16>
    %c3 = arith.constant 3 : index
    %c0_11 = arith.constant 0 : index
    %c0_12 = arith.constant 0 : index
    %22 = vector.load %arg2[%c3, %c0_11, %c0_12] : memref<5x96x168xbf16, #tpu.memory_space<vmem>>, vector<1x96x168xbf16>
    %23 = vector.shape_cast %22 : vector<1x96x168xbf16> to vector<96x168xbf16>
    %cst_13 = arith.constant dense<0.000000e+00> : vector<28x168xf32>
    %24 = tpu.matmul %21, %23, %cst_13 {dimension_numbers = #tpu.dot_dimension_numbers<[1], [0], [0], [1], [0, 0, 1, 1], [], []>} : vector<28x96xbf16>, vector<96x168xbf16>, vector<28x168xf32> -> vector<28x168xf32>
    %25 = arith.addf %19, %24 : vector<28x168xf32>
    %26 = vector.extract_strided_slice %2 {offsets = [4, 0], sizes = [28, 96], strides = [1, 1]} : vector<32x96xf32> to vector<28x96xf32>
    %27 = arith.truncf %26 : vector<28x96xf32> to vector<28x96xbf16>
    %c4 = arith.constant 4 : index
    %c0_14 = arith.constant 0 : index
    %c0_15 = arith.constant 0 : index
    %28 = vector.load %arg2[%c4, %c0_14, %c0_15] : memref<5x96x168xbf16, #tpu.memory_space<vmem>>, vector<1x96x168xbf16>
    %29 = vector.shape_cast %28 : vector<1x96x168xbf16> to vector<96x168xbf16>
    %cst_16 = arith.constant dense<0.000000e+00> : vector<28x168xf32>
    %30 = tpu.matmul %27, %29, %cst_16 {dimension_numbers = #tpu.dot_dimension_numbers<[1], [0], [0], [1], [0, 0, 1, 1], [], []>} : vector<28x96xbf16>, vector<96x168xbf16>, vector<28x168xf32> -> vector<28x168xf32>
    %31 = arith.addf %25, %30 : vector<28x168xf32>
    %c0_17 = arith.constant 0 : index
    %c0_18 = arith.constant 0 : index
    %32 = vector.load %arg3[%c0_17, %c0_18] : memref<1x168xf32, #tpu.memory_space<vmem>>, vector<1x168xf32>
    %33 = vector.broadcast %32 : vector<1x168xf32> to vector<28x168xf32>
    %34 = arith.addf %31, %33 : vector<28x168xf32>
    %cst_19 = arith.constant 0.000000e+00 : f32
    %35 = vector.broadcast %cst_19 : f32 to vector<28x168xf32>
    %36 = arith.maximumf %34, %35 : vector<28x168xf32>
    %37 = arith.truncf %36 : vector<28x168xf32> to vector<28x168xbf16>
    %c0_20 = arith.constant 0 : index
    %c0_21 = arith.constant 0 : index
    %38 = vector.load %arg5[%c0_20, %c0_21] : memref<168x84xbf16, #tpu.memory_space<vmem>>, vector<168x84xbf16>
    %cst_22 = arith.constant dense<0.000000e+00> : vector<28x84xf32>
    %39 = tpu.matmul %37, %38, %cst_22 {dimension_numbers = #tpu.dot_dimension_numbers<[1], [0], [0], [1], [0, 0, 1, 1], [], []>} : vector<28x168xbf16>, vector<168x84xbf16>, vector<28x84xf32> -> vector<28x84xf32>
    %c0_23 = arith.constant 0 : index
    %c0_24 = arith.constant 0 : index
    %40 = vector.load %arg4[%c0_23, %c0_24] : memref<14x28xbf16, #tpu.memory_space<vmem>>, vector<14x28xbf16>
    %41 = arith.truncf %39 : vector<28x84xf32> to vector<28x84xbf16>
    %cst_25 = arith.constant dense<0.000000e+00> : vector<14x84xf32>
    %42 = tpu.matmul %40, %41, %cst_25 {dimension_numbers = #tpu.dot_dimension_numbers<[1], [0], [0], [1], [0, 0, 1, 1], [], []>} : vector<14x28xbf16>, vector<28x84xbf16>, vector<14x84xf32> -> vector<14x84xf32>
    %43 = vector.extract_strided_slice %42 {offsets = [0, 0], sizes = [10, 84], strides = [1, 1]} : vector<14x84xf32> to vector<10x84xf32>
    %44 = arith.truncf %43 : vector<10x84xf32> to vector<10x84xbf16>
    %c0_26 = arith.constant 0 : index
    %c0_27 = arith.constant 0 : index
    %c0_28 = arith.constant 0 : index
    %45 = vector.load %arg6[%c0_26, %c0_27, %c0_28] : memref<5x84x160xbf16, #tpu.memory_space<vmem>>, vector<1x84x160xbf16>
    %46 = vector.shape_cast %45 : vector<1x84x160xbf16> to vector<84x160xbf16>
    %cst_29 = arith.constant dense<0.000000e+00> : vector<10x160xf32>
    %47 = tpu.matmul %44, %46, %cst_29 {dimension_numbers = #tpu.dot_dimension_numbers<[1], [0], [0], [1], [0, 0, 1, 1], [], []>} : vector<10x84xbf16>, vector<84x160xbf16>, vector<10x160xf32> -> vector<10x160xf32>
    %48 = vector.extract_strided_slice %42 {offsets = [1, 0], sizes = [10, 84], strides = [1, 1]} : vector<14x84xf32> to vector<10x84xf32>
    %49 = arith.truncf %48 : vector<10x84xf32> to vector<10x84xbf16>
    %c1_30 = arith.constant 1 : index
    %c0_31 = arith.constant 0 : index
    %c0_32 = arith.constant 0 : index
    %50 = vector.load %arg6[%c1_30, %c0_31, %c0_32] : memref<5x84x160xbf16, #tpu.memory_space<vmem>>, vector<1x84x160xbf16>
    %51 = vector.shape_cast %50 : vector<1x84x160xbf16> to vector<84x160xbf16>
    %cst_33 = arith.constant dense<0.000000e+00> : vector<10x160xf32>
    %52 = tpu.matmul %49, %51, %cst_33 {dimension_numbers = #tpu.dot_dimension_numbers<[1], [0], [0], [1], [0, 0, 1, 1], [], []>} : vector<10x84xbf16>, vector<84x160xbf16>, vector<10x160xf32> -> vector<10x160xf32>
    %53 = arith.addf %47, %52 : vector<10x160xf32>
    %54 = vector.extract_strided_slice %42 {offsets = [2, 0], sizes = [10, 84], strides = [1, 1]} : vector<14x84xf32> to vector<10x84xf32>
    %55 = arith.truncf %54 : vector<10x84xf32> to vector<10x84xbf16>
    %c2_34 = arith.constant 2 : index
    %c0_35 = arith.constant 0 : index
    %c0_36 = arith.constant 0 : index
    %56 = vector.load %arg6[%c2_34, %c0_35, %c0_36] : memref<5x84x160xbf16, #tpu.memory_space<vmem>>, vector<1x84x160xbf16>
    %57 = vector.shape_cast %56 : vector<1x84x160xbf16> to vector<84x160xbf16>
    %cst_37 = arith.constant dense<0.000000e+00> : vector<10x160xf32>
    %58 = tpu.matmul %55, %57, %cst_37 {dimension_numbers = #tpu.dot_dimension_numbers<[1], [0], [0], [1], [0, 0, 1, 1], [], []>} : vector<10x84xbf16>, vector<84x160xbf16>, vector<10x160xf32> -> vector<10x160xf32>
    %59 = arith.addf %53, %58 : vector<10x160xf32>
    %60 = vector.extract_strided_slice %42 {offsets = [3, 0], sizes = [10, 84], strides = [1, 1]} : vector<14x84xf32> to vector<10x84xf32>
    %61 = arith.truncf %60 : vector<10x84xf32> to vector<10x84xbf16>
    %c3_38 = arith.constant 3 : index
    %c0_39 = arith.constant 0 : index
    %c0_40 = arith.constant 0 : index
    %62 = vector.load %arg6[%c3_38, %c0_39, %c0_40] : memref<5x84x160xbf16, #tpu.memory_space<vmem>>, vector<1x84x160xbf16>
    %63 = vector.shape_cast %62 : vector<1x84x160xbf16> to vector<84x160xbf16>
    %cst_41 = arith.constant dense<0.000000e+00> : vector<10x160xf32>
    %64 = tpu.matmul %61, %63, %cst_41 {dimension_numbers = #tpu.dot_dimension_numbers<[1], [0], [0], [1], [0, 0, 1, 1], [], []>} : vector<10x84xbf16>, vector<84x160xbf16>, vector<10x160xf32> -> vector<10x160xf32>
    %65 = arith.addf %59, %64 : vector<10x160xf32>
    %66 = vector.extract_strided_slice %42 {offsets = [4, 0], sizes = [10, 84], strides = [1, 1]} : vector<14x84xf32> to vector<10x84xf32>
    %67 = arith.truncf %66 : vector<10x84xf32> to vector<10x84xbf16>
    %c4_42 = arith.constant 4 : index
    %c0_43 = arith.constant 0 : index
    %c0_44 = arith.constant 0 : index
    %68 = vector.load %arg6[%c4_42, %c0_43, %c0_44] : memref<5x84x160xbf16, #tpu.memory_space<vmem>>, vector<1x84x160xbf16>
    %69 = vector.shape_cast %68 : vector<1x84x160xbf16> to vector<84x160xbf16>
    %cst_45 = arith.constant dense<0.000000e+00> : vector<10x160xf32>
    %70 = tpu.matmul %67, %69, %cst_45 {dimension_numbers = #tpu.dot_dimension_numbers<[1], [0], [0], [1], [0, 0, 1, 1], [], []>} : vector<10x84xbf16>, vector<84x160xbf16>, vector<10x160xf32> -> vector<10x160xf32>
    %71 = arith.addf %65, %70 : vector<10x160xf32>
    %c0_46 = arith.constant 0 : index
    %c0_47 = arith.constant 0 : index
    %72 = vector.load %arg7[%c0_46, %c0_47] : memref<1x160xf32, #tpu.memory_space<vmem>>, vector<1x160xf32>
    %73 = vector.broadcast %72 : vector<1x160xf32> to vector<10x160xf32>
    %74 = arith.addf %71, %73 : vector<10x160xf32>
    %cst_48 = arith.constant 0.000000e+00 : f32
    %75 = vector.broadcast %cst_48 : f32 to vector<10x160xf32>
    %76 = arith.maximumf %74, %75 : vector<10x160xf32>
    %77 = arith.truncf %76 : vector<10x160xf32> to vector<10x160xbf16>
    %c0_49 = arith.constant 0 : index
    %c0_50 = arith.constant 0 : index
    %78 = vector.load %arg9[%c0_49, %c0_50] : memref<160x80xbf16, #tpu.memory_space<vmem>>, vector<160x80xbf16>
    %cst_51 = arith.constant dense<0.000000e+00> : vector<10x80xf32>
    %79 = tpu.matmul %77, %78, %cst_51 {dimension_numbers = #tpu.dot_dimension_numbers<[1], [0], [0], [1], [0, 0, 1, 1], [], []>} : vector<10x160xbf16>, vector<160x80xbf16>, vector<10x80xf32> -> vector<10x80xf32>
    %c0_52 = arith.constant 0 : index
    %c0_53 = arith.constant 0 : index
    %80 = vector.load %arg8[%c0_52, %c0_53] : memref<5x10xbf16, #tpu.memory_space<vmem>>, vector<5x10xbf16>
    %81 = arith.truncf %79 : vector<10x80xf32> to vector<10x80xbf16>
    %cst_54 = arith.constant dense<0.000000e+00> : vector<5x80xf32>
    %82 = tpu.matmul %80, %81, %cst_54 {dimension_numbers = #tpu.dot_dimension_numbers<[1], [0], [0], [1], [0, 0, 1, 1], [], []>} : vector<5x10xbf16>, vector<10x80xbf16>, vector<5x80xf32> -> vector<5x80xf32>
    %83 = vector.extract_strided_slice %82 {offsets = [0, 0], sizes = [1, 80], strides = [1, 1]} : vector<5x80xf32> to vector<1x80xf32>
    %c0_55 = arith.constant 0 : index
    %c0_56 = arith.constant 0 : index
    %c0_57 = arith.constant 0 : index
    %84 = vector.load %arg17[%c0_55, %c0_56, %c0_57] : memref<5x8x80xf32, #tpu.memory_space<vmem>>, vector<1x1x80xf32>
    %85 = vector.shape_cast %84 : vector<1x1x80xf32> to vector<1x80xf32>
    %86 = vector.shape_cast %83 : vector<1x80xf32> to vector<1x1x80xf32>
    tpu.vector_store %arg17[%c0_55, %c0_56, %c0_57], %86 {strides = array<i32>} : memref<5x8x80xf32, #tpu.memory_space<vmem>>, vector<1x1x80xf32>,
    %87 = vector.extract_strided_slice %82 {offsets = [1, 0], sizes = [1, 80], strides = [1, 1]} : vector<5x80xf32> to vector<1x80xf32>
    %c1_58 = arith.constant 1 : index
    %c0_59 = arith.constant 0 : index
    %c0_60 = arith.constant 0 : index
    %88 = vector.load %arg17[%c1_58, %c0_59, %c0_60] : memref<5x8x80xf32, #tpu.memory_space<vmem>>, vector<1x1x80xf32>
    %89 = vector.shape_cast %88 : vector<1x1x80xf32> to vector<1x80xf32>
    %90 = vector.shape_cast %87 : vector<1x80xf32> to vector<1x1x80xf32>
    tpu.vector_store %arg17[%c1_58, %c0_59, %c0_60], %90 {strides = array<i32>} : memref<5x8x80xf32, #tpu.memory_space<vmem>>, vector<1x1x80xf32>,
    %91 = vector.extract_strided_slice %82 {offsets = [2, 0], sizes = [1, 80], strides = [1, 1]} : vector<5x80xf32> to vector<1x80xf32>
    %c2_61 = arith.constant 2 : index
    %c0_62 = arith.constant 0 : index
    %c0_63 = arith.constant 0 : index
    %92 = vector.load %arg17[%c2_61, %c0_62, %c0_63] : memref<5x8x80xf32, #tpu.memory_space<vmem>>, vector<1x1x80xf32>
    %93 = vector.shape_cast %92 : vector<1x1x80xf32> to vector<1x80xf32>
    %94 = vector.shape_cast %91 : vector<1x80xf32> to vector<1x1x80xf32>
    tpu.vector_store %arg17[%c2_61, %c0_62, %c0_63], %94 {strides = array<i32>} : memref<5x8x80xf32, #tpu.memory_space<vmem>>, vector<1x1x80xf32>,
    %95 = vector.extract_strided_slice %82 {offsets = [3, 0], sizes = [1, 80], strides = [1, 1]} : vector<5x80xf32> to vector<1x80xf32>
    %c3_64 = arith.constant 3 : index
    %c0_65 = arith.constant 0 : index
    %c0_66 = arith.constant 0 : index
    %96 = vector.load %arg17[%c3_64, %c0_65, %c0_66] : memref<5x8x80xf32, #tpu.memory_space<vmem>>, vector<1x1x80xf32>
    %97 = vector.shape_cast %96 : vector<1x1x80xf32> to vector<1x80xf32>
    %98 = vector.shape_cast %95 : vector<1x80xf32> to vector<1x1x80xf32>
    tpu.vector_store %arg17[%c3_64, %c0_65, %c0_66], %98 {strides = array<i32>} : memref<5x8x80xf32, #tpu.memory_space<vmem>>, vector<1x1x80xf32>,
    %99 = vector.extract_strided_slice %82 {offsets = [4, 0], sizes = [1, 80], strides = [1, 1]} : vector<5x80xf32> to vector<1x80xf32>
    %c4_67 = arith.constant 4 : index
    %c0_68 = arith.constant 0 : index
    %c0_69 = arith.constant 0 : index
    %100 = vector.load %arg17[%c4_67, %c0_68, %c0_69] : memref<5x8x80xf32, #tpu.memory_space<vmem>>, vector<1x1x80xf32>
    %101 = vector.shape_cast %100 : vector<1x1x80xf32> to vector<1x80xf32>
    %102 = vector.shape_cast %99 : vector<1x80xf32> to vector<1x1x80xf32>
    tpu.vector_store %arg17[%c4_67, %c0_68, %c0_69], %102 {strides = array<i32>} : memref<5x8x80xf32, #tpu.memory_space<vmem>>, vector<1x1x80xf32>,
    %c1_70 = arith.constant 1 : index
    %c0_71 = arith.constant 0 : index
    %c0_72 = arith.constant 0 : index
    %103 = vector.load %arg1[%c1_70, %c0_71, %c0_72] : memref<8x32x96xbf16, #tpu.memory_space<vmem>>, vector<1x32x96xbf16>
    %104 = vector.shape_cast %103 : vector<1x32x96xbf16> to vector<32x96xbf16>
    %105 = arith.extf %104 : vector<32x96xbf16> to vector<32x96xf32>
    %106 = vector.extract_strided_slice %105 {offsets = [0, 0], sizes = [28, 96], strides = [1, 1]} : vector<32x96xf32> to vector<28x96xf32>
    %107 = arith.truncf %106 : vector<28x96xf32> to vector<28x96xbf16>
    %c0_73 = arith.constant 0 : index
    %c0_74 = arith.constant 0 : index
    %c0_75 = arith.constant 0 : index
    %108 = vector.load %arg2[%c0_73, %c0_74, %c0_75] : memref<5x96x168xbf16, #tpu.memory_space<vmem>>, vector<1x96x168xbf16>
    %109 = vector.shape_cast %108 : vector<1x96x168xbf16> to vector<96x168xbf16>
    %cst_76 = arith.constant dense<0.000000e+00> : vector<28x168xf32>
    %110 = tpu.matmul %107, %109, %cst_76 {dimension_numbers = #tpu.dot_dimension_numbers<[1], [0], [0], [1], [0, 0, 1, 1], [], []>} : vector<28x96xbf16>, vector<96x168xbf16>, vector<28x168xf32> -> vector<28x168xf32>
    %111 = vector.extract_strided_slice %105 {offsets = [1, 0], sizes = [28, 96], strides = [1, 1]} : vector<32x96xf32> to vector<28x96xf32>
    %112 = arith.truncf %111 : vector<28x96xf32> to vector<28x96xbf16>
    %c1_77 = arith.constant 1 : index
    %c0_78 = arith.constant 0 : index
    %c0_79 = arith.constant 0 : index
    %113 = vector.load %arg2[%c1_77, %c0_78, %c0_79] : memref<5x96x168xbf16, #tpu.memory_space<vmem>>, vector<1x96x168xbf16>
    %114 = vector.shape_cast %113 : vector<1x96x168xbf16> to vector<96x168xbf16>
    %cst_80 = arith.constant dense<0.000000e+00> : vector<28x168xf32>
    %115 = tpu.matmul %112, %114, %cst_80 {dimension_numbers = #tpu.dot_dimension_numbers<[1], [0], [0], [1], [0, 0, 1, 1], [], []>} : vector<28x96xbf16>, vector<96x168xbf16>, vector<28x168xf32> -> vector<28x168xf32>
    %116 = arith.addf %110, %115 : vector<28x168xf32>
    %117 = vector.extract_strided_slice %105 {offsets = [2, 0], sizes = [28, 96], strides = [1, 1]} : vector<32x96xf32> to vector<28x96xf32>
    %118 = arith.truncf %117 : vector<28x96xf32> to vector<28x96xbf16>
    %c2_81 = arith.constant 2 : index
    %c0_82 = arith.constant 0 : index
    %c0_83 = arith.constant 0 : index
    %119 = vector.load %arg2[%c2_81, %c0_82, %c0_83] : memref<5x96x168xbf16, #tpu.memory_space<vmem>>, vector<1x96x168xbf16>
    %120 = vector.shape_cast %119 : vector<1x96x168xbf16> to vector<96x168xbf16>
    %cst_84 = arith.constant dense<0.000000e+00> : vector<28x168xf32>
    %121 = tpu.matmul %118, %120, %cst_84 {dimension_numbers = #tpu.dot_dimension_numbers<[1], [0], [0], [1], [0, 0, 1, 1], [], []>} : vector<28x96xbf16>, vector<96x168xbf16>, vector<28x168xf32> -> vector<28x168xf32>
    %122 = arith.addf %116, %121 : vector<28x168xf32>
    %123 = vector.extract_strided_slice %105 {offsets = [3, 0], sizes = [28, 96], strides = [1, 1]} : vector<32x96xf32> to vector<28x96xf32>
    %124 = arith.truncf %123 : vector<28x96xf32> to vector<28x96xbf16>
    %c3_85 = arith.constant 3 : index
    %c0_86 = arith.constant 0 : index
    %c0_87 = arith.constant 0 : index
    %125 = vector.load %arg2[%c3_85, %c0_86, %c0_87] : memref<5x96x168xbf16, #tpu.memory_space<vmem>>, vector<1x96x168xbf16>
    %126 = vector.shape_cast %125 : vector<1x96x168xbf16> to vector<96x168xbf16>
    %cst_88 = arith.constant dense<0.000000e+00> : vector<28x168xf32>
    %127 = tpu.matmul %124, %126, %cst_88 {dimension_numbers = #tpu.dot_dimension_numbers<[1], [0], [0], [1], [0, 0, 1, 1], [], []>} : vector<28x96xbf16>, vector<96x168xbf16>, vector<28x168xf32> -> vector<28x168xf32>
    %128 = arith.addf %122, %127 : vector<28x168xf32>
    %129 = vector.extract_strided_slice %105 {offsets = [4, 0], sizes = [28, 96], strides = [1, 1]} : vector<32x96xf32> to vector<28x96xf32>
    %130 = arith.truncf %129 : vector<28x96xf32> to vector<28x96xbf16>
    %c4_89 = arith.constant 4 : index
    %c0_90 = arith.constant 0 : index
    %c0_91 = arith.constant 0 : index
    %131 = vector.load %arg2[%c4_89, %c0_90, %c0_91] : memref<5x96x168xbf16, #tpu.memory_space<vmem>>, vector<1x96x168xbf16>
    %132 = vector.shape_cast %131 : vector<1x96x168xbf16> to vector<96x168xbf16>
    %cst_92 = arith.constant dense<0.000000e+00> : vector<28x168xf32>
    %133 = tpu.matmul %130, %132, %cst_92 {dimension_numbers = #tpu.dot_dimension_numbers<[1], [0], [0], [1], [0, 0, 1, 1], [], []>} : vector<28x96xbf16>, vector<96x168xbf16>, vector<28x168xf32> -> vector<28x168xf32>
    %134 = arith.addf %128, %133 : vector<28x168xf32>
    %c0_93 = arith.constant 0 : index
    %c0_94 = arith.constant 0 : index
    %135 = vector.load %arg3[%c0_93, %c0_94] : memref<1x168xf32, #tpu.memory_space<vmem>>, vector<1x168xf32>
    %136 = vector.broadcast %135 : vector<1x168xf32> to vector<28x168xf32>
    %137 = arith.addf %134, %136 : vector<28x168xf32>
    %cst_95 = arith.constant 0.000000e+00 : f32
    %138 = vector.broadcast %cst_95 : f32 to vector<28x168xf32>
    %139 = arith.maximumf %137, %138 : vector<28x168xf32>
    %140 = arith.truncf %139 : vector<28x168xf32> to vector<28x168xbf16>
    %c0_96 = arith.constant 0 : index
    %c0_97 = arith.constant 0 : index
    %141 = vector.load %arg5[%c0_96, %c0_97] : memref<168x84xbf16, #tpu.memory_space<vmem>>, vector<168x84xbf16>
    %cst_98 = arith.constant dense<0.000000e+00> : vector<28x84xf32>
    %142 = tpu.matmul %140, %141, %cst_98 {dimension_numbers = #tpu.dot_dimension_numbers<[1], [0], [0], [1], [0, 0, 1, 1], [], []>} : vector<28x168xbf16>, vector<168x84xbf16>, vector<28x84xf32> -> vector<28x84xf32>
    %c0_99 = arith.constant 0 : index
    %c0_100 = arith.constant 0 : index
    %143 = vector.load %arg4[%c0_99, %c0_100] : memref<14x28xbf16, #tpu.memory_space<vmem>>, vector<14x28xbf16>
    %144 = arith.truncf %142 : vector<28x84xf32> to vector<28x84xbf16>
    %cst_101 = arith.constant dense<0.000000e+00> : vector<14x84xf32>
    %145 = tpu.matmul %143, %144, %cst_101 {dimension_numbers = #tpu.dot_dimension_numbers<[1], [0], [0], [1], [0, 0, 1, 1], [], []>} : vector<14x28xbf16>, vector<28x84xbf16>, vector<14x84xf32> -> vector<14x84xf32>
    %146 = vector.extract_strided_slice %145 {offsets = [0, 0], sizes = [10, 84], strides = [1, 1]} : vector<14x84xf32> to vector<10x84xf32>
    %147 = arith.truncf %146 : vector<10x84xf32> to vector<10x84xbf16>
    %c0_102 = arith.constant 0 : index
    %c0_103 = arith.constant 0 : index
    %c0_104 = arith.constant 0 : index
    %148 = vector.load %arg6[%c0_102, %c0_103, %c0_104] : memref<5x84x160xbf16, #tpu.memory_space<vmem>>, vector<1x84x160xbf16>
    %149 = vector.shape_cast %148 : vector<1x84x160xbf16> to vector<84x160xbf16>
    %cst_105 = arith.constant dense<0.000000e+00> : vector<10x160xf32>
    %150 = tpu.matmul %147, %149, %cst_105 {dimension_numbers = #tpu.dot_dimension_numbers<[1], [0], [0], [1], [0, 0, 1, 1], [], []>} : vector<10x84xbf16>, vector<84x160xbf16>, vector<10x160xf32> -> vector<10x160xf32>
    %151 = vector.extract_strided_slice %145 {offsets = [1, 0], sizes = [10, 84], strides = [1, 1]} : vector<14x84xf32> to vector<10x84xf32>
    %152 = arith.truncf %151 : vector<10x84xf32> to vector<10x84xbf16>
    %c1_106 = arith.constant 1 : index
    %c0_107 = arith.constant 0 : index
    %c0_108 = arith.constant 0 : index
    %153 = vector.load %arg6[%c1_106, %c0_107, %c0_108] : memref<5x84x160xbf16, #tpu.memory_space<vmem>>, vector<1x84x160xbf16>
    %154 = vector.shape_cast %153 : vector<1x84x160xbf16> to vector<84x160xbf16>
    %cst_109 = arith.constant dense<0.000000e+00> : vector<10x160xf32>
    %155 = tpu.matmul %152, %154, %cst_109 {dimension_numbers = #tpu.dot_dimension_numbers<[1], [0], [0], [1], [0, 0, 1, 1], [], []>} : vector<10x84xbf16>, vector<84x160xbf16>, vector<10x160xf32> -> vector<10x160xf32>
    %156 = arith.addf %150, %155 : vector<10x160xf32>
    %157 = vector.extract_strided_slice %145 {offsets = [2, 0], sizes = [10, 84], strides = [1, 1]} : vector<14x84xf32> to vector<10x84xf32>
    %158 = arith.truncf %157 : vector<10x84xf32> to vector<10x84xbf16>
    %c2_110 = arith.constant 2 : index
    %c0_111 = arith.constant 0 : index
    %c0_112 = arith.constant 0 : index
    %159 = vector.load %arg6[%c2_110, %c0_111, %c0_112] : memref<5x84x160xbf16, #tpu.memory_space<vmem>>, vector<1x84x160xbf16>
    %160 = vector.shape_cast %159 : vector<1x84x160xbf16> to vector<84x160xbf16>
    %cst_113 = arith.constant dense<0.000000e+00> : vector<10x160xf32>
    %161 = tpu.matmul %158, %160, %cst_113 {dimension_numbers = #tpu.dot_dimension_numbers<[1], [0], [0], [1], [0, 0, 1, 1], [], []>} : vector<10x84xbf16>, vector<84x160xbf16>, vector<10x160xf32> -> vector<10x160xf32>
    %162 = arith.addf %156, %161 : vector<10x160xf32>
    %163 = vector.extract_strided_slice %145 {offsets = [3, 0], sizes = [10, 84], strides = [1, 1]} : vector<14x84xf32> to vector<10x84xf32>
    %164 = arith.truncf %163 : vector<10x84xf32> to vector<10x84xbf16>
    %c3_114 = arith.constant 3 : index
    %c0_115 = arith.constant 0 : index
    %c0_116 = arith.constant 0 : index
    %165 = vector.load %arg6[%c3_114, %c0_115, %c0_116] : memref<5x84x160xbf16, #tpu.memory_space<vmem>>, vector<1x84x160xbf16>
    %166 = vector.shape_cast %165 : vector<1x84x160xbf16> to vector<84x160xbf16>
    %cst_117 = arith.constant dense<0.000000e+00> : vector<10x160xf32>
    %167 = tpu.matmul %164, %166, %cst_117 {dimension_numbers = #tpu.dot_dimension_numbers<[1], [0], [0], [1], [0, 0, 1, 1], [], []>} : vector<10x84xbf16>, vector<84x160xbf16>, vector<10x160xf32> -> vector<10x160xf32>
    %168 = arith.addf %162, %167 : vector<10x160xf32>
    %169 = vector.extract_strided_slice %145 {offsets = [4, 0], sizes = [10, 84], strides = [1, 1]} : vector<14x84xf32> to vector<10x84xf32>
    %170 = arith.truncf %169 : vector<10x84xf32> to vector<10x84xbf16>
    %c4_118 = arith.constant 4 : index
    %c0_119 = arith.constant 0 : index
    %c0_120 = arith.constant 0 : index
    %171 = vector.load %arg6[%c4_118, %c0_119, %c0_120] : memref<5x84x160xbf16, #tpu.memory_space<vmem>>, vector<1x84x160xbf16>
    %172 = vector.shape_cast %171 : vector<1x84x160xbf16> to vector<84x160xbf16>
    %cst_121 = arith.constant dense<0.000000e+00> : vector<10x160xf32>
    %173 = tpu.matmul %170, %172, %cst_121 {dimension_numbers = #tpu.dot_dimension_numbers<[1], [0], [0], [1], [0, 0, 1, 1], [], []>} : vector<10x84xbf16>, vector<84x160xbf16>, vector<10x160xf32> -> vector<10x160xf32>
    %174 = arith.addf %168, %173 : vector<10x160xf32>
    %c0_122 = arith.constant 0 : index
    %c0_123 = arith.constant 0 : index
    %175 = vector.load %arg7[%c0_122, %c0_123] : memref<1x160xf32, #tpu.memory_space<vmem>>, vector<1x160xf32>
    %176 = vector.broadcast %175 : vector<1x160xf32> to vector<10x160xf32>
    %177 = arith.addf %174, %176 : vector<10x160xf32>
    %cst_124 = arith.constant 0.000000e+00 : f32
    %178 = vector.broadcast %cst_124 : f32 to vector<10x160xf32>
    %179 = arith.maximumf %177, %178 : vector<10x160xf32>
    %180 = arith.truncf %179 : vector<10x160xf32> to vector<10x160xbf16>
    %c0_125 = arith.constant 0 : index
    %c0_126 = arith.constant 0 : index
    %181 = vector.load %arg9[%c0_125, %c0_126] : memref<160x80xbf16, #tpu.memory_space<vmem>>, vector<160x80xbf16>
    %cst_127 = arith.constant dense<0.000000e+00> : vector<10x80xf32>
    %182 = tpu.matmul %180, %181, %cst_127 {dimension_numbers = #tpu.dot_dimension_numbers<[1], [0], [0], [1], [0, 0, 1, 1], [], []>} : vector<10x160xbf16>, vector<160x80xbf16>, vector<10x80xf32> -> vector<10x80xf32>
    %c0_128 = arith.constant 0 : index
    %c0_129 = arith.constant 0 : index
    %183 = vector.load %arg8[%c0_128, %c0_129] : memref<5x10xbf16, #tpu.memory_space<vmem>>, vector<5x10xbf16>
    %184 = arith.truncf %182 : vector<10x80xf32> to vector<10x80xbf16>
    %cst_130 = arith.constant dense<0.000000e+00> : vector<5x80xf32>
    %185 = tpu.matmul %183, %184, %cst_130 {dimension_numbers = #tpu.dot_dimension_numbers<[1], [0], [0], [1], [0, 0, 1, 1], [], []>} : vector<5x10xbf16>, vector<10x80xbf16>, vector<5x80xf32> -> vector<5x80xf32>
    %186 = vector.extract_strided_slice %185 {offsets = [0, 0], sizes = [1, 80], strides = [1, 1]} : vector<5x80xf32> to vector<1x80xf32>
    %c0_131 = arith.constant 0 : index
    %c1_132 = arith.constant 1 : index
    %c0_133 = arith.constant 0 : index
    %187 = vector.load %arg17[%c0_131, %c1_132, %c0_133] : memref<5x8x80xf32, #tpu.memory_space<vmem>>, vector<1x1x80xf32>
    %188 = vector.shape_cast %187 : vector<1x1x80xf32> to vector<1x80xf32>
    %189 = vector.shape_cast %186 : vector<1x80xf32> to vector<1x1x80xf32>
    tpu.vector_store %arg17[%c0_131, %c1_132, %c0_133], %189 {strides = array<i32>} : memref<5x8x80xf32, #tpu.memory_space<vmem>>, vector<1x1x80xf32>,
    %190 = vector.extract_strided_slice %185 {offsets = [1, 0], sizes = [1, 80], strides = [1, 1]} : vector<5x80xf32> to vector<1x80xf32>
    %c1_134 = arith.constant 1 : index
    %c1_135 = arith.constant 1 : index
    %c0_136 = arith.constant 0 : index
    %191 = vector.load %arg17[%c1_134, %c1_135, %c0_136] : memref<5x8x80xf32, #tpu.memory_space<vmem>>, vector<1x1x80xf32>
    %192 = vector.shape_cast %191 : vector<1x1x80xf32> to vector<1x80xf32>
    %193 = vector.shape_cast %190 : vector<1x80xf32> to vector<1x1x80xf32>
    tpu.vector_store %arg17[%c1_134, %c1_135, %c0_136], %193 {strides = array<i32>} : memref<5x8x80xf32, #tpu.memory_space<vmem>>, vector<1x1x80xf32>,
    %194 = vector.extract_strided_slice %185 {offsets = [2, 0], sizes = [1, 80], strides = [1, 1]} : vector<5x80xf32> to vector<1x80xf32>
    %c2_137 = arith.constant 2 : index
    %c1_138 = arith.constant 1 : index
    %c0_139 = arith.constant 0 : index
    %195 = vector.load %arg17[%c2_137, %c1_138, %c0_139] : memref<5x8x80xf32, #tpu.memory_space<vmem>>, vector<1x1x80xf32>
    %196 = vector.shape_cast %195 : vector<1x1x80xf32> to vector<1x80xf32>
    %197 = vector.shape_cast %194 : vector<1x80xf32> to vector<1x1x80xf32>
    tpu.vector_store %arg17[%c2_137, %c1_138, %c0_139], %197 {strides = array<i32>} : memref<5x8x80xf32, #tpu.memory_space<vmem>>, vector<1x1x80xf32>,
    %198 = vector.extract_strided_slice %185 {offsets = [3, 0], sizes = [1, 80], strides = [1, 1]} : vector<5x80xf32> to vector<1x80xf32>
    %c3_140 = arith.constant 3 : index
    %c1_141 = arith.constant 1 : index
    %c0_142 = arith.constant 0 : index
    %199 = vector.load %arg17[%c3_140, %c1_141, %c0_142] : memref<5x8x80xf32, #tpu.memory_space<vmem>>, vector<1x1x80xf32>
    %200 = vector.shape_cast %199 : vector<1x1x80xf32> to vector<1x80xf32>
    %201 = vector.shape_cast %198 : vector<1x80xf32> to vector<1x1x80xf32>
    tpu.vector_store %arg17[%c3_140, %c1_141, %c0_142], %201 {strides = array<i32>} : memref<5x8x80xf32, #tpu.memory_space<vmem>>, vector<1x1x80xf32>,
    %202 = vector.extract_strided_slice %185 {offsets = [4, 0], sizes = [1, 80], strides = [1, 1]} : vector<5x80xf32> to vector<1x80xf32>
    %c4_143 = arith.constant 4 : index
    %c1_144 = arith.constant 1 : index
    %c0_145 = arith.constant 0 : index
    %203 = vector.load %arg17[%c4_143, %c1_144, %c0_145] : memref<5x8x80xf32, #tpu.memory_space<vmem>>, vector<1x1x80xf32>
    %204 = vector.shape_cast %203 : vector<1x1x80xf32> to vector<1x80xf32>
    %205 = vector.shape_cast %202 : vector<1x80xf32> to vector<1x1x80xf32>
    tpu.vector_store %arg17[%c4_143, %c1_144, %c0_145], %205 {strides = array<i32>} : memref<5x8x80xf32, #tpu.memory_space<vmem>>, vector<1x1x80xf32>,
    %c2_146 = arith.constant 2 : index
    %c0_147 = arith.constant 0 : index
    %c0_148 = arith.constant 0 : index
    %206 = vector.load %arg1[%c2_146, %c0_147, %c0_148] : memref<8x32x96xbf16, #tpu.memory_space<vmem>>, vector<1x32x96xbf16>
    %207 = vector.shape_cast %206 : vector<1x32x96xbf16> to vector<32x96xbf16>
    %208 = arith.extf %207 : vector<32x96xbf16> to vector<32x96xf32>
    %209 = vector.extract_strided_slice %208 {offsets = [0, 0], sizes = [28, 96], strides = [1, 1]} : vector<32x96xf32> to vector<28x96xf32>
    %210 = arith.truncf %209 : vector<28x96xf32> to vector<28x96xbf16>
    %c0_149 = arith.constant 0 : index
    %c0_150 = arith.constant 0 : index
    %c0_151 = arith.constant 0 : index
    %211 = vector.load %arg2[%c0_149, %c0_150, %c0_151] : memref<5x96x168xbf16, #tpu.memory_space<vmem>>, vector<1x96x168xbf16>
    %212 = vector.shape_cast %211 : vector<1x96x168xbf16> to vector<96x168xbf16>
    %cst_152 = arith.constant dense<0.000000e+00> : vector<28x168xf32>
    %213 = tpu.matmul %210, %212, %cst_152 {dimension_numbers = #tpu.dot_dimension_numbers<[1], [0], [0], [1], [0, 0, 1, 1], [], []>} : vector<28x96xbf16>, vector<96x168xbf16>, vector<28x168xf32> -> vector<28x168xf32>
    %214 = vector.extract_strided_slice %208 {offsets = [1, 0], sizes = [28, 96], strides = [1, 1]} : vector<32x96xf32> to vector<28x96xf32>
    %215 = arith.truncf %214 : vector<28x96xf32> to vector<28x96xbf16>
    %c1_153 = arith.constant 1 : index
    %c0_154 = arith.constant 0 : index
    %c0_155 = arith.constant 0 : index
    %216 = vector.load %arg2[%c1_153, %c0_154, %c0_155] : memref<5x96x168xbf16, #tpu.memory_space<vmem>>, vector<1x96x168xbf16>
    %217 = vector.shape_cast %216 : vector<1x96x168xbf16> to vector<96x168xbf16>
    %cst_156 = arith.constant dense<0.000000e+00> : vector<28x168xf32>
    %218 = tpu.matmul %215, %217, %cst_156 {dimension_numbers = #tpu.dot_dimension_numbers<[1], [0], [0], [1], [0, 0, 1, 1], [], []>} : vector<28x96xbf16>, vector<96x168xbf16>, vector<28x168xf32> -> vector<28x168xf32>
    %219 = arith.addf %213, %218 : vector<28x168xf32>
    %220 = vector.extract_strided_slice %208 {offsets = [2, 0], sizes = [28, 96], strides = [1, 1]} : vector<32x96xf32> to vector<28x96xf32>
    %221 = arith.truncf %220 : vector<28x96xf32> to vector<28x96xbf16>
    %c2_157 = arith.constant 2 : index
    %c0_158 = arith.constant 0 : index
    %c0_159 = arith.constant 0 : index
    %222 = vector.load %arg2[%c2_157, %c0_158, %c0_159] : memref<5x96x168xbf16, #tpu.memory_space<vmem>>, vector<1x96x168xbf16>
    %223 = vector.shape_cast %222 : vector<1x96x168xbf16> to vector<96x168xbf16>
    %cst_160 = arith.constant dense<0.000000e+00> : vector<28x168xf32>
    %224 = tpu.matmul %221, %223, %cst_160 {dimension_numbers = #tpu.dot_dimension_numbers<[1], [0], [0], [1], [0, 0, 1, 1], [], []>} : vector<28x96xbf16>, vector<96x168xbf16>, vector<28x168xf32> -> vector<28x168xf32>
    %225 = arith.addf %219, %224 : vector<28x168xf32>
    %226 = vector.extract_strided_slice %208 {offsets = [3, 0], sizes = [28, 96], strides = [1, 1]} : vector<32x96xf32> to vector<28x96xf32>
    %227 = arith.truncf %226 : vector<28x96xf32> to vector<28x96xbf16>
    %c3_161 = arith.constant 3 : index
    %c0_162 = arith.constant 0 : index
    %c0_163 = arith.constant 0 : index
    %228 = vector.load %arg2[%c3_161, %c0_162, %c0_163] : memref<5x96x168xbf16, #tpu.memory_space<vmem>>, vector<1x96x168xbf16>
    %229 = vector.shape_cast %228 : vector<1x96x168xbf16> to vector<96x168xbf16>
    %cst_164 = arith.constant dense<0.000000e+00> : vector<28x168xf32>
    %230 = tpu.matmul %227, %229, %cst_164 {dimension_numbers = #tpu.dot_dimension_numbers<[1], [0], [0], [1], [0, 0, 1, 1], [], []>} : vector<28x96xbf16>, vector<96x168xbf16>, vector<28x168xf32> -> vector<28x168xf32>
    %231 = arith.addf %225, %230 : vector<28x168xf32>
    %232 = vector.extract_strided_slice %208 {offsets = [4, 0], sizes = [28, 96], strides = [1, 1]} : vector<32x96xf32> to vector<28x96xf32>
    %233 = arith.truncf %232 : vector<28x96xf32> to vector<28x96xbf16>
    %c4_165 = arith.constant 4 : index
    %c0_166 = arith.constant 0 : index
    %c0_167 = arith.constant 0 : index
    %234 = vector.load %arg2[%c4_165, %c0_166, %c0_167] : memref<5x96x168xbf16, #tpu.memory_space<vmem>>, vector<1x96x168xbf16>
    %235 = vector.shape_cast %234 : vector<1x96x168xbf16> to vector<96x168xbf16>
    %cst_168 = arith.constant dense<0.000000e+00> : vector<28x168xf32>
    %236 = tpu.matmul %233, %235, %cst_168 {dimension_numbers = #tpu.dot_dimension_numbers<[1], [0], [0], [1], [0, 0, 1, 1], [], []>} : vector<28x96xbf16>, vector<96x168xbf16>, vector<28x168xf32> -> vector<28x168xf32>
    %237 = arith.addf %231, %236 : vector<28x168xf32>
    %c0_169 = arith.constant 0 : index
    %c0_170 = arith.constant 0 : index
    %238 = vector.load %arg3[%c0_169, %c0_170] : memref<1x168xf32, #tpu.memory_space<vmem>>, vector<1x168xf32>
    %239 = vector.broadcast %238 : vector<1x168xf32> to vector<28x168xf32>
    %240 = arith.addf %237, %239 : vector<28x168xf32>
    %cst_171 = arith.constant 0.000000e+00 : f32
    %241 = vector.broadcast %cst_171 : f32 to vector<28x168xf32>
    %242 = arith.maximumf %240, %241 : vector<28x168xf32>
    %243 = arith.truncf %242 : vector<28x168xf32> to vector<28x168xbf16>
    %c0_172 = arith.constant 0 : index
    %c0_173 = arith.constant 0 : index
    %244 = vector.load %arg5[%c0_172, %c0_173] : memref<168x84xbf16, #tpu.memory_space<vmem>>, vector<168x84xbf16>
    %cst_174 = arith.constant dense<0.000000e+00> : vector<28x84xf32>
    %245 = tpu.matmul %243, %244, %cst_174 {dimension_numbers = #tpu.dot_dimension_numbers<[1], [0], [0], [1], [0, 0, 1, 1], [], []>} : vector<28x168xbf16>, vector<168x84xbf16>, vector<28x84xf32> -> vector<28x84xf32>
    %c0_175 = arith.constant 0 : index
    %c0_176 = arith.constant 0 : index
    %246 = vector.load %arg4[%c0_175, %c0_176] : memref<14x28xbf16, #tpu.memory_space<vmem>>, vector<14x28xbf16>
    %247 = arith.truncf %245 : vector<28x84xf32> to vector<28x84xbf16>
    %cst_177 = arith.constant dense<0.000000e+00> : vector<14x84xf32>
    %248 = tpu.matmul %246, %247, %cst_177 {dimension_numbers = #tpu.dot_dimension_numbers<[1], [0], [0], [1], [0, 0, 1, 1], [], []>} : vector<14x28xbf16>, vector<28x84xbf16>, vector<14x84xf32> -> vector<14x84xf32>
    %249 = vector.extract_strided_slice %248 {offsets = [0, 0], sizes = [10, 84], strides = [1, 1]} : vector<14x84xf32> to vector<10x84xf32>
    %250 = arith.truncf %249 : vector<10x84xf32> to vector<10x84xbf16>
    %c0_178 = arith.constant 0 : index
    %c0_179 = arith.constant 0 : index
    %c0_180 = arith.constant 0 : index
    %251 = vector.load %arg6[%c0_178, %c0_179, %c0_180] : memref<5x84x160xbf16, #tpu.memory_space<vmem>>, vector<1x84x160xbf16>
    %252 = vector.shape_cast %251 : vector<1x84x160xbf16> to vector<84x160xbf16>
    %cst_181 = arith.constant dense<0.000000e+00> : vector<10x160xf32>
    %253 = tpu.matmul %250, %252, %cst_181 {dimension_numbers = #tpu.dot_dimension_numbers<[1], [0], [0], [1], [0, 0, 1, 1], [], []>} : vector<10x84xbf16>, vector<84x160xbf16>, vector<10x160xf32> -> vector<10x160xf32>
    %254 = vector.extract_strided_slice %248 {offsets = [1, 0], sizes = [10, 84], strides = [1, 1]} : vector<14x84xf32> to vector<10x84xf32>
    %255 = arith.truncf %254 : vector<10x84xf32> to vector<10x84xbf16>
    %c1_182 = arith.constant 1 : index
    %c0_183 = arith.constant 0 : index
    %c0_184 = arith.constant 0 : index
    %256 = vector.load %arg6[%c1_182, %c0_183, %c0_184] : memref<5x84x160xbf16, #tpu.memory_space<vmem>>, vector<1x84x160xbf16>
    %257 = vector.shape_cast %256 : vector<1x84x160xbf16> to vector<84x160xbf16>
    %cst_185 = arith.constant dense<0.000000e+00> : vector<10x160xf32>
    %258 = tpu.matmul %255, %257, %cst_185 {dimension_numbers = #tpu.dot_dimension_numbers<[1], [0], [0], [1], [0, 0, 1, 1], [], []>} : vector<10x84xbf16>, vector<84x160xbf16>, vector<10x160xf32> -> vector<10x160xf32>
    %259 = arith.addf %253, %258 : vector<10x160xf32>
    %260 = vector.extract_strided_slice %248 {offsets = [2, 0], sizes = [10, 84], strides = [1, 1]} : vector<14x84xf32> to vector<10x84xf32>
    %261 = arith.truncf %260 : vector<10x84xf32> to vector<10x84xbf16>
    %c2_186 = arith.constant 2 : index
    %c0_187 = arith.constant 0 : index
    %c0_188 = arith.constant 0 : index
    %262 = vector.load %arg6[%c2_186, %c0_187, %c0_188] : memref<5x84x160xbf16, #tpu.memory_space<vmem>>, vector<1x84x160xbf16>
    %263 = vector.shape_cast %262 : vector<1x84x160xbf16> to vector<84x160xbf16>
    %cst_189 = arith.constant dense<0.000000e+00> : vector<10x160xf32>
    %264 = tpu.matmul %261, %263, %cst_189 {dimension_numbers = #tpu.dot_dimension_numbers<[1], [0], [0], [1], [0, 0, 1, 1], [], []>} : vector<10x84xbf16>, vector<84x160xbf16>, vector<10x160xf32> -> vector<10x160xf32>
    %265 = arith.addf %259, %264 : vector<10x160xf32>
    %266 = vector.extract_strided_slice %248 {offsets = [3, 0], sizes = [10, 84], strides = [1, 1]} : vector<14x84xf32> to vector<10x84xf32>
    %267 = arith.truncf %266 : vector<10x84xf32> to vector<10x84xbf16>
    %c3_190 = arith.constant 3 : index
    %c0_191 = arith.constant 0 : index
    %c0_192 = arith.constant 0 : index
    %268 = vector.load %arg6[%c3_190, %c0_191, %c0_192] : memref<5x84x160xbf16, #tpu.memory_space<vmem>>, vector<1x84x160xbf16>
    %269 = vector.shape_cast %268 : vector<1x84x160xbf16> to vector<84x160xbf16>
    %cst_193 = arith.constant dense<0.000000e+00> : vector<10x160xf32>
    %270 = tpu.matmul %267, %269, %cst_193 {dimension_numbers = #tpu.dot_dimension_numbers<[1], [0], [0], [1], [0, 0, 1, 1], [], []>} : vector<10x84xbf16>, vector<84x160xbf16>, vector<10x160xf32> -> vector<10x160xf32>
    %271 = arith.addf %265, %270 : vector<10x160xf32>
    %272 = vector.extract_strided_slice %248 {offsets = [4, 0], sizes = [10, 84], strides = [1, 1]} : vector<14x84xf32> to vector<10x84xf32>
    %273 = arith.truncf %272 : vector<10x84xf32> to vector<10x84xbf16>
    %c4_194 = arith.constant 4 : index
    %c0_195 = arith.constant 0 : index
    %c0_196 = arith.constant 0 : index
    %274 = vector.load %arg6[%c4_194, %c0_195, %c0_196] : memref<5x84x160xbf16, #tpu.memory_space<vmem>>, vector<1x84x160xbf16>
    %275 = vector.shape_cast %274 : vector<1x84x160xbf16> to vector<84x160xbf16>
    %cst_197 = arith.constant dense<0.000000e+00> : vector<10x160xf32>
    %276 = tpu.matmul %273, %275, %cst_197 {dimension_numbers = #tpu.dot_dimension_numbers<[1], [0], [0], [1], [0, 0, 1, 1], [], []>} : vector<10x84xbf16>, vector<84x160xbf16>, vector<10x160xf32> -> vector<10x160xf32>
    %277 = arith.addf %271, %276 : vector<10x160xf32>
    %c0_198 = arith.constant 0 : index
    %c0_199 = arith.constant 0 : index
    %278 = vector.load %arg7[%c0_198, %c0_199] : memref<1x160xf32, #tpu.memory_space<vmem>>, vector<1x160xf32>
    %279 = vector.broadcast %278 : vector<1x160xf32> to vector<10x160xf32>
    %280 = arith.addf %277, %279 : vector<10x160xf32>
    %cst_200 = arith.constant 0.000000e+00 : f32
    %281 = vector.broadcast %cst_200 : f32 to vector<10x160xf32>
    %282 = arith.maximumf %280, %281 : vector<10x160xf32>
    %283 = arith.truncf %282 : vector<10x160xf32> to vector<10x160xbf16>
    %c0_201 = arith.constant 0 : index
    %c0_202 = arith.constant 0 : index
    %284 = vector.load %arg9[%c0_201, %c0_202] : memref<160x80xbf16, #tpu.memory_space<vmem>>, vector<160x80xbf16>
    %cst_203 = arith.constant dense<0.000000e+00> : vector<10x80xf32>
    %285 = tpu.matmul %283, %284, %cst_203 {dimension_numbers = #tpu.dot_dimension_numbers<[1], [0], [0], [1], [0, 0, 1, 1], [], []>} : vector<10x160xbf16>, vector<160x80xbf16>, vector<10x80xf32> -> vector<10x80xf32>
    %c0_204 = arith.constant 0 : index
    %c0_205 = arith.constant 0 : index
    %286 = vector.load %arg8[%c0_204, %c0_205] : memref<5x10xbf16, #tpu.memory_space<vmem>>, vector<5x10xbf16>
    %287 = arith.truncf %285 : vector<10x80xf32> to vector<10x80xbf16>
    %cst_206 = arith.constant dense<0.000000e+00> : vector<5x80xf32>
    %288 = tpu.matmul %286, %287, %cst_206 {dimension_numbers = #tpu.dot_dimension_numbers<[1], [0], [0], [1], [0, 0, 1, 1], [], []>} : vector<5x10xbf16>, vector<10x80xbf16>, vector<5x80xf32> -> vector<5x80xf32>
    %289 = vector.extract_strided_slice %288 {offsets = [0, 0], sizes = [1, 80], strides = [1, 1]} : vector<5x80xf32> to vector<1x80xf32>
    %c0_207 = arith.constant 0 : index
    %c2_208 = arith.constant 2 : index
    %c0_209 = arith.constant 0 : index
    %290 = vector.load %arg17[%c0_207, %c2_208, %c0_209] : memref<5x8x80xf32, #tpu.memory_space<vmem>>, vector<1x1x80xf32>
    %291 = vector.shape_cast %290 : vector<1x1x80xf32> to vector<1x80xf32>
    %292 = vector.shape_cast %289 : vector<1x80xf32> to vector<1x1x80xf32>
    tpu.vector_store %arg17[%c0_207, %c2_208, %c0_209], %292 {strides = array<i32>} : memref<5x8x80xf32, #tpu.memory_space<vmem>>, vector<1x1x80xf32>,
    %293 = vector.extract_strided_slice %288 {offsets = [1, 0], sizes = [1, 80], strides = [1, 1]} : vector<5x80xf32> to vector<1x80xf32>
    %c1_210 = arith.constant 1 : index
    %c2_211 = arith.constant 2 : index
    %c0_212 = arith.constant 0 : index
    %294 = vector.load %arg17[%c1_210, %c2_211, %c0_212] : memref<5x8x80xf32, #tpu.memory_space<vmem>>, vector<1x1x80xf32>
    %295 = vector.shape_cast %294 : vector<1x1x80xf32> to vector<1x80xf32>
    %296 = vector.shape_cast %293 : vector<1x80xf32> to vector<1x1x80xf32>
    tpu.vector_store %arg17[%c1_210, %c2_211, %c0_212], %296 {strides = array<i32>} : memref<5x8x80xf32, #tpu.memory_space<vmem>>, vector<1x1x80xf32>,
    %297 = vector.extract_strided_slice %288 {offsets = [2, 0], sizes = [1, 80], strides = [1, 1]} : vector<5x80xf32> to vector<1x80xf32>
    %c2_213 = arith.constant 2 : index
    %c2_214 = arith.constant 2 : index
    %c0_215 = arith.constant 0 : index
    %298 = vector.load %arg17[%c2_213, %c2_214, %c0_215] : memref<5x8x80xf32, #tpu.memory_space<vmem>>, vector<1x1x80xf32>
    %299 = vector.shape_cast %298 : vector<1x1x80xf32> to vector<1x80xf32>
    %300 = vector.shape_cast %297 : vector<1x80xf32> to vector<1x1x80xf32>
    tpu.vector_store %arg17[%c2_213, %c2_214, %c0_215], %300 {strides = array<i32>} : memref<5x8x80xf32, #tpu.memory_space<vmem>>, vector<1x1x80xf32>,
    %301 = vector.extract_strided_slice %288 {offsets = [3, 0], sizes = [1, 80], strides = [1, 1]} : vector<5x80xf32> to vector<1x80xf32>
    %c3_216 = arith.constant 3 : index
    %c2_217 = arith.constant 2 : index
    %c0_218 = arith.constant 0 : index
    %302 = vector.load %arg17[%c3_216, %c2_217, %c0_218] : memref<5x8x80xf32, #tpu.memory_space<vmem>>, vector<1x1x80xf32>
    %303 = vector.shape_cast %302 : vector<1x1x80xf32> to vector<1x80xf32>
    %304 = vector.shape_cast %301 : vector<1x80xf32> to vector<1x1x80xf32>
    tpu.vector_store %arg17[%c3_216, %c2_217, %c0_218], %304 {strides = array<i32>} : memref<5x8x80xf32, #tpu.memory_space<vmem>>, vector<1x1x80xf32>,
    %305 = vector.extract_strided_slice %288 {offsets = [4, 0], sizes = [1, 80], strides = [1, 1]} : vector<5x80xf32> to vector<1x80xf32>
    %c4_219 = arith.constant 4 : index
    %c2_220 = arith.constant 2 : index
    %c0_221 = arith.constant 0 : index
    %306 = vector.load %arg17[%c4_219, %c2_220, %c0_221] : memref<5x8x80xf32, #tpu.memory_space<vmem>>, vector<1x1x80xf32>
    %307 = vector.shape_cast %306 : vector<1x1x80xf32> to vector<1x80xf32>
    %308 = vector.shape_cast %305 : vector<1x80xf32> to vector<1x1x80xf32>
    tpu.vector_store %arg17[%c4_219, %c2_220, %c0_221], %308 {strides = array<i32>} : memref<5x8x80xf32, #tpu.memory_space<vmem>>, vector<1x1x80xf32>,
    %c3_222 = arith.constant 3 : index
    %c0_223 = arith.constant 0 : index
    %c0_224 = arith.constant 0 : index
    %309 = vector.load %arg1[%c3_222, %c0_223, %c0_224] : memref<8x32x96xbf16, #tpu.memory_space<vmem>>, vector<1x32x96xbf16>
    %310 = vector.shape_cast %309 : vector<1x32x96xbf16> to vector<32x96xbf16>
    %311 = arith.extf %310 : vector<32x96xbf16> to vector<32x96xf32>
    %312 = vector.extract_strided_slice %311 {offsets = [0, 0], sizes = [28, 96], strides = [1, 1]} : vector<32x96xf32> to vector<28x96xf32>
    %313 = arith.truncf %312 : vector<28x96xf32> to vector<28x96xbf16>
    %c0_225 = arith.constant 0 : index
    %c0_226 = arith.constant 0 : index
    %c0_227 = arith.constant 0 : index
    %314 = vector.load %arg2[%c0_225, %c0_226, %c0_227] : memref<5x96x168xbf16, #tpu.memory_space<vmem>>, vector<1x96x168xbf16>
    %315 = vector.shape_cast %314 : vector<1x96x168xbf16> to vector<96x168xbf16>
    %cst_228 = arith.constant dense<0.000000e+00> : vector<28x168xf32>
    %316 = tpu.matmul %313, %315, %cst_228 {dimension_numbers = #tpu.dot_dimension_numbers<[1], [0], [0], [1], [0, 0, 1, 1], [], []>} : vector<28x96xbf16>, vector<96x168xbf16>, vector<28x168xf32> -> vector<28x168xf32>
    %317 = vector.extract_strided_slice %311 {offsets = [1, 0], sizes = [28, 96], strides = [1, 1]} : vector<32x96xf32> to vector<28x96xf32>
    %318 = arith.truncf %317 : vector<28x96xf32> to vector<28x96xbf16>
    %c1_229 = arith.constant 1 : index
    %c0_230 = arith.constant 0 : index
    %c0_231 = arith.constant 0 : index
    %319 = vector.load %arg2[%c1_229, %c0_230, %c0_231] : memref<5x96x168xbf16, #tpu.memory_space<vmem>>, vector<1x96x168xbf16>
    %320 = vector.shape_cast %319 : vector<1x96x168xbf16> to vector<96x168xbf16>
    %cst_232 = arith.constant dense<0.000000e+00> : vector<28x168xf32>
    %321 = tpu.matmul %318, %320, %cst_232 {dimension_numbers = #tpu.dot_dimension_numbers<[1], [0], [0], [1], [0, 0, 1, 1], [], []>} : vector<28x96xbf16>, vector<96x168xbf16>, vector<28x168xf32> -> vector<28x168xf32>
    %322 = arith.addf %316, %321 : vector<28x168xf32>
    %323 = vector.extract_strided_slice %311 {offsets = [2, 0], sizes = [28, 96], strides = [1, 1]} : vector<32x96xf32> to vector<28x96xf32>
    %324 = arith.truncf %323 : vector<28x96xf32> to vector<28x96xbf16>
    %c2_233 = arith.constant 2 : index
    %c0_234 = arith.constant 0 : index
    %c0_235 = arith.constant 0 : index
    %325 = vector.load %arg2[%c2_233, %c0_234, %c0_235] : memref<5x96x168xbf16, #tpu.memory_space<vmem>>, vector<1x96x168xbf16>
    %326 = vector.shape_cast %325 : vector<1x96x168xbf16> to vector<96x168xbf16>
    %cst_236 = arith.constant dense<0.000000e+00> : vector<28x168xf32>
    %327 = tpu.matmul %324, %326, %cst_236 {dimension_numbers = #tpu.dot_dimension_numbers<[1], [0], [0], [1], [0, 0, 1, 1], [], []>} : vector<28x96xbf16>, vector<96x168xbf16>, vector<28x168xf32> -> vector<28x168xf32>
    %328 = arith.addf %322, %327 : vector<28x168xf32>
    %329 = vector.extract_strided_slice %311 {offsets = [3, 0], sizes = [28, 96], strides = [1, 1]} : vector<32x96xf32> to vector<28x96xf32>
    %330 = arith.truncf %329 : vector<28x96xf32> to vector<28x96xbf16>
    %c3_237 = arith.constant 3 : index
    %c0_238 = arith.constant 0 : index
    %c0_239 = arith.constant 0 : index
    %331 = vector.load %arg2[%c3_237, %c0_238, %c0_239] : memref<5x96x168xbf16, #tpu.memory_space<vmem>>, vector<1x96x168xbf16>
    %332 = vector.shape_cast %331 : vector<1x96x168xbf16> to vector<96x168xbf16>
    %cst_240 = arith.constant dense<0.000000e+00> : vector<28x168xf32>
    %333 = tpu.matmul %330, %332, %cst_240 {dimension_numbers = #tpu.dot_dimension_numbers<[1], [0], [0], [1], [0, 0, 1, 1], [], []>} : vector<28x96xbf16>, vector<96x168xbf16>, vector<28x168xf32> -> vector<28x168xf32>
    %334 = arith.addf %328, %333 : vector<28x168xf32>
    %335 = vector.extract_strided_slice %311 {offsets = [4, 0], sizes = [28, 96], strides = [1, 1]} : vector<32x96xf32> to vector<28x96xf32>
    %336 = arith.truncf %335 : vector<28x96xf32> to vector<28x96xbf16>
    %c4_241 = arith.constant 4 : index
    %c0_242 = arith.constant 0 : index
    %c0_243 = arith.constant 0 : index
    %337 = vector.load %arg2[%c4_241, %c0_242, %c0_243] : memref<5x96x168xbf16, #tpu.memory_space<vmem>>, vector<1x96x168xbf16>
    %338 = vector.shape_cast %337 : vector<1x96x168xbf16> to vector<96x168xbf16>
    %cst_244 = arith.constant dense<0.000000e+00> : vector<28x168xf32>
    %339 = tpu.matmul %336, %338, %cst_244 {dimension_numbers = #tpu.dot_dimension_numbers<[1], [0], [0], [1], [0, 0, 1, 1], [], []>} : vector<28x96xbf16>, vector<96x168xbf16>, vector<28x168xf32> -> vector<28x168xf32>
    %340 = arith.addf %334, %339 : vector<28x168xf32>
    %c0_245 = arith.constant 0 : index
    %c0_246 = arith.constant 0 : index
    %341 = vector.load %arg3[%c0_245, %c0_246] : memref<1x168xf32, #tpu.memory_space<vmem>>, vector<1x168xf32>
    %342 = vector.broadcast %341 : vector<1x168xf32> to vector<28x168xf32>
    %343 = arith.addf %340, %342 : vector<28x168xf32>
    %cst_247 = arith.constant 0.000000e+00 : f32
    %344 = vector.broadcast %cst_247 : f32 to vector<28x168xf32>
    %345 = arith.maximumf %343, %344 : vector<28x168xf32>
    %346 = arith.truncf %345 : vector<28x168xf32> to vector<28x168xbf16>
    %c0_248 = arith.constant 0 : index
    %c0_249 = arith.constant 0 : index
    %347 = vector.load %arg5[%c0_248, %c0_249] : memref<168x84xbf16, #tpu.memory_space<vmem>>, vector<168x84xbf16>
    %cst_250 = arith.constant dense<0.000000e+00> : vector<28x84xf32>
    %348 = tpu.matmul %346, %347, %cst_250 {dimension_numbers = #tpu.dot_dimension_numbers<[1], [0], [0], [1], [0, 0, 1, 1], [], []>} : vector<28x168xbf16>, vector<168x84xbf16>, vector<28x84xf32> -> vector<28x84xf32>
    %c0_251 = arith.constant 0 : index
    %c0_252 = arith.constant 0 : index
    %349 = vector.load %arg4[%c0_251, %c0_252] : memref<14x28xbf16, #tpu.memory_space<vmem>>, vector<14x28xbf16>
    %350 = arith.truncf %348 : vector<28x84xf32> to vector<28x84xbf16>
    %cst_253 = arith.constant dense<0.000000e+00> : vector<14x84xf32>
    %351 = tpu.matmul %349, %350, %cst_253 {dimension_numbers = #tpu.dot_dimension_numbers<[1], [0], [0], [1], [0, 0, 1, 1], [], []>} : vector<14x28xbf16>, vector<28x84xbf16>, vector<14x84xf32> -> vector<14x84xf32>
    %352 = vector.extract_strided_slice %351 {offsets = [0, 0], sizes = [10, 84], strides = [1, 1]} : vector<14x84xf32> to vector<10x84xf32>
    %353 = arith.truncf %352 : vector<10x84xf32> to vector<10x84xbf16>
    %c0_254 = arith.constant 0 : index
    %c0_255 = arith.constant 0 : index
    %c0_256 = arith.constant 0 : index
    %354 = vector.load %arg6[%c0_254, %c0_255, %c0_256] : memref<5x84x160xbf16, #tpu.memory_space<vmem>>, vector<1x84x160xbf16>
    %355 = vector.shape_cast %354 : vector<1x84x160xbf16> to vector<84x160xbf16>
    %cst_257 = arith.constant dense<0.000000e+00> : vector<10x160xf32>
    %356 = tpu.matmul %353, %355, %cst_257 {dimension_numbers = #tpu.dot_dimension_numbers<[1], [0], [0], [1], [0, 0, 1, 1], [], []>} : vector<10x84xbf16>, vector<84x160xbf16>, vector<10x160xf32> -> vector<10x160xf32>
    %357 = vector.extract_strided_slice %351 {offsets = [1, 0], sizes = [10, 84], strides = [1, 1]} : vector<14x84xf32> to vector<10x84xf32>
    %358 = arith.truncf %357 : vector<10x84xf32> to vector<10x84xbf16>
    %c1_258 = arith.constant 1 : index
    %c0_259 = arith.constant 0 : index
    %c0_260 = arith.constant 0 : index
    %359 = vector.load %arg6[%c1_258, %c0_259, %c0_260] : memref<5x84x160xbf16, #tpu.memory_space<vmem>>, vector<1x84x160xbf16>
    %360 = vector.shape_cast %359 : vector<1x84x160xbf16> to vector<84x160xbf16>
    %cst_261 = arith.constant dense<0.000000e+00> : vector<10x160xf32>
    %361 = tpu.matmul %358, %360, %cst_261 {dimension_numbers = #tpu.dot_dimension_numbers<[1], [0], [0], [1], [0, 0, 1, 1], [], []>} : vector<10x84xbf16>, vector<84x160xbf16>, vector<10x160xf32> -> vector<10x160xf32>
    %362 = arith.addf %356, %361 : vector<10x160xf32>
    %363 = vector.extract_strided_slice %351 {offsets = [2, 0], sizes = [10, 84], strides = [1, 1]} : vector<14x84xf32> to vector<10x84xf32>
    %364 = arith.truncf %363 : vector<10x84xf32> to vector<10x84xbf16>
    %c2_262 = arith.constant 2 : index
    %c0_263 = arith.constant 0 : index
    %c0_264 = arith.constant 0 : index
    %365 = vector.load %arg6[%c2_262, %c0_263, %c0_264] : memref<5x84x160xbf16, #tpu.memory_space<vmem>>, vector<1x84x160xbf16>
    %366 = vector.shape_cast %365 : vector<1x84x160xbf16> to vector<84x160xbf16>
    %cst_265 = arith.constant dense<0.000000e+00> : vector<10x160xf32>
    %367 = tpu.matmul %364, %366, %cst_265 {dimension_numbers = #tpu.dot_dimension_numbers<[1], [0], [0], [1], [0, 0, 1, 1], [], []>} : vector<10x84xbf16>, vector<84x160xbf16>, vector<10x160xf32> -> vector<10x160xf32>
    %368 = arith.addf %362, %367 : vector<10x160xf32>
    %369 = vector.extract_strided_slice %351 {offsets = [3, 0], sizes = [10, 84], strides = [1, 1]} : vector<14x84xf32> to vector<10x84xf32>
    %370 = arith.truncf %369 : vector<10x84xf32> to vector<10x84xbf16>
    %c3_266 = arith.constant 3 : index
    %c0_267 = arith.constant 0 : index
    %c0_268 = arith.constant 0 : index
    %371 = vector.load %arg6[%c3_266, %c0_267, %c0_268] : memref<5x84x160xbf16, #tpu.memory_space<vmem>>, vector<1x84x160xbf16>
    %372 = vector.shape_cast %371 : vector<1x84x160xbf16> to vector<84x160xbf16>
    %cst_269 = arith.constant dense<0.000000e+00> : vector<10x160xf32>
    %373 = tpu.matmul %370, %372, %cst_269 {dimension_numbers = #tpu.dot_dimension_numbers<[1], [0], [0], [1], [0, 0, 1, 1], [], []>} : vector<10x84xbf16>, vector<84x160xbf16>, vector<10x160xf32> -> vector<10x160xf32>
    %374 = arith.addf %368, %373 : vector<10x160xf32>
    %375 = vector.extract_strided_slice %351 {offsets = [4, 0], sizes = [10, 84], strides = [1, 1]} : vector<14x84xf32> to vector<10x84xf32>
    %376 = arith.truncf %375 : vector<10x84xf32> to vector<10x84xbf16>
    %c4_270 = arith.constant 4 : index
    %c0_271 = arith.constant 0 : index
    %c0_272 = arith.constant 0 : index
    %377 = vector.load %arg6[%c4_270, %c0_271, %c0_272] : memref<5x84x160xbf16, #tpu.memory_space<vmem>>, vector<1x84x160xbf16>
    %378 = vector.shape_cast %377 : vector<1x84x160xbf16> to vector<84x160xbf16>
    %cst_273 = arith.constant dense<0.000000e+00> : vector<10x160xf32>
    %379 = tpu.matmul %376, %378, %cst_273 {dimension_numbers = #tpu.dot_dimension_numbers<[1], [0], [0], [1], [0, 0, 1, 1], [], []>} : vector<10x84xbf16>, vector<84x160xbf16>, vector<10x160xf32> -> vector<10x160xf32>
    %380 = arith.addf %374, %379 : vector<10x160xf32>
    %c0_274 = arith.constant 0 : index
    %c0_275 = arith.constant 0 : index
    %381 = vector.load %arg7[%c0_274, %c0_275] : memref<1x160xf32, #tpu.memory_space<vmem>>, vector<1x160xf32>
    %382 = vector.broadcast %381 : vector<1x160xf32> to vector<10x160xf32>
    %383 = arith.addf %380, %382 : vector<10x160xf32>
    %cst_276 = arith.constant 0.000000e+00 : f32
    %384 = vector.broadcast %cst_276 : f32 to vector<10x160xf32>
    %385 = arith.maximumf %383, %384 : vector<10x160xf32>
    %386 = arith.truncf %385 : vector<10x160xf32> to vector<10x160xbf16>
    %c0_277 = arith.constant 0 : index
    %c0_278 = arith.constant 0 : index
    %387 = vector.load %arg9[%c0_277, %c0_278] : memref<160x80xbf16, #tpu.memory_space<vmem>>, vector<160x80xbf16>
    %cst_279 = arith.constant dense<0.000000e+00> : vector<10x80xf32>
    %388 = tpu.matmul %386, %387, %cst_279 {dimension_numbers = #tpu.dot_dimension_numbers<[1], [0], [0], [1], [0, 0, 1, 1], [], []>} : vector<10x160xbf16>, vector<160x80xbf16>, vector<10x80xf32> -> vector<10x80xf32>
    %c0_280 = arith.constant 0 : index
    %c0_281 = arith.constant 0 : index
    %389 = vector.load %arg8[%c0_280, %c0_281] : memref<5x10xbf16, #tpu.memory_space<vmem>>, vector<5x10xbf16>
    %390 = arith.truncf %388 : vector<10x80xf32> to vector<10x80xbf16>
    %cst_282 = arith.constant dense<0.000000e+00> : vector<5x80xf32>
    %391 = tpu.matmul %389, %390, %cst_282 {dimension_numbers = #tpu.dot_dimension_numbers<[1], [0], [0], [1], [0, 0, 1, 1], [], []>} : vector<5x10xbf16>, vector<10x80xbf16>, vector<5x80xf32> -> vector<5x80xf32>
    %392 = vector.extract_strided_slice %391 {offsets = [0, 0], sizes = [1, 80], strides = [1, 1]} : vector<5x80xf32> to vector<1x80xf32>
    %c0_283 = arith.constant 0 : index
    %c3_284 = arith.constant 3 : index
    %c0_285 = arith.constant 0 : index
    %393 = vector.load %arg17[%c0_283, %c3_284, %c0_285] : memref<5x8x80xf32, #tpu.memory_space<vmem>>, vector<1x1x80xf32>
    %394 = vector.shape_cast %393 : vector<1x1x80xf32> to vector<1x80xf32>
    %395 = vector.shape_cast %392 : vector<1x80xf32> to vector<1x1x80xf32>
    tpu.vector_store %arg17[%c0_283, %c3_284, %c0_285], %395 {strides = array<i32>} : memref<5x8x80xf32, #tpu.memory_space<vmem>>, vector<1x1x80xf32>,
    %396 = vector.extract_strided_slice %391 {offsets = [1, 0], sizes = [1, 80], strides = [1, 1]} : vector<5x80xf32> to vector<1x80xf32>
    %c1_286 = arith.constant 1 : index
    %c3_287 = arith.constant 3 : index
    %c0_288 = arith.constant 0 : index
    %397 = vector.load %arg17[%c1_286, %c3_287, %c0_288] : memref<5x8x80xf32, #tpu.memory_space<vmem>>, vector<1x1x80xf32>
    %398 = vector.shape_cast %397 : vector<1x1x80xf32> to vector<1x80xf32>
    %399 = vector.shape_cast %396 : vector<1x80xf32> to vector<1x1x80xf32>
    tpu.vector_store %arg17[%c1_286, %c3_287, %c0_288], %399 {strides = array<i32>} : memref<5x8x80xf32, #tpu.memory_space<vmem>>, vector<1x1x80xf32>,
    %400 = vector.extract_strided_slice %391 {offsets = [2, 0], sizes = [1, 80], strides = [1, 1]} : vector<5x80xf32> to vector<1x80xf32>
    %c2_289 = arith.constant 2 : index
    %c3_290 = arith.constant 3 : index
    %c0_291 = arith.constant 0 : index
    %401 = vector.load %arg17[%c2_289, %c3_290, %c0_291] : memref<5x8x80xf32, #tpu.memory_space<vmem>>, vector<1x1x80xf32>
    %402 = vector.shape_cast %401 : vector<1x1x80xf32> to vector<1x80xf32>
    %403 = vector.shape_cast %400 : vector<1x80xf32> to vector<1x1x80xf32>
    tpu.vector_store %arg17[%c2_289, %c3_290, %c0_291], %403 {strides = array<i32>} : memref<5x8x80xf32, #tpu.memory_space<vmem>>, vector<1x1x80xf32>,
    %404 = vector.extract_strided_slice %391 {offsets = [3, 0], sizes = [1, 80], strides = [1, 1]} : vector<5x80xf32> to vector<1x80xf32>
    %c3_292 = arith.constant 3 : index
    %c3_293 = arith.constant 3 : index
    %c0_294 = arith.constant 0 : index
    %405 = vector.load %arg17[%c3_292, %c3_293, %c0_294] : memref<5x8x80xf32, #tpu.memory_space<vmem>>, vector<1x1x80xf32>
    %406 = vector.shape_cast %405 : vector<1x1x80xf32> to vector<1x80xf32>
    %407 = vector.shape_cast %404 : vector<1x80xf32> to vector<1x1x80xf32>
    tpu.vector_store %arg17[%c3_292, %c3_293, %c0_294], %407 {strides = array<i32>} : memref<5x8x80xf32, #tpu.memory_space<vmem>>, vector<1x1x80xf32>,
    %408 = vector.extract_strided_slice %391 {offsets = [4, 0], sizes = [1, 80], strides = [1, 1]} : vector<5x80xf32> to vector<1x80xf32>
    %c4_295 = arith.constant 4 : index
    %c3_296 = arith.constant 3 : index
    %c0_297 = arith.constant 0 : index
    %409 = vector.load %arg17[%c4_295, %c3_296, %c0_297] : memref<5x8x80xf32, #tpu.memory_space<vmem>>, vector<1x1x80xf32>
    %410 = vector.shape_cast %409 : vector<1x1x80xf32> to vector<1x80xf32>
    %411 = vector.shape_cast %408 : vector<1x80xf32> to vector<1x1x80xf32>
    tpu.vector_store %arg17[%c4_295, %c3_296, %c0_297], %411 {strides = array<i32>} : memref<5x8x80xf32, #tpu.memory_space<vmem>>, vector<1x1x80xf32>,
    %c4_298 = arith.constant 4 : index
    %c0_299 = arith.constant 0 : index
    %c0_300 = arith.constant 0 : index
    %412 = vector.load %arg1[%c4_298, %c0_299, %c0_300] : memref<8x32x96xbf16, #tpu.memory_space<vmem>>, vector<1x32x96xbf16>
    %413 = vector.shape_cast %412 : vector<1x32x96xbf16> to vector<32x96xbf16>
    %414 = arith.extf %413 : vector<32x96xbf16> to vector<32x96xf32>
    %415 = vector.extract_strided_slice %414 {offsets = [0, 0], sizes = [28, 96], strides = [1, 1]} : vector<32x96xf32> to vector<28x96xf32>
    %416 = arith.truncf %415 : vector<28x96xf32> to vector<28x96xbf16>
    %c0_301 = arith.constant 0 : index
    %c0_302 = arith.constant 0 : index
    %c0_303 = arith.constant 0 : index
    %417 = vector.load %arg2[%c0_301, %c0_302, %c0_303] : memref<5x96x168xbf16, #tpu.memory_space<vmem>>, vector<1x96x168xbf16>
    %418 = vector.shape_cast %417 : vector<1x96x168xbf16> to vector<96x168xbf16>
    %cst_304 = arith.constant dense<0.000000e+00> : vector<28x168xf32>
    %419 = tpu.matmul %416, %418, %cst_304 {dimension_numbers = #tpu.dot_dimension_numbers<[1], [0], [0], [1], [0, 0, 1, 1], [], []>} : vector<28x96xbf16>, vector<96x168xbf16>, vector<28x168xf32> -> vector<28x168xf32>
    %420 = vector.extract_strided_slice %414 {offsets = [1, 0], sizes = [28, 96], strides = [1, 1]} : vector<32x96xf32> to vector<28x96xf32>
    %421 = arith.truncf %420 : vector<28x96xf32> to vector<28x96xbf16>
    %c1_305 = arith.constant 1 : index
    %c0_306 = arith.constant 0 : index
    %c0_307 = arith.constant 0 : index
    %422 = vector.load %arg2[%c1_305, %c0_306, %c0_307] : memref<5x96x168xbf16, #tpu.memory_space<vmem>>, vector<1x96x168xbf16>
    %423 = vector.shape_cast %422 : vector<1x96x168xbf16> to vector<96x168xbf16>
    %cst_308 = arith.constant dense<0.000000e+00> : vector<28x168xf32>
    %424 = tpu.matmul %421, %423, %cst_308 {dimension_numbers = #tpu.dot_dimension_numbers<[1], [0], [0], [1], [0, 0, 1, 1], [], []>} : vector<28x96xbf16>, vector<96x168xbf16>, vector<28x168xf32> -> vector<28x168xf32>
    %425 = arith.addf %419, %424 : vector<28x168xf32>
    %426 = vector.extract_strided_slice %414 {offsets = [2, 0], sizes = [28, 96], strides = [1, 1]} : vector<32x96xf32> to vector<28x96xf32>
    %427 = arith.truncf %426 : vector<28x96xf32> to vector<28x96xbf16>
    %c2_309 = arith.constant 2 : index
    %c0_310 = arith.constant 0 : index
    %c0_311 = arith.constant 0 : index
    %428 = vector.load %arg2[%c2_309, %c0_310, %c0_311] : memref<5x96x168xbf16, #tpu.memory_space<vmem>>, vector<1x96x168xbf16>
    %429 = vector.shape_cast %428 : vector<1x96x168xbf16> to vector<96x168xbf16>
    %cst_312 = arith.constant dense<0.000000e+00> : vector<28x168xf32>
    %430 = tpu.matmul %427, %429, %cst_312 {dimension_numbers = #tpu.dot_dimension_numbers<[1], [0], [0], [1], [0, 0, 1, 1], [], []>} : vector<28x96xbf16>, vector<96x168xbf16>, vector<28x168xf32> -> vector<28x168xf32>
    %431 = arith.addf %425, %430 : vector<28x168xf32>
    %432 = vector.extract_strided_slice %414 {offsets = [3, 0], sizes = [28, 96], strides = [1, 1]} : vector<32x96xf32> to vector<28x96xf32>
    %433 = arith.truncf %432 : vector<28x96xf32> to vector<28x96xbf16>
    %c3_313 = arith.constant 3 : index
    %c0_314 = arith.constant 0 : index
    %c0_315 = arith.constant 0 : index
    %434 = vector.load %arg2[%c3_313, %c0_314, %c0_315] : memref<5x96x168xbf16, #tpu.memory_space<vmem>>, vector<1x96x168xbf16>
    %435 = vector.shape_cast %434 : vector<1x96x168xbf16> to vector<96x168xbf16>
    %cst_316 = arith.constant dense<0.000000e+00> : vector<28x168xf32>
    %436 = tpu.matmul %433, %435, %cst_316 {dimension_numbers = #tpu.dot_dimension_numbers<[1], [0], [0], [1], [0, 0, 1, 1], [], []>} : vector<28x96xbf16>, vector<96x168xbf16>, vector<28x168xf32> -> vector<28x168xf32>
    %437 = arith.addf %431, %436 : vector<28x168xf32>
    %438 = vector.extract_strided_slice %414 {offsets = [4, 0], sizes = [28, 96], strides = [1, 1]} : vector<32x96xf32> to vector<28x96xf32>
    %439 = arith.truncf %438 : vector<28x96xf32> to vector<28x96xbf16>
    %c4_317 = arith.constant 4 : index
    %c0_318 = arith.constant 0 : index
    %c0_319 = arith.constant 0 : index
    %440 = vector.load %arg2[%c4_317, %c0_318, %c0_319] : memref<5x96x168xbf16, #tpu.memory_space<vmem>>, vector<1x96x168xbf16>
    %441 = vector.shape_cast %440 : vector<1x96x168xbf16> to vector<96x168xbf16>
    %cst_320 = arith.constant dense<0.000000e+00> : vector<28x168xf32>
    %442 = tpu.matmul %439, %441, %cst_320 {dimension_numbers = #tpu.dot_dimension_numbers<[1], [0], [0], [1], [0, 0, 1, 1], [], []>} : vector<28x96xbf16>, vector<96x168xbf16>, vector<28x168xf32> -> vector<28x168xf32>
    %443 = arith.addf %437, %442 : vector<28x168xf32>
    %c0_321 = arith.constant 0 : index
    %c0_322 = arith.constant 0 : index
    %444 = vector.load %arg3[%c0_321, %c0_322] : memref<1x168xf32, #tpu.memory_space<vmem>>, vector<1x168xf32>
    %445 = vector.broadcast %444 : vector<1x168xf32> to vector<28x168xf32>
    %446 = arith.addf %443, %445 : vector<28x168xf32>
    %cst_323 = arith.constant 0.000000e+00 : f32
    %447 = vector.broadcast %cst_323 : f32 to vector<28x168xf32>
    %448 = arith.maximumf %446, %447 : vector<28x168xf32>
    %449 = arith.truncf %448 : vector<28x168xf32> to vector<28x168xbf16>
    %c0_324 = arith.constant 0 : index
    %c0_325 = arith.constant 0 : index
    %450 = vector.load %arg5[%c0_324, %c0_325] : memref<168x84xbf16, #tpu.memory_space<vmem>>, vector<168x84xbf16>
    %cst_326 = arith.constant dense<0.000000e+00> : vector<28x84xf32>
    %451 = tpu.matmul %449, %450, %cst_326 {dimension_numbers = #tpu.dot_dimension_numbers<[1], [0], [0], [1], [0, 0, 1, 1], [], []>} : vector<28x168xbf16>, vector<168x84xbf16>, vector<28x84xf32> -> vector<28x84xf32>
    %c0_327 = arith.constant 0 : index
    %c0_328 = arith.constant 0 : index
    %452 = vector.load %arg4[%c0_327, %c0_328] : memref<14x28xbf16, #tpu.memory_space<vmem>>, vector<14x28xbf16>
    %453 = arith.truncf %451 : vector<28x84xf32> to vector<28x84xbf16>
    %cst_329 = arith.constant dense<0.000000e+00> : vector<14x84xf32>
    %454 = tpu.matmul %452, %453, %cst_329 {dimension_numbers = #tpu.dot_dimension_numbers<[1], [0], [0], [1], [0, 0, 1, 1], [], []>} : vector<14x28xbf16>, vector<28x84xbf16>, vector<14x84xf32> -> vector<14x84xf32>
    %455 = vector.extract_strided_slice %454 {offsets = [0, 0], sizes = [10, 84], strides = [1, 1]} : vector<14x84xf32> to vector<10x84xf32>
    %456 = arith.truncf %455 : vector<10x84xf32> to vector<10x84xbf16>
    %c0_330 = arith.constant 0 : index
    %c0_331 = arith.constant 0 : index
    %c0_332 = arith.constant 0 : index
    %457 = vector.load %arg6[%c0_330, %c0_331, %c0_332] : memref<5x84x160xbf16, #tpu.memory_space<vmem>>, vector<1x84x160xbf16>
    %458 = vector.shape_cast %457 : vector<1x84x160xbf16> to vector<84x160xbf16>
    %cst_333 = arith.constant dense<0.000000e+00> : vector<10x160xf32>
    %459 = tpu.matmul %456, %458, %cst_333 {dimension_numbers = #tpu.dot_dimension_numbers<[1], [0], [0], [1], [0, 0, 1, 1], [], []>} : vector<10x84xbf16>, vector<84x160xbf16>, vector<10x160xf32> -> vector<10x160xf32>
    %460 = vector.extract_strided_slice %454 {offsets = [1, 0], sizes = [10, 84], strides = [1, 1]} : vector<14x84xf32> to vector<10x84xf32>
    %461 = arith.truncf %460 : vector<10x84xf32> to vector<10x84xbf16>
    %c1_334 = arith.constant 1 : index
    %c0_335 = arith.constant 0 : index
    %c0_336 = arith.constant 0 : index
    %462 = vector.load %arg6[%c1_334, %c0_335, %c0_336] : memref<5x84x160xbf16, #tpu.memory_space<vmem>>, vector<1x84x160xbf16>
    %463 = vector.shape_cast %462 : vector<1x84x160xbf16> to vector<84x160xbf16>
    %cst_337 = arith.constant dense<0.000000e+00> : vector<10x160xf32>
    %464 = tpu.matmul %461, %463, %cst_337 {dimension_numbers = #tpu.dot_dimension_numbers<[1], [0], [0], [1], [0, 0, 1, 1], [], []>} : vector<10x84xbf16>, vector<84x160xbf16>, vector<10x160xf32> -> vector<10x160xf32>
    %465 = arith.addf %459, %464 : vector<10x160xf32>
    %466 = vector.extract_strided_slice %454 {offsets = [2, 0], sizes = [10, 84], strides = [1, 1]} : vector<14x84xf32> to vector<10x84xf32>
    %467 = arith.truncf %466 : vector<10x84xf32> to vector<10x84xbf16>
    %c2_338 = arith.constant 2 : index
    %c0_339 = arith.constant 0 : index
    %c0_340 = arith.constant 0 : index
    %468 = vector.load %arg6[%c2_338, %c0_339, %c0_340] : memref<5x84x160xbf16, #tpu.memory_space<vmem>>, vector<1x84x160xbf16>
    %469 = vector.shape_cast %468 : vector<1x84x160xbf16> to vector<84x160xbf16>
    %cst_341 = arith.constant dense<0.000000e+00> : vector<10x160xf32>
    %470 = tpu.matmul %467, %469, %cst_341 {dimension_numbers = #tpu.dot_dimension_numbers<[1], [0], [0], [1], [0, 0, 1, 1], [], []>} : vector<10x84xbf16>, vector<84x160xbf16>, vector<10x160xf32> -> vector<10x160xf32>
    %471 = arith.addf %465, %470 : vector<10x160xf32>
    %472 = vector.extract_strided_slice %454 {offsets = [3, 0], sizes = [10, 84], strides = [1, 1]} : vector<14x84xf32> to vector<10x84xf32>
    %473 = arith.truncf %472 : vector<10x84xf32> to vector<10x84xbf16>
    %c3_342 = arith.constant 3 : index
    %c0_343 = arith.constant 0 : index
    %c0_344 = arith.constant 0 : index
    %474 = vector.load %arg6[%c3_342, %c0_343, %c0_344] : memref<5x84x160xbf16, #tpu.memory_space<vmem>>, vector<1x84x160xbf16>
    %475 = vector.shape_cast %474 : vector<1x84x160xbf16> to vector<84x160xbf16>
    %cst_345 = arith.constant dense<0.000000e+00> : vector<10x160xf32>
    %476 = tpu.matmul %473, %475, %cst_345 {dimension_numbers = #tpu.dot_dimension_numbers<[1], [0], [0], [1], [0, 0, 1, 1], [], []>} : vector<10x84xbf16>, vector<84x160xbf16>, vector<10x160xf32> -> vector<10x160xf32>
    %477 = arith.addf %471, %476 : vector<10x160xf32>
    %478 = vector.extract_strided_slice %454 {offsets = [4, 0], sizes = [10, 84], strides = [1, 1]} : vector<14x84xf32> to vector<10x84xf32>
    %479 = arith.truncf %478 : vector<10x84xf32> to vector<10x84xbf16>
    %c4_346 = arith.constant 4 : index
    %c0_347 = arith.constant 0 : index
    %c0_348 = arith.constant 0 : index
    %480 = vector.load %arg6[%c4_346, %c0_347, %c0_348] : memref<5x84x160xbf16, #tpu.memory_space<vmem>>, vector<1x84x160xbf16>
    %481 = vector.shape_cast %480 : vector<1x84x160xbf16> to vector<84x160xbf16>
    %cst_349 = arith.constant dense<0.000000e+00> : vector<10x160xf32>
    %482 = tpu.matmul %479, %481, %cst_349 {dimension_numbers = #tpu.dot_dimension_numbers<[1], [0], [0], [1], [0, 0, 1, 1], [], []>} : vector<10x84xbf16>, vector<84x160xbf16>, vector<10x160xf32> -> vector<10x160xf32>
    %483 = arith.addf %477, %482 : vector<10x160xf32>
    %c0_350 = arith.constant 0 : index
    %c0_351 = arith.constant 0 : index
    %484 = vector.load %arg7[%c0_350, %c0_351] : memref<1x160xf32, #tpu.memory_space<vmem>>, vector<1x160xf32>
    %485 = vector.broadcast %484 : vector<1x160xf32> to vector<10x160xf32>
    %486 = arith.addf %483, %485 : vector<10x160xf32>
    %cst_352 = arith.constant 0.000000e+00 : f32
    %487 = vector.broadcast %cst_352 : f32 to vector<10x160xf32>
    %488 = arith.maximumf %486, %487 : vector<10x160xf32>
    %489 = arith.truncf %488 : vector<10x160xf32> to vector<10x160xbf16>
    %c0_353 = arith.constant 0 : index
    %c0_354 = arith.constant 0 : index
    %490 = vector.load %arg9[%c0_353, %c0_354] : memref<160x80xbf16, #tpu.memory_space<vmem>>, vector<160x80xbf16>
    %cst_355 = arith.constant dense<0.000000e+00> : vector<10x80xf32>
    %491 = tpu.matmul %489, %490, %cst_355 {dimension_numbers = #tpu.dot_dimension_numbers<[1], [0], [0], [1], [0, 0, 1, 1], [], []>} : vector<10x160xbf16>, vector<160x80xbf16>, vector<10x80xf32> -> vector<10x80xf32>
    %c0_356 = arith.constant 0 : index
    %c0_357 = arith.constant 0 : index
    %492 = vector.load %arg8[%c0_356, %c0_357] : memref<5x10xbf16, #tpu.memory_space<vmem>>, vector<5x10xbf16>
    %493 = arith.truncf %491 : vector<10x80xf32> to vector<10x80xbf16>
    %cst_358 = arith.constant dense<0.000000e+00> : vector<5x80xf32>
    %494 = tpu.matmul %492, %493, %cst_358 {dimension_numbers = #tpu.dot_dimension_numbers<[1], [0], [0], [1], [0, 0, 1, 1], [], []>} : vector<5x10xbf16>, vector<10x80xbf16>, vector<5x80xf32> -> vector<5x80xf32>
    %495 = vector.extract_strided_slice %494 {offsets = [0, 0], sizes = [1, 80], strides = [1, 1]} : vector<5x80xf32> to vector<1x80xf32>
    %c0_359 = arith.constant 0 : index
    %c4_360 = arith.constant 4 : index
    %c0_361 = arith.constant 0 : index
    %496 = vector.load %arg17[%c0_359, %c4_360, %c0_361] : memref<5x8x80xf32, #tpu.memory_space<vmem>>, vector<1x1x80xf32>
    %497 = vector.shape_cast %496 : vector<1x1x80xf32> to vector<1x80xf32>
    %498 = vector.shape_cast %495 : vector<1x80xf32> to vector<1x1x80xf32>
    tpu.vector_store %arg17[%c0_359, %c4_360, %c0_361], %498 {strides = array<i32>} : memref<5x8x80xf32, #tpu.memory_space<vmem>>, vector<1x1x80xf32>,
    %499 = vector.extract_strided_slice %494 {offsets = [1, 0], sizes = [1, 80], strides = [1, 1]} : vector<5x80xf32> to vector<1x80xf32>
    %c1_362 = arith.constant 1 : index
    %c4_363 = arith.constant 4 : index
    %c0_364 = arith.constant 0 : index
    %500 = vector.load %arg17[%c1_362, %c4_363, %c0_364] : memref<5x8x80xf32, #tpu.memory_space<vmem>>, vector<1x1x80xf32>
    %501 = vector.shape_cast %500 : vector<1x1x80xf32> to vector<1x80xf32>
    %502 = vector.shape_cast %499 : vector<1x80xf32> to vector<1x1x80xf32>
    tpu.vector_store %arg17[%c1_362, %c4_363, %c0_364], %502 {strides = array<i32>} : memref<5x8x80xf32, #tpu.memory_space<vmem>>, vector<1x1x80xf32>,
    %503 = vector.extract_strided_slice %494 {offsets = [2, 0], sizes = [1, 80], strides = [1, 1]} : vector<5x80xf32> to vector<1x80xf32>
    %c2_365 = arith.constant 2 : index
    %c4_366 = arith.constant 4 : index
    %c0_367 = arith.constant 0 : index
    %504 = vector.load %arg17[%c2_365, %c4_366, %c0_367] : memref<5x8x80xf32, #tpu.memory_space<vmem>>, vector<1x1x80xf32>
    %505 = vector.shape_cast %504 : vector<1x1x80xf32> to vector<1x80xf32>
    %506 = vector.shape_cast %503 : vector<1x80xf32> to vector<1x1x80xf32>
    tpu.vector_store %arg17[%c2_365, %c4_366, %c0_367], %506 {strides = array<i32>} : memref<5x8x80xf32, #tpu.memory_space<vmem>>, vector<1x1x80xf32>,
    %507 = vector.extract_strided_slice %494 {offsets = [3, 0], sizes = [1, 80], strides = [1, 1]} : vector<5x80xf32> to vector<1x80xf32>
    %c3_368 = arith.constant 3 : index
    %c4_369 = arith.constant 4 : index
    %c0_370 = arith.constant 0 : index
    %508 = vector.load %arg17[%c3_368, %c4_369, %c0_370] : memref<5x8x80xf32, #tpu.memory_space<vmem>>, vector<1x1x80xf32>
    %509 = vector.shape_cast %508 : vector<1x1x80xf32> to vector<1x80xf32>
    %510 = vector.shape_cast %507 : vector<1x80xf32> to vector<1x1x80xf32>
    tpu.vector_store %arg17[%c3_368, %c4_369, %c0_370], %510 {strides = array<i32>} : memref<5x8x80xf32, #tpu.memory_space<vmem>>, vector<1x1x80xf32>,
    %511 = vector.extract_strided_slice %494 {offsets = [4, 0], sizes = [1, 80], strides = [1, 1]} : vector<5x80xf32> to vector<1x80xf32>
    %c4_371 = arith.constant 4 : index
    %c4_372 = arith.constant 4 : index
    %c0_373 = arith.constant 0 : index
    %512 = vector.load %arg17[%c4_371, %c4_372, %c0_373] : memref<5x8x80xf32, #tpu.memory_space<vmem>>, vector<1x1x80xf32>
    %513 = vector.shape_cast %512 : vector<1x1x80xf32> to vector<1x80xf32>
    %514 = vector.shape_cast %511 : vector<1x80xf32> to vector<1x1x80xf32>
    tpu.vector_store %arg17[%c4_371, %c4_372, %c0_373], %514 {strides = array<i32>} : memref<5x8x80xf32, #tpu.memory_space<vmem>>, vector<1x1x80xf32>,
    %c5 = arith.constant 5 : index
    %c0_374 = arith.constant 0 : index
    %c0_375 = arith.constant 0 : index
    %515 = vector.load %arg1[%c5, %c0_374, %c0_375] : memref<8x32x96xbf16, #tpu.memory_space<vmem>>, vector<1x32x96xbf16>
    %516 = vector.shape_cast %515 : vector<1x32x96xbf16> to vector<32x96xbf16>
    %517 = arith.extf %516 : vector<32x96xbf16> to vector<32x96xf32>
    %518 = vector.extract_strided_slice %517 {offsets = [0, 0], sizes = [28, 96], strides = [1, 1]} : vector<32x96xf32> to vector<28x96xf32>
    %519 = arith.truncf %518 : vector<28x96xf32> to vector<28x96xbf16>
    %c0_376 = arith.constant 0 : index
    %c0_377 = arith.constant 0 : index
    %c0_378 = arith.constant 0 : index
    %520 = vector.load %arg2[%c0_376, %c0_377, %c0_378] : memref<5x96x168xbf16, #tpu.memory_space<vmem>>, vector<1x96x168xbf16>
    %521 = vector.shape_cast %520 : vector<1x96x168xbf16> to vector<96x168xbf16>
    %cst_379 = arith.constant dense<0.000000e+00> : vector<28x168xf32>
    %522 = tpu.matmul %519, %521, %cst_379 {dimension_numbers = #tpu.dot_dimension_numbers<[1], [0], [0], [1], [0, 0, 1, 1], [], []>} : vector<28x96xbf16>, vector<96x168xbf16>, vector<28x168xf32> -> vector<28x168xf32>
    %523 = vector.extract_strided_slice %517 {offsets = [1, 0], sizes = [28, 96], strides = [1, 1]} : vector<32x96xf32> to vector<28x96xf32>
    %524 = arith.truncf %523 : vector<28x96xf32> to vector<28x96xbf16>
    %c1_380 = arith.constant 1 : index
    %c0_381 = arith.constant 0 : index
    %c0_382 = arith.constant 0 : index
    %525 = vector.load %arg2[%c1_380, %c0_381, %c0_382] : memref<5x96x168xbf16, #tpu.memory_space<vmem>>, vector<1x96x168xbf16>
    %526 = vector.shape_cast %525 : vector<1x96x168xbf16> to vector<96x168xbf16>
    %cst_383 = arith.constant dense<0.000000e+00> : vector<28x168xf32>
    %527 = tpu.matmul %524, %526, %cst_383 {dimension_numbers = #tpu.dot_dimension_numbers<[1], [0], [0], [1], [0, 0, 1, 1], [], []>} : vector<28x96xbf16>, vector<96x168xbf16>, vector<28x168xf32> -> vector<28x168xf32>
    %528 = arith.addf %522, %527 : vector<28x168xf32>
    %529 = vector.extract_strided_slice %517 {offsets = [2, 0], sizes = [28, 96], strides = [1, 1]} : vector<32x96xf32> to vector<28x96xf32>
    %530 = arith.truncf %529 : vector<28x96xf32> to vector<28x96xbf16>
    %c2_384 = arith.constant 2 : index
    %c0_385 = arith.constant 0 : index
    %c0_386 = arith.constant 0 : index
    %531 = vector.load %arg2[%c2_384, %c0_385, %c0_386] : memref<5x96x168xbf16, #tpu.memory_space<vmem>>, vector<1x96x168xbf16>
    %532 = vector.shape_cast %531 : vector<1x96x168xbf16> to vector<96x168xbf16>
    %cst_387 = arith.constant dense<0.000000e+00> : vector<28x168xf32>
    %533 = tpu.matmul %530, %532, %cst_387 {dimension_numbers = #tpu.dot_dimension_numbers<[1], [0], [0], [1], [0, 0, 1, 1], [], []>} : vector<28x96xbf16>, vector<96x168xbf16>, vector<28x168xf32> -> vector<28x168xf32>
    %534 = arith.addf %528, %533 : vector<28x168xf32>
    %535 = vector.extract_strided_slice %517 {offsets = [3, 0], sizes = [28, 96], strides = [1, 1]} : vector<32x96xf32> to vector<28x96xf32>
    %536 = arith.truncf %535 : vector<28x96xf32> to vector<28x96xbf16>
    %c3_388 = arith.constant 3 : index
    %c0_389 = arith.constant 0 : index
    %c0_390 = arith.constant 0 : index
    %537 = vector.load %arg2[%c3_388, %c0_389, %c0_390] : memref<5x96x168xbf16, #tpu.memory_space<vmem>>, vector<1x96x168xbf16>
    %538 = vector.shape_cast %537 : vector<1x96x168xbf16> to vector<96x168xbf16>
    %cst_391 = arith.constant dense<0.000000e+00> : vector<28x168xf32>
    %539 = tpu.matmul %536, %538, %cst_391 {dimension_numbers = #tpu.dot_dimension_numbers<[1], [0], [0], [1], [0, 0, 1, 1], [], []>} : vector<28x96xbf16>, vector<96x168xbf16>, vector<28x168xf32> -> vector<28x168xf32>
    %540 = arith.addf %534, %539 : vector<28x168xf32>
    %541 = vector.extract_strided_slice %517 {offsets = [4, 0], sizes = [28, 96], strides = [1, 1]} : vector<32x96xf32> to vector<28x96xf32>
    %542 = arith.truncf %541 : vector<28x96xf32> to vector<28x96xbf16>
    %c4_392 = arith.constant 4 : index
    %c0_393 = arith.constant 0 : index
    %c0_394 = arith.constant 0 : index
    %543 = vector.load %arg2[%c4_392, %c0_393, %c0_394] : memref<5x96x168xbf16, #tpu.memory_space<vmem>>, vector<1x96x168xbf16>
    %544 = vector.shape_cast %543 : vector<1x96x168xbf16> to vector<96x168xbf16>
    %cst_395 = arith.constant dense<0.000000e+00> : vector<28x168xf32>
    %545 = tpu.matmul %542, %544, %cst_395 {dimension_numbers = #tpu.dot_dimension_numbers<[1], [0], [0], [1], [0, 0, 1, 1], [], []>} : vector<28x96xbf16>, vector<96x168xbf16>, vector<28x168xf32> -> vector<28x168xf32>
    %546 = arith.addf %540, %545 : vector<28x168xf32>
    %c0_396 = arith.constant 0 : index
    %c0_397 = arith.constant 0 : index
    %547 = vector.load %arg3[%c0_396, %c0_397] : memref<1x168xf32, #tpu.memory_space<vmem>>, vector<1x168xf32>
    %548 = vector.broadcast %547 : vector<1x168xf32> to vector<28x168xf32>
    %549 = arith.addf %546, %548 : vector<28x168xf32>
    %cst_398 = arith.constant 0.000000e+00 : f32
    %550 = vector.broadcast %cst_398 : f32 to vector<28x168xf32>
    %551 = arith.maximumf %549, %550 : vector<28x168xf32>
    %552 = arith.truncf %551 : vector<28x168xf32> to vector<28x168xbf16>
    %c0_399 = arith.constant 0 : index
    %c0_400 = arith.constant 0 : index
    %553 = vector.load %arg5[%c0_399, %c0_400] : memref<168x84xbf16, #tpu.memory_space<vmem>>, vector<168x84xbf16>
    %cst_401 = arith.constant dense<0.000000e+00> : vector<28x84xf32>
    %554 = tpu.matmul %552, %553, %cst_401 {dimension_numbers = #tpu.dot_dimension_numbers<[1], [0], [0], [1], [0, 0, 1, 1], [], []>} : vector<28x168xbf16>, vector<168x84xbf16>, vector<28x84xf32> -> vector<28x84xf32>
    %c0_402 = arith.constant 0 : index
    %c0_403 = arith.constant 0 : index
    %555 = vector.load %arg4[%c0_402, %c0_403] : memref<14x28xbf16, #tpu.memory_space<vmem>>, vector<14x28xbf16>
    %556 = arith.truncf %554 : vector<28x84xf32> to vector<28x84xbf16>
    %cst_404 = arith.constant dense<0.000000e+00> : vector<14x84xf32>
    %557 = tpu.matmul %555, %556, %cst_404 {dimension_numbers = #tpu.dot_dimension_numbers<[1], [0], [0], [1], [0, 0, 1, 1], [], []>} : vector<14x28xbf16>, vector<28x84xbf16>, vector<14x84xf32> -> vector<14x84xf32>
    %558 = vector.extract_strided_slice %557 {offsets = [0, 0], sizes = [10, 84], strides = [1, 1]} : vector<14x84xf32> to vector<10x84xf32>
    %559 = arith.truncf %558 : vector<10x84xf32> to vector<10x84xbf16>
    %c0_405 = arith.constant 0 : index
    %c0_406 = arith.constant 0 : index
    %c0_407 = arith.constant 0 : index
    %560 = vector.load %arg6[%c0_405, %c0_406, %c0_407] : memref<5x84x160xbf16, #tpu.memory_space<vmem>>, vector<1x84x160xbf16>
    %561 = vector.shape_cast %560 : vector<1x84x160xbf16> to vector<84x160xbf16>
    %cst_408 = arith.constant dense<0.000000e+00> : vector<10x160xf32>
    %562 = tpu.matmul %559, %561, %cst_408 {dimension_numbers = #tpu.dot_dimension_numbers<[1], [0], [0], [1], [0, 0, 1, 1], [], []>} : vector<10x84xbf16>, vector<84x160xbf16>, vector<10x160xf32> -> vector<10x160xf32>
    %563 = vector.extract_strided_slice %557 {offsets = [1, 0], sizes = [10, 84], strides = [1, 1]} : vector<14x84xf32> to vector<10x84xf32>
    %564 = arith.truncf %563 : vector<10x84xf32> to vector<10x84xbf16>
    %c1_409 = arith.constant 1 : index
    %c0_410 = arith.constant 0 : index
    %c0_411 = arith.constant 0 : index
    %565 = vector.load %arg6[%c1_409, %c0_410, %c0_411] : memref<5x84x160xbf16, #tpu.memory_space<vmem>>, vector<1x84x160xbf16>
    %566 = vector.shape_cast %565 : vector<1x84x160xbf16> to vector<84x160xbf16>
    %cst_412 = arith.constant dense<0.000000e+00> : vector<10x160xf32>
    %567 = tpu.matmul %564, %566, %cst_412 {dimension_numbers = #tpu.dot_dimension_numbers<[1], [0], [0], [1], [0, 0, 1, 1], [], []>} : vector<10x84xbf16>, vector<84x160xbf16>, vector<10x160xf32> -> vector<10x160xf32>
    %568 = arith.addf %562, %567 : vector<10x160xf32>
    %569 = vector.extract_strided_slice %557 {offsets = [2, 0], sizes = [10, 84], strides = [1, 1]} : vector<14x84xf32> to vector<10x84xf32>
    %570 = arith.truncf %569 : vector<10x84xf32> to vector<10x84xbf16>
    %c2_413 = arith.constant 2 : index
    %c0_414 = arith.constant 0 : index
    %c0_415 = arith.constant 0 : index
    %571 = vector.load %arg6[%c2_413, %c0_414, %c0_415] : memref<5x84x160xbf16, #tpu.memory_space<vmem>>, vector<1x84x160xbf16>
    %572 = vector.shape_cast %571 : vector<1x84x160xbf16> to vector<84x160xbf16>
    %cst_416 = arith.constant dense<0.000000e+00> : vector<10x160xf32>
    %573 = tpu.matmul %570, %572, %cst_416 {dimension_numbers = #tpu.dot_dimension_numbers<[1], [0], [0], [1], [0, 0, 1, 1], [], []>} : vector<10x84xbf16>, vector<84x160xbf16>, vector<10x160xf32> -> vector<10x160xf32>
    %574 = arith.addf %568, %573 : vector<10x160xf32>
    %575 = vector.extract_strided_slice %557 {offsets = [3, 0], sizes = [10, 84], strides = [1, 1]} : vector<14x84xf32> to vector<10x84xf32>
    %576 = arith.truncf %575 : vector<10x84xf32> to vector<10x84xbf16>
    %c3_417 = arith.constant 3 : index
    %c0_418 = arith.constant 0 : index
    %c0_419 = arith.constant 0 : index
    %577 = vector.load %arg6[%c3_417, %c0_418, %c0_419] : memref<5x84x160xbf16, #tpu.memory_space<vmem>>, vector<1x84x160xbf16>
    %578 = vector.shape_cast %577 : vector<1x84x160xbf16> to vector<84x160xbf16>
    %cst_420 = arith.constant dense<0.000000e+00> : vector<10x160xf32>
    %579 = tpu.matmul %576, %578, %cst_420 {dimension_numbers = #tpu.dot_dimension_numbers<[1], [0], [0], [1], [0, 0, 1, 1], [], []>} : vector<10x84xbf16>, vector<84x160xbf16>, vector<10x160xf32> -> vector<10x160xf32>
    %580 = arith.addf %574, %579 : vector<10x160xf32>
    %581 = vector.extract_strided_slice %557 {offsets = [4, 0], sizes = [10, 84], strides = [1, 1]} : vector<14x84xf32> to vector<10x84xf32>
    %582 = arith.truncf %581 : vector<10x84xf32> to vector<10x84xbf16>
    %c4_421 = arith.constant 4 : index
    %c0_422 = arith.constant 0 : index
    %c0_423 = arith.constant 0 : index
    %583 = vector.load %arg6[%c4_421, %c0_422, %c0_423] : memref<5x84x160xbf16, #tpu.memory_space<vmem>>, vector<1x84x160xbf16>
    %584 = vector.shape_cast %583 : vector<1x84x160xbf16> to vector<84x160xbf16>
    %cst_424 = arith.constant dense<0.000000e+00> : vector<10x160xf32>
    %585 = tpu.matmul %582, %584, %cst_424 {dimension_numbers = #tpu.dot_dimension_numbers<[1], [0], [0], [1], [0, 0, 1, 1], [], []>} : vector<10x84xbf16>, vector<84x160xbf16>, vector<10x160xf32> -> vector<10x160xf32>
    %586 = arith.addf %580, %585 : vector<10x160xf32>
    %c0_425 = arith.constant 0 : index
    %c0_426 = arith.constant 0 : index
    %587 = vector.load %arg7[%c0_425, %c0_426] : memref<1x160xf32, #tpu.memory_space<vmem>>, vector<1x160xf32>
    %588 = vector.broadcast %587 : vector<1x160xf32> to vector<10x160xf32>
    %589 = arith.addf %586, %588 : vector<10x160xf32>
    %cst_427 = arith.constant 0.000000e+00 : f32
    %590 = vector.broadcast %cst_427 : f32 to vector<10x160xf32>
    %591 = arith.maximumf %589, %590 : vector<10x160xf32>
    %592 = arith.truncf %591 : vector<10x160xf32> to vector<10x160xbf16>
    %c0_428 = arith.constant 0 : index
    %c0_429 = arith.constant 0 : index
    %593 = vector.load %arg9[%c0_428, %c0_429] : memref<160x80xbf16, #tpu.memory_space<vmem>>, vector<160x80xbf16>
    %cst_430 = arith.constant dense<0.000000e+00> : vector<10x80xf32>
    %594 = tpu.matmul %592, %593, %cst_430 {dimension_numbers = #tpu.dot_dimension_numbers<[1], [0], [0], [1], [0, 0, 1, 1], [], []>} : vector<10x160xbf16>, vector<160x80xbf16>, vector<10x80xf32> -> vector<10x80xf32>
    %c0_431 = arith.constant 0 : index
    %c0_432 = arith.constant 0 : index
    %595 = vector.load %arg8[%c0_431, %c0_432] : memref<5x10xbf16, #tpu.memory_space<vmem>>, vector<5x10xbf16>
    %596 = arith.truncf %594 : vector<10x80xf32> to vector<10x80xbf16>
    %cst_433 = arith.constant dense<0.000000e+00> : vector<5x80xf32>
    %597 = tpu.matmul %595, %596, %cst_433 {dimension_numbers = #tpu.dot_dimension_numbers<[1], [0], [0], [1], [0, 0, 1, 1], [], []>} : vector<5x10xbf16>, vector<10x80xbf16>, vector<5x80xf32> -> vector<5x80xf32>
    %598 = vector.extract_strided_slice %597 {offsets = [0, 0], sizes = [1, 80], strides = [1, 1]} : vector<5x80xf32> to vector<1x80xf32>
    %c0_434 = arith.constant 0 : index
    %c5_435 = arith.constant 5 : index
    %c0_436 = arith.constant 0 : index
    %599 = vector.load %arg17[%c0_434, %c5_435, %c0_436] : memref<5x8x80xf32, #tpu.memory_space<vmem>>, vector<1x1x80xf32>
    %600 = vector.shape_cast %599 : vector<1x1x80xf32> to vector<1x80xf32>
    %601 = vector.shape_cast %598 : vector<1x80xf32> to vector<1x1x80xf32>
    tpu.vector_store %arg17[%c0_434, %c5_435, %c0_436], %601 {strides = array<i32>} : memref<5x8x80xf32, #tpu.memory_space<vmem>>, vector<1x1x80xf32>,
    %602 = vector.extract_strided_slice %597 {offsets = [1, 0], sizes = [1, 80], strides = [1, 1]} : vector<5x80xf32> to vector<1x80xf32>
    %c1_437 = arith.constant 1 : index
    %c5_438 = arith.constant 5 : index
    %c0_439 = arith.constant 0 : index
    %603 = vector.load %arg17[%c1_437, %c5_438, %c0_439] : memref<5x8x80xf32, #tpu.memory_space<vmem>>, vector<1x1x80xf32>
    %604 = vector.shape_cast %603 : vector<1x1x80xf32> to vector<1x80xf32>
    %605 = vector.shape_cast %602 : vector<1x80xf32> to vector<1x1x80xf32>
    tpu.vector_store %arg17[%c1_437, %c5_438, %c0_439], %605 {strides = array<i32>} : memref<5x8x80xf32, #tpu.memory_space<vmem>>, vector<1x1x80xf32>,
    %606 = vector.extract_strided_slice %597 {offsets = [2, 0], sizes = [1, 80], strides = [1, 1]} : vector<5x80xf32> to vector<1x80xf32>
    %c2_440 = arith.constant 2 : index
    %c5_441 = arith.constant 5 : index
    %c0_442 = arith.constant 0 : index
    %607 = vector.load %arg17[%c2_440, %c5_441, %c0_442] : memref<5x8x80xf32, #tpu.memory_space<vmem>>, vector<1x1x80xf32>
    %608 = vector.shape_cast %607 : vector<1x1x80xf32> to vector<1x80xf32>
    %609 = vector.shape_cast %606 : vector<1x80xf32> to vector<1x1x80xf32>
    tpu.vector_store %arg17[%c2_440, %c5_441, %c0_442], %609 {strides = array<i32>} : memref<5x8x80xf32, #tpu.memory_space<vmem>>, vector<1x1x80xf32>,
    %610 = vector.extract_strided_slice %597 {offsets = [3, 0], sizes = [1, 80], strides = [1, 1]} : vector<5x80xf32> to vector<1x80xf32>
    %c3_443 = arith.constant 3 : index
    %c5_444 = arith.constant 5 : index
    %c0_445 = arith.constant 0 : index
    %611 = vector.load %arg17[%c3_443, %c5_444, %c0_445] : memref<5x8x80xf32, #tpu.memory_space<vmem>>, vector<1x1x80xf32>
    %612 = vector.shape_cast %611 : vector<1x1x80xf32> to vector<1x80xf32>
    %613 = vector.shape_cast %610 : vector<1x80xf32> to vector<1x1x80xf32>
    tpu.vector_store %arg17[%c3_443, %c5_444, %c0_445], %613 {strides = array<i32>} : memref<5x8x80xf32, #tpu.memory_space<vmem>>, vector<1x1x80xf32>,
    %614 = vector.extract_strided_slice %597 {offsets = [4, 0], sizes = [1, 80], strides = [1, 1]} : vector<5x80xf32> to vector<1x80xf32>
    %c4_446 = arith.constant 4 : index
    %c5_447 = arith.constant 5 : index
    %c0_448 = arith.constant 0 : index
    %615 = vector.load %arg17[%c4_446, %c5_447, %c0_448] : memref<5x8x80xf32, #tpu.memory_space<vmem>>, vector<1x1x80xf32>
    %616 = vector.shape_cast %615 : vector<1x1x80xf32> to vector<1x80xf32>
    %617 = vector.shape_cast %614 : vector<1x80xf32> to vector<1x1x80xf32>
    tpu.vector_store %arg17[%c4_446, %c5_447, %c0_448], %617 {strides = array<i32>} : memref<5x8x80xf32, #tpu.memory_space<vmem>>, vector<1x1x80xf32>,
    %c6 = arith.constant 6 : index
    %c0_449 = arith.constant 0 : index
    %c0_450 = arith.constant 0 : index
    %618 = vector.load %arg1[%c6, %c0_449, %c0_450] : memref<8x32x96xbf16, #tpu.memory_space<vmem>>, vector<1x32x96xbf16>
    %619 = vector.shape_cast %618 : vector<1x32x96xbf16> to vector<32x96xbf16>
    %620 = arith.extf %619 : vector<32x96xbf16> to vector<32x96xf32>
    %621 = vector.extract_strided_slice %620 {offsets = [0, 0], sizes = [28, 96], strides = [1, 1]} : vector<32x96xf32> to vector<28x96xf32>
    %622 = arith.truncf %621 : vector<28x96xf32> to vector<28x96xbf16>
    %c0_451 = arith.constant 0 : index
    %c0_452 = arith.constant 0 : index
    %c0_453 = arith.constant 0 : index
    %623 = vector.load %arg2[%c0_451, %c0_452, %c0_453] : memref<5x96x168xbf16, #tpu.memory_space<vmem>>, vector<1x96x168xbf16>
    %624 = vector.shape_cast %623 : vector<1x96x168xbf16> to vector<96x168xbf16>
    %cst_454 = arith.constant dense<0.000000e+00> : vector<28x168xf32>
    %625 = tpu.matmul %622, %624, %cst_454 {dimension_numbers = #tpu.dot_dimension_numbers<[1], [0], [0], [1], [0, 0, 1, 1], [], []>} : vector<28x96xbf16>, vector<96x168xbf16>, vector<28x168xf32> -> vector<28x168xf32>
    %626 = vector.extract_strided_slice %620 {offsets = [1, 0], sizes = [28, 96], strides = [1, 1]} : vector<32x96xf32> to vector<28x96xf32>
    %627 = arith.truncf %626 : vector<28x96xf32> to vector<28x96xbf16>
    %c1_455 = arith.constant 1 : index
    %c0_456 = arith.constant 0 : index
    %c0_457 = arith.constant 0 : index
    %628 = vector.load %arg2[%c1_455, %c0_456, %c0_457] : memref<5x96x168xbf16, #tpu.memory_space<vmem>>, vector<1x96x168xbf16>
    %629 = vector.shape_cast %628 : vector<1x96x168xbf16> to vector<96x168xbf16>
    %cst_458 = arith.constant dense<0.000000e+00> : vector<28x168xf32>
    %630 = tpu.matmul %627, %629, %cst_458 {dimension_numbers = #tpu.dot_dimension_numbers<[1], [0], [0], [1], [0, 0, 1, 1], [], []>} : vector<28x96xbf16>, vector<96x168xbf16>, vector<28x168xf32> -> vector<28x168xf32>
    %631 = arith.addf %625, %630 : vector<28x168xf32>
    %632 = vector.extract_strided_slice %620 {offsets = [2, 0], sizes = [28, 96], strides = [1, 1]} : vector<32x96xf32> to vector<28x96xf32>
    %633 = arith.truncf %632 : vector<28x96xf32> to vector<28x96xbf16>
    %c2_459 = arith.constant 2 : index
    %c0_460 = arith.constant 0 : index
    %c0_461 = arith.constant 0 : index
    %634 = vector.load %arg2[%c2_459, %c0_460, %c0_461] : memref<5x96x168xbf16, #tpu.memory_space<vmem>>, vector<1x96x168xbf16>
    %635 = vector.shape_cast %634 : vector<1x96x168xbf16> to vector<96x168xbf16>
    %cst_462 = arith.constant dense<0.000000e+00> : vector<28x168xf32>
    %636 = tpu.matmul %633, %635, %cst_462 {dimension_numbers = #tpu.dot_dimension_numbers<[1], [0], [0], [1], [0, 0, 1, 1], [], []>} : vector<28x96xbf16>, vector<96x168xbf16>, vector<28x168xf32> -> vector<28x168xf32>
    %637 = arith.addf %631, %636 : vector<28x168xf32>
    %638 = vector.extract_strided_slice %620 {offsets = [3, 0], sizes = [28, 96], strides = [1, 1]} : vector<32x96xf32> to vector<28x96xf32>
    %639 = arith.truncf %638 : vector<28x96xf32> to vector<28x96xbf16>
    %c3_463 = arith.constant 3 : index
    %c0_464 = arith.constant 0 : index
    %c0_465 = arith.constant 0 : index
    %640 = vector.load %arg2[%c3_463, %c0_464, %c0_465] : memref<5x96x168xbf16, #tpu.memory_space<vmem>>, vector<1x96x168xbf16>
    %641 = vector.shape_cast %640 : vector<1x96x168xbf16> to vector<96x168xbf16>
    %cst_466 = arith.constant dense<0.000000e+00> : vector<28x168xf32>
    %642 = tpu.matmul %639, %641, %cst_466 {dimension_numbers = #tpu.dot_dimension_numbers<[1], [0], [0], [1], [0, 0, 1, 1], [], []>} : vector<28x96xbf16>, vector<96x168xbf16>, vector<28x168xf32> -> vector<28x168xf32>
    %643 = arith.addf %637, %642 : vector<28x168xf32>
    %644 = vector.extract_strided_slice %620 {offsets = [4, 0], sizes = [28, 96], strides = [1, 1]} : vector<32x96xf32> to vector<28x96xf32>
    %645 = arith.truncf %644 : vector<28x96xf32> to vector<28x96xbf16>
    %c4_467 = arith.constant 4 : index
    %c0_468 = arith.constant 0 : index
    %c0_469 = arith.constant 0 : index
    %646 = vector.load %arg2[%c4_467, %c0_468, %c0_469] : memref<5x96x168xbf16, #tpu.memory_space<vmem>>, vector<1x96x168xbf16>
    %647 = vector.shape_cast %646 : vector<1x96x168xbf16> to vector<96x168xbf16>
    %cst_470 = arith.constant dense<0.000000e+00> : vector<28x168xf32>
    %648 = tpu.matmul %645, %647, %cst_470 {dimension_numbers = #tpu.dot_dimension_numbers<[1], [0], [0], [1], [0, 0, 1, 1], [], []>} : vector<28x96xbf16>, vector<96x168xbf16>, vector<28x168xf32> -> vector<28x168xf32>
    %649 = arith.addf %643, %648 : vector<28x168xf32>
    %c0_471 = arith.constant 0 : index
    %c0_472 = arith.constant 0 : index
    %650 = vector.load %arg3[%c0_471, %c0_472] : memref<1x168xf32, #tpu.memory_space<vmem>>, vector<1x168xf32>
    %651 = vector.broadcast %650 : vector<1x168xf32> to vector<28x168xf32>
    %652 = arith.addf %649, %651 : vector<28x168xf32>
    %cst_473 = arith.constant 0.000000e+00 : f32
    %653 = vector.broadcast %cst_473 : f32 to vector<28x168xf32>
    %654 = arith.maximumf %652, %653 : vector<28x168xf32>
    %655 = arith.truncf %654 : vector<28x168xf32> to vector<28x168xbf16>
    %c0_474 = arith.constant 0 : index
    %c0_475 = arith.constant 0 : index
    %656 = vector.load %arg5[%c0_474, %c0_475] : memref<168x84xbf16, #tpu.memory_space<vmem>>, vector<168x84xbf16>
    %cst_476 = arith.constant dense<0.000000e+00> : vector<28x84xf32>
    %657 = tpu.matmul %655, %656, %cst_476 {dimension_numbers = #tpu.dot_dimension_numbers<[1], [0], [0], [1], [0, 0, 1, 1], [], []>} : vector<28x168xbf16>, vector<168x84xbf16>, vector<28x84xf32> -> vector<28x84xf32>
    %c0_477 = arith.constant 0 : index
    %c0_478 = arith.constant 0 : index
    %658 = vector.load %arg4[%c0_477, %c0_478] : memref<14x28xbf16, #tpu.memory_space<vmem>>, vector<14x28xbf16>
    %659 = arith.truncf %657 : vector<28x84xf32> to vector<28x84xbf16>
    %cst_479 = arith.constant dense<0.000000e+00> : vector<14x84xf32>
    %660 = tpu.matmul %658, %659, %cst_479 {dimension_numbers = #tpu.dot_dimension_numbers<[1], [0], [0], [1], [0, 0, 1, 1], [], []>} : vector<14x28xbf16>, vector<28x84xbf16>, vector<14x84xf32> -> vector<14x84xf32>
    %661 = vector.extract_strided_slice %660 {offsets = [0, 0], sizes = [10, 84], strides = [1, 1]} : vector<14x84xf32> to vector<10x84xf32>
    %662 = arith.truncf %661 : vector<10x84xf32> to vector<10x84xbf16>
    %c0_480 = arith.constant 0 : index
    %c0_481 = arith.constant 0 : index
    %c0_482 = arith.constant 0 : index
    %663 = vector.load %arg6[%c0_480, %c0_481, %c0_482] : memref<5x84x160xbf16, #tpu.memory_space<vmem>>, vector<1x84x160xbf16>
    %664 = vector.shape_cast %663 : vector<1x84x160xbf16> to vector<84x160xbf16>
    %cst_483 = arith.constant dense<0.000000e+00> : vector<10x160xf32>
    %665 = tpu.matmul %662, %664, %cst_483 {dimension_numbers = #tpu.dot_dimension_numbers<[1], [0], [0], [1], [0, 0, 1, 1], [], []>} : vector<10x84xbf16>, vector<84x160xbf16>, vector<10x160xf32> -> vector<10x160xf32>
    %666 = vector.extract_strided_slice %660 {offsets = [1, 0], sizes = [10, 84], strides = [1, 1]} : vector<14x84xf32> to vector<10x84xf32>
    %667 = arith.truncf %666 : vector<10x84xf32> to vector<10x84xbf16>
    %c1_484 = arith.constant 1 : index
    %c0_485 = arith.constant 0 : index
    %c0_486 = arith.constant 0 : index
    %668 = vector.load %arg6[%c1_484, %c0_485, %c0_486] : memref<5x84x160xbf16, #tpu.memory_space<vmem>>, vector<1x84x160xbf16>
    %669 = vector.shape_cast %668 : vector<1x84x160xbf16> to vector<84x160xbf16>
    %cst_487 = arith.constant dense<0.000000e+00> : vector<10x160xf32>
    %670 = tpu.matmul %667, %669, %cst_487 {dimension_numbers = #tpu.dot_dimension_numbers<[1], [0], [0], [1], [0, 0, 1, 1], [], []>} : vector<10x84xbf16>, vector<84x160xbf16>, vector<10x160xf32> -> vector<10x160xf32>
    %671 = arith.addf %665, %670 : vector<10x160xf32>
    %672 = vector.extract_strided_slice %660 {offsets = [2, 0], sizes = [10, 84], strides = [1, 1]} : vector<14x84xf32> to vector<10x84xf32>
    %673 = arith.truncf %672 : vector<10x84xf32> to vector<10x84xbf16>
    %c2_488 = arith.constant 2 : index
    %c0_489 = arith.constant 0 : index
    %c0_490 = arith.constant 0 : index
    %674 = vector.load %arg6[%c2_488, %c0_489, %c0_490] : memref<5x84x160xbf16, #tpu.memory_space<vmem>>, vector<1x84x160xbf16>
    %675 = vector.shape_cast %674 : vector<1x84x160xbf16> to vector<84x160xbf16>
    %cst_491 = arith.constant dense<0.000000e+00> : vector<10x160xf32>
    %676 = tpu.matmul %673, %675, %cst_491 {dimension_numbers = #tpu.dot_dimension_numbers<[1], [0], [0], [1], [0, 0, 1, 1], [], []>} : vector<10x84xbf16>, vector<84x160xbf16>, vector<10x160xf32> -> vector<10x160xf32>
    %677 = arith.addf %671, %676 : vector<10x160xf32>
    %678 = vector.extract_strided_slice %660 {offsets = [3, 0], sizes = [10, 84], strides = [1, 1]} : vector<14x84xf32> to vector<10x84xf32>
    %679 = arith.truncf %678 : vector<10x84xf32> to vector<10x84xbf16>
    %c3_492 = arith.constant 3 : index
    %c0_493 = arith.constant 0 : index
    %c0_494 = arith.constant 0 : index
    %680 = vector.load %arg6[%c3_492, %c0_493, %c0_494] : memref<5x84x160xbf16, #tpu.memory_space<vmem>>, vector<1x84x160xbf16>
    %681 = vector.shape_cast %680 : vector<1x84x160xbf16> to vector<84x160xbf16>
    %cst_495 = arith.constant dense<0.000000e+00> : vector<10x160xf32>
    %682 = tpu.matmul %679, %681, %cst_495 {dimension_numbers = #tpu.dot_dimension_numbers<[1], [0], [0], [1], [0, 0, 1, 1], [], []>} : vector<10x84xbf16>, vector<84x160xbf16>, vector<10x160xf32> -> vector<10x160xf32>
    %683 = arith.addf %677, %682 : vector<10x160xf32>
    %684 = vector.extract_strided_slice %660 {offsets = [4, 0], sizes = [10, 84], strides = [1, 1]} : vector<14x84xf32> to vector<10x84xf32>
    %685 = arith.truncf %684 : vector<10x84xf32> to vector<10x84xbf16>
    %c4_496 = arith.constant 4 : index
    %c0_497 = arith.constant 0 : index
    %c0_498 = arith.constant 0 : index
    %686 = vector.load %arg6[%c4_496, %c0_497, %c0_498] : memref<5x84x160xbf16, #tpu.memory_space<vmem>>, vector<1x84x160xbf16>
    %687 = vector.shape_cast %686 : vector<1x84x160xbf16> to vector<84x160xbf16>
    %cst_499 = arith.constant dense<0.000000e+00> : vector<10x160xf32>
    %688 = tpu.matmul %685, %687, %cst_499 {dimension_numbers = #tpu.dot_dimension_numbers<[1], [0], [0], [1], [0, 0, 1, 1], [], []>} : vector<10x84xbf16>, vector<84x160xbf16>, vector<10x160xf32> -> vector<10x160xf32>
    %689 = arith.addf %683, %688 : vector<10x160xf32>
    %c0_500 = arith.constant 0 : index
    %c0_501 = arith.constant 0 : index
    %690 = vector.load %arg7[%c0_500, %c0_501] : memref<1x160xf32, #tpu.memory_space<vmem>>, vector<1x160xf32>
    %691 = vector.broadcast %690 : vector<1x160xf32> to vector<10x160xf32>
    %692 = arith.addf %689, %691 : vector<10x160xf32>
    %cst_502 = arith.constant 0.000000e+00 : f32
    %693 = vector.broadcast %cst_502 : f32 to vector<10x160xf32>
    %694 = arith.maximumf %692, %693 : vector<10x160xf32>
    %695 = arith.truncf %694 : vector<10x160xf32> to vector<10x160xbf16>
    %c0_503 = arith.constant 0 : index
    %c0_504 = arith.constant 0 : index
    %696 = vector.load %arg9[%c0_503, %c0_504] : memref<160x80xbf16, #tpu.memory_space<vmem>>, vector<160x80xbf16>
    %cst_505 = arith.constant dense<0.000000e+00> : vector<10x80xf32>
    %697 = tpu.matmul %695, %696, %cst_505 {dimension_numbers = #tpu.dot_dimension_numbers<[1], [0], [0], [1], [0, 0, 1, 1], [], []>} : vector<10x160xbf16>, vector<160x80xbf16>, vector<10x80xf32> -> vector<10x80xf32>
    %c0_506 = arith.constant 0 : index
    %c0_507 = arith.constant 0 : index
    %698 = vector.load %arg8[%c0_506, %c0_507] : memref<5x10xbf16, #tpu.memory_space<vmem>>, vector<5x10xbf16>
    %699 = arith.truncf %697 : vector<10x80xf32> to vector<10x80xbf16>
    %cst_508 = arith.constant dense<0.000000e+00> : vector<5x80xf32>
    %700 = tpu.matmul %698, %699, %cst_508 {dimension_numbers = #tpu.dot_dimension_numbers<[1], [0], [0], [1], [0, 0, 1, 1], [], []>} : vector<5x10xbf16>, vector<10x80xbf16>, vector<5x80xf32> -> vector<5x80xf32>
    %701 = vector.extract_strided_slice %700 {offsets = [0, 0], sizes = [1, 80], strides = [1, 1]} : vector<5x80xf32> to vector<1x80xf32>
    %c0_509 = arith.constant 0 : index
    %c6_510 = arith.constant 6 : index
    %c0_511 = arith.constant 0 : index
    %702 = vector.load %arg17[%c0_509, %c6_510, %c0_511] : memref<5x8x80xf32, #tpu.memory_space<vmem>>, vector<1x1x80xf32>
    %703 = vector.shape_cast %702 : vector<1x1x80xf32> to vector<1x80xf32>
    %704 = vector.shape_cast %701 : vector<1x80xf32> to vector<1x1x80xf32>
    tpu.vector_store %arg17[%c0_509, %c6_510, %c0_511], %704 {strides = array<i32>} : memref<5x8x80xf32, #tpu.memory_space<vmem>>, vector<1x1x80xf32>,
    %705 = vector.extract_strided_slice %700 {offsets = [1, 0], sizes = [1, 80], strides = [1, 1]} : vector<5x80xf32> to vector<1x80xf32>
    %c1_512 = arith.constant 1 : index
    %c6_513 = arith.constant 6 : index
    %c0_514 = arith.constant 0 : index
    %706 = vector.load %arg17[%c1_512, %c6_513, %c0_514] : memref<5x8x80xf32, #tpu.memory_space<vmem>>, vector<1x1x80xf32>
    %707 = vector.shape_cast %706 : vector<1x1x80xf32> to vector<1x80xf32>
    %708 = vector.shape_cast %705 : vector<1x80xf32> to vector<1x1x80xf32>
    tpu.vector_store %arg17[%c1_512, %c6_513, %c0_514], %708 {strides = array<i32>} : memref<5x8x80xf32, #tpu.memory_space<vmem>>, vector<1x1x80xf32>,
    %709 = vector.extract_strided_slice %700 {offsets = [2, 0], sizes = [1, 80], strides = [1, 1]} : vector<5x80xf32> to vector<1x80xf32>
    %c2_515 = arith.constant 2 : index
    %c6_516 = arith.constant 6 : index
    %c0_517 = arith.constant 0 : index
    %710 = vector.load %arg17[%c2_515, %c6_516, %c0_517] : memref<5x8x80xf32, #tpu.memory_space<vmem>>, vector<1x1x80xf32>
    %711 = vector.shape_cast %710 : vector<1x1x80xf32> to vector<1x80xf32>
    %712 = vector.shape_cast %709 : vector<1x80xf32> to vector<1x1x80xf32>
    tpu.vector_store %arg17[%c2_515, %c6_516, %c0_517], %712 {strides = array<i32>} : memref<5x8x80xf32, #tpu.memory_space<vmem>>, vector<1x1x80xf32>,
    %713 = vector.extract_strided_slice %700 {offsets = [3, 0], sizes = [1, 80], strides = [1, 1]} : vector<5x80xf32> to vector<1x80xf32>
    %c3_518 = arith.constant 3 : index
    %c6_519 = arith.constant 6 : index
    %c0_520 = arith.constant 0 : index
    %714 = vector.load %arg17[%c3_518, %c6_519, %c0_520] : memref<5x8x80xf32, #tpu.memory_space<vmem>>, vector<1x1x80xf32>
    %715 = vector.shape_cast %714 : vector<1x1x80xf32> to vector<1x80xf32>
    %716 = vector.shape_cast %713 : vector<1x80xf32> to vector<1x1x80xf32>
    tpu.vector_store %arg17[%c3_518, %c6_519, %c0_520], %716 {strides = array<i32>} : memref<5x8x80xf32, #tpu.memory_space<vmem>>, vector<1x1x80xf32>,
    %717 = vector.extract_strided_slice %700 {offsets = [4, 0], sizes = [1, 80], strides = [1, 1]} : vector<5x80xf32> to vector<1x80xf32>
    %c4_521 = arith.constant 4 : index
    %c6_522 = arith.constant 6 : index
    %c0_523 = arith.constant 0 : index
    %718 = vector.load %arg17[%c4_521, %c6_522, %c0_523] : memref<5x8x80xf32, #tpu.memory_space<vmem>>, vector<1x1x80xf32>
    %719 = vector.shape_cast %718 : vector<1x1x80xf32> to vector<1x80xf32>
    %720 = vector.shape_cast %717 : vector<1x80xf32> to vector<1x1x80xf32>
    tpu.vector_store %arg17[%c4_521, %c6_522, %c0_523], %720 {strides = array<i32>} : memref<5x8x80xf32, #tpu.memory_space<vmem>>, vector<1x1x80xf32>,
    %c7 = arith.constant 7 : index
    %c0_524 = arith.constant 0 : index
    %c0_525 = arith.constant 0 : index
    %721 = vector.load %arg1[%c7, %c0_524, %c0_525] : memref<8x32x96xbf16, #tpu.memory_space<vmem>>, vector<1x32x96xbf16>
    %722 = vector.shape_cast %721 : vector<1x32x96xbf16> to vector<32x96xbf16>
    %723 = arith.extf %722 : vector<32x96xbf16> to vector<32x96xf32>
    %724 = vector.extract_strided_slice %723 {offsets = [0, 0], sizes = [28, 96], strides = [1, 1]} : vector<32x96xf32> to vector<28x96xf32>
    %725 = arith.truncf %724 : vector<28x96xf32> to vector<28x96xbf16>
    %c0_526 = arith.constant 0 : index
    %c0_527 = arith.constant 0 : index
    %c0_528 = arith.constant 0 : index
    %726 = vector.load %arg2[%c0_526, %c0_527, %c0_528] : memref<5x96x168xbf16, #tpu.memory_space<vmem>>, vector<1x96x168xbf16>
    %727 = vector.shape_cast %726 : vector<1x96x168xbf16> to vector<96x168xbf16>
    %cst_529 = arith.constant dense<0.000000e+00> : vector<28x168xf32>
    %728 = tpu.matmul %725, %727, %cst_529 {dimension_numbers = #tpu.dot_dimension_numbers<[1], [0], [0], [1], [0, 0, 1, 1], [], []>} : vector<28x96xbf16>, vector<96x168xbf16>, vector<28x168xf32> -> vector<28x168xf32>
    %729 = vector.extract_strided_slice %723 {offsets = [1, 0], sizes = [28, 96], strides = [1, 1]} : vector<32x96xf32> to vector<28x96xf32>
    %730 = arith.truncf %729 : vector<28x96xf32> to vector<28x96xbf16>
    %c1_530 = arith.constant 1 : index
    %c0_531 = arith.constant 0 : index
    %c0_532 = arith.constant 0 : index
    %731 = vector.load %arg2[%c1_530, %c0_531, %c0_532] : memref<5x96x168xbf16, #tpu.memory_space<vmem>>, vector<1x96x168xbf16>
    %732 = vector.shape_cast %731 : vector<1x96x168xbf16> to vector<96x168xbf16>
    %cst_533 = arith.constant dense<0.000000e+00> : vector<28x168xf32>
    %733 = tpu.matmul %730, %732, %cst_533 {dimension_numbers = #tpu.dot_dimension_numbers<[1], [0], [0], [1], [0, 0, 1, 1], [], []>} : vector<28x96xbf16>, vector<96x168xbf16>, vector<28x168xf32> -> vector<28x168xf32>
    %734 = arith.addf %728, %733 : vector<28x168xf32>
    %735 = vector.extract_strided_slice %723 {offsets = [2, 0], sizes = [28, 96], strides = [1, 1]} : vector<32x96xf32> to vector<28x96xf32>
    %736 = arith.truncf %735 : vector<28x96xf32> to vector<28x96xbf16>
    %c2_534 = arith.constant 2 : index
    %c0_535 = arith.constant 0 : index
    %c0_536 = arith.constant 0 : index
    %737 = vector.load %arg2[%c2_534, %c0_535, %c0_536] : memref<5x96x168xbf16, #tpu.memory_space<vmem>>, vector<1x96x168xbf16>
    %738 = vector.shape_cast %737 : vector<1x96x168xbf16> to vector<96x168xbf16>
    %cst_537 = arith.constant dense<0.000000e+00> : vector<28x168xf32>
    %739 = tpu.matmul %736, %738, %cst_537 {dimension_numbers = #tpu.dot_dimension_numbers<[1], [0], [0], [1], [0, 0, 1, 1], [], []>} : vector<28x96xbf16>, vector<96x168xbf16>, vector<28x168xf32> -> vector<28x168xf32>
    %740 = arith.addf %734, %739 : vector<28x168xf32>
    %741 = vector.extract_strided_slice %723 {offsets = [3, 0], sizes = [28, 96], strides = [1, 1]} : vector<32x96xf32> to vector<28x96xf32>
    %742 = arith.truncf %741 : vector<28x96xf32> to vector<28x96xbf16>
    %c3_538 = arith.constant 3 : index
    %c0_539 = arith.constant 0 : index
    %c0_540 = arith.constant 0 : index
    %743 = vector.load %arg2[%c3_538, %c0_539, %c0_540] : memref<5x96x168xbf16, #tpu.memory_space<vmem>>, vector<1x96x168xbf16>
    %744 = vector.shape_cast %743 : vector<1x96x168xbf16> to vector<96x168xbf16>
    %cst_541 = arith.constant dense<0.000000e+00> : vector<28x168xf32>
    %745 = tpu.matmul %742, %744, %cst_541 {dimension_numbers = #tpu.dot_dimension_numbers<[1], [0], [0], [1], [0, 0, 1, 1], [], []>} : vector<28x96xbf16>, vector<96x168xbf16>, vector<28x168xf32> -> vector<28x168xf32>
    %746 = arith.addf %740, %745 : vector<28x168xf32>
    %747 = vector.extract_strided_slice %723 {offsets = [4, 0], sizes = [28, 96], strides = [1, 1]} : vector<32x96xf32> to vector<28x96xf32>
    %748 = arith.truncf %747 : vector<28x96xf32> to vector<28x96xbf16>
    %c4_542 = arith.constant 4 : index
    %c0_543 = arith.constant 0 : index
    %c0_544 = arith.constant 0 : index
    %749 = vector.load %arg2[%c4_542, %c0_543, %c0_544] : memref<5x96x168xbf16, #tpu.memory_space<vmem>>, vector<1x96x168xbf16>
    %750 = vector.shape_cast %749 : vector<1x96x168xbf16> to vector<96x168xbf16>
    %cst_545 = arith.constant dense<0.000000e+00> : vector<28x168xf32>
    %751 = tpu.matmul %748, %750, %cst_545 {dimension_numbers = #tpu.dot_dimension_numbers<[1], [0], [0], [1], [0, 0, 1, 1], [], []>} : vector<28x96xbf16>, vector<96x168xbf16>, vector<28x168xf32> -> vector<28x168xf32>
    %752 = arith.addf %746, %751 : vector<28x168xf32>
    %c0_546 = arith.constant 0 : index
    %c0_547 = arith.constant 0 : index
    %753 = vector.load %arg3[%c0_546, %c0_547] : memref<1x168xf32, #tpu.memory_space<vmem>>, vector<1x168xf32>
    %754 = vector.broadcast %753 : vector<1x168xf32> to vector<28x168xf32>
    %755 = arith.addf %752, %754 : vector<28x168xf32>
    %cst_548 = arith.constant 0.000000e+00 : f32
    %756 = vector.broadcast %cst_548 : f32 to vector<28x168xf32>
    %757 = arith.maximumf %755, %756 : vector<28x168xf32>
    %758 = arith.truncf %757 : vector<28x168xf32> to vector<28x168xbf16>
    %c0_549 = arith.constant 0 : index
    %c0_550 = arith.constant 0 : index
    %759 = vector.load %arg5[%c0_549, %c0_550] : memref<168x84xbf16, #tpu.memory_space<vmem>>, vector<168x84xbf16>
    %cst_551 = arith.constant dense<0.000000e+00> : vector<28x84xf32>
    %760 = tpu.matmul %758, %759, %cst_551 {dimension_numbers = #tpu.dot_dimension_numbers<[1], [0], [0], [1], [0, 0, 1, 1], [], []>} : vector<28x168xbf16>, vector<168x84xbf16>, vector<28x84xf32> -> vector<28x84xf32>
    %c0_552 = arith.constant 0 : index
    %c0_553 = arith.constant 0 : index
    %761 = vector.load %arg4[%c0_552, %c0_553] : memref<14x28xbf16, #tpu.memory_space<vmem>>, vector<14x28xbf16>
    %762 = arith.truncf %760 : vector<28x84xf32> to vector<28x84xbf16>
    %cst_554 = arith.constant dense<0.000000e+00> : vector<14x84xf32>
    %763 = tpu.matmul %761, %762, %cst_554 {dimension_numbers = #tpu.dot_dimension_numbers<[1], [0], [0], [1], [0, 0, 1, 1], [], []>} : vector<14x28xbf16>, vector<28x84xbf16>, vector<14x84xf32> -> vector<14x84xf32>
    %764 = vector.extract_strided_slice %763 {offsets = [0, 0], sizes = [10, 84], strides = [1, 1]} : vector<14x84xf32> to vector<10x84xf32>
    %765 = arith.truncf %764 : vector<10x84xf32> to vector<10x84xbf16>
    %c0_555 = arith.constant 0 : index
    %c0_556 = arith.constant 0 : index
    %c0_557 = arith.constant 0 : index
    %766 = vector.load %arg6[%c0_555, %c0_556, %c0_557] : memref<5x84x160xbf16, #tpu.memory_space<vmem>>, vector<1x84x160xbf16>
    %767 = vector.shape_cast %766 : vector<1x84x160xbf16> to vector<84x160xbf16>
    %cst_558 = arith.constant dense<0.000000e+00> : vector<10x160xf32>
    %768 = tpu.matmul %765, %767, %cst_558 {dimension_numbers = #tpu.dot_dimension_numbers<[1], [0], [0], [1], [0, 0, 1, 1], [], []>} : vector<10x84xbf16>, vector<84x160xbf16>, vector<10x160xf32> -> vector<10x160xf32>
    %769 = vector.extract_strided_slice %763 {offsets = [1, 0], sizes = [10, 84], strides = [1, 1]} : vector<14x84xf32> to vector<10x84xf32>
    %770 = arith.truncf %769 : vector<10x84xf32> to vector<10x84xbf16>
    %c1_559 = arith.constant 1 : index
    %c0_560 = arith.constant 0 : index
    %c0_561 = arith.constant 0 : index
    %771 = vector.load %arg6[%c1_559, %c0_560, %c0_561] : memref<5x84x160xbf16, #tpu.memory_space<vmem>>, vector<1x84x160xbf16>
    %772 = vector.shape_cast %771 : vector<1x84x160xbf16> to vector<84x160xbf16>
    %cst_562 = arith.constant dense<0.000000e+00> : vector<10x160xf32>
    %773 = tpu.matmul %770, %772, %cst_562 {dimension_numbers = #tpu.dot_dimension_numbers<[1], [0], [0], [1], [0, 0, 1, 1], [], []>} : vector<10x84xbf16>, vector<84x160xbf16>, vector<10x160xf32> -> vector<10x160xf32>
    %774 = arith.addf %768, %773 : vector<10x160xf32>
    %775 = vector.extract_strided_slice %763 {offsets = [2, 0], sizes = [10, 84], strides = [1, 1]} : vector<14x84xf32> to vector<10x84xf32>
    %776 = arith.truncf %775 : vector<10x84xf32> to vector<10x84xbf16>
    %c2_563 = arith.constant 2 : index
    %c0_564 = arith.constant 0 : index
    %c0_565 = arith.constant 0 : index
    %777 = vector.load %arg6[%c2_563, %c0_564, %c0_565] : memref<5x84x160xbf16, #tpu.memory_space<vmem>>, vector<1x84x160xbf16>
    %778 = vector.shape_cast %777 : vector<1x84x160xbf16> to vector<84x160xbf16>
    %cst_566 = arith.constant dense<0.000000e+00> : vector<10x160xf32>
    %779 = tpu.matmul %776, %778, %cst_566 {dimension_numbers = #tpu.dot_dimension_numbers<[1], [0], [0], [1], [0, 0, 1, 1], [], []>} : vector<10x84xbf16>, vector<84x160xbf16>, vector<10x160xf32> -> vector<10x160xf32>
    %780 = arith.addf %774, %779 : vector<10x160xf32>
    %781 = vector.extract_strided_slice %763 {offsets = [3, 0], sizes = [10, 84], strides = [1, 1]} : vector<14x84xf32> to vector<10x84xf32>
    %782 = arith.truncf %781 : vector<10x84xf32> to vector<10x84xbf16>
    %c3_567 = arith.constant 3 : index
    %c0_568 = arith.constant 0 : index
    %c0_569 = arith.constant 0 : index
    %783 = vector.load %arg6[%c3_567, %c0_568, %c0_569] : memref<5x84x160xbf16, #tpu.memory_space<vmem>>, vector<1x84x160xbf16>
    %784 = vector.shape_cast %783 : vector<1x84x160xbf16> to vector<84x160xbf16>
    %cst_570 = arith.constant dense<0.000000e+00> : vector<10x160xf32>
    %785 = tpu.matmul %782, %784, %cst_570 {dimension_numbers = #tpu.dot_dimension_numbers<[1], [0], [0], [1], [0, 0, 1, 1], [], []>} : vector<10x84xbf16>, vector<84x160xbf16>, vector<10x160xf32> -> vector<10x160xf32>
    %786 = arith.addf %780, %785 : vector<10x160xf32>
    %787 = vector.extract_strided_slice %763 {offsets = [4, 0], sizes = [10, 84], strides = [1, 1]} : vector<14x84xf32> to vector<10x84xf32>
    %788 = arith.truncf %787 : vector<10x84xf32> to vector<10x84xbf16>
    %c4_571 = arith.constant 4 : index
    %c0_572 = arith.constant 0 : index
    %c0_573 = arith.constant 0 : index
    %789 = vector.load %arg6[%c4_571, %c0_572, %c0_573] : memref<5x84x160xbf16, #tpu.memory_space<vmem>>, vector<1x84x160xbf16>
    %790 = vector.shape_cast %789 : vector<1x84x160xbf16> to vector<84x160xbf16>
    %cst_574 = arith.constant dense<0.000000e+00> : vector<10x160xf32>
    %791 = tpu.matmul %788, %790, %cst_574 {dimension_numbers = #tpu.dot_dimension_numbers<[1], [0], [0], [1], [0, 0, 1, 1], [], []>} : vector<10x84xbf16>, vector<84x160xbf16>, vector<10x160xf32> -> vector<10x160xf32>
    %792 = arith.addf %786, %791 : vector<10x160xf32>
    %c0_575 = arith.constant 0 : index
    %c0_576 = arith.constant 0 : index
    %793 = vector.load %arg7[%c0_575, %c0_576] : memref<1x160xf32, #tpu.memory_space<vmem>>, vector<1x160xf32>
    %794 = vector.broadcast %793 : vector<1x160xf32> to vector<10x160xf32>
    %795 = arith.addf %792, %794 : vector<10x160xf32>
    %cst_577 = arith.constant 0.000000e+00 : f32
    %796 = vector.broadcast %cst_577 : f32 to vector<10x160xf32>
    %797 = arith.maximumf %795, %796 : vector<10x160xf32>
    %798 = arith.truncf %797 : vector<10x160xf32> to vector<10x160xbf16>
    %c0_578 = arith.constant 0 : index
    %c0_579 = arith.constant 0 : index
    %799 = vector.load %arg9[%c0_578, %c0_579] : memref<160x80xbf16, #tpu.memory_space<vmem>>, vector<160x80xbf16>
    %cst_580 = arith.constant dense<0.000000e+00> : vector<10x80xf32>
    %800 = tpu.matmul %798, %799, %cst_580 {dimension_numbers = #tpu.dot_dimension_numbers<[1], [0], [0], [1], [0, 0, 1, 1], [], []>} : vector<10x160xbf16>, vector<160x80xbf16>, vector<10x80xf32> -> vector<10x80xf32>
    %c0_581 = arith.constant 0 : index
    %c0_582 = arith.constant 0 : index
    %801 = vector.load %arg8[%c0_581, %c0_582] : memref<5x10xbf16, #tpu.memory_space<vmem>>, vector<5x10xbf16>
    %802 = arith.truncf %800 : vector<10x80xf32> to vector<10x80xbf16>
    %cst_583 = arith.constant dense<0.000000e+00> : vector<5x80xf32>
    %803 = tpu.matmul %801, %802, %cst_583 {dimension_numbers = #tpu.dot_dimension_numbers<[1], [0], [0], [1], [0, 0, 1, 1], [], []>} : vector<5x10xbf16>, vector<10x80xbf16>, vector<5x80xf32> -> vector<5x80xf32>
    %804 = vector.extract_strided_slice %803 {offsets = [0, 0], sizes = [1, 80], strides = [1, 1]} : vector<5x80xf32> to vector<1x80xf32>
    %c0_584 = arith.constant 0 : index
    %c7_585 = arith.constant 7 : index
    %c0_586 = arith.constant 0 : index
    %805 = vector.load %arg17[%c0_584, %c7_585, %c0_586] : memref<5x8x80xf32, #tpu.memory_space<vmem>>, vector<1x1x80xf32>
    %806 = vector.shape_cast %805 : vector<1x1x80xf32> to vector<1x80xf32>
    %807 = vector.shape_cast %804 : vector<1x80xf32> to vector<1x1x80xf32>
    tpu.vector_store %arg17[%c0_584, %c7_585, %c0_586], %807 {strides = array<i32>} : memref<5x8x80xf32, #tpu.memory_space<vmem>>, vector<1x1x80xf32>,
    %808 = vector.extract_strided_slice %803 {offsets = [1, 0], sizes = [1, 80], strides = [1, 1]} : vector<5x80xf32> to vector<1x80xf32>
    %c1_587 = arith.constant 1 : index
    %c7_588 = arith.constant 7 : index
    %c0_589 = arith.constant 0 : index
    %809 = vector.load %arg17[%c1_587, %c7_588, %c0_589] : memref<5x8x80xf32, #tpu.memory_space<vmem>>, vector<1x1x80xf32>
    %810 = vector.shape_cast %809 : vector<1x1x80xf32> to vector<1x80xf32>
    %811 = vector.shape_cast %808 : vector<1x80xf32> to vector<1x1x80xf32>
    tpu.vector_store %arg17[%c1_587, %c7_588, %c0_589], %811 {strides = array<i32>} : memref<5x8x80xf32, #tpu.memory_space<vmem>>, vector<1x1x80xf32>,
    %812 = vector.extract_strided_slice %803 {offsets = [2, 0], sizes = [1, 80], strides = [1, 1]} : vector<5x80xf32> to vector<1x80xf32>
    %c2_590 = arith.constant 2 : index
    %c7_591 = arith.constant 7 : index
    %c0_592 = arith.constant 0 : index
    %813 = vector.load %arg17[%c2_590, %c7_591, %c0_592] : memref<5x8x80xf32, #tpu.memory_space<vmem>>, vector<1x1x80xf32>
    %814 = vector.shape_cast %813 : vector<1x1x80xf32> to vector<1x80xf32>
    %815 = vector.shape_cast %812 : vector<1x80xf32> to vector<1x1x80xf32>
    tpu.vector_store %arg17[%c2_590, %c7_591, %c0_592], %815 {strides = array<i32>} : memref<5x8x80xf32, #tpu.memory_space<vmem>>, vector<1x1x80xf32>,
    %816 = vector.extract_strided_slice %803 {offsets = [3, 0], sizes = [1, 80], strides = [1, 1]} : vector<5x80xf32> to vector<1x80xf32>
    %c3_593 = arith.constant 3 : index
    %c7_594 = arith.constant 7 : index
    %c0_595 = arith.constant 0 : index
    %817 = vector.load %arg17[%c3_593, %c7_594, %c0_595] : memref<5x8x80xf32, #tpu.memory_space<vmem>>, vector<1x1x80xf32>
    %818 = vector.shape_cast %817 : vector<1x1x80xf32> to vector<1x80xf32>
    %819 = vector.shape_cast %816 : vector<1x80xf32> to vector<1x1x80xf32>
    tpu.vector_store %arg17[%c3_593, %c7_594, %c0_595], %819 {strides = array<i32>} : memref<5x8x80xf32, #tpu.memory_space<vmem>>, vector<1x1x80xf32>,
    %820 = vector.extract_strided_slice %803 {offsets = [4, 0], sizes = [1, 80], strides = [1, 1]} : vector<5x80xf32> to vector<1x80xf32>
    %c4_596 = arith.constant 4 : index
    %c7_597 = arith.constant 7 : index
    %c0_598 = arith.constant 0 : index
    %821 = vector.load %arg17[%c4_596, %c7_597, %c0_598] : memref<5x8x80xf32, #tpu.memory_space<vmem>>, vector<1x1x80xf32>
    %822 = vector.shape_cast %821 : vector<1x1x80xf32> to vector<1x80xf32>
    %823 = vector.shape_cast %820 : vector<1x80xf32> to vector<1x1x80xf32>
    tpu.vector_store %arg17[%c4_596, %c7_597, %c0_598], %823 {strides = array<i32>} : memref<5x8x80xf32, #tpu.memory_space<vmem>>, vector<1x1x80xf32>,
    %c0_599 = arith.constant 0 : index
    %c0_600 = arith.constant 0 : index
    %c0_601 = arith.constant 0 : index
    %824 = vector.load %arg17[%c0_599, %c0_600, %c0_601] : memref<5x8x80xf32, #tpu.memory_space<vmem>>, vector<1x8x80xf32>
    %825 = vector.shape_cast %824 : vector<1x8x80xf32> to vector<8x80xf32>
    %826 = arith.truncf %825 : vector<8x80xf32> to vector<8x80xbf16>
    %c0_602 = arith.constant 0 : index
    %c0_603 = arith.constant 0 : index
    %c0_604 = arith.constant 0 : index
    %827 = vector.load %arg10[%c0_602, %c0_603, %c0_604] : memref<5x80x120xbf16, #tpu.memory_space<vmem>>, vector<1x80x120xbf16>
    %828 = vector.shape_cast %827 : vector<1x80x120xbf16> to vector<80x120xbf16>
    %cst_605 = arith.constant dense<0.000000e+00> : vector<8x120xf32>
    %829 = tpu.matmul %826, %828, %cst_605 {dimension_numbers = #tpu.dot_dimension_numbers<[1], [0], [0], [1], [0, 0, 1, 1], [], []>} : vector<8x80xbf16>, vector<80x120xbf16>, vector<8x120xf32> -> vector<8x120xf32>
    %c1_606 = arith.constant 1 : index
    %c0_607 = arith.constant 0 : index
    %c0_608 = arith.constant 0 : index
    %830 = vector.load %arg17[%c1_606, %c0_607, %c0_608] : memref<5x8x80xf32, #tpu.memory_space<vmem>>, vector<1x8x80xf32>
    %831 = vector.shape_cast %830 : vector<1x8x80xf32> to vector<8x80xf32>
    %832 = arith.truncf %831 : vector<8x80xf32> to vector<8x80xbf16>
    %c1_609 = arith.constant 1 : index
    %c0_610 = arith.constant 0 : index
    %c0_611 = arith.constant 0 : index
    %833 = vector.load %arg10[%c1_609, %c0_610, %c0_611] : memref<5x80x120xbf16, #tpu.memory_space<vmem>>, vector<1x80x120xbf16>
    %834 = vector.shape_cast %833 : vector<1x80x120xbf16> to vector<80x120xbf16>
    %cst_612 = arith.constant dense<0.000000e+00> : vector<8x120xf32>
    %835 = tpu.matmul %832, %834, %cst_612 {dimension_numbers = #tpu.dot_dimension_numbers<[1], [0], [0], [1], [0, 0, 1, 1], [], []>} : vector<8x80xbf16>, vector<80x120xbf16>, vector<8x120xf32> -> vector<8x120xf32>
    %836 = arith.addf %829, %835 : vector<8x120xf32>
    %c2_613 = arith.constant 2 : index
    %c0_614 = arith.constant 0 : index
    %c0_615 = arith.constant 0 : index
    %837 = vector.load %arg17[%c2_613, %c0_614, %c0_615] : memref<5x8x80xf32, #tpu.memory_space<vmem>>, vector<1x8x80xf32>
    %838 = vector.shape_cast %837 : vector<1x8x80xf32> to vector<8x80xf32>
    %839 = arith.truncf %838 : vector<8x80xf32> to vector<8x80xbf16>
    %c2_616 = arith.constant 2 : index
    %c0_617 = arith.constant 0 : index
    %c0_618 = arith.constant 0 : index
    %840 = vector.load %arg10[%c2_616, %c0_617, %c0_618] : memref<5x80x120xbf16, #tpu.memory_space<vmem>>, vector<1x80x120xbf16>
    %841 = vector.shape_cast %840 : vector<1x80x120xbf16> to vector<80x120xbf16>
    %cst_619 = arith.constant dense<0.000000e+00> : vector<8x120xf32>
    %842 = tpu.matmul %839, %841, %cst_619 {dimension_numbers = #tpu.dot_dimension_numbers<[1], [0], [0], [1], [0, 0, 1, 1], [], []>} : vector<8x80xbf16>, vector<80x120xbf16>, vector<8x120xf32> -> vector<8x120xf32>
    %843 = arith.addf %836, %842 : vector<8x120xf32>
    %c3_620 = arith.constant 3 : index
    %c0_621 = arith.constant 0 : index
    %c0_622 = arith.constant 0 : index
    %844 = vector.load %arg17[%c3_620, %c0_621, %c0_622] : memref<5x8x80xf32, #tpu.memory_space<vmem>>, vector<1x8x80xf32>
    %845 = vector.shape_cast %844 : vector<1x8x80xf32> to vector<8x80xf32>
    %846 = arith.truncf %845 : vector<8x80xf32> to vector<8x80xbf16>
    %c3_623 = arith.constant 3 : index
    %c0_624 = arith.constant 0 : index
    %c0_625 = arith.constant 0 : index
    %847 = vector.load %arg10[%c3_623, %c0_624, %c0_625] : memref<5x80x120xbf16, #tpu.memory_space<vmem>>, vector<1x80x120xbf16>
    %848 = vector.shape_cast %847 : vector<1x80x120xbf16> to vector<80x120xbf16>
    %cst_626 = arith.constant dense<0.000000e+00> : vector<8x120xf32>
    %849 = tpu.matmul %846, %848, %cst_626 {dimension_numbers = #tpu.dot_dimension_numbers<[1], [0], [0], [1], [0, 0, 1, 1], [], []>} : vector<8x80xbf16>, vector<80x120xbf16>, vector<8x120xf32> -> vector<8x120xf32>
    %850 = arith.addf %843, %849 : vector<8x120xf32>
    %c4_627 = arith.constant 4 : index
    %c0_628 = arith.constant 0 : index
    %c0_629 = arith.constant 0 : index
    %851 = vector.load %arg17[%c4_627, %c0_628, %c0_629] : memref<5x8x80xf32, #tpu.memory_space<vmem>>, vector<1x8x80xf32>
    %852 = vector.shape_cast %851 : vector<1x8x80xf32> to vector<8x80xf32>
    %853 = arith.truncf %852 : vector<8x80xf32> to vector<8x80xbf16>
    %c4_630 = arith.constant 4 : index
    %c0_631 = arith.constant 0 : index
    %c0_632 = arith.constant 0 : index
    %854 = vector.load %arg10[%c4_630, %c0_631, %c0_632] : memref<5x80x120xbf16, #tpu.memory_space<vmem>>, vector<1x80x120xbf16>
    %855 = vector.shape_cast %854 : vector<1x80x120xbf16> to vector<80x120xbf16>
    %cst_633 = arith.constant dense<0.000000e+00> : vector<8x120xf32>
    %856 = tpu.matmul %853, %855, %cst_633 {dimension_numbers = #tpu.dot_dimension_numbers<[1], [0], [0], [1], [0, 0, 1, 1], [], []>} : vector<8x80xbf16>, vector<80x120xbf16>, vector<8x120xf32> -> vector<8x120xf32>
    %857 = arith.addf %850, %856 : vector<8x120xf32>
    %c0_634 = arith.constant 0 : index
    %c0_635 = arith.constant 0 : index
    %858 = vector.load %arg11[%c0_634, %c0_635] : memref<1x120xf32, #tpu.memory_space<vmem>>, vector<1x120xf32>
    %859 = vector.broadcast %858 : vector<1x120xf32> to vector<8x120xf32>
    %860 = arith.addf %857, %859 : vector<8x120xf32>
    %cst_636 = arith.constant 0.000000e+00 : f32
    %861 = vector.broadcast %cst_636 : f32 to vector<8x120xf32>
    %862 = arith.maximumf %860, %861 : vector<8x120xf32>
    %863 = arith.truncf %862 : vector<8x120xf32> to vector<8x120xbf16>
    %c0_637 = arith.constant 0 : index
    %c0_638 = arith.constant 0 : index
    %864 = vector.load %arg12[%c0_637, %c0_638] : memref<120x84xbf16, #tpu.memory_space<vmem>>, vector<120x84xbf16>
    %cst_639 = arith.constant dense<0.000000e+00> : vector<8x84xf32>
    %865 = tpu.matmul %863, %864, %cst_639 {dimension_numbers = #tpu.dot_dimension_numbers<[1], [0], [0], [1], [0, 0, 1, 1], [], []>} : vector<8x120xbf16>, vector<120x84xbf16>, vector<8x84xf32> -> vector<8x84xf32>
    %c0_640 = arith.constant 0 : index
    %c0_641 = arith.constant 0 : index
    %866 = vector.load %arg13[%c0_640, %c0_641] : memref<1x84xf32, #tpu.memory_space<vmem>>, vector<1x84xf32>
    %867 = vector.broadcast %866 : vector<1x84xf32> to vector<8x84xf32>
    %868 = arith.addf %865, %867 : vector<8x84xf32>
    %cst_642 = arith.constant 0.000000e+00 : f32
    %869 = vector.broadcast %cst_642 : f32 to vector<8x84xf32>
    %870 = arith.maximumf %868, %869 : vector<8x84xf32>
    %871 = arith.truncf %870 : vector<8x84xf32> to vector<8x84xbf16>
    %c0_643 = arith.constant 0 : index
    %c0_644 = arith.constant 0 : index
    %872 = vector.load %arg14[%c0_643, %c0_644] : memref<84x128xbf16, #tpu.memory_space<vmem>>, vector<84x128xbf16>
    %cst_645 = arith.constant dense<0.000000e+00> : vector<8x128xf32>
    %873 = tpu.matmul %871, %872, %cst_645 {dimension_numbers = #tpu.dot_dimension_numbers<[1], [0], [0], [1], [0, 0, 1, 1], [], []>} : vector<8x84xbf16>, vector<84x128xbf16>, vector<8x128xf32> -> vector<8x128xf32>
    %c0_646 = arith.constant 0 : index
    %c0_647 = arith.constant 0 : index
    %874 = vector.load %arg15[%c0_646, %c0_647] : memref<1x128xf32, #tpu.memory_space<vmem>>, vector<1x128xf32>
    %875 = vector.broadcast %874 : vector<1x128xf32> to vector<8x128xf32>
    %876 = arith.addf %873, %875 : vector<8x128xf32>
    %c0_648 = arith.constant 0 : index
    %c0_649 = arith.constant 0 : index
    %877 = vector.load %arg16[%c0_648, %c0_649] : memref<8x128xf32, #tpu.memory_space<vmem>>, vector<8x128xf32>
    tpu.vector_store %arg16[%c0_648, %c0_649], %876 {strides = array<i32>} : memref<8x128xf32, #tpu.memory_space<vmem>>, vector<8x128xf32>,
    return
  }
  func.func @transform_0(%arg0: i32) -> (i32, i32, i32) {
    %c0_i32 = arith.constant 0 : i32
    %c0_i32_0 = arith.constant 0 : i32
    %c0_i32_1 = arith.constant 0 : i32
    return %arg0, %c0_i32, %c0_i32_0 : i32, i32, i32
  }
  func.func @transform_1(%arg0: i32) -> (i32, i32, i32) {
    %c0_i32 = arith.constant 0 : i32
    %c0_i32_0 = arith.constant 0 : i32
    %c0_i32_1 = arith.constant 0 : i32
    %c0_i32_2 = arith.constant 0 : i32
    return %c0_i32, %c0_i32_0, %c0_i32_1 : i32, i32, i32
  }
  func.func @transform_2(%arg0: i32) -> (i32, i32) {
    %c0_i32 = arith.constant 0 : i32
    %c0_i32_0 = arith.constant 0 : i32
    %c0_i32_1 = arith.constant 0 : i32
    return %c0_i32, %c0_i32_0 : i32, i32
  }
  func.func @transform_3(%arg0: i32) -> (i32, i32) {
    %c0_i32 = arith.constant 0 : i32
    %c0_i32_0 = arith.constant 0 : i32
    %c0_i32_1 = arith.constant 0 : i32
    return %c0_i32, %c0_i32_0 : i32, i32
  }
  func.func @transform_4(%arg0: i32) -> (i32, i32) {
    %c0_i32 = arith.constant 0 : i32
    %c0_i32_0 = arith.constant 0 : i32
    %c0_i32_1 = arith.constant 0 : i32
    return %c0_i32, %c0_i32_0 : i32, i32
  }
  func.func @transform_5(%arg0: i32) -> (i32, i32, i32) {
    %c0_i32 = arith.constant 0 : i32
    %c0_i32_0 = arith.constant 0 : i32
    %c0_i32_1 = arith.constant 0 : i32
    %c0_i32_2 = arith.constant 0 : i32
    return %c0_i32, %c0_i32_0, %c0_i32_1 : i32, i32, i32
  }
  func.func @transform_6(%arg0: i32) -> (i32, i32) {
    %c0_i32 = arith.constant 0 : i32
    %c0_i32_0 = arith.constant 0 : i32
    %c0_i32_1 = arith.constant 0 : i32
    return %c0_i32, %c0_i32_0 : i32, i32
  }
  func.func @transform_7(%arg0: i32) -> (i32, i32) {
    %c0_i32 = arith.constant 0 : i32
    %c0_i32_0 = arith.constant 0 : i32
    %c0_i32_1 = arith.constant 0 : i32
    return %c0_i32, %c0_i32_0 : i32, i32
  }
  func.func @transform_8(%arg0: i32) -> (i32, i32) {
    %c0_i32 = arith.constant 0 : i32
    %c0_i32_0 = arith.constant 0 : i32
    %c0_i32_1 = arith.constant 0 : i32
    return %c0_i32, %c0_i32_0 : i32, i32
  }
  func.func @transform_9(%arg0: i32) -> (i32, i32, i32) {
    %c0_i32 = arith.constant 0 : i32
    %c0_i32_0 = arith.constant 0 : i32
    %c0_i32_1 = arith.constant 0 : i32
    %c0_i32_2 = arith.constant 0 : i32
    return %c0_i32, %c0_i32_0, %c0_i32_1 : i32, i32, i32
  }
  func.func @transform_10(%arg0: i32) -> (i32, i32) {
    %c0_i32 = arith.constant 0 : i32
    %c0_i32_0 = arith.constant 0 : i32
    %c0_i32_1 = arith.constant 0 : i32
    return %c0_i32, %c0_i32_0 : i32, i32
  }
  func.func @transform_11(%arg0: i32) -> (i32, i32) {
    %c0_i32 = arith.constant 0 : i32
    %c0_i32_0 = arith.constant 0 : i32
    %c0_i32_1 = arith.constant 0 : i32
    return %c0_i32, %c0_i32_0 : i32, i32
  }
  func.func @transform_12(%arg0: i32) -> (i32, i32) {
    %c0_i32 = arith.constant 0 : i32
    %c0_i32_0 = arith.constant 0 : i32
    %c0_i32_1 = arith.constant 0 : i32
    return %c0_i32, %c0_i32_0 : i32, i32
  }
  func.func @transform_13(%arg0: i32) -> (i32, i32) {
    %c0_i32 = arith.constant 0 : i32
    %c0_i32_0 = arith.constant 0 : i32
    %c0_i32_1 = arith.constant 0 : i32
    return %c0_i32, %c0_i32_0 : i32, i32
  }
  func.func @transform_14(%arg0: i32) -> (i32, i32) {
    %c0_i32 = arith.constant 0 : i32
    %c0_i32_0 = arith.constant 0 : i32
    %c0_i32_1 = arith.constant 0 : i32
    return %c0_i32, %c0_i32_0 : i32, i32
  }
  func.func @transform_15(%arg0: i32) -> (i32, i32) {
    %c0_i32 = arith.constant 0 : i32
    %c0_i32_0 = arith.constant 0 : i32
    return %arg0, %c0_i32 : i32, i32
  }
}

</mosaic_0001>

<bundles_post_ra>
// kernel: lenet_forward.1
= control target key start
LH: loop header
LB: loop body
LE: loop exit
PB: predicated region body
PF: predicated region fallthrough
CT: control target
= control target key end

     0   :  { %s19589_s18 = smov 0   ;;  %s24112_s0 = inlined_call_operand.vmem [shape: bf16[24,32,96], index: 0, kind: input, shape index: {}]   ;;  %s24113_s1 = inlined_call_operand.vmem [shape: bf16[5,96,168], index: 1, kind: input, shape index: {}]   ;;  %s24114_s2 = inlined_call_operand.vmem [shape: f32[1,168], index: 2, kind: input, shape index: {}]   ;;  %s24115_s3 = inlined_call_operand.vmem [shape: bf16[14,28], index: 3, kind: input, shape index: {}]   ;;  %s24116_s4 = inlined_call_operand.vmem [shape: bf16[168,84], index: 4, kind: input, shape index: {}]   ;;  %s24117_s5 = inlined_call_operand.vmem [shape: bf16[5,84,160], index: 5, kind: input, shape index: {}]   ;;  %s24118_s6 = inlined_call_operand.vmem [shape: f32[1,160], index: 6, kind: input, shape index: {}]   ;;  %s24119_s7 = inlined_call_operand.vmem [shape: bf16[5,10], index: 7, kind: input, shape index: {}]   ;;  %s24120_s8 = inlined_call_operand.vmem [shape: bf16[160,80], index: 8, kind: input, shape index: {}]   ;;  %s24121_s9 = inlined_call_operand.vmem [shape: bf16[5,80,120], index: 9, kind: input, shape index: {}]   ;;  %s24122_s10 = inlined_call_operand.vmem [shape: f32[1,120], index: 10, kind: input, shape index: {}]   ;;  %s24123_s11 = inlined_call_operand.vmem [shape: bf16[120,84], index: 11, kind: input, shape index: {}]   ;;  %s24124_s12 = inlined_call_operand.vmem [shape: f32[1,84], index: 12, kind: input, shape index: {}]   ;;  %s24125_s13 = inlined_call_operand.vmem [shape: bf16[84,128], index: 13, kind: input, shape index: {}]   ;;  %s24126_s14 = inlined_call_operand.vmem [shape: f32[1,128], index: 14, kind: input, shape index: {}]   ;;  %s24127_s15 = inlined_call_operand.vmem [shape: f32[24,128], index: 15, kind: output, shape index: {}]  }
   0x1 LB: > { %s19595_s19 = sadd.s32 4294967295, %s19504_s18   ;;  %p15339_p0 = scmp.ge.s32.totalorder %s19504_s18, 1  ;;  %s19504_s18 = sphi %s19589_s18, %s25_s18  }
   0x2   : > { %p439_p1 = scmp.lt.s32.totalorder %s19504_s18, 4 }
   0x4   : > { %p440_p2 = pnand %p15339_p0, %p439_p1 }
   0x5   : > { %s15340_s22 = sshll.u32 (!%p440_p2), %s19595_s19, 3  ;;  %p494_p4 = scmp.lt.s32.totalorder (!%p440_p2), %s19595_s19, 2 }
   0x6   : > { %443 = sbr.rel (%p440_p2) target bundleno = 10144 (0x27a0), region = 80  ;;  %p488_p3 = scmp.lt.s32.totalorder (!%p440_p2), %s15340_s22, 23 }
   0xb   : > { %v17867_v0 = vld [vmem:[%s24113_s1 + $0xb4] ss:$8 sps:$4 sm:$0xff]   ;;  %v19506_v2 = vmov 0   ;;  %v17871_v3 = vld [vmem:[%s24113_s1 + $0xb0] ss:$8 sps:$4 sm:$0xff]   ;;  %s24158_s22 = smov (!%p488_p3, %s15340_s22), 23 }
   0xc   : > { %v17869_v1 = vld [vmem:[%s24113_s1 + $0x54] ss:$8 sps:$4 sm:$0xff]   ;;  %649 = vmatprep.mubr.bf16.mxu0 %v19506_v2  ;;  %766 = vmatprep.mubr.bf16.mxu1 %v19506_v2  ;;  %v17872_v4 = vld [vmem:[%s24113_s1 + $0x50] ss:$8 sps:$4 sm:$0xff]   ;;  %v17873_v5 = vld [vmem:[%s24113_s1 + $0xa4] ss:$8 sps:$4 sm:$0xff]  }
   0xd   : > { %621 = vmatprep.subr.bf16.mxu0 %v17867_v0  ;;  %738 = vmatprep.subr.bf16.mxu1 %v17869_v1  ;;  %v17875_v6 = vld [vmem:[%s24113_s1 + $0x44] ss:$8 sps:$4 sm:$0xff]   ;;  %v17877_v7 = vld [vmem:[%s24113_s1 + $0xa0] ss:$8 sps:$4 sm:$0xff]   ;;  %v17879_v9 = vld [vmem:[%s24113_s1 + $0x94] ss:$8 sps:$4 sm:$0xff]  }
   0xe   : > { %622 = vmatpush1.bf16.msra.mxu0 %v17871_v3  ;;  %739 = vmatpush1.bf16.msra.mxu1 %v17872_v4  ;;  %v17878_v8 = vld [vmem:[%s24113_s1 + $0x40] ss:$8 sps:$4 sm:$0xff]   ;;  %v17881_v10 = vld [vmem:[%s24113_s1 + $0x34] ss:$8 sps:$4 sm:$0xff]   ;;  %v17883_v11 = vld [vmem:[%s24113_s1 + $0x90] ss:$8 sps:$4 sm:$0xff]  }
   0xf   : > { %623 = vmatprep.subr.bf16.mxu0 %v17873_v5  ;;  %740 = vmatprep.subr.bf16.mxu1 %v17875_v6  ;;  %v17884_v12 = vld [vmem:[%s24113_s1 + $0x30] ss:$8 sps:$4 sm:$0xff]   ;;  %v17885_v13 = vld [vmem:[%s24113_s1 + $0x84] ss:$8 sps:$4 sm:$0xff]   ;;  %v17889_v15 = vld [vmem:[%s24113_s1 + $0x80] ss:$8 sps:$4 sm:$0xff]  }
  0x10   : > { %v17887_v14 = vld [vmem:[%s24113_s1 + $0x24] ss:$8 sps:$4 sm:$0xff]   ;;  %s17551_s27 = sshll.u32 %s24158_s22, 4  ;;  %v17890_v16 = vld [vmem:[%s24113_s1 + $0x20] ss:$8 sps:$4 sm:$0xff]   ;;  %vm610_vm1 = vcmask 785408  }
  0x11   : > { %v17891_v17 = vld [vmem:[%s24113_s1 + $0x74] ss:$8 sps:$4 sm:$0xff]   ;;  %v17895_v19 = vld [vmem:[%s24113_s1 + $0x70] ss:$8 sps:$4 sm:$0xff]   ;;  %s19662_s25 = scalar_lea.vmem %s24112_s0, %s17551_s27  ;;  %v17897_v21 = vld [vmem:[%s24113_s1 + $0x64] ss:$8 sps:$4 sm:$0xff]  }
  0x12   : > { %624 = vmatpush1.bf16.msra.mxu0 %v17877_v7  ;;  %741 = vmatpush1.bf16.msra.mxu1 %v17878_v8  ;;  %v17893_v18 = vld [vmem:[%s24113_s1 + $0x14] ss:$8 sps:$4 sm:$0xff]   ;;  %v17896_v20 = vld [vmem:[%s24113_s1 + $0x10] ss:$8 sps:$4 sm:$0xff]   ;;  %v17899_v22 = vld [vmem:[%s24113_s1 + $0x4] ss:$8 sps:$4 sm:$0xff]  }
  0x13   : > { %625 = vmatprep.subr.bf16.mxu0 %v17879_v9  ;;  %742 = vmatprep.subr.bf16.mxu1 %v17881_v10  ;;  %v19674_v23 = vld [vmem:[%s19662_s25] sm:$0xff]   ;;  %v19677_v24 = vld [vmem:[%s19662_s25 + $0x8] sm:$0xff]   ;;  %v17907_v30 = vld [vmem:[%s24113_s1 + $0x114] ss:$8 sps:$4 sm:$0xff]   ;;  %vm24129_vm0 = vsmask.f32 7424 }
  0x14   : > { %v17901_v25 = vld [vmem:[%s24113_s1 + $0x60] ss:$8 sps:$4 sm:$0xff]   ;;  %v536_v26 = vshrl.u32 %v19674_v23, 16  ;;  %v538_v27 = vshll.u32 %v19674_v23, 16  ;;  %v543_v28 = vshll.u32 %v19677_v24, 16  ;;  %v547_v42 = vshrl.u32 %v19677_v24, 16 }
  0x15   : > { %v17902_v29 = vld [vmem:[%s24113_s1] ss:$8 sps:$4 sm:$0xff]   ;;  %v17910_v33 = vld [vmem:[%s24113_s1 + $0x174] ss:$8 sps:$4 sm:$0xff]   ;;  %v17905_v35 = vld [vmem:[%s24113_s1 + $0x110] ss:$8 sps:$4 sm:$0xff]  }
  0x16   : > { %626 = vmatpush1.bf16.msra.mxu0 %v17883_v11  ;;  %743 = vmatpush1.bf16.msra.mxu1 %v17884_v12  ;;  %v540_v31 = vrot.slane %v538_v27, 1  ;;  %v545_v32 = vrot.slane %v543_v28, 1  ;;  %v17908_v36 = vld [vmem:[%s24113_s1 + $0x170] ss:$8 sps:$4 sm:$0xff]   ;;  %v17913_v37 = vld [vmem:[%s24113_s1 + $0x104] ss:$8 sps:$4 sm:$0xff]  }
  0x17   : > { %627 = vmatprep.subr.bf16.mxu0 %v17885_v13  ;;  %744 = vmatprep.subr.bf16.mxu1 %v17887_v14  ;;  %v17916_v39 = vld [vmem:[%s24113_s1 + $0x164] ss:$8 sps:$4 sm:$0xff]   ;;  %v17911_v40 = vld [vmem:[%s24113_s1 + $0x100] ss:$8 sps:$4 sm:$0xff]   ;;  %v17919_v43 = vld [vmem:[%s24113_s1 + $0xf4] ss:$8 sps:$4 sm:$0xff]  }
  0x18   : > { %v541_v34 = vor.u32 %v540_v31, %v536_v26  ;;  %v17914_v41 = vld [vmem:[%s24113_s1 + $0x160] ss:$8 sps:$4 sm:$0xff]   ;;  %v17922_v44 = vld [vmem:[%s24113_s1 + $0x154] ss:$8 sps:$4 sm:$0xff]   ;;  %v17917_v45 = vld [vmem:[%s24113_s1 + $0xf0] ss:$8 sps:$4 sm:$0xff]   ;;  %v549_v47 = vor.u32 %v547_v42, %v545_v32 }
  0x19   : > { %v17920_v46 = vld [vmem:[%s24113_s1 + $0x150] ss:$8 sps:$4 sm:$0xff]   ;;  %v17925_v48 = vld [vmem:[%s24113_s1 + $0xe4] ss:$8 sps:$4 sm:$0xff]   ;;  %v17923_v50 = vld [vmem:[%s24113_s1 + $0xe0] ss:$8 sps:$4 sm:$0xff]  }
  0x1a   : > { %628 = vmatpush1.bf16.msra.mxu0 %v17889_v15  ;;  %745 = vmatpush1.bf16.msra.mxu1 %v17890_v16  ;;  %v546_v38 = vsel %vm24129_vm0, %v541_v34, %v545_v32  ;;  %v17928_v49 = vld [vmem:[%s24113_s1 + $0x144] ss:$8 sps:$4 sm:$0xff]   ;;  %v17926_v51 = vld [vmem:[%s24113_s1 + $0x140] ss:$8 sps:$4 sm:$0xff]   ;;  %v17931_v52 = vld [vmem:[%s24113_s1 + $0xd4] ss:$8 sps:$4 sm:$0xff]  }
  0x1b   : > { %629 = vmatprep.subr.bf16.mxu0 %v17891_v17  ;;  %746 = vmatprep.subr.bf16.mxu1 %v17893_v18  ;;  %v17934_v53 = vld [vmem:[%s24113_s1 + $0x134] ss:$8 sps:$4 sm:$0xff]   ;;  %v947_v54 = vrot.slane %v536_v26, 1  ;;  %vm802_vm2 = vcmask 1046528   ;;  %vm24128_vm3 = vsmask.f32 6400 }
  0x1c   : > { %v948_v55 = vrot.slane %v538_v27, 2  ;;  %v17929_v56 = vld [vmem:[%s24113_s1 + $0xd0] ss:$8 sps:$4 sm:$0xff]   ;;  %v951_v58 = vrot.slane %v543_v28, 2  ;;  %v950_v59 = vrot.slane %v547_v42, 1  ;;  %v803_v62 = vrot.slane %v19674_v23, 1 }
  0x1d   : > { %v17932_v57 = vld [vmem:[%s24113_s1 + $0x130] ss:$8 sps:$4 sm:$0xff]   ;;  %v17937_v60 = vld [vmem:[%s24113_s1 + $0xc4] ss:$8 sps:$4 sm:$0xff]   ;;  %v804_v63 = vrot.slane %v19677_v24, 1  ;;  %vm1094_vm4 = vcmask 1045504  }
  0x1e   : > { %630 = vmatpush1.bf16.msra.mxu0 %v17895_v19  ;;  %747 = vmatpush1.bf16.msra.mxu1 %v17896_v20  ;;  %v17940_v61 = vld [vmem:[%s24113_s1 + $0x124] ss:$8 sps:$4 sm:$0xff]   ;;  %v17935_v0 = vld [vmem:[%s24113_s1 + $0xc0] ss:$8 sps:$4 sm:$0xff]   ;;  %v17943_v3 = vld [vmem:[%s24113_s1 + $0x1d4] ss:$8 sps:$4 sm:$0xff]   ;;  %v949_v4 = vor.u32 %v948_v55, %v947_v54  ;;  %v952_v5 = vor.u32 %v951_v58, %v950_v59  ;;  %v1227_v59 = vlaneseq }
  0x1f   : > { %631 = vmatprep.subr.bf16.mxu0 %v17897_v21  ;;  %748 = vmatprep.subr.bf16.mxu1 %v17899_v22  ;;  %v17938_v1 = vld [vmem:[%s24113_s1 + $0x120] ss:$8 sps:$4 sm:$0xff]   ;;  %v17941_v6 = vld [vmem:[%s24113_s1 + $0x1d0] ss:$8 sps:$4 sm:$0xff]   ;;  %v17946_v7 = vld [vmem:[%s24113_s1 + $0x1c4] ss:$8 sps:$4 sm:$0xff]   ;;  %v805_v8 = vsel %vm802_vm2, %v803_v62, %v804_v63 }
  0x20   : > { %v953_v9 = vsel %vm24128_vm3, %v949_v4, %v952_v5  ;;  %v17944_v10 = vld [vmem:[%s24113_s1 + $0x1c0] ss:$8 sps:$4 sm:$0xff]   ;;  %v17949_v11 = vld [vmem:[%s24113_s1 + $0x1b4] ss:$8 sps:$4 sm:$0xff]   ;;  %v17947_v12 = vld [vmem:[%s24113_s1 + $0x1b0] ss:$8 sps:$4 sm:$0xff]  }
  0x21   : > { %v17952_v13 = vld [vmem:[%s24113_s1 + $0x1a4] ss:$8 sps:$4 sm:$0xff]   ;;  %v17950_v14 = vld [vmem:[%s24113_s1 + $0x1a0] ss:$8 sps:$4 sm:$0xff]   ;;  %v17955_v15 = vld [vmem:[%s24113_s1 + $0x194] ss:$8 sps:$4 sm:$0xff]  }
  0x22   : > { %632 = vmatpush1.bf16.msra.mxu0 %v17901_v25  ;;  %749 = vmatpush1.bf16.msra.mxu1 %v17902_v29  ;;  %v17953_v16 = vld [vmem:[%s24113_s1 + $0x190] ss:$8 sps:$4 sm:$0xff]   ;;  %v17958_v17 = vld [vmem:[%s24113_s1 + $0x184] ss:$8 sps:$4 sm:$0xff]   ;;  %v17956_v18 = vld [vmem:[%s24113_s1 + $0x180] ss:$8 sps:$4 sm:$0xff]  }
  0x23   : > { %876 = vmatprep.subr.bf16.mxu0 %v17907_v30  ;;  %1024 = vmatprep.subr.bf16.mxu1 %v17910_v33  ;;  %v1095_v19 = vrot.slane %v19674_v23, 2  ;;  %v1096_v20 = vrot.slane %v19677_v24, 2  ;;  %v17959_v22 = vld [vmem:[%s24116_s4 + $0x38] sm:$0xff]   ;;  %v17962_v25 = vld [vmem:[%s24116_s4 + $0x20] sm:$0xff]   ;;  %v17964_v27 = vld [vmem:[%s24116_s4 + $0x10] sm:$0xff]   ;;  %vm24130_vm5 = vcmask 1043456  }
  0x24   : > { %v17963_v26 = vld [vmem:[%s24116_s4 + $0x18] sm:$0xff]   ;;  %v17965_v28 = vld [vmem:[%s24116_s4 + $0x8] sm:$0xff]   ;;  %v17966_v29 = vld [vmem:[%s24116_s4] sm:$0xff]   ;;  %vm1341_vm6 = vcmask 326656   ;;  %vm19508_vm7 = vmmov 0   ;;  %vm1549_vm8 = vcmask 1041408  }
  0x25   : > { %15370 = vmatmul.mubr.msk.bf16.vlgmr.msra.gmra.mxu0 %vm610_vm1, %v546_v38  ;;  %15384 = vmatmul.mubr.msk.bf16.vlgmr.msra.gmra.mxu1 %vm610_vm1, %v19674_v23  ;;  %v1097_v21 = vsel %vm1094_vm4, %v1095_v19, %v1096_v20  ;;  %v17960_v23 = vld [vmem:[%s24116_s4 + $0x30] sm:$0xff]   ;;  %v17968_v32 = vld [vmem:[%s24116_s4 + $0x48] sm:$0xff]   ;;  %v17969_v33 = vld [vmem:[%s24116_s4 + $0x40] sm:$0xff]   ;;  %vm1410_vm9 = vcmask 228352   ;;  %vm1545_vm10 = vcmask 687104   ;;  %vm2182_vm11 = vcmask 261120  }
  0x26   : > { %877 = vmatpush1.bf16.msra.mxu0 %v17905_v35  ;;  %1025 = vmatpush1.bf16.msra.mxu1 %v17908_v36  ;;  %v17967_v30 = vld [vmem:[%s24116_s4 + $0x50] ss:$0 sps:$4 sm:$0xff]   ;;  %vm2233_vm12 = vcmask 1044480   ;;  %vm24131_vm13 = vcmask 80896   ;;  %vm2277_vm14 = vcmask 647168   ;;  %vm2280_vm15 = vcmask 648193  }
  0x27   : > { %878 = vmatprep.subr.bf16.mxu0 %v17913_v37  ;;  %1026 = vmatprep.subr.bf16.mxu1 %v17916_v39  ;;  %v1350_v31 = vsel %vm24130_vm5, %v17967_v30, 0  ;;  %s24160_s19 = smov (!%p494_p4, %s19595_s19), 2 }
  0x28   : > { %659 = vmatprep.mubr.bf16.mxu0 %v19506_v2  ;;  %776 = vmatprep.mubr.bf16.mxu1 %v19506_v2  ;;  %s15343_s29 = sshll.u32 %s24160_s19, 3 }
  0x29   : > { %s497_s27 = scalar_lea.vmem %s24127_s15, %s15343_s29 }
  0x2a   : > { %879 = vmatpush1.bf16.msra.mxu0 %v17911_v40  ;;  %1027 = vmatpush1.bf16.msra.mxu1 %v17914_v41 }
  0x2b   : > { %880 = vmatprep.subr.bf16.mxu0 %v17919_v43  ;;  %1028 = vmatprep.subr.bf16.mxu1 %v17922_v44 }
  0x2d   : > { %15371 = vmatmul.mubr.msk.bf16.gmra.mxu0 %vm610_vm1, %v549_v47  ;;  %15385 = vmatmul.mubr.msk.bf16.gmra.mxu1 %vm610_vm1, %v19677_v24  ;;  %v17961_v24 = vld [vmem:[%s24116_s4 + $0x28] sm:$0xff]  }
  0x2e   : > { %881 = vmatpush1.bf16.msra.mxu0 %v17917_v45  ;;  %1029 = vmatpush1.bf16.msra.mxu1 %v17920_v46 }
  0x2f   : > { %882 = vmatprep.subr.bf16.mxu0 %v17925_v48  ;;  %1030 = vmatprep.subr.bf16.mxu1 %v17928_v49 }
  0x30   : > { %904 = vmatprep.mubr.bf16.mxu0 %v19506_v2  ;;  %1052 = vmatprep.mubr.bf16.mxu1 %v19506_v2 }
  0x32   : > { %883 = vmatpush1.bf16.msra.mxu0 %v17923_v50  ;;  %1031 = vmatpush1.bf16.msra.mxu1 %v17926_v51 }
  0x33   : > { %884 = vmatprep.subr.bf16.mxu0 %v17931_v52  ;;  %1032 = vmatprep.subr.bf16.mxu1 %v17934_v53 }
  0x36   : > { %885 = vmatpush1.bf16.msra.mxu0 %v17929_v56  ;;  %1033 = vmatpush1.bf16.msra.mxu1 %v17932_v57 }
  0x37   : > { %886 = vmatprep.subr.bf16.mxu0 %v17937_v60  ;;  %1034 = vmatprep.subr.bf16.mxu1 %v17940_v61 }
  0x3a   : > { %887 = vmatpush1.bf16.msra.mxu0 %v17935_v0  ;;  %1035 = vmatpush1.bf16.msra.mxu1 %v17938_v1  ;;  %v1228_v0 = vshrl.u32 %v1227_v59, 7 }
  0x3b   : > { %1168 = vmatprep.subr.bf16.mxu0 %v17943_v3  ;;  %1352 = vmatprep.subr.bf16.mxu1 %v19506_v2 }
  0x3d   : > { %15410 = vmatmul.mubr.msk.bf16.vlgmr.msra.gmra.mxu0 %vm610_vm1, %v805_v8  ;;  %15436 = vmatmul.mubr.msk.bf16.vlgmr.msra.gmra.mxu1 %vm610_vm1, %v953_v9 }
  0x3e   : > { %1169 = vmatpush1.bf16.msra.mxu0 %v17941_v6  ;;  %914 = vmatprep.mubr.bf16.mxu0 %v19506_v2 }
  0x3f   : > { %1170 = vmatprep.subr.bf16.mxu0 %v17946_v7  ;;  %1062 = vmatprep.mubr.bf16.mxu1 %v19506_v2  ;;  %v19870_v7 = vsub.s32 1, %v1228_v0 }
  0x40   : > { %1353 = vmatpush1.bf16.msra.mxu1 %v17959_v22 }
  0x41   : > { %1354 = vmatprep.subr.bf16.mxu1 %v19506_v2 }
  0x42   : > { %1171 = vmatpush1.bf16.msra.mxu0 %v17944_v10  ;;  %v1225_v10 = vld [vmem:[%s24114_s2] sm:$0x3] }
  0x43   : > { %1172 = vmatprep.subr.bf16.mxu0 %v17949_v11  ;;  %v1234_v19 = vrot.slane %v1225_v10, %v19870_v7 }
  0x44   : > { %1355 = vmatpush1.bf16.msra.mxu1 %v17960_v23 }
  0x45   : > { %15411 = vmatmul.mubr.msk.bf16.gmra.mxu0 %vm610_vm1, %v804_v63  ;;  %15437 = vmatmul.mubr.msk.bf16.gmra.mxu1 %vm610_vm1, %v952_v5 }
  0x46   : > { %1173 = vmatpush1.bf16.msra.mxu0 %v17947_v12  ;;  %1196 = vmatprep.mubr.bf16.mxu0 %v19506_v2  ;;  %v19875_v12 = vsub.s32 0, %v1228_v0 }
  0x47   : > { %1174 = vmatprep.subr.bf16.mxu0 %v17952_v13  ;;  %1356 = vmatprep.subr.bf16.mxu1 %v19506_v2 }
  0x48   : > { %1357 = vmatpush1.bf16.msra.mxu1 %v17961_v24 }
  0x49   : > { %1358 = vmatprep.subr.bf16.mxu1 %v19506_v2 }
  0x4a   : > { %1175 = vmatpush1.bf16.msra.mxu0 %v17950_v14 }
  0x4b   : > { %1176 = vmatprep.subr.bf16.mxu0 %v17955_v15 }
  0x4c   : > { %1359 = vmatpush1.bf16.msra.mxu1 %v17962_v25 }
  0x4d   : > { %1360 = vmatprep.subr.bf16.mxu1 %v19506_v2 }
  0x4e   : > { %1177 = vmatpush1.bf16.msra.mxu0 %v17953_v16 }
  0x4f   : > { %1178 = vmatprep.subr.bf16.mxu0 %v17958_v17 }
  0x50   : > { %1361 = vmatpush1.bf16.msra.mxu1 %v17963_v26  ;;  %v1230_v26 = vrot.slane %v1225_v10, %v19875_v12 }
  0x51   : > { %1362 = vmatprep.subr.bf16.mxu1 %v19506_v2 }
  0x52   : > { %1179 = vmatpush1.bf16.msra.mxu0 %v17956_v18 }
  0x54   : > { %1363 = vmatpush1.bf16.msra.mxu1 %v17964_v27 }
  0x55   : > { %15462 = vmatmul.mubr.msk.bf16.vlgmr.msra.gmra.mxu0 %vm610_vm1, %v1097_v21  ;;  %1364 = vmatprep.subr.bf16.mxu1 %v19506_v2 }
  0x56   : > { %1206 = vmatprep.mubr.bf16.mxu0 %v19506_v2 }
  0x58   : > { %1365 = vmatpush1.bf16.msra.mxu1 %v17965_v28 }
  0x59   : > { %1366 = vmatprep.subr.bf16.mxu1 %v19506_v2 }
  0x5c   : > { %1367 = vmatpush1.bf16.msra.mxu1 %v17966_v29 }
  0x5d   : > { %15463 = vmatmul.mubr.msk.bf16.gmra.mxu0 %vm610_vm1, %v1096_v20  ;;  %1378 = vmatprep.subr.bf16.mxu1 %v19506_v2 }
  0x60   : > { %1379 = vmatpush2.bf16.msra.mxu1 %v1350_v31 }
  0x61   : > { %1380 = vmatprep.subr.bf16.mxu1 %v19506_v2 }
  0x64   : > { %1381 = vmatpush2.bf16.msra.mxu1 %v17968_v32 }
  0x65   : > { %1382 = vmatprep.subr.bf16.mxu1 %v19506_v2 }
  0x68   : > { %1383 = vmatpush2.bf16.msra.mxu1 %v17969_v33 }
  0xe5   : > { %v651_v34 = vpop.f32.mrf.mxu0  ;;  %v768_v35 = vpop.f32.mrf.mxu1 }
  0xe6   : > { %v769_v63 = vadd.f32 %v768_v35, %v651_v34 }
  0xe7   : > { %v653_v36 = vpop.f32.mrf.mxu0  ;;  %v770_v38 = vpop.f32.mrf.mxu1 }
  0xe8   : > { %v771_v62 = vadd.f32 %v770_v38, %v653_v36 }
  0xe9   : > { %v655_v37 = vpop.f32.mrf.mxu0  ;;  %v772_v40 = vpop.f32.mrf.mxu1 }
  0xea   : > { %v773_v1 = vadd.f32 %v772_v40, %v655_v37 }
  0xeb   : > { %v657_v39 = vpop.f32.mrf.mxu0  ;;  %v774_v42 = vpop.f32.mrf.mxu1 }
  0xec   : > { %v775_v8 = vadd.f32 %v774_v42, %v657_v39 }
  0xed   : > { %v661_v41 = vpop.f32.mrf.mxu0  ;;  %v778_v44 = vpop.f32.mrf.mxu1 }
  0xee   : > { %v779_v13 = vadd.f32 %v778_v44, %v661_v41 }
  0xef   : > { %v663_v43 = vpop.f32.mrf.mxu0  ;;  %v780_v46 = vpop.f32.mrf.mxu1 }
  0xf0   : > { %v781_v20 = vadd.f32 %v780_v46, %v663_v43 }
  0xf1   : > { %v665_v45 = vpop.f32.mrf.mxu0  ;;  %v782_v48 = vpop.f32.mrf.mxu1 }
  0xf2   : > { %v783_v24 = vadd.f32 %v782_v48, %v665_v45 }
  0xf3   : > { %v667_v47 = vpop.f32.mrf.mxu0  ;;  %v784_v51 = vpop.f32.mrf.mxu1 }
  0xf4   : > { %v785_v32 = vadd.f32 %v784_v51, %v667_v47 }
  0xfd   : > { %v906_v49 = vpop.f32.mrf.mxu0  ;;  %v1054_v53 = vpop.f32.mrf.mxu1 }
  0xfe   : > { %v925_v5 = vadd.f32 %v906_v49, %v769_v63 }
  0xff   : > { %v908_v50 = vpop.f32.mrf.mxu0  ;;  %v1056_v55 = vpop.f32.mrf.mxu1 }
 0x100   : > { %v926_v3 = vadd.f32 %v908_v50, %v771_v62  ;;  %v1073_v17 = vadd.f32 %v1054_v53, %v925_v5 }
 0x101   : > { %v910_v52 = vpop.f32.mrf.mxu0  ;;  %v1058_v57 = vpop.f32.mrf.mxu1 }
 0x102   : > { %v927_v9 = vadd.f32 %v910_v52, %v773_v1  ;;  %v1074_v14 = vadd.f32 %v1056_v55, %v926_v3 }
 0x103   : > { %v912_v54 = vpop.f32.mrf.mxu0  ;;  %v1060_v60 = vpop.f32.mrf.mxu1 }
 0x104   : > { %v928_v15 = vadd.f32 %v912_v54, %v775_v8  ;;  %v1075_v21 = vadd.f32 %v1058_v57, %v927_v9  ;;  %v19507_v8 = vmov 0.0   ;;  %v1470_v9 = vld [vmem:[%s24117_s5 + $0x50] sm:$0x33] }
 0x105   : > { %v916_v56 = vpop.f32.mrf.mxu0  ;;  %v1064_v4 = vpop.f32.mrf.mxu1  ;;  %17638 = vmatprep.subr.bf16.mxu0 %v19507_v8  ;;  %17642 = vmatprep.mubr.msk.bf16.mxu0 %vm19508_vm7, %v19507_v8  ;;  %v15515_v10 = vcombine.high %v1470_v9, %v1470_v9 }
 0x106   : > { %v929_v22 = vadd.f32 %v916_v56, %v779_v13  ;;  %v1076_v28 = vadd.f32 %v1060_v60, %v928_v15  ;;  %v17975_v13 = vld [vmem:[%s24117_s5 + $0x44] ss:$8 sps:$4 sm:$0xff]  }
 0x107   : > { %v918_v58 = vpop.f32.mrf.mxu0  ;;  %v1066_v16 = vpop.f32.mrf.mxu1  ;;  %15516 = vmatprep.subr.msk.bf16.mxu1 %vm1549_vm8, %v15515_v10  ;;  %v18012_v10 = vld [vmem:[%s24117_s5 + $0x138] ss:$8 sps:$4 sm:$0xff]  }
 0x108   : > { %v930_v29 = vadd.f32 %v918_v58, %v781_v20  ;;  %v1077_v35 = vadd.f32 %v1064_v4, %v929_v22  ;;  %v17992_v20 = vld [vmem:[%s24117_s5 + $0x14] ss:$8 sps:$4 sm:$0xff]  }
 0x109   : > { %v920_v61 = vpop.f32.mrf.mxu0  ;;  %v1068_v30 = vpop.f32.mrf.mxu1 }
 0x10a   : > { %v931_v33 = vadd.f32 %v920_v61, %v783_v24  ;;  %v1078_v42 = vadd.f32 %v1066_v16, %v930_v29  ;;  %v17980_v16 = vld [vmem:[%s24117_s5 + $0x34] ss:$8 sps:$4 sm:$0xff]  }
 0x10b   : > { %v922_v6 = vpop.f32.mrf.mxu0  ;;  %v1070_v43 = vpop.f32.mrf.mxu1 }
 0x10c   : > { %v932_v39 = vadd.f32 %v922_v6, %v785_v32  ;;  %v1079_v46 = vadd.f32 %v1068_v30, %v931_v33 }
 0x10e   : > { %v1080_v51 = vadd.f32 %v1070_v43, %v932_v39  ;;  %v17981_v39 = vld [vmem:[%s24117_s5 + $0x98] ss:$8 sps:$4 sm:$0xff]  }
 0x10f   : > { %v17993_v43 = vld [vmem:[%s24117_s5 + $0x78] ss:$8 sps:$4 sm:$0xff]  }
 0x115   : > { %v1198_v11 = vpop.f32.mrf.mxu0 }
 0x116   : > { %v1217_v25 = vadd.f32 %v1198_v11, %v1073_v17  ;;  %v15514_v11 = vcombine.low %v1470_v9, %v1470_v9  ;;  %v17978_v17 = vld [vmem:[%s24117_s5 + $0x30] ss:$8 sps:$4 sm:$0xff]   ;;  %v18017_v9 = vld [vmem:[%s24117_s5 + $0xf4] ss:$8 sps:$4 sm:$0xff]  }
 0x117   : > { %v1200_v18 = vpop.f32.mrf.mxu0 }
 0x118   : > { %v1218_v23 = vadd.f32 %v1200_v18, %v1074_v14  ;;  %v1237_v40 = vadd.f32 %v1230_v26, %v1217_v25  ;;  %v17973_v14 = vld [vmem:[%s24117_s5 + $0x40] ss:$8 sps:$4 sm:$0xff]   ;;  %v1657_v15 = vsel %vm1549_vm8, %v15514_v11, 0  ;;  %v17986_v18 = vld [vmem:[%s24117_s5 + $0x24] ss:$8 sps:$4 sm:$0xff]  }
 0x119   : > { %v1202_v27 = vpop.f32.mrf.mxu0  ;;  %v18020_v11 = vld [vmem:[%s24117_s5 + $0x12c] ss:$8 sps:$4 sm:$0xff]  }
 0x11a   : > { %v1219_v31 = vadd.f32 %v1202_v27, %v1075_v21  ;;  %v1238_v36 = vadd.f32 %v1234_v19, %v1218_v23  ;;  %v1245_v54 = vmax.f32 %v1237_v40, 0.0  ;;  %v17990_v21 = vld [vmem:[%s24117_s5 + $0x10] ss:$8 sps:$4 sm:$0xff]   ;;  %v17989_v40 = vld [vmem:[%s24117_s5 + $0x8c] ss:$8 sps:$4 sm:$0xff]  }
 0x11b   : > { %v1204_v34 = vpop.f32.mrf.mxu0 }
 0x11c   : > { %v1239_v37 = vadd.f32 %v1230_v26, %v1219_v31  ;;  %v1220_v38 = vadd.f32 %v1204_v34, %v1076_v28  ;;  %v1246_v50 = vmax.f32 %v1238_v36, 0.0  ;;  %v15489_v31 = vld [vmem:[%s24117_s5 + $0xa8] sm:$0x33]  ;;  %v17970_v36 = vld [vmem:[%s24115_s3] sm:$0x7f]  }
 0x11d   : > { %v1208_v41 = vpop.f32.mrf.mxu0  ;;  %v15501_v33 = vcombine.high %v15489_v31, %v15489_v31  ;;  %v15500_v34 = vcombine.low %v15489_v31, %v15489_v31 }
 0x11e   : > { %v1240_v44 = vadd.f32 %v1234_v19, %v1220_v38  ;;  %v1221_v45 = vadd.f32 %v1208_v41, %v1077_v35  ;;  %v1247_v48 = vmax.f32 %v1239_v37, 0.0  ;;  %v17983_v38 = vld [vmem:[%s24117_s5 + $0x9c] ss:$8 sps:$4 sm:$0xff]   ;;  %v17987_v41 = vld [vmem:[%s24117_s5 + $0x88] ss:$8 sps:$4 sm:$0xff]  }
 0x11f   : > { %v1210_v49 = vpop.f32.mrf.mxu0  ;;  %v1551_v37 = vsel %vm1549_vm8, %v15500_v34, 0 }
 0x120   : > { %v1248_v52 = vmax.f32 %v1240_v44, 0.0  ;;  %v1241_v53 = vadd.f32 %v1230_v26, %v1221_v45  ;;  %v1222_v47 = vadd.f32 %v1210_v49, %v1078_v42  ;;  %v1253_v60 = vpack.c.bf16 %v1247_v48, %v1245_v54  ;;  %v17995_v42 = vld [vmem:[%s24117_s5 + $0x7c] ss:$8 sps:$4 sm:$0xff]   ;;  %v17996_v45 = vld [vmem:[%s24117_s5] ss:$8 sps:$4 sm:$0xff]  }
 0x121   : > { %v1212_v55 = vpop.f32.mrf.mxu0  ;;  %v17998_v44 = vld [vmem:[%s24117_s5 + $0x4] ss:$8 sps:$4 sm:$0xff]   ;;  %v17999_v48 = vld [vmem:[%s24117_s5 + $0x68] ss:$8 sps:$4 sm:$0xff]   ;;  %v15553_v49 = vld [vmem:[%s24117_s5 + $0x158] sm:$0x33] }
 0x122   : > { %v1254_v56 = vpack.c.bf16 %v1248_v52, %v1246_v50  ;;  %v1249_v57 = vmax.f32 %v1241_v53, 0.0  ;;  %v1242_v58 = vadd.f32 %v1234_v19, %v1222_v47  ;;  %v1223_v59 = vadd.f32 %v1212_v55, %v1079_v46  ;;  %v18001_v46 = vld [vmem:[%s24117_s5 + $0x6c] ss:$8 sps:$4 sm:$0xff]   ;;  %v18006_v52 = vld [vmem:[%s24117_s5 + $0x5c] ss:$8 sps:$4 sm:$0xff]  }
 0x123   : > { %v1214_v61 = vpop.f32.mrf.mxu0  ;;  %v15565_v50 = vcombine.high %v15553_v49, %v15553_v49  ;;  %v18004_v53 = vld [vmem:[%s24117_s5 + $0x58] ss:$8 sps:$4 sm:$0xff]   ;;  %v15564_v55 = vcombine.low %v15553_v49, %v15553_v49  ;;  %v18058_v49 = vld [vmem:[%s24120_s8 + $0x28] sm:$0xff]  }
 0x124   : > { %v1250_v62 = vmax.f32 %v1242_v58, 0.0  ;;  %v1243_v63 = vadd.f32 %v1230_v26, %v1223_v59  ;;  %v1224_v0 = vadd.f32 %v1214_v61, %v1080_v51  ;;  %15475 = vmatprep.mubr.msk.bf16.mxu1 %vm1341_vm6, %v1254_v56  ;;  %v15528_v47 = vld [vmem:[%s24117_s5 + $0x100] sm:$0x33] }
 0x125   : > { %1385 = vmatmul.mubr.bf16.vlgmr.msra.gmra.mxu1 %v1253_v60  ;;  %v15540_v51 = vcombine.high %v15528_v47, %v15528_v47  ;;  %v1904_v59 = vsel %vm1549_vm8, %v15564_v55, 0  ;;  %v18009_v60 = vld [vmem:[%s24117_s5 + $0x14c] ss:$8 sps:$4 sm:$0xff]   ;;  %v18065_v55 = vld [vmem:[%s24120_s8 + $0x40] sm:$0xff]  }
 0x126   : > { %v1251_v1 = vmax.f32 %v1243_v63, 0.0  ;;  %v1244_v3 = vadd.f32 %v1234_v19, %v1224_v0  ;;  %1667 = vmatpush1.bf16.msra.mxu1 %v1657_v15  ;;  %v17984_v19 = vld [vmem:[%s24117_s5 + $0x20] ss:$8 sps:$4 sm:$0xff]   ;;  %v15539_v63 = vcombine.low %v15528_v47, %v15528_v47 }
 0x127   : > { %1668 = vmatprep.subr.bf16.mxu1 %v17975_v13  ;;  %v18007_v0 = vld [vmem:[%s24117_s5 + $0x148] ss:$8 sps:$4 sm:$0xff]  }
 0x128   : > { %v1252_v4 = vmax.f32 %v1244_v3, 0.0  ;;  %v1255_v6 = vpack.c.bf16 %v1251_v1, %v1249_v57  ;;  %v18015_v13 = vld [vmem:[%s24117_s5 + $0xf0] ss:$8 sps:$4 sm:$0xff]   ;;  %v18062_v47 = vld [vmem:[%s24120_s8 + $0x8] sm:$0xff]  }
 0x129   : > { %v18018_v15 = vld [vmem:[%s24117_s5 + $0x128] ss:$8 sps:$4 sm:$0xff]  }
 0x12a   : > { %v1256_v5 = vpack.c.bf16 %v1252_v4, %v1250_v62  ;;  %1669 = vmatpush1.bf16.msra.mxu1 %v17973_v14  ;;  %v18014_v4 = vld [vmem:[%s24117_s5 + $0x13c] ss:$8 sps:$4 sm:$0xff]  }
 0x12b   : > { %1670 = vmatprep.subr.bf16.mxu1 %v17980_v16  ;;  %v18023_v14 = vld [vmem:[%s24117_s5 + $0xe4] ss:$8 sps:$4 sm:$0xff]  }
 0x12c   : > { %15476 = vmatprep.mubr.msk.bf16.mxu1 %vm1341_vm6, %v1256_v5  ;;  %v18026_v16 = vld [vmem:[%s24117_s5 + $0x11c] ss:$8 sps:$4 sm:$0xff]  }
 0x12d   : > { %1393 = vmatmul.mubr.bf16.gmra.mxu1 %v1255_v6  ;;  %v1778_v6 = vsel %vm1549_vm8, %v15539_v63, 0 }
 0x12e   : > { %1694 = vmatprep.mubr.bf16.mxu1 %v19506_v2  ;;  %1671 = vmatpush1.bf16.msra.mxu1 %v17978_v17  ;;  %v18021_v17 = vld [vmem:[%s24117_s5 + $0xe0] ss:$8 sps:$4 sm:$0xff]  }
 0x12f   : > { %1672 = vmatprep.subr.bf16.mxu1 %v17986_v18  ;;  %v18029_v18 = vld [vmem:[%s24117_s5 + $0xd4] ss:$8 sps:$4 sm:$0xff]  }
 0x132   : > { %1673 = vmatpush1.bf16.msra.mxu1 %v17984_v19  ;;  %v18024_v19 = vld [vmem:[%s24117_s5 + $0x118] ss:$8 sps:$4 sm:$0xff]  }
 0x133   : > { %1674 = vmatprep.subr.bf16.mxu1 %v17992_v20  ;;  %v18032_v20 = vld [vmem:[%s24117_s5 + $0x10c] ss:$8 sps:$4 sm:$0xff]  }
 0x136   : > { %1675 = vmatpush1.bf16.msra.mxu1 %v17990_v21  ;;  %v18027_v21 = vld [vmem:[%s24117_s5 + $0xd0] ss:$8 sps:$4 sm:$0xff]  }
 0x137   : > { %1676 = vmatprep.subr.bf16.mxu1 %v17998_v44  ;;  %v18053_v44 = vld [vmem:[%s24117_s5 + $0x160] ss:$8 sps:$4 sm:$0xff]  }
 0x13a   : > { %1677 = vmatpush1.bf16.msra.mxu1 %v17996_v45 }
 0x13b   : > { %15566 = vmatprep.subr.msk.bf16.mxu1 %vm1549_vm8, %v15565_v50  ;;  %v18059_v50 = vld [vmem:[%s24120_s8 + $0x20] sm:$0xff]  }
 0x1e5   : > { %v1386_v22 = vpop.f32.mrf.mxu1 }
 0x1e7   : > { %v1388_v23 = vpop.f32.mrf.mxu1 }
 0x1e8   : > { %v18030_v23 = vld [vmem:[%s24117_s5 + $0x108] ss:$8 sps:$4 sm:$0xff]  }
 0x1e9   : > { %v1389_v24 = vpop.f32.mrf.mxu1 }
 0x1ea   : > { %v1403_v35 = vpack.c.bf16 %v1389_v24, %v1386_v22  ;;  %v18035_v22 = vld [vmem:[%s24117_s5 + $0xc4] ss:$8 sps:$4 sm:$0xff]  }
 0x1eb   : > { %v1391_v25 = vpop.f32.mrf.mxu1 }
 0x1ed   : > { %v1394_v26 = vpop.f32.mrf.mxu1 }
 0x1ef   : > { %v1396_v27 = vpop.f32.mrf.mxu1 }
 0x1f0   : > { %v18038_v27 = vld [vmem:[%s24117_s5 + $0xb4] ss:$8 sps:$4 sm:$0xff]  }
 0x1f1   : > { %v1397_v28 = vpop.f32.mrf.mxu1 }
 0x1f2   : > { %v1404_v29 = vpack.c.bf16 %v1397_v28, %v1394_v26  ;;  %v18033_v26 = vld [vmem:[%s24117_s5 + $0xc0] ss:$8 sps:$4 sm:$0xff]   ;;  %v15578_v28 = vld [vmem:[%s24117_s5 + $0x1b0] sm:$0x33] }
 0x1f3   : > { %v1399_v30 = vpop.f32.mrf.mxu1  ;;  %v15590_v31 = vcombine.high %v15578_v28, %v15578_v28 }
 0x1f4   : > { %v1416_v32 = vsel %vm1094_vm4, %v1404_v29, 0  ;;  %v18036_v30 = vld [vmem:[%s24117_s5 + $0xb0] ss:$8 sps:$4 sm:$0xff]  }
 0x1f5   : > { %17639 = vmatpush3.bf16.msra.mxu0 %v1416_v32  ;;  %v15589_v32 = vcombine.low %v15578_v28, %v15578_v28 }
 0x1f6   : > { %17640 = vmatprep.subr.bf16.mxu0 %v19507_v8 }
 0x1f7   : > { %v2028_v34 = vsel %vm1549_vm8, %v15589_v32, 0 }
 0x1f9   : > { %17641 = vmatpush3.bf16.msra.mxu0 %v1403_v35  ;;  %v18043_v35 = vld [vmem:[%s24117_s5 + $0x1a4] ss:$8 sps:$4 sm:$0xff]  }
 0x1fa   : > { %15502 = vmatprep.subr.msk.bf16.mxu0 %vm1549_vm8, %v15501_v33 }
 0x1fc   : > { %17643 = vmatmul.mubr.msk.bf16.vlgmr.msra.gmra.mxu0 %vm1410_vm9, %v17970_v36  ;;  %v18041_v36 = vld [vmem:[%s24117_s5 + $0x1a0] ss:$8 sps:$4 sm:$0xff]  }
 0x1fd   : > { %1561 = vmatpush1.bf16.msra.mxu0 %v1551_v37  ;;  %1588 = vmatprep.mubr.bf16.mxu0 %v19506_v2  ;;  %v18046_v37 = vld [vmem:[%s24117_s5 + $0x194] ss:$8 sps:$4 sm:$0xff]  }
 0x1fe   : > { %1562 = vmatprep.subr.bf16.mxu0 %v17983_v38  ;;  %v18044_v38 = vld [vmem:[%s24117_s5 + $0x190] ss:$8 sps:$4 sm:$0xff]  }
 0x201   : > { %1563 = vmatpush1.bf16.msra.mxu0 %v17981_v39  ;;  %v18049_v39 = vld [vmem:[%s24117_s5 + $0x184] ss:$8 sps:$4 sm:$0xff]  }
 0x202   : > { %1564 = vmatprep.subr.bf16.mxu0 %v17989_v40  ;;  %v18047_v40 = vld [vmem:[%s24117_s5 + $0x180] ss:$8 sps:$4 sm:$0xff]  }
 0x205   : > { %1565 = vmatpush1.bf16.msra.mxu0 %v17987_v41  ;;  %v18052_v41 = vld [vmem:[%s24117_s5 + $0x174] ss:$8 sps:$4 sm:$0xff]  }
 0x206   : > { %1566 = vmatprep.subr.bf16.mxu0 %v17995_v42  ;;  %v18050_v42 = vld [vmem:[%s24117_s5 + $0x170] ss:$8 sps:$4 sm:$0xff]  }
 0x209   : > { %1567 = vmatpush1.bf16.msra.mxu0 %v17993_v43  ;;  %v18055_v43 = vld [vmem:[%s24117_s5 + $0x164] ss:$8 sps:$4 sm:$0xff]  }
 0x20a   : > { %1568 = vmatprep.subr.bf16.mxu0 %v18001_v46  ;;  %v18056_v46 = vld [vmem:[%s24120_s8 + $0x38] sm:$0xff]  }
 0x20d   : > { %1569 = vmatpush1.bf16.msra.mxu0 %v17999_v48  ;;  %v18057_v48 = vld [vmem:[%s24120_s8 + $0x30] sm:$0xff]  }
 0x20e   : > { %1570 = vmatprep.subr.bf16.mxu0 %v18006_v52  ;;  %v18060_v52 = vld [vmem:[%s24120_s8 + $0x18] sm:$0xff]  }
 0x211   : > { %1571 = vmatpush1.bf16.msra.mxu0 %v18004_v53  ;;  %v18061_v53 = vld [vmem:[%s24120_s8 + $0x10] sm:$0xff]  }
 0x212   : > { %15541 = vmatprep.subr.msk.bf16.mxu0 %vm1549_vm8, %v15540_v51  ;;  %v18063_v51 = vld [vmem:[%s24120_s8] sm:$0xff]  }
 0x2bc   : > { %v1452_v54 = vpop.f32.mrf.mxu0 }
 0x2be   : > { %v17644_v56 = vpop.f32.mrf.mxu0 }
 0x2c0   : > { %v1455_v57 = vpop.f32.mrf.mxu0 }
 0x2c1   : > { %v19970_v58 = vpack.c.bf16 %v1455_v57, %v1452_v54  ;;  %v18064_v54 = vld [vmem:[%s24120_s8 + $0x48] sm:$0xff]  }
 0x2c2   : > { %v17645_v61 = vpop.f32.mrf.mxu0 }
 0x2c3   : > { %v1486_v62 = vshll.u32 %v19970_v58, 16  ;;  %15517 = vmatmul.mubr.msk.bf16.vlgmr.msra.gmra.mxu1 %vm1545_vm10, %v19970_v58  ;;  %v1484_v1 = vshrl.u32 %v19970_v58, 16  ;;  %v1718_v33 = vrot.slane %v19970_v58, 1  ;;  %v1968_v45 = vrot.slane %v19970_v58, 2 }
 0x2c4   : > { %1914 = vmatpush1.bf16.msra.mxu1 %v1904_v59  ;;  %1941 = vmatprep.mubr.bf16.mxu1 %v19506_v2 }
 0x2c5   : > { %1915 = vmatprep.subr.bf16.mxu1 %v18009_v60  ;;  %v1488_v3 = vrot.slane %v1486_v62, 1  ;;  %v1842_v24 = vrot.slane %v1484_v1, 1  ;;  %v1843_v25 = vrot.slane %v1486_v62, 2 }
 0x2c7   : > { %v1489_v5 = vor.u32 %v1488_v3, %v1484_v1  ;;  %v1844_v29 = vor.u32 %v1843_v25, %v1842_v24 }
 0x2c8   : > { %1916 = vmatpush1.bf16.msra.mxu1 %v18007_v0 }
 0x2c9   : > { %15503 = vmatmul.mubr.msk.bf16.vlgmr.msra.gmra.mxu0 %vm1545_vm10, %v1489_v5  ;;  %1917 = vmatprep.subr.bf16.mxu1 %v18014_v4 }
 0x2ca   : > { %1788 = vmatpush1.bf16.msra.mxu0 %v1778_v6  ;;  %1815 = vmatprep.mubr.bf16.mxu0 %v19506_v2 }
 0x2cb   : > { %1789 = vmatprep.subr.bf16.mxu0 %v18017_v9 }
 0x2cc   : > { %1918 = vmatpush1.bf16.msra.mxu1 %v18012_v10 }
 0x2cd   : > { %1919 = vmatprep.subr.bf16.mxu1 %v18020_v11 }
 0x2ce   : > { %1790 = vmatpush1.bf16.msra.mxu0 %v18015_v13 }
 0x2cf   : > { %1791 = vmatprep.subr.bf16.mxu0 %v18023_v14 }
 0x2d0   : > { %1920 = vmatpush1.bf16.msra.mxu1 %v18018_v15 }
 0x2d1   : > { %1921 = vmatprep.subr.bf16.mxu1 %v18026_v16 }
 0x2d2   : > { %1792 = vmatpush1.bf16.msra.mxu0 %v18021_v17 }
 0x2d3   : > { %1793 = vmatprep.subr.bf16.mxu0 %v18029_v18 }
 0x2d4   : > { %1922 = vmatpush1.bf16.msra.mxu1 %v18024_v19 }
 0x2d5   : > { %1923 = vmatprep.subr.bf16.mxu1 %v18032_v20  ;;  %v2080_v20 = vld [vmem:[%s24118_s6] sm:$0x3] }
 0x2d6   : > { %1794 = vmatpush1.bf16.msra.mxu0 %v18027_v21  ;;  %v2089_v25 = vrot.slane %v2080_v20, %v19870_v7 }
 0x2d7   : > { %1795 = vmatprep.subr.bf16.mxu0 %v18035_v22 }
 0x2d8   : > { %1924 = vmatpush1.bf16.msra.mxu1 %v18030_v23 }
 0x2d9   : > { %2186 = vmatprep.subr.bf16.mxu1 %v19506_v2 }
 0x2da   : > { %1796 = vmatpush1.bf16.msra.mxu0 %v18033_v26 }
 0x2db   : > { %15567 = vmatmul.mubr.msk.bf16.vlgmr.msra.gmra.mxu1 %vm1545_vm10, %v1844_v29  ;;  %1797 = vmatprep.subr.bf16.mxu0 %v18038_v27  ;;  %v2085_v29 = vrot.slane %v2080_v20, %v19875_v12 }
 0x2dc   : > { %2187 = vmatpush1.bf16.msra.mxu1 %v18056_v46  ;;  %v18069_v46 = vld [vmem:[%s24113_s1 + $0x50] ss:$8 sps:$4 sm:$0xff]  }
 0x2dd   : > { %2188 = vmatprep.subr.bf16.mxu1 %v19506_v2 }
 0x2de   : > { %1798 = vmatpush1.bf16.msra.mxu0 %v18036_v30 }
 0x2df   : > { %15591 = vmatprep.subr.msk.bf16.mxu0 %vm1549_vm8, %v15590_v31 }
 0x2e0   : > { %2189 = vmatpush1.bf16.msra.mxu1 %v18057_v48  ;;  %v18075_v48 = vld [vmem:[%s24113_s1 + $0x40] ss:$8 sps:$4 sm:$0xff]  }
 0x2e1   : > { %15542 = vmatmul.mubr.msk.bf16.vlgmr.msra.gmra.mxu0 %vm1545_vm10, %v1718_v33  ;;  %2190 = vmatprep.subr.bf16.mxu1 %v19506_v2 }
 0x2e2   : > { %2038 = vmatpush1.bf16.msra.mxu0 %v2028_v34  ;;  %2065 = vmatprep.mubr.bf16.mxu0 %v19506_v2 }
 0x2e3   : > { %2039 = vmatprep.subr.bf16.mxu0 %v18043_v35 }
 0x2e4   : > { %2191 = vmatpush1.bf16.msra.mxu1 %v18058_v49  ;;  %v18077_v49 = vld [vmem:[%s24113_s1 + $0x44] ss:$8 sps:$4 sm:$0xff]  }
 0x2e5   : > { %2192 = vmatprep.subr.bf16.mxu1 %v19506_v2 }
 0x2e6   : > { %2040 = vmatpush1.bf16.msra.mxu0 %v18041_v36 }
 0x2e7   : > { %2041 = vmatprep.subr.bf16.mxu0 %v18046_v37 }
 0x2e8   : > { %2193 = vmatpush1.bf16.msra.mxu1 %v18059_v50  ;;  %v18081_v50 = vld [vmem:[%s24113_s1 + $0x30] ss:$8 sps:$4 sm:$0xff]  }
 0x2e9   : > { %2194 = vmatprep.subr.bf16.mxu1 %v19506_v2 }
 0x2ea   : > { %2042 = vmatpush1.bf16.msra.mxu0 %v18044_v38 }
 0x2eb   : > { %2043 = vmatprep.subr.bf16.mxu0 %v18049_v39 }
 0x2ec   : > { %2195 = vmatpush1.bf16.msra.mxu1 %v18060_v52  ;;  %v18083_v52 = vld [vmem:[%s24113_s1 + $0x34] ss:$8 sps:$4 sm:$0xff]  }
 0x2ed   : > { %2196 = vmatprep.subr.bf16.mxu1 %v19506_v2 }
 0x2ee   : > { %2044 = vmatpush1.bf16.msra.mxu0 %v18047_v40 }
 0x2ef   : > { %2045 = vmatprep.subr.bf16.mxu0 %v18052_v41 }
 0x2f0   : > { %2197 = vmatpush1.bf16.msra.mxu1 %v18061_v53  ;;  %v18087_v53 = vld [vmem:[%s24113_s1 + $0x20] ss:$8 sps:$4 sm:$0xff]  }
 0x2f1   : > { %2198 = vmatprep.subr.bf16.mxu1 %v19506_v2 }
 0x2f2   : > { %2046 = vmatpush1.bf16.msra.mxu0 %v18050_v42 }
 0x2f3   : > { %2047 = vmatprep.subr.bf16.mxu0 %v18055_v43 }
 0x2f4   : > { %2199 = vmatpush1.bf16.msra.mxu1 %v18062_v47  ;;  %v18089_v47 = vld [vmem:[%s24113_s1 + $0x24] ss:$8 sps:$4 sm:$0xff]  }
 0x2f5   : > { %2200 = vmatprep.subr.bf16.mxu1 %v19506_v2 }
 0x2f6   : > { %2048 = vmatpush1.bf16.msra.mxu0 %v18053_v44 }
 0x2f7   : > { %17646 = vmatprep.subr.bf16.mxu0 %v19507_v8 }
 0x2f8   : > { %2201 = vmatpush1.bf16.msra.mxu1 %v18063_v51  ;;  %v18093_v51 = vld [vmem:[%s24113_s1 + $0x10] ss:$8 sps:$4 sm:$0xff]  }
 0x2f9   : > { %15592 = vmatmul.mubr.msk.bf16.vlgmr.msra.gmra.mxu0 %vm1545_vm10, %v1968_v45  ;;  %2214 = vmatprep.subr.bf16.mxu1 %v19506_v2  ;;  %v18071_v45 = vld [vmem:[%s24113_s1 + $0x54] ss:$8 sps:$4 sm:$0xff]  }
 0x2fa   : > { %17648 = vmatprep.mubr.msk.bf16.mxu0 %vm19508_vm7, %v19507_v8 }
 0x2fc   : > { %2215 = vmatpush2.bf16.msra.mxu1 %v18064_v54  ;;  %v18095_v54 = vld [vmem:[%s24113_s1 + $0x14] ss:$8 sps:$4 sm:$0xff]  }
 0x2fd   : > { %2216 = vmatprep.subr.bf16.mxu1 %v19506_v2 }
 0x300   : > { %2217 = vmatpush2.bf16.msra.mxu1 %v18065_v55  ;;  %v20163_v55 = vld [vmem:[%s19662_s25 + $0x10] sm:$0xff]  }
 0x301   : > { %2528 = vmatprep.subr.bf16.mxu1 %v18071_v45  ;;  %v18078_v45 = vld [vmem:[%s24113_s1 + $0x90] ss:$8 sps:$4 sm:$0xff]  }
 0x383   : > { %v1696_v58 = vpop.f32.mrf.mxu1 }
 0x385   : > { %v1698_v60 = vpop.f32.mrf.mxu1 }
 0x387   : > { %v1700_v62 = vpop.f32.mrf.mxu1 }
 0x389   : > { %v1590_v56 = vpop.f32.mrf.mxu0  ;;  %v1702_v0 = vpop.f32.mrf.mxu1 }
 0x38a   : > { %v1697_v6 = vadd.f32 %v1696_v58, %v1590_v56  ;;  %v20166_v56 = vld [vmem:[%s19662_s25 + $0x18] sm:$0xff]   ;;  %v18099_v58 = vld [vmem:[%s24113_s1] ss:$8 sps:$4 sm:$0xff]  }
 0x38b   : > { %v1592_v57 = vpop.f32.mrf.mxu0 }
 0x38c   : > { %v1699_v5 = vadd.f32 %v1698_v60, %v1592_v57  ;;  %v2329_v57 = vshll.u32 %v20163_v55, 16  ;;  %v2327_v60 = vshrl.u32 %v20163_v55, 16 }
 0x38d   : > { %v1594_v59 = vpop.f32.mrf.mxu0 }
 0x38e   : > { %v1701_v10 = vadd.f32 %v1700_v62, %v1594_v59  ;;  %v18101_v59 = vld [vmem:[%s24113_s1 + $0x4] ss:$8 sps:$4 sm:$0xff]   ;;  %v2334_v62 = vshll.u32 %v20166_v56, 16 }
 0x38f   : > { %v1596_v61 = vpop.f32.mrf.mxu0 }
 0x390   : > { %v1703_v15 = vadd.f32 %v1702_v0, %v1596_v61  ;;  %v2331_v61 = vrot.slane %v2329_v57, 1  ;;  %v2336_v0 = vrot.slane %v2334_v62, 1 }
 0x39b   : > { %v1943_v3 = vpop.f32.mrf.mxu1 }
 0x39d   : > { %v1945_v9 = vpop.f32.mrf.mxu1 }
 0x39f   : > { %v1947_v17 = vpop.f32.mrf.mxu1 }
 0x3a1   : > { %v1817_v63 = vpop.f32.mrf.mxu0  ;;  %v1949_v27 = vpop.f32.mrf.mxu1 }
 0x3a2   : > { %v1826_v13 = vadd.f32 %v1817_v63, %v1697_v6  ;;  %v2332_v63 = vor.u32 %v2331_v61, %v2327_v60  ;;  %v18113_v6 = vld [vmem:[%s24113_s1 + $0x160] ss:$8 sps:$4 sm:$0xff]   ;;  %v18130_v61 = vld [vmem:[%s24113_s1 + $0xd4] ss:$8 sps:$4 sm:$0xff]  }
 0x3a3   : > { %v1819_v1 = vpop.f32.mrf.mxu0 }
 0x3a4   : > { %v1827_v11 = vadd.f32 %v1819_v1, %v1699_v5  ;;  %v1952_v22 = vadd.f32 %v1943_v3, %v1826_v13  ;;  %v20178_v1 = vsel %vm24129_vm0, %v2332_v63, %v2336_v0  ;;  %v18109_v3 = vld [vmem:[%s24113_s1 + $0x174] ss:$8 sps:$4 sm:$0xff]   ;;  %v18115_v5 = vld [vmem:[%s24113_s1 + $0x164] ss:$8 sps:$4 sm:$0xff]   ;;  %vm2286_vm0 = vcmask 650243  }
 0x3a5   : > { %v1821_v4 = vpop.f32.mrf.mxu0  ;;  %v18136_v63 = vld [vmem:[%s24113_s1 + $0xc4] ss:$8 sps:$4 sm:$0xff]  }
 0x3a6   : > { %v1828_v16 = vadd.f32 %v1821_v4, %v1701_v10  ;;  %v1953_v21 = vadd.f32 %v1945_v9, %v1827_v11  ;;  %v18107_v4 = vld [vmem:[%s24113_s1 + $0x170] ss:$8 sps:$4 sm:$0xff]   ;;  %v2338_v9 = vshrl.u32 %v20166_v56, 16  ;;  %v18121_v10 = vld [vmem:[%s24113_s1 + $0x154] ss:$8 sps:$4 sm:$0xff]  }
 0x3a7   : > { %v1823_v14 = vpop.f32.mrf.mxu0  ;;  %v18119_v11 = vld [vmem:[%s24113_s1 + $0x150] ss:$8 sps:$4 sm:$0xff]  }
 0x3a8   : > { %v1829_v19 = vadd.f32 %v1823_v14, %v1703_v15  ;;  %v1954_v26 = vadd.f32 %v1947_v17, %v1828_v16  ;;  %v20204_v13 = vor.u32 %v2338_v9, %v2336_v0  ;;  %v18127_v14 = vld [vmem:[%s24113_s1 + $0x144] ss:$8 sps:$4 sm:$0xff]   ;;  %v18125_v15 = vld [vmem:[%s24113_s1 + $0x140] ss:$8 sps:$4 sm:$0xff]   ;;  %v18133_v16 = vld [vmem:[%s24113_s1 + $0x134] ss:$8 sps:$4 sm:$0xff]  }
 0x3a9   : > { %v18131_v17 = vld [vmem:[%s24113_s1 + $0x130] ss:$8 sps:$4 sm:$0xff]   ;;  %v2736_v20 = vrot.slane %v2338_v9, 1  ;;  %v18134_v0 = vld [vmem:[%s24113_s1 + $0xc0] ss:$8 sps:$4 sm:$0xff]  }
 0x3aa   : > { %v1955_v32 = vadd.f32 %v1949_v27, %v1829_v19  ;;  %v2737_v19 = vrot.slane %v2334_v62, 2  ;;  %v18128_v62 = vld [vmem:[%s24113_s1 + $0xd0] ss:$8 sps:$4 sm:$0xff]  }
 0x3ab   : > { %v18146_v9 = vld [vmem:[%s24113_s1 + $0x1b0] ss:$8 sps:$4 sm:$0xff]  }
 0x3b9   : > { %v2067_v18 = vpop.f32.mrf.mxu0 }
 0x3ba   : > { %v2076_v28 = vadd.f32 %v2067_v18, %v1952_v22  ;;  %v2733_v18 = vrot.slane %v2327_v60, 1  ;;  %v18137_v22 = vld [vmem:[%s24113_s1 + $0x120] ss:$8 sps:$4 sm:$0xff]  }
 0x3bb   : > { %v2069_v23 = vpop.f32.mrf.mxu0  ;;  %v18122_v60 = vld [vmem:[%s24113_s1 + $0xe0] ss:$8 sps:$4 sm:$0xff]  }
 0x3bc   : > { %v2077_v24 = vadd.f32 %v2069_v23, %v1953_v21  ;;  %v2092_v37 = vadd.f32 %v2085_v29, %v2076_v28  ;;  %v18139_v21 = vld [vmem:[%s24113_s1 + $0x124] ss:$8 sps:$4 sm:$0xff]   ;;  %v2591_v23 = vrot.slane %v20163_v55, 1  ;;  %v2738_v28 = vor.u32 %v2737_v19, %v2736_v20  ;;  %v18162_v20 = vld [vmem:[%s24116_s4 + $0x18] sm:$0xff]  }
 0x3bd   : > { %v2071_v30 = vpop.f32.mrf.mxu0  ;;  %v18161_v19 = vld [vmem:[%s24116_s4 + $0x20] sm:$0xff]  }
 0x3be   : > { %v2078_v31 = vadd.f32 %v2071_v30, %v1954_v26  ;;  %v2093_v34 = vadd.f32 %v2089_v25, %v2077_v24  ;;  %v2096_v42 = vmax.f32 %v2092_v37, 0.0  ;;  %v2592_v24 = vrot.slane %v20166_v56, 1  ;;  %v18068_v37 = vld [vmem:[%s24113_s1 + $0xb4] ss:$8 sps:$4 sm:$0xff]  }
 0x3bf   : > { %v2073_v33 = vpop.f32.mrf.mxu0  ;;  %v2879_v30 = vrot.slane %v20163_v55, 2 }
 0x3c0   : > { %v2094_v35 = vadd.f32 %v2085_v29, %v2078_v31  ;;  %v2079_v36 = vadd.f32 %v2073_v33, %v1955_v32  ;;  %v2097_v40 = vmax.f32 %v2093_v34, 0.0  ;;  %v20230_v26 = vsel %vm802_vm2, %v2591_v23, %v2592_v24  ;;  %v18165_v23 = vld [vmem:[%s24116_s4] sm:$0xff]  }
 0x3c1   : > { %v2880_v31 = vrot.slane %v20166_v56, 2 }
 0x3c2   : > { %v2095_v38 = vadd.f32 %v2089_v25, %v2079_v36  ;;  %v2098_v39 = vmax.f32 %v2094_v35, 0.0  ;;  %v2734_v25 = vrot.slane %v2329_v57, 2  ;;  %v18118_v57 = vld [vmem:[%s24113_s1 + $0xf4] ss:$8 sps:$4 sm:$0xff]  }
 0x3c3   : > { %v20242_v32 = vsel %vm1094_vm4, %v2879_v30, %v2880_v31 }
 0x3c4   : > { %v2099_v41 = vmax.f32 %v2095_v38, 0.0  ;;  %v2100_v44 = vpack.c.bf16 %v2098_v39, %v2096_v42  ;;  %v2735_v27 = vor.u32 %v2734_v25, %v2733_v18  ;;  %v18074_v42 = vld [vmem:[%s24113_s1 + $0xa4] ss:$8 sps:$4 sm:$0xff]   ;;  %v18159_v18 = vld [vmem:[%s24116_s4 + $0x30] sm:$0xff]  }
 0x3c6   : > { %v2101_v43 = vpack.c.bf16 %v2099_v41, %v2097_v40  ;;  %v2739_v29 = vsel %vm24128_vm3, %v2735_v27, %v2738_v28  ;;  %v2227_v40 = vld [vmem:[%s24119_s7] sm:$0x7]  ;;  %v18066_v41 = vld [vmem:[%s24113_s1 + $0xb0] ss:$8 sps:$4 sm:$0xff]   ;;  %vm2283_vm3 = vcmask 649218  }
 0x3c7   : > { %v18168_v27 = vld [vmem:[%s24116_s4 + $0x40] sm:$0xff]  }
 0x3c8   : > { %15603 = vmatprep.mubr.msk.bf16.mxu1 %vm2182_vm11, %v2101_v43  ;;  %v18072_v43 = vld [vmem:[%s24113_s1 + $0xa0] ss:$8 sps:$4 sm:$0xff]  }
 0x3c9   : > { %2219 = vmatmul.mubr.bf16.vlgmr.msra.gmra.mxu1 %v2100_v44  ;;  %v18080_v44 = vld [vmem:[%s24113_s1 + $0x94] ss:$8 sps:$4 sm:$0xff]  }
 0x3ca   : > { %2556 = vmatprep.mubr.bf16.mxu1 %v19506_v2  ;;  %2529 = vmatpush1.bf16.msra.mxu1 %v18069_v46  ;;  %v18086_v46 = vld [vmem:[%s24113_s1 + $0x84] ss:$8 sps:$4 sm:$0xff]  }
 0x3cb   : > { %2530 = vmatprep.subr.bf16.mxu1 %v18077_v49  ;;  %v18092_v49 = vld [vmem:[%s24113_s1 + $0x74] ss:$8 sps:$4 sm:$0xff]  }
 0x3ce   : > { %2531 = vmatpush1.bf16.msra.mxu1 %v18075_v48  ;;  %v18084_v48 = vld [vmem:[%s24113_s1 + $0x80] ss:$8 sps:$4 sm:$0xff]  }
 0x3cf   : > { %2532 = vmatprep.subr.bf16.mxu1 %v18083_v52  ;;  %v18098_v52 = vld [vmem:[%s24113_s1 + $0x64] ss:$8 sps:$4 sm:$0xff]  }
 0x3d2   : > { %2533 = vmatpush1.bf16.msra.mxu1 %v18081_v50  ;;  %v18090_v50 = vld [vmem:[%s24113_s1 + $0x70] ss:$8 sps:$4 sm:$0xff]  }
 0x3d3   : > { %2534 = vmatprep.subr.bf16.mxu1 %v18089_v47  ;;  %v18106_v47 = vld [vmem:[%s24113_s1 + $0x114] ss:$8 sps:$4 sm:$0xff]  }
 0x3d6   : > { %2535 = vmatpush1.bf16.msra.mxu1 %v18087_v53  ;;  %v18096_v53 = vld [vmem:[%s24113_s1 + $0x60] ss:$8 sps:$4 sm:$0xff]  }
 0x3d7   : > { %2536 = vmatprep.subr.bf16.mxu1 %v18095_v54  ;;  %v18112_v54 = vld [vmem:[%s24113_s1 + $0x104] ss:$8 sps:$4 sm:$0xff]  }
 0x3da   : > { %2537 = vmatpush1.bf16.msra.mxu1 %v18093_v51  ;;  %v18104_v51 = vld [vmem:[%s24113_s1 + $0x110] ss:$8 sps:$4 sm:$0xff]  }
 0x3db   : > { %2538 = vmatprep.subr.bf16.mxu1 %v18101_v59  ;;  %v18124_v59 = vld [vmem:[%s24113_s1 + $0xe4] ss:$8 sps:$4 sm:$0xff]  }
 0x3de   : > { %2539 = vmatpush1.bf16.msra.mxu1 %v18099_v58  ;;  %v18116_v58 = vld [vmem:[%s24113_s1 + $0xf0] ss:$8 sps:$4 sm:$0xff]  }
 0x3df   : > { %2810 = vmatprep.subr.bf16.mxu1 %v18109_v3  ;;  %v18140_v3 = vld [vmem:[%s24113_s1 + $0x1d0] ss:$8 sps:$4 sm:$0xff]  }
 0x3e1   : > { %15649 = vmatmul.mubr.msk.bf16.vlgmr.msra.gmra.mxu1 %vm610_vm1, %v20163_v55  ;;  %v18110_v55 = vld [vmem:[%s24113_s1 + $0x100] ss:$8 sps:$4 sm:$0xff]  }
 0x3e2   : > { %2566 = vmatprep.mubr.bf16.mxu1 %v19506_v2  ;;  %2811 = vmatpush1.bf16.msra.mxu1 %v18107_v4  ;;  %v18145_v4 = vld [vmem:[%s24113_s1 + $0x1c4] ss:$8 sps:$4 sm:$0xff]  }
 0x3e3   : > { %2812 = vmatprep.subr.bf16.mxu1 %v18115_v5  ;;  %v18143_v5 = vld [vmem:[%s24113_s1 + $0x1c0] ss:$8 sps:$4 sm:$0xff]  }
 0x3e6   : > { %2813 = vmatpush1.bf16.msra.mxu1 %v18113_v6  ;;  %v18148_v6 = vld [vmem:[%s24113_s1 + $0x1b4] ss:$8 sps:$4 sm:$0xff]  }
 0x3e7   : > { %2814 = vmatprep.subr.bf16.mxu1 %v18121_v10  ;;  %v18151_v10 = vld [vmem:[%s24113_s1 + $0x1a4] ss:$8 sps:$4 sm:$0xff]  }
 0x3e9   : > { %15650 = vmatmul.mubr.msk.bf16.gmra.mxu1 %vm610_vm1, %v20166_v56  ;;  %v18160_v56 = vld [vmem:[%s24116_s4 + $0x28] sm:$0xff]  }
 0x3ea   : > { %2838 = vmatprep.mubr.bf16.mxu1 %v19506_v2  ;;  %2815 = vmatpush1.bf16.msra.mxu1 %v18119_v11  ;;  %v18149_v11 = vld [vmem:[%s24113_s1 + $0x1a0] ss:$8 sps:$4 sm:$0xff]  }
 0x3eb   : > { %2816 = vmatprep.subr.bf16.mxu1 %v18127_v14  ;;  %v18152_v14 = vld [vmem:[%s24113_s1 + $0x190] ss:$8 sps:$4 sm:$0xff]  }
 0x3ee   : > { %2817 = vmatpush1.bf16.msra.mxu1 %v18125_v15  ;;  %v18157_v15 = vld [vmem:[%s24113_s1 + $0x184] ss:$8 sps:$4 sm:$0xff]  }
 0x3ef   : > { %2818 = vmatprep.subr.bf16.mxu1 %v18133_v16  ;;  %v18155_v16 = vld [vmem:[%s24113_s1 + $0x180] ss:$8 sps:$4 sm:$0xff]  }
 0x3f2   : > { %2819 = vmatpush1.bf16.msra.mxu1 %v18131_v17  ;;  %v18158_v17 = vld [vmem:[%s24116_s4 + $0x38] sm:$0xff]  }
 0x3f3   : > { %2820 = vmatprep.subr.bf16.mxu1 %v18139_v21  ;;  %v18163_v21 = vld [vmem:[%s24116_s4 + $0x10] sm:$0xff]  }
 0x3f6   : > { %2821 = vmatpush1.bf16.msra.mxu1 %v18137_v22  ;;  %v18164_v22 = vld [vmem:[%s24116_s4 + $0x8] sm:$0xff]  }
 0x3f7   : > { %3134 = vmatprep.subr.bf16.mxu1 %v19506_v2 }
 0x3f9   : > { %15701 = vmatmul.mubr.msk.bf16.vlgmr.msra.gmra.mxu1 %vm610_vm1, %v2739_v29 }
 0x3fa   : > { %2848 = vmatprep.mubr.bf16.mxu1 %v19506_v2  ;;  %3135 = vmatpush1.bf16.msra.mxu1 %v18158_v17 }
 0x3fb   : > { %3136 = vmatprep.subr.bf16.mxu1 %v19506_v2 }
 0x3fe   : > { %3137 = vmatpush1.bf16.msra.mxu1 %v18159_v18 }
 0x3ff   : > { %3138 = vmatprep.subr.bf16.mxu1 %v19506_v2 }
 0x401   : > { %15702 = vmatmul.mubr.msk.bf16.gmra.mxu1 %vm610_vm1, %v2738_v28 }
 0x402   : > { %3139 = vmatpush1.bf16.msra.mxu1 %v18160_v56 }
 0x403   : > { %3140 = vmatprep.subr.bf16.mxu1 %v19506_v2 }
 0x406   : > { %3141 = vmatpush1.bf16.msra.mxu1 %v18161_v19 }
 0x407   : > { %3142 = vmatprep.subr.bf16.mxu1 %v19506_v2 }
 0x40a   : > { %3143 = vmatpush1.bf16.msra.mxu1 %v18162_v20 }
 0x40b   : > { %3144 = vmatprep.subr.bf16.mxu1 %v19506_v2 }
 0x40e   : > { %3145 = vmatpush1.bf16.msra.mxu1 %v18163_v21 }
 0x40f   : > { %3146 = vmatprep.subr.bf16.mxu1 %v19506_v2 }
 0x412   : > { %3147 = vmatpush1.bf16.msra.mxu1 %v18164_v22 }
 0x413   : > { %3148 = vmatprep.subr.bf16.mxu1 %v19506_v2 }
 0x416   : > { %3149 = vmatpush1.bf16.msra.mxu1 %v18165_v23 }
 0x417   : > { %3160 = vmatprep.subr.bf16.mxu1 %v19506_v2 }
 0x489   : > { %v2220_v33 = vpop.f32.mrf.mxu1 }
 0x48b   : > { %v2222_v34 = vpop.f32.mrf.mxu1 }
 0x48d   : > { %v2223_v35 = vpop.f32.mrf.mxu1 }
 0x48e   : > { %v2228_v36 = vpack.c.bf16 %v2223_v35, %v2220_v33 }
 0x48f   : > { %v2225_v38 = vpop.f32.mrf.mxu1 }
 0x490   : > { %v2235_v39 = vsel %vm2233_vm12, %v2228_v36, 0 }
 0x491   : > { %17647 = vmatpush3.bf16.msra.mxu0 %v2235_v39 }
 0x492   : > { %2411 = vmatprep.subr.bf16.mxu0 %v18068_v37 }
 0x494   : > { %17649 = vmatmul.mubr.msk.bf16.vlgmr.msra.gmra.mxu0 %vm24131_vm13, %v2227_v40 }
 0x495   : > { %2412 = vmatpush1.bf16.msra.mxu0 %v18066_v41  ;;  %2439 = vmatprep.mubr.bf16.mxu0 %v19506_v2 }
 0x496   : > { %2413 = vmatprep.subr.bf16.mxu0 %v18074_v42 }
 0x499   : > { %2414 = vmatpush1.bf16.msra.mxu0 %v18072_v43 }
 0x49a   : > { %2415 = vmatprep.subr.bf16.mxu0 %v18080_v44 }
 0x49d   : > { %2416 = vmatpush1.bf16.msra.mxu0 %v18078_v45 }
 0x49e   : > { %2417 = vmatprep.subr.bf16.mxu0 %v18086_v46 }
 0x4a1   : > { %2418 = vmatpush1.bf16.msra.mxu0 %v18084_v48  ;;  %v2558_v33 = vpop.f32.mrf.mxu1 }
 0x4a2   : > { %2419 = vmatprep.subr.bf16.mxu0 %v18092_v49 }
 0x4a3   : > { %v2560_v36 = vpop.f32.mrf.mxu1 }
 0x4a5   : > { %2420 = vmatpush1.bf16.msra.mxu0 %v18090_v50  ;;  %v2562_v38 = vpop.f32.mrf.mxu1 }
 0x4a6   : > { %2421 = vmatprep.subr.bf16.mxu0 %v18098_v52 }
 0x4a7   : > { %v2564_v40 = vpop.f32.mrf.mxu1 }
 0x4a9   : > { %2422 = vmatpush1.bf16.msra.mxu0 %v18096_v53  ;;  %v2568_v42 = vpop.f32.mrf.mxu1 }
 0x4aa   : > { %2664 = vmatprep.subr.bf16.mxu0 %v18106_v47 }
 0x4ab   : > { %v2570_v44 = vpop.f32.mrf.mxu1 }
 0x4ac   : > { %15635 = vmatmul.mubr.msk.bf16.vlgmr.msra.gmra.mxu0 %vm610_vm1, %v20178_v1  ;;  %v18142_v1 = vld [vmem:[%s24113_s1 + $0x1d4] ss:$8 sps:$4 sm:$0xff]  }
 0x4ad   : > { %2665 = vmatpush1.bf16.msra.mxu0 %v18104_v51  ;;  %2449 = vmatprep.mubr.bf16.mxu0 %v19506_v2  ;;  %v2572_v46 = vpop.f32.mrf.mxu1 }
 0x4ae   : > { %2666 = vmatprep.subr.bf16.mxu0 %v18112_v54 }
 0x4af   : > { %v2574_v50 = vpop.f32.mrf.mxu1 }
 0x4b1   : > { %2667 = vmatpush1.bf16.msra.mxu0 %v18110_v55 }
 0x4b2   : > { %2668 = vmatprep.subr.bf16.mxu0 %v18118_v57 }
 0x4b4   : > { %15636 = vmatmul.mubr.msk.bf16.gmra.mxu0 %vm610_vm1, %v20204_v13  ;;  %v18154_v13 = vld [vmem:[%s24113_s1 + $0x194] ss:$8 sps:$4 sm:$0xff]  }
 0x4b5   : > { %2669 = vmatpush1.bf16.msra.mxu0 %v18116_v58  ;;  %2692 = vmatprep.mubr.bf16.mxu0 %v19506_v2 }
 0x4b6   : > { %2670 = vmatprep.subr.bf16.mxu0 %v18124_v59 }
 0x4b9   : > { %2671 = vmatpush1.bf16.msra.mxu0 %v18122_v60  ;;  %v2840_v53 = vpop.f32.mrf.mxu1 }
 0x4ba   : > { %2672 = vmatprep.subr.bf16.mxu0 %v18130_v61 }
 0x4bb   : > { %v2842_v51 = vpop.f32.mrf.mxu1 }
 0x4bd   : > { %2673 = vmatpush1.bf16.msra.mxu0 %v18128_v62  ;;  %v2844_v55 = vpop.f32.mrf.mxu1 }
 0x4be   : > { %2674 = vmatprep.subr.bf16.mxu0 %v18136_v63 }
 0x4bf   : > { %v2846_v58 = vpop.f32.mrf.mxu1 }
 0x4c1   : > { %2675 = vmatpush1.bf16.msra.mxu0 %v18134_v0 }
 0x4c2   : > { %2952 = vmatprep.subr.bf16.mxu0 %v18142_v1  ;;  %v2850_v1 = vpop.f32.mrf.mxu1 }
 0x4c4   : > { %15675 = vmatmul.mubr.msk.bf16.vlgmr.msra.gmra.mxu0 %vm610_vm1, %v20230_v26  ;;  %v18167_v26 = vld [vmem:[%s24116_s4 + $0x48] sm:$0xff]  }
 0x4c5   : > { %2953 = vmatpush1.bf16.msra.mxu0 %v18140_v3  ;;  %2702 = vmatprep.mubr.bf16.mxu0 %v19506_v2 }
 0x4c6   : > { %2954 = vmatprep.subr.bf16.mxu0 %v18145_v4 }
 0x4c9   : > { %2955 = vmatpush1.bf16.msra.mxu0 %v18143_v5 }
 0x4ca   : > { %2956 = vmatprep.subr.bf16.mxu0 %v18148_v6 }
 0x4cc   : > { %15676 = vmatmul.mubr.msk.bf16.gmra.mxu0 %vm610_vm1, %v2592_v24  ;;  %v18166_v24 = vld [vmem:[%s24116_s4 + $0x50] ss:$0 sps:$4 sm:$0xff]  }
 0x4cd   : > { %2957 = vmatpush1.bf16.msra.mxu0 %v18146_v9  ;;  %2980 = vmatprep.mubr.bf16.mxu0 %v19506_v2  ;;  %v3132_v25 = vsel %vm24130_vm5, %v18166_v24, 0  ;;  %vm2289_vm5 = vcmask 651268  }
 0x4ce   : > { %2958 = vmatprep.subr.bf16.mxu0 %v18151_v10  ;;  %3161 = vmatpush2.bf16.msra.mxu1 %v3132_v25 }
 0x4cf   : > { %3162 = vmatprep.subr.bf16.mxu1 %v19506_v2 }
 0x4d1   : > { %2959 = vmatpush1.bf16.msra.mxu0 %v18149_v11  ;;  %v3009_v11 = vld [vmem:[%s24114_s2] sm:$0x3] }
 0x4d2   : > { %2960 = vmatprep.subr.bf16.mxu0 %v18154_v13  ;;  %3163 = vmatpush2.bf16.msra.mxu1 %v18167_v26  ;;  %v3018_v56 = vrot.slane %v3009_v11, %v19870_v7  ;;  %v3014_v21 = vrot.slane %v3009_v11, %v19875_v12 }
 0x4d3   : > { %3164 = vmatprep.subr.bf16.mxu1 %v19506_v2 }
 0x4d5   : > { %2961 = vmatpush1.bf16.msra.mxu0 %v18152_v14  ;;  %v2852_v14 = vpop.f32.mrf.mxu1 }
 0x4d6   : > { %2962 = vmatprep.subr.bf16.mxu0 %v18157_v15  ;;  %3165 = vmatpush2.bf16.msra.mxu1 %v18168_v27 }
 0x4d9   : > { %2963 = vmatpush1.bf16.msra.mxu0 %v18155_v16 }
 0x4da   : > { %17652 = vmatprep.subr.bf16.mxu0 %v19507_v8 }
 0x4dc   : > { %15727 = vmatmul.mubr.msk.bf16.vlgmr.msra.gmra.mxu0 %vm610_vm1, %v20242_v32 }
 0x4dd   : > { %2990 = vmatprep.mubr.bf16.mxu0 %v19506_v2 }
 0x4e4   : > { %15728 = vmatmul.mubr.msk.bf16.gmra.mxu0 %vm610_vm1, %v2880_v31 }
 0x4e5   : > { %17656 = vmatprep.mubr.msk.bf16.mxu0 %vm19508_vm7, %v19507_v8 }
 0x554   : > { %v2271_v28 = vpop.f32.mrf.mxu0 }
 0x555   : > { %2278 = vst.msk [vmem:[#allocation2] sm:$0x1] %vm2277_vm14, %v2271_v28 }
 0x556   : > { %2281 = vst.msk [vmem:[#allocation2 + $0x7] sm:$0x2] %vm2280_vm15, %v2271_v28  ;;  %v17650_v29 = vpop.f32.mrf.mxu0 }
 0x557   : > { %2284 = vst.msk [vmem:[#allocation2 + $0xe] sm:$0x4] %vm2283_vm3, %v2271_v28  ;;  %v2854_v29 = vpop.f32.mrf.mxu1 }
 0x558   : > { %2287 = vst.msk [vmem:[#allocation2 + $0x15] sm:$0x8] %vm2286_vm0, %v2271_v28  ;;  %v2274_v30 = vpop.f32.mrf.mxu0 }
 0x559   : > { %2290 = vst.msk [vmem:[#allocation2 + $0x1c] sm:$0x10] %vm2289_vm5, %v2271_v28 }
 0x55a   : > { %v17651_v31 = vpop.f32.mrf.mxu0 }
 0x56c   : > { %v2441_v32 = vpop.f32.mrf.mxu0 }
 0x56d   : > { %v2559_v61 = vadd.f32 %v2558_v33, %v2441_v32 }
 0x56e   : > { %v2443_v34 = vpop.f32.mrf.mxu0 }
 0x56f   : > { %v2561_v60 = vadd.f32 %v2560_v36, %v2443_v34 }
 0x570   : > { %v2445_v35 = vpop.f32.mrf.mxu0 }
 0x571   : > { %v2563_v62 = vadd.f32 %v2562_v38, %v2445_v35 }
 0x572   : > { %v2447_v37 = vpop.f32.mrf.mxu0 }
 0x573   : > { %v2565_v4 = vadd.f32 %v2564_v40, %v2447_v37 }
 0x574   : > { %v2451_v39 = vpop.f32.mrf.mxu0 }
 0x575   : > { %v2569_v19 = vadd.f32 %v2568_v42, %v2451_v39 }
 0x576   : > { %v2453_v41 = vpop.f32.mrf.mxu0 }
 0x577   : > { %v2571_v16 = vadd.f32 %v2570_v44, %v2453_v41  ;;  %v2856_v41 = vpop.f32.mrf.mxu1 }
 0x578   : > { %v2455_v43 = vpop.f32.mrf.mxu0 }
 0x579   : > { %v2573_v23 = vadd.f32 %v2572_v46, %v2455_v43 }
 0x57a   : > { %v2457_v45 = vpop.f32.mrf.mxu0 }
 0x57b   : > { %v2575_v27 = vadd.f32 %v2574_v50, %v2457_v45 }
 0x584   : > { %v2694_v48 = vpop.f32.mrf.mxu0 }
 0x585   : > { %v2713_v0 = vadd.f32 %v2694_v48, %v2559_v61 }
 0x586   : > { %v2696_v49 = vpop.f32.mrf.mxu0 }
 0x587   : > { %v2714_v63 = vadd.f32 %v2696_v49, %v2561_v60  ;;  %v2859_v13 = vadd.f32 %v2840_v53, %v2713_v0 }
 0x588   : > { %v2698_v52 = vpop.f32.mrf.mxu0 }
 0x589   : > { %v2715_v5 = vadd.f32 %v2698_v52, %v2563_v62  ;;  %v2860_v9 = vadd.f32 %v2842_v51, %v2714_v63 }
 0x58a   : > { %v2700_v47 = vpop.f32.mrf.mxu0 }
 0x58b   : > { %v2716_v10 = vadd.f32 %v2700_v47, %v2565_v4  ;;  %v2861_v17 = vadd.f32 %v2844_v55, %v2715_v5  ;;  %v3250_v5 = vld [vmem:[%s24117_s5 + $0x50] sm:$0x33] }
 0x58c   : > { %v2704_v54 = vpop.f32.mrf.mxu0 }
 0x58d   : > { %v2862_v24 = vadd.f32 %v2846_v58, %v2716_v10  ;;  %v2717_v28 = vadd.f32 %v2704_v54, %v2569_v19  ;;  %v18174_v10 = vld [vmem:[%s24117_s5 + $0x44] ss:$8 sps:$4 sm:$0xff]  }
 0x58e   : > { %v2706_v57 = vpop.f32.mrf.mxu0 }
 0x58f   : > { %v2718_v25 = vadd.f32 %v2706_v57, %v2571_v16  ;;  %v2863_v40 = vadd.f32 %v2850_v1, %v2717_v28  ;;  %v18185_v16 = vld [vmem:[%s24117_s5 + $0x24] ss:$8 sps:$4 sm:$0xff]  }
 0x590   : > { %v2708_v59 = vpop.f32.mrf.mxu0  ;;  %v15754_v28 = vld [vmem:[%s24117_s5 + $0xa8] sm:$0x33] }
 0x591   : > { %v2719_v31 = vadd.f32 %v2708_v59, %v2573_v23  ;;  %v2864_v37 = vadd.f32 %v2852_v14, %v2718_v25  ;;  %v18179_v14 = vld [vmem:[%s24117_s5 + $0x34] ss:$8 sps:$4 sm:$0xff]  }
 0x592   : > { %v2710_v3 = vpop.f32.mrf.mxu0 }
 0x593   : > { %v2720_v38 = vadd.f32 %v2710_v3, %v2575_v27  ;;  %v2865_v44 = vadd.f32 %v2854_v29, %v2719_v31  ;;  %v15765_v31 = vcombine.low %v15754_v28, %v15754_v28 }
 0x595   : > { %v2866_v53 = vadd.f32 %v2856_v41, %v2720_v38  ;;  %v18186_v38 = vld [vmem:[%s24117_s5 + $0x88] ss:$8 sps:$4 sm:$0xff]   ;;  %v18197_v41 = vld [vmem:[%s24117_s5 + $0x4] ss:$8 sps:$4 sm:$0xff]  }
 0x59c   : > { %v2982_v6 = vpop.f32.mrf.mxu0 }
 0x59d   : > { %v3001_v20 = vadd.f32 %v2982_v6, %v2859_v13  ;;  %v15780_v6 = vcombine.high %v3250_v5, %v3250_v5  ;;  %v18172_v13 = vld [vmem:[%s24117_s5 + $0x40] ss:$8 sps:$4 sm:$0xff]  }
 0x59e   : > { %v2984_v15 = vpop.f32.mrf.mxu0 }
 0x59f   : > { %v3002_v18 = vadd.f32 %v2984_v15, %v2860_v9  ;;  %v3021_v35 = vadd.f32 %v3014_v21, %v3001_v20  ;;  %v15779_v9 = vcombine.low %v3250_v5, %v3250_v5  ;;  %15781 = vmatprep.subr.msk.bf16.mxu1 %vm1549_vm8, %v15780_v6  ;;  %v18177_v15 = vld [vmem:[%s24117_s5 + $0x30] ss:$8 sps:$4 sm:$0xff]   ;;  %v18216_v5 = vld [vmem:[%s24117_s5 + $0xf4] ss:$8 sps:$4 sm:$0xff]  }
 0x5a0   : > { %v2986_v22 = vpop.f32.mrf.mxu0  ;;  %v18211_v6 = vld [vmem:[%s24117_s5 + $0x138] ss:$8 sps:$4 sm:$0xff]  }
 0x5a1   : > { %v3003_v26 = vadd.f32 %v2986_v22, %v2861_v17  ;;  %v3022_v32 = vadd.f32 %v3018_v56, %v3002_v18  ;;  %v3029_v49 = vmax.f32 %v3021_v35, 0.0  ;;  %v3434_v11 = vsel %vm1549_vm8, %v15779_v9, 0  ;;  %v18183_v17 = vld [vmem:[%s24117_s5 + $0x20] ss:$8 sps:$4 sm:$0xff]   ;;  %v18191_v18 = vld [vmem:[%s24117_s5 + $0x14] ss:$8 sps:$4 sm:$0xff]  }
 0x5a2   : > { %v2988_v30 = vpop.f32.mrf.mxu0  ;;  %v18182_v35 = vld [vmem:[%s24117_s5 + $0x9c] ss:$8 sps:$4 sm:$0xff]   ;;  %v18219_v9 = vld [vmem:[%s24117_s5 + $0x12c] ss:$8 sps:$4 sm:$0xff]  }
 0x5a3   : > { %v3023_v33 = vadd.f32 %v3014_v21, %v3003_v26  ;;  %v3004_v34 = vadd.f32 %v2988_v30, %v2862_v24  ;;  %v3030_v46 = vmax.f32 %v3022_v32, 0.0  ;;  %v15766_v30 = vcombine.high %v15754_v28, %v15754_v28 }
 0x5a4   : > { %v2992_v36 = vpop.f32.mrf.mxu0 }
 0x5a5   : > { %v3024_v39 = vadd.f32 %v3018_v56, %v3004_v34  ;;  %v3031_v42 = vmax.f32 %v3023_v33, 0.0  ;;  %v3005_v50 = vadd.f32 %v2992_v36, %v2863_v40  ;;  %v18169_v33 = vld [vmem:[%s24115_s3] sm:$0x7f]   ;;  %v3328_v34 = vsel %vm1549_vm8, %v15765_v31, 0 }
 0x5a6   : > { %v2994_v43 = vpop.f32.mrf.mxu0  ;;  %v18180_v36 = vld [vmem:[%s24117_s5 + $0x98] ss:$8 sps:$4 sm:$0xff]  }
 0x5a7   : > { %v3032_v48 = vmax.f32 %v3024_v39, 0.0  ;;  %v3006_v45 = vadd.f32 %v2994_v43, %v2864_v37  ;;  %v3037_v54 = vpack.c.bf16 %v3031_v42, %v3029_v49  ;;  %v3025_v60 = vadd.f32 %v3014_v21, %v3005_v50  ;;  %v18188_v37 = vld [vmem:[%s24117_s5 + $0x8c] ss:$8 sps:$4 sm:$0xff]   ;;  %v18194_v39 = vld [vmem:[%s24117_s5 + $0x7c] ss:$8 sps:$4 sm:$0xff]  }
 0x5a8   : > { %v2996_v52 = vpop.f32.mrf.mxu0  ;;  %v18192_v40 = vld [vmem:[%s24117_s5 + $0x78] ss:$8 sps:$4 sm:$0xff]   ;;  %v18200_v43 = vld [vmem:[%s24117_s5 + $0x6c] ss:$8 sps:$4 sm:$0xff]  }
 0x5a9   : > { %v3038_v47 = vpack.c.bf16 %v3032_v48, %v3030_v46  ;;  %v3007_v51 = vadd.f32 %v2996_v52, %v2865_v44  ;;  %v3026_v57 = vadd.f32 %v3018_v56, %v3006_v45  ;;  %v3033_v1 = vmax.f32 %v3025_v60, 0.0  ;;  %v18195_v42 = vld [vmem:[%s24117_s5] ss:$8 sps:$4 sm:$0xff]   ;;  %v15818_v46 = vld [vmem:[%s24117_s5 + $0x158] sm:$0x33] }
 0x5aa   : > { %v2998_v55 = vpop.f32.mrf.mxu0  ;;  %v18198_v44 = vld [vmem:[%s24117_s5 + $0x68] ss:$8 sps:$4 sm:$0xff]   ;;  %v15830_v48 = vcombine.high %v15818_v46, %v15818_v46  ;;  %v18205_v45 = vld [vmem:[%s24117_s5 + $0x5c] ss:$8 sps:$4 sm:$0xff]   ;;  %v18203_v49 = vld [vmem:[%s24117_s5 + $0x58] ss:$8 sps:$4 sm:$0xff]  }
 0x5ab   : > { %v3027_v58 = vadd.f32 %v3014_v21, %v3007_v51  ;;  %v3008_v59 = vadd.f32 %v2998_v55, %v2866_v53  ;;  %15740 = vmatprep.mubr.msk.bf16.mxu1 %vm1341_vm6, %v3038_v47  ;;  %v3034_v63 = vmax.f32 %v3026_v57, 0.0  ;;  %v15793_v50 = vld [vmem:[%s24117_s5 + $0x100] sm:$0x33]  ;;  %v15829_v47 = vcombine.low %v15818_v46, %v15818_v46  ;;  %v18257_v46 = vld [vmem:[%s24120_s8 + $0x28] sm:$0xff]  }
 0x5ac   : > { %3167 = vmatmul.mubr.bf16.vlgmr.msra.gmra.mxu1 %v3037_v54  ;;  %v15805_v52 = vcombine.high %v15793_v50, %v15793_v50 }
 0x5ad   : > { %v3028_v61 = vadd.f32 %v3018_v56, %v3008_v59  ;;  %v3035_v62 = vmax.f32 %v3027_v58, 0.0  ;;  %3444 = vmatpush1.bf16.msra.mxu1 %v3434_v11  ;;  %v18189_v56 = vld [vmem:[%s24117_s5 + $0x10] ss:$8 sps:$4 sm:$0xff]   ;;  %v3679_v57 = vsel %vm1549_vm8, %v15829_v47, 0  ;;  %v18208_v58 = vld [vmem:[%s24117_s5 + $0x14c] ss:$8 sps:$4 sm:$0xff]  }
 0x5ae   : > { %3445 = vmatprep.subr.bf16.mxu1 %v18174_v10  ;;  %v18214_v10 = vld [vmem:[%s24117_s5 + $0xf0] ss:$8 sps:$4 sm:$0xff]   ;;  %v18222_v11 = vld [vmem:[%s24117_s5 + $0xe4] ss:$8 sps:$4 sm:$0xff]  }
 0x5af   : > { %v3036_v0 = vmax.f32 %v3028_v61, 0.0  ;;  %v3039_v4 = vpack.c.bf16 %v3035_v62, %v3033_v1  ;;  %v15804_v61 = vcombine.low %v15793_v50, %v15793_v50  ;;  %v18206_v62 = vld [vmem:[%s24117_s5 + $0x148] ss:$8 sps:$4 sm:$0xff]   ;;  %v18213_v1 = vld [vmem:[%s24117_s5 + $0x13c] ss:$8 sps:$4 sm:$0xff]  }
 0x5b0   : > { %v18261_v50 = vld [vmem:[%s24120_s8 + $0x8] sm:$0xff]   ;;  %v18264_v47 = vld [vmem:[%s24120_s8 + $0x40] sm:$0xff]  }
 0x5b1   : > { %v3040_v3 = vpack.c.bf16 %v3036_v0, %v3034_v63  ;;  %3446 = vmatpush1.bf16.msra.mxu1 %v18172_v13  ;;  %v18217_v13 = vld [vmem:[%s24117_s5 + $0x128] ss:$8 sps:$4 sm:$0xff]  }
 0x5b2   : > { %3447 = vmatprep.subr.bf16.mxu1 %v18179_v14  ;;  %v18225_v14 = vld [vmem:[%s24117_s5 + $0x11c] ss:$8 sps:$4 sm:$0xff]  }
 0x5b3   : > { %15741 = vmatprep.mubr.msk.bf16.mxu1 %vm1341_vm6, %v3040_v3 }
 0x5b4   : > { %3175 = vmatmul.mubr.bf16.gmra.mxu1 %v3039_v4  ;;  %v3554_v4 = vsel %vm1549_vm8, %v15804_v61, 0 }
 0x5b5   : > { %3471 = vmatprep.mubr.bf16.mxu1 %v19506_v2  ;;  %3448 = vmatpush1.bf16.msra.mxu1 %v18177_v15  ;;  %v18220_v15 = vld [vmem:[%s24117_s5 + $0xe0] ss:$8 sps:$4 sm:$0xff]  }
 0x5b6   : > { %3449 = vmatprep.subr.bf16.mxu1 %v18185_v16  ;;  %v18228_v16 = vld [vmem:[%s24117_s5 + $0xd4] ss:$8 sps:$4 sm:$0xff]  }
 0x5b9   : > { %3450 = vmatpush1.bf16.msra.mxu1 %v18183_v17  ;;  %v18223_v17 = vld [vmem:[%s24117_s5 + $0x118] ss:$8 sps:$4 sm:$0xff]  }
 0x5ba   : > { %3451 = vmatprep.subr.bf16.mxu1 %v18191_v18  ;;  %v18231_v18 = vld [vmem:[%s24117_s5 + $0x10c] ss:$8 sps:$4 sm:$0xff]  }
 0x5bd   : > { %3452 = vmatpush1.bf16.msra.mxu1 %v18189_v56  ;;  %v18226_v56 = vld [vmem:[%s24117_s5 + $0xd0] ss:$8 sps:$4 sm:$0xff]  }
 0x5be   : > { %3453 = vmatprep.subr.bf16.mxu1 %v18197_v41  ;;  %v18252_v41 = vld [vmem:[%s24117_s5 + $0x160] ss:$8 sps:$4 sm:$0xff]  }
 0x5c1   : > { %3454 = vmatpush1.bf16.msra.mxu1 %v18195_v42 }
 0x5c2   : > { %15831 = vmatprep.subr.msk.bf16.mxu1 %vm1549_vm8, %v15830_v48  ;;  %v18258_v48 = vld [vmem:[%s24120_s8 + $0x20] sm:$0xff]  }
 0x66c   : > { %v3168_v19 = vpop.f32.mrf.mxu1 }
 0x66e   : > { %v3170_v20 = vpop.f32.mrf.mxu1 }
 0x66f   : > { %v18229_v20 = vld [vmem:[%s24117_s5 + $0x108] ss:$8 sps:$4 sm:$0xff]  }
 0x670   : > { %v3171_v21 = vpop.f32.mrf.mxu1 }
 0x671   : > { %v3185_v32 = vpack.c.bf16 %v3171_v21, %v3168_v19  ;;  %v18234_v19 = vld [vmem:[%s24117_s5 + $0xc4] ss:$8 sps:$4 sm:$0xff]  }
 0x672   : > { %v3173_v22 = vpop.f32.mrf.mxu1 }
 0x674   : > { %v3176_v23 = vpop.f32.mrf.mxu1 }
 0x676   : > { %v3178_v24 = vpop.f32.mrf.mxu1 }
 0x677   : > { %v18237_v24 = vld [vmem:[%s24117_s5 + $0xb4] ss:$8 sps:$4 sm:$0xff]  }
 0x678   : > { %v3179_v25 = vpop.f32.mrf.mxu1 }
 0x679   : > { %v3186_v26 = vpack.c.bf16 %v3179_v25, %v3176_v23  ;;  %v18232_v23 = vld [vmem:[%s24117_s5 + $0xc0] ss:$8 sps:$4 sm:$0xff]   ;;  %v15843_v25 = vld [vmem:[%s24117_s5 + $0x1b0] sm:$0x33] }
 0x67a   : > { %v3181_v27 = vpop.f32.mrf.mxu1  ;;  %v15855_v28 = vcombine.high %v15843_v25, %v15843_v25 }
 0x67b   : > { %v3196_v29 = vsel %vm1094_vm4, %v3186_v26, 0  ;;  %v18235_v27 = vld [vmem:[%s24117_s5 + $0xb0] ss:$8 sps:$4 sm:$0xff]  }
 0x67c   : > { %17653 = vmatpush3.bf16.msra.mxu0 %v3196_v29  ;;  %v15854_v29 = vcombine.low %v15843_v25, %v15843_v25 }
 0x67d   : > { %17654 = vmatprep.subr.bf16.mxu0 %v19507_v8 }
 0x67e   : > { %v3802_v31 = vsel %vm1549_vm8, %v15854_v29, 0 }
 0x680   : > { %17655 = vmatpush3.bf16.msra.mxu0 %v3185_v32  ;;  %v18242_v32 = vld [vmem:[%s24117_s5 + $0x1a4] ss:$8 sps:$4 sm:$0xff]  }
 0x681   : > { %15767 = vmatprep.subr.msk.bf16.mxu0 %vm1549_vm8, %v15766_v30 }
 0x683   : > { %17657 = vmatmul.mubr.msk.bf16.vlgmr.msra.gmra.mxu0 %vm1410_vm9, %v18169_v33  ;;  %v18240_v33 = vld [vmem:[%s24117_s5 + $0x1a0] ss:$8 sps:$4 sm:$0xff]  }
 0x684   : > { %3338 = vmatpush1.bf16.msra.mxu0 %v3328_v34  ;;  %3365 = vmatprep.mubr.bf16.mxu0 %v19506_v2  ;;  %v18245_v34 = vld [vmem:[%s24117_s5 + $0x194] ss:$8 sps:$4 sm:$0xff]  }
 0x685   : > { %3339 = vmatprep.subr.bf16.mxu0 %v18182_v35  ;;  %v18243_v35 = vld [vmem:[%s24117_s5 + $0x190] ss:$8 sps:$4 sm:$0xff]  }
 0x688   : > { %3340 = vmatpush1.bf16.msra.mxu0 %v18180_v36  ;;  %v18248_v36 = vld [vmem:[%s24117_s5 + $0x184] ss:$8 sps:$4 sm:$0xff]  }
 0x689   : > { %3341 = vmatprep.subr.bf16.mxu0 %v18188_v37  ;;  %v18246_v37 = vld [vmem:[%s24117_s5 + $0x180] ss:$8 sps:$4 sm:$0xff]  }
 0x68c   : > { %3342 = vmatpush1.bf16.msra.mxu0 %v18186_v38  ;;  %v18251_v38 = vld [vmem:[%s24117_s5 + $0x174] ss:$8 sps:$4 sm:$0xff]  }
 0x68d   : > { %3343 = vmatprep.subr.bf16.mxu0 %v18194_v39  ;;  %v18249_v39 = vld [vmem:[%s24117_s5 + $0x170] ss:$8 sps:$4 sm:$0xff]  }
 0x690   : > { %3344 = vmatpush1.bf16.msra.mxu0 %v18192_v40  ;;  %v18254_v40 = vld [vmem:[%s24117_s5 + $0x164] ss:$8 sps:$4 sm:$0xff]  }
 0x691   : > { %3345 = vmatprep.subr.bf16.mxu0 %v18200_v43  ;;  %v18255_v43 = vld [vmem:[%s24120_s8 + $0x38] sm:$0xff]  }
 0x694   : > { %3346 = vmatpush1.bf16.msra.mxu0 %v18198_v44  ;;  %v18256_v44 = vld [vmem:[%s24120_s8 + $0x30] sm:$0xff]  }
 0x695   : > { %3347 = vmatprep.subr.bf16.mxu0 %v18205_v45  ;;  %v18259_v45 = vld [vmem:[%s24120_s8 + $0x18] sm:$0xff]  }
 0x698   : > { %3348 = vmatpush1.bf16.msra.mxu0 %v18203_v49  ;;  %v18260_v49 = vld [vmem:[%s24120_s8 + $0x10] sm:$0xff]  }
 0x699   : > { %15806 = vmatprep.subr.msk.bf16.mxu0 %vm1549_vm8, %v15805_v52  ;;  %v18262_v52 = vld [vmem:[%s24120_s8] sm:$0xff]  }
 0x743   : > { %v3232_v53 = vpop.f32.mrf.mxu0 }
 0x745   : > { %v17658_v51 = vpop.f32.mrf.mxu0 }
 0x747   : > { %v3235_v54 = vpop.f32.mrf.mxu0 }
 0x748   : > { %v20522_v55 = vpack.c.bf16 %v3235_v54, %v3232_v53  ;;  %v18263_v53 = vld [vmem:[%s24120_s8 + $0x48] sm:$0xff]  }
 0x749   : > { %v17659_v59 = vpop.f32.mrf.mxu0 }
 0x74a   : > { %v3265_v60 = vshll.u32 %v20522_v55, 16  ;;  %15782 = vmatmul.mubr.msk.bf16.vlgmr.msra.gmra.mxu1 %vm1545_vm10, %v20522_v55  ;;  %v3263_v63 = vshrl.u32 %v20522_v55, 16  ;;  %v3494_v30 = vrot.slane %v20522_v55, 1  ;;  %v3742_v42 = vrot.slane %v20522_v55, 2 }
 0x74b   : > { %3689 = vmatpush1.bf16.msra.mxu1 %v3679_v57  ;;  %3716 = vmatprep.mubr.bf16.mxu1 %v19506_v2 }
 0x74c   : > { %3690 = vmatprep.subr.bf16.mxu1 %v18208_v58  ;;  %v3267_v0 = vrot.slane %v3265_v60, 1  ;;  %v3617_v21 = vrot.slane %v3263_v63, 1  ;;  %v3618_v22 = vrot.slane %v3265_v60, 2 }
 0x74e   : > { %v3268_v3 = vor.u32 %v3267_v0, %v3263_v63  ;;  %v3619_v26 = vor.u32 %v3618_v22, %v3617_v21 }
 0x74f   : > { %3691 = vmatpush1.bf16.msra.mxu1 %v18206_v62 }
 0x750   : > { %15768 = vmatmul.mubr.msk.bf16.vlgmr.msra.gmra.mxu0 %vm1545_vm10, %v3268_v3  ;;  %3692 = vmatprep.subr.bf16.mxu1 %v18213_v1 }
 0x751   : > { %3564 = vmatpush1.bf16.msra.mxu0 %v3554_v4  ;;  %3591 = vmatprep.mubr.bf16.mxu0 %v19506_v2 }
 0x752   : > { %3565 = vmatprep.subr.bf16.mxu0 %v18216_v5 }
 0x753   : > { %3693 = vmatpush1.bf16.msra.mxu1 %v18211_v6 }
 0x754   : > { %3694 = vmatprep.subr.bf16.mxu1 %v18219_v9 }
 0x755   : > { %3566 = vmatpush1.bf16.msra.mxu0 %v18214_v10 }
 0x756   : > { %3567 = vmatprep.subr.bf16.mxu0 %v18222_v11 }
 0x757   : > { %3695 = vmatpush1.bf16.msra.mxu1 %v18217_v13 }
 0x758   : > { %3696 = vmatprep.subr.bf16.mxu1 %v18225_v14 }
 0x759   : > { %3568 = vmatpush1.bf16.msra.mxu0 %v18220_v15 }
 0x75a   : > { %3569 = vmatprep.subr.bf16.mxu0 %v18228_v16 }
 0x75b   : > { %3697 = vmatpush1.bf16.msra.mxu1 %v18223_v17 }
 0x75c   : > { %3698 = vmatprep.subr.bf16.mxu1 %v18231_v18  ;;  %v3854_v18 = vld [vmem:[%s24118_s6] sm:$0x3] }
 0x75d   : > { %3570 = vmatpush1.bf16.msra.mxu0 %v18226_v56  ;;  %v3863_v22 = vrot.slane %v3854_v18, %v19870_v7 }
 0x75e   : > { %3571 = vmatprep.subr.bf16.mxu0 %v18234_v19 }
 0x75f   : > { %3699 = vmatpush1.bf16.msra.mxu1 %v18229_v20 }
 0x760   : > { %3959 = vmatprep.subr.bf16.mxu1 %v19506_v2 }
 0x761   : > { %3572 = vmatpush1.bf16.msra.mxu0 %v18232_v23 }
 0x762   : > { %15832 = vmatmul.mubr.msk.bf16.vlgmr.msra.gmra.mxu1 %vm1545_vm10, %v3619_v26  ;;  %3573 = vmatprep.subr.bf16.mxu0 %v18237_v24  ;;  %v3859_v26 = vrot.slane %v3854_v18, %v19875_v12 }
 0x763   : > { %3960 = vmatpush1.bf16.msra.mxu1 %v18255_v43  ;;  %v18285_v43 = vld [vmem:[%s24113_s1 + $0x114] ss:$8 sps:$4 sm:$0xff]  }
 0x764   : > { %3961 = vmatprep.subr.bf16.mxu1 %v19506_v2 }
 0x765   : > { %3574 = vmatpush1.bf16.msra.mxu0 %v18235_v27 }
 0x766   : > { %15856 = vmatprep.subr.msk.bf16.mxu0 %vm1549_vm8, %v15855_v28 }
 0x767   : > { %3962 = vmatpush1.bf16.msra.mxu1 %v18256_v44  ;;  %v18293_v44 = vld [vmem:[%s24113_s1 + $0x104] ss:$8 sps:$4 sm:$0xff]  }
 0x768   : > { %15807 = vmatmul.mubr.msk.bf16.vlgmr.msra.gmra.mxu0 %vm1545_vm10, %v3494_v30  ;;  %3963 = vmatprep.subr.bf16.mxu1 %v19506_v2 }
 0x769   : > { %3812 = vmatpush1.bf16.msra.mxu0 %v3802_v31  ;;  %3839 = vmatprep.mubr.bf16.mxu0 %v19506_v2 }
 0x76a   : > { %3813 = vmatprep.subr.bf16.mxu0 %v18242_v32 }
 0x76b   : > { %3964 = vmatpush1.bf16.msra.mxu1 %v18257_v46  ;;  %v18291_v46 = vld [vmem:[%s24113_s1 + $0x100] ss:$8 sps:$4 sm:$0xff]  }
 0x76c   : > { %3965 = vmatprep.subr.bf16.mxu1 %v19506_v2 }
 0x76d   : > { %3814 = vmatpush1.bf16.msra.mxu0 %v18240_v33 }
 0x76e   : > { %3815 = vmatprep.subr.bf16.mxu0 %v18245_v34 }
 0x76f   : > { %3966 = vmatpush1.bf16.msra.mxu1 %v18258_v48  ;;  %v18297_v48 = vld [vmem:[%s24113_s1 + $0xf0] ss:$8 sps:$4 sm:$0xff]  }
 0x770   : > { %3967 = vmatprep.subr.bf16.mxu1 %v19506_v2 }
 0x771   : > { %3816 = vmatpush1.bf16.msra.mxu0 %v18243_v35 }
 0x772   : > { %3817 = vmatprep.subr.bf16.mxu0 %v18248_v36 }
 0x773   : > { %3968 = vmatpush1.bf16.msra.mxu1 %v18259_v45  ;;  %v18299_v45 = vld [vmem:[%s24113_s1 + $0xf4] ss:$8 sps:$4 sm:$0xff]  }
 0x774   : > { %3969 = vmatprep.subr.bf16.mxu1 %v19506_v2 }
 0x775   : > { %3818 = vmatpush1.bf16.msra.mxu0 %v18246_v37 }
 0x776   : > { %3819 = vmatprep.subr.bf16.mxu0 %v18251_v38 }
 0x777   : > { %3970 = vmatpush1.bf16.msra.mxu1 %v18260_v49  ;;  %v18303_v49 = vld [vmem:[%s24113_s1 + $0xe0] ss:$8 sps:$4 sm:$0xff]  }
 0x778   : > { %3971 = vmatprep.subr.bf16.mxu1 %v19506_v2 }
 0x779   : > { %3820 = vmatpush1.bf16.msra.mxu0 %v18249_v39 }
 0x77a   : > { %3821 = vmatprep.subr.bf16.mxu0 %v18254_v40 }
 0x77b   : > { %3972 = vmatpush1.bf16.msra.mxu1 %v18261_v50  ;;  %v18305_v50 = vld [vmem:[%s24113_s1 + $0xe4] ss:$8 sps:$4 sm:$0xff]  }
 0x77c   : > { %3973 = vmatprep.subr.bf16.mxu1 %v19506_v2 }
 0x77d   : > { %3822 = vmatpush1.bf16.msra.mxu0 %v18252_v41 }
 0x77e   : > { %17660 = vmatprep.subr.bf16.mxu0 %v19507_v8 }
 0x77f   : > { %3974 = vmatpush1.bf16.msra.mxu1 %v18262_v52  ;;  %v18309_v52 = vld [vmem:[%s24113_s1 + $0xd0] ss:$8 sps:$4 sm:$0xff]  }
 0x780   : > { %15857 = vmatmul.mubr.msk.bf16.vlgmr.msra.gmra.mxu0 %vm1545_vm10, %v3742_v42  ;;  %3987 = vmatprep.subr.bf16.mxu1 %v19506_v2  ;;  %v18283_v42 = vld [vmem:[%s24113_s1 + $0x110] ss:$8 sps:$4 sm:$0xff]  }
 0x781   : > { %17662 = vmatprep.mubr.msk.bf16.mxu0 %vm19508_vm7, %v19507_v8 }
 0x783   : > { %3988 = vmatpush2.bf16.msra.mxu1 %v18263_v53  ;;  %v18311_v53 = vld [vmem:[%s24113_s1 + $0xd4] ss:$8 sps:$4 sm:$0xff]  }
 0x784   : > { %3989 = vmatprep.subr.bf16.mxu1 %v19506_v2 }
 0x787   : > { %3990 = vmatpush2.bf16.msra.mxu1 %v18264_v47  ;;  %v18315_v47 = vld [vmem:[%s24113_s1 + $0xc0] ss:$8 sps:$4 sm:$0xff]  }
 0x788   : > { %4426 = vmatprep.subr.bf16.mxu1 %v18285_v43 }
 0x80a   : > { %v3473_v55 = vpop.f32.mrf.mxu1 }
 0x80c   : > { %v3475_v58 = vpop.f32.mrf.mxu1 }
 0x80e   : > { %v3477_v60 = vpop.f32.mrf.mxu1 }
 0x810   : > { %v3367_v51 = vpop.f32.mrf.mxu0  ;;  %v3479_v62 = vpop.f32.mrf.mxu1 }
 0x811   : > { %v3474_v4 = vadd.f32 %v3473_v55, %v3367_v51  ;;  %v18317_v51 = vld [vmem:[%s24113_s1 + $0xc4] ss:$8 sps:$4 sm:$0xff]  }
 0x812   : > { %v3369_v54 = vpop.f32.mrf.mxu0  ;;  %v20724_v55 = vld [vmem:[%s19662_s25 + $0x28] sm:$0xff]  }
 0x813   : > { %v3476_v3 = vadd.f32 %v3475_v58, %v3369_v54  ;;  %v20721_v54 = vld [vmem:[%s19662_s25 + $0x20] sm:$0xff]   ;;  %v18323_v58 = vld [vmem:[%s24113_s1 + $0x1d4] ss:$8 sps:$4 sm:$0xff]   ;;  %v4100_v43 = vshrl.u32 %v20724_v55, 16 }
 0x814   : > { %v3371_v57 = vpop.f32.mrf.mxu0 }
 0x815   : > { %v3478_v6 = vadd.f32 %v3477_v60, %v3371_v57  ;;  %v18321_v57 = vld [vmem:[%s24113_s1 + $0x1d0] ss:$8 sps:$4 sm:$0xff]   ;;  %v4354_v60 = vrot.slane %v20724_v55, 1 }
 0x816   : > { %v3373_v59 = vpop.f32.mrf.mxu0 }
 0x817   : > { %v3480_v13 = vadd.f32 %v3479_v62, %v3373_v59  ;;  %v4353_v59 = vrot.slane %v20721_v54, 1  ;;  %v18329_v62 = vld [vmem:[%s24113_s1 + $0x1c4] ss:$8 sps:$4 sm:$0xff]  }
 0x822   : > { %v3718_v0 = vpop.f32.mrf.mxu1 }
 0x824   : > { %v3720_v5 = vpop.f32.mrf.mxu1 }
 0x826   : > { %v3722_v15 = vpop.f32.mrf.mxu1 }
 0x828   : > { %v3593_v61 = vpop.f32.mrf.mxu0  ;;  %v3724_v24 = vpop.f32.mrf.mxu1 }
 0x829   : > { %v3602_v10 = vadd.f32 %v3593_v61, %v3474_v4  ;;  %v4355_v61 = vsel %vm802_vm2, %v4353_v59, %v4354_v60  ;;  %v18339_v4 = vld [vmem:[%s24113_s1 + $0x1a0] ss:$8 sps:$4 sm:$0xff]   ;;  %v18332_v59 = vld [vmem:[%s24113_s1 + $0x164] ss:$8 sps:$4 sm:$0xff]  }
 0x82a   : > { %v3595_v63 = vpop.f32.mrf.mxu0 }
 0x82b   : > { %v3603_v9 = vadd.f32 %v3595_v63, %v3476_v3  ;;  %v3727_v19 = vadd.f32 %v3718_v0, %v3602_v10  ;;  %v18327_v63 = vld [vmem:[%s24113_s1 + $0x1c0] ss:$8 sps:$4 sm:$0xff]   ;;  %v18333_v0 = vld [vmem:[%s24113_s1 + $0x1b0] ss:$8 sps:$4 sm:$0xff]   ;;  %v18341_v3 = vld [vmem:[%s24113_s1 + $0x1a4] ss:$8 sps:$4 sm:$0xff]  }
 0x82c   : > { %v3597_v1 = vpop.f32.mrf.mxu0  ;;  %v18353_v10 = vld [vmem:[%s24113_s1 + $0x184] ss:$8 sps:$4 sm:$0xff]  }
 0x82d   : > { %v3604_v14 = vadd.f32 %v3597_v1, %v3478_v6  ;;  %v3728_v56 = vadd.f32 %v3720_v5, %v3603_v9  ;;  %v18335_v1 = vld [vmem:[%s24113_s1 + $0x1b4] ss:$8 sps:$4 sm:$0xff]   ;;  %v18345_v5 = vld [vmem:[%s24113_s1 + $0x190] ss:$8 sps:$4 sm:$0xff]   ;;  %v18351_v9 = vld [vmem:[%s24113_s1 + $0x180] ss:$8 sps:$4 sm:$0xff]  }
 0x82e   : > { %v3599_v11 = vpop.f32.mrf.mxu0  ;;  %v18347_v6 = vld [vmem:[%s24113_s1 + $0x194] ss:$8 sps:$4 sm:$0xff]  }
 0x82f   : > { %v3605_v17 = vadd.f32 %v3599_v11, %v3480_v13  ;;  %v3729_v23 = vadd.f32 %v3722_v15, %v3604_v14  ;;  %v4641_v11 = vrot.slane %v20721_v54, 2  ;;  %v4642_v13 = vrot.slane %v20724_v55, 2 }
 0x831   : > { %v3730_v29 = vadd.f32 %v3724_v24, %v3605_v17  ;;  %v4643_v14 = vsel %vm1094_vm4, %v4641_v11, %v4642_v13  ;;  %v18268_v24 = vld [vmem:[%s24113_s1 + $0xa0] ss:$8 sps:$4 sm:$0xff]  }
 0x840   : > { %v3841_v16 = vpop.f32.mrf.mxu0 }
 0x841   : > { %v3850_v25 = vadd.f32 %v3841_v16, %v3727_v19 }
 0x842   : > { %v3843_v20 = vpop.f32.mrf.mxu0 }
 0x843   : > { %v3851_v21 = vadd.f32 %v3843_v20, %v3728_v56  ;;  %v3866_v34 = vadd.f32 %v3859_v26, %v3850_v25  ;;  %v18267_v56 = vld [vmem:[%s24113_s1 + $0xb4] ss:$8 sps:$4 sm:$0xff]  }
 0x844   : > { %v3845_v27 = vpop.f32.mrf.mxu0  ;;  %v18273_v25 = vld [vmem:[%s24113_s1 + $0x94] ss:$8 sps:$4 sm:$0xff]  }
 0x845   : > { %v3852_v28 = vadd.f32 %v3845_v27, %v3729_v23  ;;  %v3867_v31 = vadd.f32 %v3863_v22, %v3851_v21  ;;  %v3870_v39 = vmax.f32 %v3866_v34, 0.0  ;;  %v4000_v21 = vld [vmem:[%s24119_s7] sm:$0x7]  ;;  %v18270_v23 = vld [vmem:[%s24113_s1 + $0xa4] ss:$8 sps:$4 sm:$0xff]   ;;  %v4096_v34 = vshll.u32 %v20724_v55, 16 }
 0x846   : > { %v3847_v30 = vpop.f32.mrf.mxu0  ;;  %v18276_v27 = vld [vmem:[%s24113_s1 + $0x84] ss:$8 sps:$4 sm:$0xff]  }
 0x847   : > { %v3868_v32 = vadd.f32 %v3859_v26, %v3852_v28  ;;  %v3853_v33 = vadd.f32 %v3847_v30, %v3730_v29  ;;  %v3871_v37 = vmax.f32 %v3867_v31, 0.0  ;;  %v18271_v26 = vld [vmem:[%s24113_s1 + $0x90] ss:$8 sps:$4 sm:$0xff]   ;;  %v18274_v28 = vld [vmem:[%s24113_s1 + $0x80] ss:$8 sps:$4 sm:$0xff]   ;;  %v4091_v29 = vshll.u32 %v20721_v54, 16 }
 0x848   : > { %v18279_v30 = vld [vmem:[%s24113_s1 + $0x74] ss:$8 sps:$4 sm:$0xff]   ;;  %v18277_v31 = vld [vmem:[%s24113_s1 + $0x70] ss:$8 sps:$4 sm:$0xff]  }
 0x849   : > { %v3869_v35 = vadd.f32 %v3863_v22, %v3853_v33  ;;  %v3872_v36 = vmax.f32 %v3868_v32, 0.0  ;;  %v18265_v22 = vld [vmem:[%s24113_s1 + $0xb0] ss:$8 sps:$4 sm:$0xff]   ;;  %v4089_v32 = vshrl.u32 %v20721_v54, 16  ;;  %v4093_v33 = vrot.slane %v4091_v29, 1 }
 0x84b   : > { %v3873_v38 = vmax.f32 %v3869_v35, 0.0  ;;  %v3874_v41 = vpack.c.bf16 %v3872_v36, %v3870_v39  ;;  %v18282_v35 = vld [vmem:[%s24113_s1 + $0x64] ss:$8 sps:$4 sm:$0xff]   ;;  %v18280_v36 = vld [vmem:[%s24113_s1 + $0x60] ss:$8 sps:$4 sm:$0xff]  }
 0x84c   : > { %v18290_v39 = vld [vmem:[%s24113_s1 + $0x54] ss:$8 sps:$4 sm:$0xff]  }
 0x84d   : > { %v3875_v40 = vpack.c.bf16 %v3873_v38, %v3871_v37  ;;  %v4094_v37 = vor.u32 %v4093_v33, %v4089_v32  ;;  %v4098_v38 = vrot.slane %v4096_v34, 1 }
 0x84f   : > { %15868 = vmatprep.mubr.msk.bf16.mxu1 %vm2182_vm11, %v3875_v40 }
 0x850   : > { %3992 = vmatmul.mubr.bf16.vlgmr.msra.gmra.mxu1 %v3874_v41  ;;  %v18288_v41 = vld [vmem:[%s24113_s1 + $0x50] ss:$8 sps:$4 sm:$0xff]  }
 0x851   : > { %4454 = vmatprep.mubr.bf16.mxu1 %v19506_v2  ;;  %4427 = vmatpush1.bf16.msra.mxu1 %v18283_v42  ;;  %v18296_v42 = vld [vmem:[%s24113_s1 + $0x44] ss:$8 sps:$4 sm:$0xff]  }
 0x852   : > { %4428 = vmatprep.subr.bf16.mxu1 %v18293_v44  ;;  %v18294_v44 = vld [vmem:[%s24113_s1 + $0x40] ss:$8 sps:$4 sm:$0xff]  }
 0x855   : > { %4429 = vmatpush1.bf16.msra.mxu1 %v18291_v46  ;;  %v18302_v46 = vld [vmem:[%s24113_s1 + $0x34] ss:$8 sps:$4 sm:$0xff]  }
 0x856   : > { %4430 = vmatprep.subr.bf16.mxu1 %v18299_v45  ;;  %v18300_v45 = vld [vmem:[%s24113_s1 + $0x30] ss:$8 sps:$4 sm:$0xff]  }
 0x859   : > { %4431 = vmatpush1.bf16.msra.mxu1 %v18297_v48  ;;  %v4102_v48 = vor.u32 %v4100_v43, %v4098_v38 }
 0x85a   : > { %4432 = vmatprep.subr.bf16.mxu1 %v18305_v50  ;;  %v18306_v50 = vld [vmem:[%s24113_s1 + $0x20] ss:$8 sps:$4 sm:$0xff]  }
 0x85d   : > { %4433 = vmatpush1.bf16.msra.mxu1 %v18303_v49  ;;  %v18308_v49 = vld [vmem:[%s24113_s1 + $0x24] ss:$8 sps:$4 sm:$0xff]  }
 0x85e   : > { %4434 = vmatprep.subr.bf16.mxu1 %v18311_v53  ;;  %v18312_v53 = vld [vmem:[%s24113_s1 + $0x10] ss:$8 sps:$4 sm:$0xff]  }
 0x861   : > { %4435 = vmatpush1.bf16.msra.mxu1 %v18309_v52  ;;  %v18314_v52 = vld [vmem:[%s24113_s1 + $0x14] ss:$8 sps:$4 sm:$0xff]  }
 0x862   : > { %4436 = vmatprep.subr.bf16.mxu1 %v18317_v51  ;;  %v18318_v51 = vld [vmem:[%s24113_s1] ss:$8 sps:$4 sm:$0xff]  }
 0x865   : > { %4437 = vmatpush1.bf16.msra.mxu1 %v18315_v47  ;;  %v18320_v47 = vld [vmem:[%s24113_s1 + $0x4] ss:$8 sps:$4 sm:$0xff]  }
 0x866   : > { %4714 = vmatprep.subr.bf16.mxu1 %v18323_v58  ;;  %v18324_v58 = vld [vmem:[%s24113_s1 + $0x170] ss:$8 sps:$4 sm:$0xff]  }
 0x868   : > { %15940 = vmatmul.mubr.msk.bf16.vlgmr.msra.gmra.mxu1 %vm610_vm1, %v4355_v61  ;;  %v18338_v61 = vld [vmem:[%s24113_s1 + $0x154] ss:$8 sps:$4 sm:$0xff]  }
 0x869   : > { %4715 = vmatpush1.bf16.msra.mxu1 %v18321_v57  ;;  %4464 = vmatprep.mubr.bf16.mxu1 %v19506_v2  ;;  %v18326_v57 = vld [vmem:[%s24113_s1 + $0x174] ss:$8 sps:$4 sm:$0xff]  }
 0x86a   : > { %4716 = vmatprep.subr.bf16.mxu1 %v18329_v62  ;;  %v18336_v62 = vld [vmem:[%s24113_s1 + $0x150] ss:$8 sps:$4 sm:$0xff]  }
 0x86d   : > { %4717 = vmatpush1.bf16.msra.mxu1 %v18327_v63  ;;  %v18344_v63 = vld [vmem:[%s24113_s1 + $0x144] ss:$8 sps:$4 sm:$0xff]  }
 0x86e   : > { %4718 = vmatprep.subr.bf16.mxu1 %v18335_v1  ;;  %v18350_v1 = vld [vmem:[%s24113_s1 + $0x134] ss:$8 sps:$4 sm:$0xff]  }
 0x870   : > { %15941 = vmatmul.mubr.msk.bf16.gmra.mxu1 %vm610_vm1, %v4354_v60  ;;  %v18330_v60 = vld [vmem:[%s24113_s1 + $0x160] ss:$8 sps:$4 sm:$0xff]  }
 0x871   : > { %4719 = vmatpush1.bf16.msra.mxu1 %v18333_v0  ;;  %4742 = vmatprep.mubr.bf16.mxu1 %v19506_v2  ;;  %v18342_v0 = vld [vmem:[%s24113_s1 + $0x140] ss:$8 sps:$4 sm:$0xff]  }
 0x872   : > { %4720 = vmatprep.subr.bf16.mxu1 %v18341_v3  ;;  %v4495_v3 = vrot.slane %v4089_v32, 1 }
 0x875   : > { %4721 = vmatpush1.bf16.msra.mxu1 %v18339_v4  ;;  %v4499_v4 = vrot.slane %v4096_v34, 2 }
 0x876   : > { %4722 = vmatprep.subr.bf16.mxu1 %v18347_v6  ;;  %v4496_v6 = vrot.slane %v4091_v29, 2 }
 0x878   : > { %v4497_v11 = vor.u32 %v4496_v6, %v4495_v3 }
 0x879   : > { %4723 = vmatpush1.bf16.msra.mxu1 %v18345_v5  ;;  %v4498_v5 = vrot.slane %v4100_v43, 1 }
 0x87a   : > { %4724 = vmatprep.subr.bf16.mxu1 %v18353_v10  ;;  %v18354_v10 = vld [vmem:[%s24113_s1 + $0x120] ss:$8 sps:$4 sm:$0xff]  }
 0x87d   : > { %4725 = vmatpush1.bf16.msra.mxu1 %v18351_v9  ;;  %v18356_v9 = vld [vmem:[%s24113_s1 + $0x124] ss:$8 sps:$4 sm:$0xff]  }
 0x87e   : > { %17666 = vmatprep.subr.bf16.mxu1 %v19507_v8 }
 0x880   : > { %15992 = vmatmul.mubr.msk.bf16.vlgmr.msra.gmra.mxu1 %vm610_vm1, %v4643_v14 }
 0x881   : > { %4752 = vmatprep.mubr.bf16.mxu1 %v19506_v2 }
 0x888   : > { %15993 = vmatmul.mubr.msk.bf16.gmra.mxu1 %vm610_vm1, %v4642_v13  ;;  %v4500_v13 = vor.u32 %v4499_v4, %v4498_v5 }
 0x889   : > { %17670 = vmatprep.mubr.msk.bf16.mxu1 %vm19508_vm7, %v19507_v8 }
 0x910   : > { %v3993_v15 = vpop.f32.mrf.mxu1 }
 0x912   : > { %v3995_v16 = vpop.f32.mrf.mxu1 }
 0x913   : > { %v18359_v16 = vld [vmem:[%s24116_s4 + $0x28] sm:$0xff]  }
 0x914   : > { %v3996_v17 = vpop.f32.mrf.mxu1 }
 0x915   : > { %v4001_v18 = vpack.c.bf16 %v3996_v17, %v3993_v15  ;;  %v18358_v15 = vld [vmem:[%s24116_s4 + $0x30] sm:$0xff]   ;;  %v18360_v17 = vld [vmem:[%s24116_s4 + $0x20] sm:$0xff]  }
 0x916   : > { %v3998_v19 = vpop.f32.mrf.mxu1 }
 0x917   : > { %v4006_v20 = vsel %vm2233_vm12, %v4001_v18, 0  ;;  %v18361_v18 = vld [vmem:[%s24116_s4 + $0x18] sm:$0xff]   ;;  %v18363_v19 = vld [vmem:[%s24116_s4 + $0x8] sm:$0xff]  }
 0x918   : > { %17661 = vmatpush3.bf16.msra.mxu0 %v4006_v20  ;;  %v18364_v20 = vld [vmem:[%s24116_s4] sm:$0xff]  }
 0x919   : > { %4173 = vmatprep.subr.bf16.mxu0 %v18267_v56  ;;  %v18362_v56 = vld [vmem:[%s24116_s4 + $0x10] sm:$0xff]  }
 0x91b   : > { %17663 = vmatmul.mubr.msk.bf16.vlgmr.msra.gmra.mxu0 %vm24131_vm13, %v4000_v21  ;;  %vm24132_vm13 = vsmask.f32 7424  ;;  %v18365_v21 = vld [vmem:[%s24116_s4 + $0x50] ss:$0 sps:$4 sm:$0xff]  }
 0x91c   : > { %4174 = vmatpush1.bf16.msra.mxu0 %v18265_v22  ;;  %4201 = vmatprep.mubr.bf16.mxu0 %v19506_v2  ;;  %v4099_v40 = vsel %vm24132_vm13, %v4094_v37, %v4098_v38  ;;  %vm24133_vm13 = vsmask.f32 6400 }
 0x91d   : > { %4175 = vmatprep.subr.bf16.mxu0 %v18270_v23  ;;  %v4501_v14 = vsel %vm24133_vm13, %v4497_v11, %v4500_v13  ;;  %vm24134_vm13 = vcmask 1043456   ;;  %v18366_v23 = vld [vmem:[%s24116_s4 + $0x48] sm:$0xff]  }
 0x91e   : > { %v4894_v22 = vsel %vm24134_vm13, %v18365_v21, 0  ;;  %vm24135_vm13 = vcmask 80896  }
 0x920   : > { %4176 = vmatpush1.bf16.msra.mxu0 %v18268_v24  ;;  %v18367_v24 = vld [vmem:[%s24116_s4 + $0x40] sm:$0xff]  }
 0x921   : > { %4177 = vmatprep.subr.bf16.mxu0 %v18273_v25 }
 0x924   : > { %4178 = vmatpush1.bf16.msra.mxu0 %v18271_v26 }
 0x925   : > { %4179 = vmatprep.subr.bf16.mxu0 %v18276_v27 }
 0x928   : > { %4180 = vmatpush1.bf16.msra.mxu0 %v18274_v28  ;;  %v4456_v33 = vpop.f32.mrf.mxu1 }
 0x929   : > { %4181 = vmatprep.subr.bf16.mxu0 %v18279_v30 }
 0x92c   : > { %4182 = vmatpush1.bf16.msra.mxu0 %v18277_v31 }
 0x92d   : > { %4183 = vmatprep.subr.bf16.mxu0 %v18282_v35  ;;  %v4458_v35 = vpop.f32.mrf.mxu1 }
 0x92f   : > { %v4460_v37 = vpop.f32.mrf.mxu1 }
 0x930   : > { %4184 = vmatpush1.bf16.msra.mxu0 %v18280_v36 }
 0x931   : > { %4290 = vmatprep.subr.bf16.mxu0 %v18290_v39  ;;  %v4462_v39 = vpop.f32.mrf.mxu1 }
 0x933   : > { %15900 = vmatmul.mubr.msk.bf16.vlgmr.msra.gmra.mxu0 %vm610_vm1, %v4099_v40 }
 0x934   : > { %4291 = vmatpush1.bf16.msra.mxu0 %v18288_v41  ;;  %4211 = vmatprep.mubr.bf16.mxu0 %v19506_v2  ;;  %v4466_v41 = vpop.f32.mrf.mxu1 }
 0x935   : > { %4292 = vmatprep.subr.bf16.mxu0 %v18296_v42 }
 0x938   : > { %4293 = vmatpush1.bf16.msra.mxu0 %v18294_v44  ;;  %v4468_v44 = vpop.f32.mrf.mxu1 }
 0x939   : > { %4294 = vmatprep.subr.bf16.mxu0 %v18302_v46 }
 0x93b   : > { %15901 = vmatmul.mubr.msk.bf16.gmra.mxu0 %vm610_vm1, %v4102_v48 }
 0x93c   : > { %4295 = vmatpush1.bf16.msra.mxu0 %v18300_v45  ;;  %4318 = vmatprep.mubr.bf16.mxu0 %v19506_v2  ;;  %v4470_v45 = vpop.f32.mrf.mxu1 }
 0x93d   : > { %4296 = vmatprep.subr.bf16.mxu0 %v18308_v49 }
 0x940   : > { %4297 = vmatpush1.bf16.msra.mxu0 %v18306_v50  ;;  %v4472_v50 = vpop.f32.mrf.mxu1 }
 0x941   : > { %4298 = vmatprep.subr.bf16.mxu0 %v18314_v52 }
 0x942   : > { %v4744_v52 = vpop.f32.mrf.mxu1 }
 0x944   : > { %4299 = vmatpush1.bf16.msra.mxu0 %v18312_v53 }
 0x945   : > { %4300 = vmatprep.subr.bf16.mxu0 %v18320_v47  ;;  %v4746_v47 = vpop.f32.mrf.mxu1 }
 0x948   : > { %4301 = vmatpush1.bf16.msra.mxu0 %v18318_v51 }
 0x949   : > { %4572 = vmatprep.subr.bf16.mxu0 %v18326_v57 }
 0x94b   : > { %15914 = vmatmul.mubr.msk.bf16.vlgmr.msra.gmra.mxu0 %vm610_vm1, %v20721_v54  ;;  %v18357_v54 = vld [vmem:[%s24116_s4 + $0x38] sm:$0xff]  }
 0x94c   : > { %4573 = vmatpush1.bf16.msra.mxu0 %v18324_v58  ;;  %4328 = vmatprep.mubr.bf16.mxu0 %v19506_v2  ;;  %v4748_v58 = vpop.f32.mrf.mxu1 }
 0x94d   : > { %4574 = vmatprep.subr.bf16.mxu0 %v18332_v59 }
 0x950   : > { %4575 = vmatpush1.bf16.msra.mxu0 %v18330_v60 }
 0x951   : > { %4576 = vmatprep.subr.bf16.mxu0 %v18338_v61 }
 0x953   : > { %15915 = vmatmul.mubr.msk.bf16.gmra.mxu0 %vm610_vm1, %v20724_v55  ;;  %v18348_v55 = vld [vmem:[%s24113_s1 + $0x130] ss:$8 sps:$4 sm:$0xff]  }
 0x954   : > { %4577 = vmatpush1.bf16.msra.mxu0 %v18336_v62  ;;  %4600 = vmatprep.mubr.bf16.mxu0 %v19506_v2 }
 0x955   : > { %4578 = vmatprep.subr.bf16.mxu0 %v18344_v63 }
 0x958   : > { %4579 = vmatpush1.bf16.msra.mxu0 %v18342_v0  ;;  %v4750_v0 = vpop.f32.mrf.mxu1 }
 0x959   : > { %4580 = vmatprep.subr.bf16.mxu0 %v18350_v1 }
 0x95c   : > { %4581 = vmatpush1.bf16.msra.mxu0 %v18348_v55  ;;  %v4771_v55 = vld [vmem:[%s24114_s2] sm:$0x3] }
 0x95d   : > { %4582 = vmatprep.subr.bf16.mxu0 %v18356_v9 }
 0x960   : > { %4583 = vmatpush1.bf16.msra.mxu0 %v18354_v10 }
 0x961   : > { %4896 = vmatprep.subr.bf16.mxu0 %v19506_v2 }
 0x963   : > { %15966 = vmatmul.mubr.msk.bf16.vlgmr.msra.gmra.mxu0 %vm610_vm1, %v4501_v14  ;;  %v4754_v14 = vpop.f32.mrf.mxu1 }
 0x964   : > { %4610 = vmatprep.mubr.bf16.mxu0 %v19506_v2  ;;  %4897 = vmatpush1.bf16.msra.mxu0 %v18357_v54 }
 0x965   : > { %4898 = vmatprep.subr.bf16.mxu0 %v19506_v2 }
 0x968   : > { %4899 = vmatpush1.bf16.msra.mxu0 %v18358_v15  ;;  %v4780_v15 = vrot.slane %v4771_v55, %v19870_v7 }
 0x969   : > { %4900 = vmatprep.subr.bf16.mxu0 %v19506_v2 }
 0x96b   : > { %15967 = vmatmul.mubr.msk.bf16.gmra.mxu0 %vm610_vm1, %v4500_v13 }
 0x96c   : > { %4901 = vmatpush1.bf16.msra.mxu0 %v18359_v16 }
 0x96d   : > { %4902 = vmatprep.subr.bf16.mxu0 %v19506_v2 }
 0x970   : > { %4903 = vmatpush1.bf16.msra.mxu0 %v18360_v17 }
 0x971   : > { %4904 = vmatprep.subr.bf16.mxu0 %v19506_v2 }
 0x974   : > { %4905 = vmatpush1.bf16.msra.mxu0 %v18361_v18 }
 0x975   : > { %4906 = vmatprep.subr.bf16.mxu0 %v19506_v2 }
 0x978   : > { %4907 = vmatpush1.bf16.msra.mxu0 %v18362_v56  ;;  %v4776_v56 = vrot.slane %v4771_v55, %v19875_v12 }
 0x979   : > { %4908 = vmatprep.subr.bf16.mxu0 %v19506_v2 }
 0x97c   : > { %4909 = vmatpush1.bf16.msra.mxu0 %v18363_v19 }
 0x97d   : > { %4910 = vmatprep.subr.bf16.mxu0 %v19506_v2 }
 0x980   : > { %4911 = vmatpush1.bf16.msra.mxu0 %v18364_v20 }
 0x981   : > { %4922 = vmatprep.subr.bf16.mxu0 %v19506_v2 }
 0x984   : > { %4923 = vmatpush2.bf16.msra.mxu0 %v4894_v22 }
 0x985   : > { %4924 = vmatprep.subr.bf16.mxu0 %v19506_v2 }
 0x988   : > { %4925 = vmatpush2.bf16.msra.mxu0 %v18366_v23 }
 0x989   : > { %4926 = vmatprep.subr.bf16.mxu0 %v19506_v2 }
 0x98c   : > { %4927 = vmatpush2.bf16.msra.mxu0 %v18367_v24 }
 0x9db   : > { %v4042_v25 = vpop.f32.mrf.mxu0 }
 0x9dc   : > { %4048 = vst.msk [vmem:[#allocation2 + $0x1] sm:$0x1] %vm2277_vm14, %v4042_v25 }
 0x9dd   : > { %4049 = vst.msk [vmem:[#allocation2 + $0x8] sm:$0x2] %vm2280_vm15, %v4042_v25  ;;  %v17664_v26 = vpop.f32.mrf.mxu0 }
 0x9de   : > { %4050 = vst.msk [vmem:[#allocation2 + $0xf] sm:$0x4] %vm2283_vm3, %v4042_v25 }
 0x9df   : > { %4051 = vst.msk [vmem:[#allocation2 + $0x16] sm:$0x8] %vm2286_vm0, %v4042_v25  ;;  %v4045_v27 = vpop.f32.mrf.mxu0 }
 0x9e0   : > { %4052 = vst.msk [vmem:[#allocation2 + $0x1d] sm:$0x10] %vm2289_vm5, %v4042_v25  ;;  %v4756_v25 = vpop.f32.mrf.mxu1 }
 0x9e1   : > { %v17665_v28 = vpop.f32.mrf.mxu0 }
 0x9f3   : > { %v4203_v29 = vpop.f32.mrf.mxu0 }
 0x9f5   : > { %v4205_v30 = vpop.f32.mrf.mxu0 }
 0x9f7   : > { %v4207_v31 = vpop.f32.mrf.mxu0 }
 0x9f9   : > { %v4209_v32 = vpop.f32.mrf.mxu0 }
 0x9fb   : > { %v4213_v34 = vpop.f32.mrf.mxu0 }
 0x9fd   : > { %v4215_v36 = vpop.f32.mrf.mxu0 }
 0x9ff   : > { %v4217_v38 = vpop.f32.mrf.mxu0 }
 0xa01   : > { %v4219_v40 = vpop.f32.mrf.mxu0 }
 0xa0b   : > { %v4320_v42 = vpop.f32.mrf.mxu0 }
 0xa0c   : > { %v4321_v57 = vadd.f32 %v4320_v42, %v4203_v29 }
 0xa0d   : > { %v4322_v43 = vpop.f32.mrf.mxu0 }
 0xa0e   : > { %v4323_v59 = vadd.f32 %v4322_v43, %v4205_v30  ;;  %v4475_v62 = vadd.f32 %v4456_v33, %v4321_v57 }
 0xa0f   : > { %v4324_v46 = vpop.f32.mrf.mxu0 }
 0xa10   : > { %v4325_v61 = vadd.f32 %v4324_v46, %v4207_v31  ;;  %v4476_v3 = vadd.f32 %v4458_v35, %v4323_v59 }
 0xa11   : > { %v4326_v48 = vpop.f32.mrf.mxu0 }
 0xa12   : > { %v4327_v1 = vadd.f32 %v4326_v48, %v4209_v32  ;;  %v4477_v9 = vadd.f32 %v4460_v37, %v4325_v61 }
 0xa13   : > { %v4330_v49 = vpop.f32.mrf.mxu0 }
 0xa14   : > { %v4331_v10 = vadd.f32 %v4330_v49, %v4213_v34  ;;  %v4478_v17 = vadd.f32 %v4462_v39, %v4327_v1  ;;  %v4758_v39 = vpop.f32.mrf.mxu1 }
 0xa15   : > { %v4332_v53 = vpop.f32.mrf.mxu0 }
 0xa16   : > { %v4333_v11 = vadd.f32 %v4332_v53, %v4215_v36  ;;  %v4479_v22 = vadd.f32 %v4466_v41, %v4331_v10  ;;  %v18372_v10 = vld [vmem:[%s24117_s5 + $0xf0] ss:$8 sps:$4 sm:$0xff]  }
 0xa17   : > { %v4334_v51 = vpop.f32.mrf.mxu0 }
 0xa18   : > { %v4335_v23 = vadd.f32 %v4334_v51, %v4217_v38  ;;  %v4480_v24 = vadd.f32 %v4468_v44, %v4333_v11  ;;  %v4760_v51 = vpop.f32.mrf.mxu1  ;;  %v18381_v11 = vld [vmem:[%s24117_s5 + $0xe4] ss:$8 sps:$4 sm:$0xff]  }
 0xa19   : > { %v4336_v60 = vpop.f32.mrf.mxu0 }
 0xa1a   : > { %v4337_v27 = vadd.f32 %v4336_v60, %v4219_v40  ;;  %v4481_v36 = vadd.f32 %v4470_v45, %v4335_v23  ;;  %v16019_v23 = vld [vmem:[%s24117_s5 + $0xa8] sm:$0x33] }
 0xa1c   : > { %v4482_v43 = vadd.f32 %v4472_v50, %v4337_v27 }
 0xa23   : > { %v4602_v63 = vpop.f32.mrf.mxu0 }
 0xa24   : > { %v4621_v4 = vadd.f32 %v4602_v63, %v4475_v62 }
 0xa25   : > { %v4604_v5 = vpop.f32.mrf.mxu0 }
 0xa26   : > { %v4622_v6 = vadd.f32 %v4604_v5, %v4476_v3  ;;  %v4763_v18 = vadd.f32 %v4744_v52, %v4621_v4  ;;  %v16058_v4 = vld [vmem:[%s24117_s5 + $0x100] sm:$0x33] }
 0xa27   : > { %v4606_v13 = vpop.f32.mrf.mxu0  ;;  %v16070_v5 = vcombine.high %v16058_v4, %v16058_v4  ;;  %v16069_v55 = vcombine.low %v16058_v4, %v16058_v4  ;;  %v18412_v4 = vld [vmem:[%s24117_s5 + $0x44] ss:$8 sps:$4 sm:$0xff]  }
 0xa28   : > { %v4764_v54 = vadd.f32 %v4746_v47, %v4622_v6  ;;  %v4623_v16 = vadd.f32 %v4606_v13, %v4477_v9  ;;  %v4783_v31 = vadd.f32 %v4776_v56, %v4763_v18  ;;  %v18374_v6 = vld [vmem:[%s24117_s5 + $0xf4] ss:$8 sps:$4 sm:$0xff]   ;;  %v18379_v13 = vld [vmem:[%s24117_s5 + $0xe0] ss:$8 sps:$4 sm:$0xff]  }
 0xa29   : > { %v4608_v19 = vpop.f32.mrf.mxu0  ;;  %16071 = vmatprep.subr.msk.bf16.mxu0 %vm1549_vm8, %v16070_v5  ;;  %v5316_v9 = vsel %vm1549_vm8, %v16069_v55, 0  ;;  %v18415_v5 = vld [vmem:[%s24117_s5 + $0x194] ss:$8 sps:$4 sm:$0xff]   ;;  %v18410_v55 = vld [vmem:[%s24117_s5 + $0x40] ss:$8 sps:$4 sm:$0xff]  }
 0xa2a   : > { %v4765_v20 = vadd.f32 %v4748_v58, %v4623_v16  ;;  %v4624_v21 = vadd.f32 %v4608_v19, %v4478_v17  ;;  %v4784_v28 = vadd.f32 %v4780_v15, %v4764_v54  ;;  %v4791_v44 = vmax.f32 %v4783_v31, 0.0  ;;  %v18385_v54 = vld [vmem:[%s24117_s5 + $0xd0] ss:$8 sps:$4 sm:$0xff]  }
 0xa2b   : > { %v4612_v26 = vpop.f32.mrf.mxu0  ;;  %v18376_v31 = vld [vmem:[%s24117_s5 + $0x98] ss:$8 sps:$4 sm:$0xff]  }
 0xa2c   : > { %v4785_v29 = vadd.f32 %v4776_v56, %v4765_v20  ;;  %v4766_v30 = vadd.f32 %v4750_v0, %v4624_v21  ;;  %v4625_v32 = vadd.f32 %v4612_v26, %v4479_v22  ;;  %v4792_v46 = vmax.f32 %v4784_v28, 0.0  ;;  %v18368_v28 = vld [vmem:[%s24115_s3] sm:$0x7f]  }
 0xa2d   : > { %v4614_v33 = vpop.f32.mrf.mxu0  ;;  %v16030_v26 = vcombine.low %v16019_v23, %v16019_v23 }
 0xa2e   : > { %v4786_v34 = vadd.f32 %v4780_v15, %v4766_v30  ;;  %v4626_v35 = vadd.f32 %v4614_v33, %v4480_v24  ;;  %v4793_v37 = vmax.f32 %v4785_v29, 0.0  ;;  %v4767_v48 = vadd.f32 %v4754_v14, %v4625_v32  ;;  %v18387_v14 = vld [vmem:[%s24117_s5 + $0xd4] ss:$8 sps:$4 sm:$0xff]   ;;  %v18382_v33 = vld [vmem:[%s24117_s5 + $0x88] ss:$8 sps:$4 sm:$0xff]  }
 0xa2f   : > { %v4616_v42 = vpop.f32.mrf.mxu0  ;;  %v5090_v29 = vsel %vm1549_vm8, %v16030_v26, 0  ;;  %v18378_v30 = vld [vmem:[%s24117_s5 + $0x9c] ss:$8 sps:$4 sm:$0xff]   ;;  %v18384_v32 = vld [vmem:[%s24117_s5 + $0x8c] ss:$8 sps:$4 sm:$0xff]  }
 0xa30   : > { %v4794_v41 = vmax.f32 %v4786_v34, 0.0  ;;  %v4768_v38 = vadd.f32 %v4756_v25, %v4626_v35  ;;  %v4627_v49 = vadd.f32 %v4616_v42, %v4481_v36  ;;  %v4799_v47 = vpack.c.bf16 %v4793_v37, %v4791_v44  ;;  %v18390_v34 = vld [vmem:[%s24117_s5 + $0x7c] ss:$8 sps:$4 sm:$0xff]   ;;  %v18388_v36 = vld [vmem:[%s24117_s5 + $0x78] ss:$8 sps:$4 sm:$0xff]  }
 0xa31   : > { %v4618_v40 = vpop.f32.mrf.mxu0  ;;  %v4787_v45 = vadd.f32 %v4776_v56, %v4767_v48  ;;  %v16031_v25 = vcombine.high %v16019_v23, %v16019_v23  ;;  %v18393_v35 = vld [vmem:[%s24117_s5 + $0xc4] ss:$8 sps:$4 sm:$0xff]   ;;  %v18391_v37 = vld [vmem:[%s24117_s5 + $0xc0] ss:$8 sps:$4 sm:$0xff]   ;;  %v18399_v42 = vld [vmem:[%s24117_s5 + $0xb4] ss:$8 sps:$4 sm:$0xff]  }
 0xa32   : > { %v4628_v52 = vadd.f32 %v4618_v40, %v4482_v43  ;;  %v4800_v53 = vpack.c.bf16 %v4794_v41, %v4792_v46  ;;  %v4769_v57 = vadd.f32 %v4758_v39, %v4627_v49  ;;  %v4788_v58 = vadd.f32 %v4780_v15, %v4768_v38  ;;  %v18396_v39 = vld [vmem:[%s24117_s5 + $0x6c] ss:$8 sps:$4 sm:$0xff]   ;;  %v18394_v43 = vld [vmem:[%s24117_s5 + $0x68] ss:$8 sps:$4 sm:$0xff]   ;;  %v18400_v38 = vld [vmem:[%s24117_s5 + $0x58] ss:$8 sps:$4 sm:$0xff]  }
 0xa33   : > { %v4795_v0 = vmax.f32 %v4787_v45, 0.0  ;;  %v18397_v46 = vld [vmem:[%s24117_s5 + $0xb0] ss:$8 sps:$4 sm:$0xff]   ;;  %v18402_v44 = vld [vmem:[%s24117_s5 + $0x5c] ss:$8 sps:$4 sm:$0xff]  }
 0xa34   : > { %v4770_v59 = vadd.f32 %v4760_v51, %v4628_v52  ;;  %16005 = vmatprep.mubr.msk.bf16.mxu0 %vm1341_vm6, %v4800_v53  ;;  %v4789_v60 = vadd.f32 %v4776_v56, %v4769_v57  ;;  %v4796_v62 = vmax.f32 %v4788_v58, 0.0  ;;  %v16108_v41 = vld [vmem:[%s24117_s5 + $0x1b0] sm:$0x33] }
 0xa35   : > { %4929 = vmatmul.mubr.bf16.vlgmr.msra.gmra.mxu0 %v4799_v47  ;;  %v16120_v48 = vcombine.high %v16108_v41, %v16108_v41  ;;  %v5012_v49 = vld [vmem:[%s24117_s5 + $0x50] sm:$0x33]  ;;  %v16119_v47 = vcombine.low %v16108_v41, %v16108_v41  ;;  %v18456_v41 = vld [vmem:[%s24120_s8 + $0x28] sm:$0xff]  }
 0xa36   : > { %v4790_v50 = vadd.f32 %v4780_v15, %v4770_v59  ;;  %v4797_v61 = vmax.f32 %v4789_v60, 0.0  ;;  %5326 = vmatpush1.bf16.msra.mxu0 %v5316_v9  ;;  %v16045_v40 = vcombine.high %v5012_v49, %v5012_v49  ;;  %v18418_v9 = vld [vmem:[%s24117_s5 + $0x34] ss:$8 sps:$4 sm:$0xff]  }
 0xa37   : > { %5327 = vmatprep.subr.bf16.mxu0 %v18374_v6  ;;  %v5564_v60 = vsel %vm1549_vm8, %v16119_v47, 0  ;;  %v18413_v6 = vld [vmem:[%s24117_s5 + $0x190] ss:$8 sps:$4 sm:$0xff]  }
 0xa38   : > { %v4798_v63 = vmax.f32 %v4790_v50, 0.0  ;;  %v4801_v3 = vpack.c.bf16 %v4797_v61, %v4795_v0  ;;  %v18408_v50 = vld [vmem:[%s24117_s5 + $0x1a4] ss:$8 sps:$4 sm:$0xff]   ;;  %v16044_v61 = vcombine.low %v5012_v49, %v5012_v49  ;;  %v18406_v0 = vld [vmem:[%s24117_s5 + $0x1a0] ss:$8 sps:$4 sm:$0xff]  }
 0xa39   : > { %v18460_v49 = vld [vmem:[%s24120_s8 + $0x8] sm:$0xff]  }
 0xa3a   : > { %v4802_v1 = vpack.c.bf16 %v4798_v63, %v4796_v62  ;;  %5328 = vmatpush1.bf16.msra.mxu0 %v18372_v10  ;;  %v18421_v10 = vld [vmem:[%s24117_s5 + $0x184] ss:$8 sps:$4 sm:$0xff]  }
 0xa3b   : > { %5329 = vmatprep.subr.bf16.mxu0 %v18381_v11  ;;  %v18416_v11 = vld [vmem:[%s24117_s5 + $0x30] ss:$8 sps:$4 sm:$0xff]  }
 0xa3c   : > { %16006 = vmatprep.mubr.msk.bf16.mxu0 %vm1341_vm6, %v4802_v1 }
 0xa3d   : > { %4937 = vmatmul.mubr.bf16.gmra.mxu0 %v4801_v3  ;;  %v5196_v3 = vsel %vm1549_vm8, %v16044_v61, 0 }
 0xa3e   : > { %5353 = vmatprep.mubr.bf16.mxu0 %v19506_v2  ;;  %5330 = vmatpush1.bf16.msra.mxu0 %v18379_v13  ;;  %v18419_v13 = vld [vmem:[%s24117_s5 + $0x180] ss:$8 sps:$4 sm:$0xff]  }
 0xa3f   : > { %5331 = vmatprep.subr.bf16.mxu0 %v18387_v14  ;;  %v18424_v14 = vld [vmem:[%s24117_s5 + $0x24] ss:$8 sps:$4 sm:$0xff]  }
 0xa42   : > { %5332 = vmatpush1.bf16.msra.mxu0 %v18385_v54  ;;  %v18427_v54 = vld [vmem:[%s24117_s5 + $0x174] ss:$8 sps:$4 sm:$0xff]  }
 0xa43   : > { %5333 = vmatprep.subr.bf16.mxu0 %v18393_v35  ;;  %v18453_v35 = vld [vmem:[%s24117_s5 + $0x10c] ss:$8 sps:$4 sm:$0xff]  }
 0xa46   : > { %5334 = vmatpush1.bf16.msra.mxu0 %v18391_v37 }
 0xa47   : > { %5335 = vmatprep.subr.bf16.mxu0 %v18399_v42 }
 0xa4a   : > { %5336 = vmatpush1.bf16.msra.mxu0 %v18397_v46  ;;  %v18455_v46 = vld [vmem:[%s24120_s8 + $0x30] sm:$0xff]  }
 0xa4b   : > { %16121 = vmatprep.subr.msk.bf16.mxu0 %vm1549_vm8, %v16120_v48  ;;  %v18459_v48 = vld [vmem:[%s24120_s8 + $0x10] sm:$0xff]  }
 0xaf5   : > { %v4930_v15 = vpop.f32.mrf.mxu0 }
 0xaf7   : > { %v4932_v16 = vpop.f32.mrf.mxu0 }
 0xaf8   : > { %v18425_v16 = vld [vmem:[%s24117_s5 + $0x170] ss:$8 sps:$4 sm:$0xff]  }
 0xaf9   : > { %v4933_v17 = vpop.f32.mrf.mxu0 }
 0xafa   : > { %v4947_v27 = vpack.c.bf16 %v4933_v17, %v4930_v15  ;;  %v18422_v15 = vld [vmem:[%s24117_s5 + $0x20] ss:$8 sps:$4 sm:$0xff]   ;;  %v18430_v17 = vld [vmem:[%s24117_s5 + $0x14] ss:$8 sps:$4 sm:$0xff]  }
 0xafb   : > { %v4935_v18 = vpop.f32.mrf.mxu0 }
 0xafc   : > { %v18433_v18 = vld [vmem:[%s24117_s5 + $0x164] ss:$8 sps:$4 sm:$0xff]  }
 0xafd   : > { %v4938_v56 = vpop.f32.mrf.mxu0 }
 0xaff   : > { %v4940_v19 = vpop.f32.mrf.mxu0 }
 0xb00   : > { %v18431_v19 = vld [vmem:[%s24117_s5 + $0x160] ss:$8 sps:$4 sm:$0xff]  }
 0xb01   : > { %v4941_v20 = vpop.f32.mrf.mxu0 }
 0xb02   : > { %v4948_v21 = vpack.c.bf16 %v4941_v20, %v4938_v56  ;;  %v18428_v56 = vld [vmem:[%s24117_s5 + $0x10] ss:$8 sps:$4 sm:$0xff]   ;;  %v18436_v20 = vld [vmem:[%s24117_s5 + $0x4] ss:$8 sps:$4 sm:$0xff]  }
 0xb03   : > { %v4943_v22 = vpop.f32.mrf.mxu0 }
 0xb04   : > { %v4958_v24 = vsel %vm1094_vm4, %v4948_v21, 0  ;;  %v16083_v21 = vld [vmem:[%s24117_s5 + $0x158] sm:$0x33]  ;;  %v18434_v22 = vld [vmem:[%s24117_s5] ss:$8 sps:$4 sm:$0xff]  }
 0xb05   : > { %17667 = vmatpush3.bf16.msra.mxu1 %v4958_v24  ;;  %v16095_v24 = vcombine.high %v16083_v21, %v16083_v21 }
 0xb06   : > { %17668 = vmatprep.subr.bf16.mxu1 %v19507_v8 }
 0xb09   : > { %17669 = vmatpush3.bf16.msra.mxu1 %v4947_v27  ;;  %v18441_v27 = vld [vmem:[%s24117_s5 + $0x14c] ss:$8 sps:$4 sm:$0xff]  }
 0xb0a   : > { %16032 = vmatprep.subr.msk.bf16.mxu1 %vm1549_vm8, %v16031_v25  ;;  %v16094_v25 = vcombine.low %v16083_v21, %v16083_v21 }
 0xb0c   : > { %17671 = vmatmul.mubr.msk.bf16.vlgmr.msra.gmra.mxu1 %vm1410_vm9, %v18368_v28  ;;  %v5441_v26 = vsel %vm1549_vm8, %v16094_v25, 0  ;;  %v18439_v28 = vld [vmem:[%s24117_s5 + $0x148] ss:$8 sps:$4 sm:$0xff]  }
 0xb0d   : > { %5100 = vmatpush1.bf16.msra.mxu1 %v5090_v29  ;;  %5127 = vmatprep.mubr.bf16.mxu1 %v19506_v2  ;;  %v18444_v29 = vld [vmem:[%s24117_s5 + $0x13c] ss:$8 sps:$4 sm:$0xff]  }
 0xb0e   : > { %5101 = vmatprep.subr.bf16.mxu1 %v18378_v30  ;;  %v18442_v30 = vld [vmem:[%s24117_s5 + $0x138] ss:$8 sps:$4 sm:$0xff]  }
 0xb11   : > { %5102 = vmatpush1.bf16.msra.mxu1 %v18376_v31  ;;  %v18447_v31 = vld [vmem:[%s24117_s5 + $0x12c] ss:$8 sps:$4 sm:$0xff]  }
 0xb12   : > { %5103 = vmatprep.subr.bf16.mxu1 %v18384_v32  ;;  %v18445_v32 = vld [vmem:[%s24117_s5 + $0x128] ss:$8 sps:$4 sm:$0xff]  }
 0xb15   : > { %5104 = vmatpush1.bf16.msra.mxu1 %v18382_v33  ;;  %v18450_v33 = vld [vmem:[%s24117_s5 + $0x11c] ss:$8 sps:$4 sm:$0xff]  }
 0xb16   : > { %5105 = vmatprep.subr.bf16.mxu1 %v18390_v34  ;;  %v18448_v34 = vld [vmem:[%s24117_s5 + $0x118] ss:$8 sps:$4 sm:$0xff]  }
 0xb19   : > { %5106 = vmatpush1.bf16.msra.mxu1 %v18388_v36  ;;  %v18451_v36 = vld [vmem:[%s24117_s5 + $0x108] ss:$8 sps:$4 sm:$0xff]  }
 0xb1a   : > { %5107 = vmatprep.subr.bf16.mxu1 %v18396_v39 }
 0xb1d   : > { %5108 = vmatpush1.bf16.msra.mxu1 %v18394_v43  ;;  %v18454_v43 = vld [vmem:[%s24120_s8 + $0x38] sm:$0xff]  }
 0xb1e   : > { %5109 = vmatprep.subr.bf16.mxu1 %v18402_v44  ;;  %v18458_v44 = vld [vmem:[%s24120_s8 + $0x18] sm:$0xff]  }
 0xb21   : > { %5110 = vmatpush1.bf16.msra.mxu1 %v18400_v38  ;;  %v18457_v38 = vld [vmem:[%s24120_s8 + $0x20] sm:$0xff]  }
 0xb22   : > { %16046 = vmatprep.subr.msk.bf16.mxu1 %vm1549_vm8, %v16045_v40  ;;  %v18461_v40 = vld [vmem:[%s24120_s8] sm:$0xff]  }
 0xbcc   : > { %v4994_v52 = vpop.f32.mrf.mxu1 }
 0xbce   : > { %v17672_v53 = vpop.f32.mrf.mxu1 }
 0xbcf   : > { %v18463_v53 = vld [vmem:[%s24120_s8 + $0x40] sm:$0xff]  }
 0xbd0   : > { %v4997_v51 = vpop.f32.mrf.mxu1 }
 0xbd1   : > { %v21058_v57 = vpack.c.bf16 %v4997_v51, %v4994_v52  ;;  %v18462_v52 = vld [vmem:[%s24120_s8 + $0x48] sm:$0xff]  }
 0xbd2   : > { %v17673_v58 = vpop.f32.mrf.mxu1 }
 0xbd3   : > { %v5027_v59 = vshll.u32 %v21058_v57, 16  ;;  %v5256_v45 = vrot.slane %v21058_v57, 1  ;;  %v5025_v62 = vshrl.u32 %v21058_v57, 16  ;;  %v5504_v23 = vrot.slane %v21058_v57, 2 }
 0xbd5   : > { %16072 = vmatmul.mubr.msk.bf16.vlgmr.msra.gmra.mxu0 %vm1545_vm10, %v5256_v45  ;;  %v5029_v63 = vrot.slane %v5027_v59, 1  ;;  %v5379_v37 = vrot.slane %v5025_v62, 1  ;;  %v5380_v39 = vrot.slane %v5027_v59, 2 }
 0xbd6   : > { %5574 = vmatpush1.bf16.msra.mxu0 %v5564_v60  ;;  %5601 = vmatprep.mubr.bf16.mxu0 %v19506_v2 }
 0xbd7   : > { %5575 = vmatprep.subr.bf16.mxu0 %v18408_v50  ;;  %v5030_v1 = vor.u32 %v5029_v63, %v5025_v62  ;;  %v5381_v42 = vor.u32 %v5380_v39, %v5379_v37 }
 0xbd9   : > { %16033 = vmatmul.mubr.msk.bf16.vlgmr.msra.gmra.mxu1 %vm1545_vm10, %v5030_v1 }
 0xbda   : > { %5206 = vmatpush1.bf16.msra.mxu1 %v5196_v3  ;;  %5576 = vmatpush1.bf16.msra.mxu0 %v18406_v0 }
 0xbdb   : > { %5207 = vmatprep.subr.bf16.mxu1 %v18412_v4  ;;  %5577 = vmatprep.subr.bf16.mxu0 %v18415_v5 }
 0xbdc   : > { %5233 = vmatprep.mubr.bf16.mxu1 %v19506_v2 }
 0xbde   : > { %5208 = vmatpush1.bf16.msra.mxu1 %v18410_v55  ;;  %5578 = vmatpush1.bf16.msra.mxu0 %v18413_v6 }
 0xbdf   : > { %5209 = vmatprep.subr.bf16.mxu1 %v18418_v9  ;;  %5579 = vmatprep.subr.bf16.mxu0 %v18421_v10 }
 0xbe2   : > { %5210 = vmatpush1.bf16.msra.mxu1 %v18416_v11  ;;  %5580 = vmatpush1.bf16.msra.mxu0 %v18419_v13 }
 0xbe3   : > { %5211 = vmatprep.subr.bf16.mxu1 %v18424_v14  ;;  %5581 = vmatprep.subr.bf16.mxu0 %v18427_v54  ;;  %v5616_v54 = vld [vmem:[%s24118_s6] sm:$0x3] }
 0xbe6   : > { %5212 = vmatpush1.bf16.msra.mxu1 %v18422_v15  ;;  %5582 = vmatpush1.bf16.msra.mxu0 %v18425_v16 }
 0xbe7   : > { %5213 = vmatprep.subr.bf16.mxu1 %v18430_v17  ;;  %5583 = vmatprep.subr.bf16.mxu0 %v18433_v18 }
 0xbea   : > { %5214 = vmatpush1.bf16.msra.mxu1 %v18428_v56  ;;  %5584 = vmatpush1.bf16.msra.mxu0 %v18431_v19  ;;  %v5625_v19 = vrot.slane %v5616_v54, %v19870_v7 }
 0xbeb   : > { %5215 = vmatprep.subr.bf16.mxu1 %v18436_v20  ;;  %17674 = vmatprep.subr.bf16.mxu0 %v19507_v8 }
 0xbed   : > { %16122 = vmatmul.mubr.msk.bf16.vlgmr.msra.gmra.mxu0 %vm1545_vm10, %v5504_v23  ;;  %v5621_v23 = vrot.slane %v5616_v54, %v19875_v12 }
 0xbee   : > { %5216 = vmatpush1.bf16.msra.mxu1 %v18434_v22  ;;  %17676 = vmatprep.mubr.msk.bf16.mxu0 %vm19508_vm7, %v19507_v8 }
 0xbef   : > { %16096 = vmatprep.subr.msk.bf16.mxu1 %vm1549_vm8, %v16095_v24 }
 0xbf1   : > { %16047 = vmatmul.mubr.msk.bf16.vlgmr.msra.gmra.mxu1 %vm1545_vm10, %v21058_v57 }
 0xbf2   : > { %5451 = vmatpush1.bf16.msra.mxu1 %v5441_v26  ;;  %5478 = vmatprep.mubr.bf16.mxu1 %v19506_v2 }
 0xbf3   : > { %5452 = vmatprep.subr.bf16.mxu1 %v18441_v27 }
 0xbf6   : > { %5453 = vmatpush1.bf16.msra.mxu1 %v18439_v28 }
 0xbf7   : > { %5454 = vmatprep.subr.bf16.mxu1 %v18444_v29 }
 0xbfa   : > { %5455 = vmatpush1.bf16.msra.mxu1 %v18442_v30 }
 0xbfb   : > { %5456 = vmatprep.subr.bf16.mxu1 %v18447_v31 }
 0xbfe   : > { %5457 = vmatpush1.bf16.msra.mxu1 %v18445_v32 }
 0xbff   : > { %5458 = vmatprep.subr.bf16.mxu1 %v18450_v33 }
 0xc02   : > { %5459 = vmatpush1.bf16.msra.mxu1 %v18448_v34 }
 0xc03   : > { %5460 = vmatprep.subr.bf16.mxu1 %v18453_v35 }
 0xc06   : > { %5461 = vmatpush1.bf16.msra.mxu1 %v18451_v36 }
 0xc07   : > { %5721 = vmatprep.subr.bf16.mxu1 %v19506_v2 }
 0xc09   : > { %16097 = vmatmul.mubr.msk.bf16.vlgmr.msra.gmra.mxu1 %vm1545_vm10, %v5381_v42  ;;  %v18482_v42 = vld [vmem:[%s24113_s1 + $0x110] ss:$8 sps:$4 sm:$0xff]  }
 0xc0a   : > { %5722 = vmatpush1.bf16.msra.mxu1 %v18454_v43  ;;  %v18484_v43 = vld [vmem:[%s24113_s1 + $0x114] ss:$8 sps:$4 sm:$0xff]  }
 0xc0b   : > { %5723 = vmatprep.subr.bf16.mxu1 %v19506_v2 }
 0xc0e   : > { %5724 = vmatpush1.bf16.msra.mxu1 %v18455_v46  ;;  %v18492_v46 = vld [vmem:[%s24113_s1 + $0x104] ss:$8 sps:$4 sm:$0xff]  }
 0xc0f   : > { %5725 = vmatprep.subr.bf16.mxu1 %v19506_v2 }
 0xc12   : > { %5726 = vmatpush1.bf16.msra.mxu1 %v18456_v41  ;;  %v18490_v41 = vld [vmem:[%s24113_s1 + $0x100] ss:$8 sps:$4 sm:$0xff]  }
 0xc13   : > { %5727 = vmatprep.subr.bf16.mxu1 %v19506_v2 }
 0xc16   : > { %5728 = vmatpush1.bf16.msra.mxu1 %v18457_v38  ;;  %v18496_v38 = vld [vmem:[%s24113_s1 + $0xf0] ss:$8 sps:$4 sm:$0xff]  }
 0xc17   : > { %5729 = vmatprep.subr.bf16.mxu1 %v19506_v2 }
 0xc1a   : > { %5730 = vmatpush1.bf16.msra.mxu1 %v18458_v44  ;;  %v18498_v44 = vld [vmem:[%s24113_s1 + $0xf4] ss:$8 sps:$4 sm:$0xff]  }
 0xc1b   : > { %5731 = vmatprep.subr.bf16.mxu1 %v19506_v2 }
 0xc1e   : > { %5732 = vmatpush1.bf16.msra.mxu1 %v18459_v48  ;;  %v18502_v48 = vld [vmem:[%s24113_s1 + $0xe0] ss:$8 sps:$4 sm:$0xff]  }
 0xc1f   : > { %5733 = vmatprep.subr.bf16.mxu1 %v19506_v2 }
 0xc22   : > { %5734 = vmatpush1.bf16.msra.mxu1 %v18460_v49  ;;  %v18504_v49 = vld [vmem:[%s24113_s1 + $0xe4] ss:$8 sps:$4 sm:$0xff]  }
 0xc23   : > { %5735 = vmatprep.subr.bf16.mxu1 %v19506_v2 }
 0xc26   : > { %5736 = vmatpush1.bf16.msra.mxu1 %v18461_v40  ;;  %v18508_v40 = vld [vmem:[%s24113_s1 + $0xd0] ss:$8 sps:$4 sm:$0xff]  }
 0xc27   : > { %5749 = vmatprep.subr.bf16.mxu1 %v19506_v2 }
 0xc2a   : > { %5750 = vmatpush2.bf16.msra.mxu1 %v18462_v52  ;;  %v18510_v52 = vld [vmem:[%s24113_s1 + $0xd4] ss:$8 sps:$4 sm:$0xff]  }
 0xc2b   : > { %5751 = vmatprep.subr.bf16.mxu1 %v19506_v2 }
 0xc2e   : > { %5752 = vmatpush2.bf16.msra.mxu1 %v18463_v53  ;;  %v18514_v53 = vld [vmem:[%s24113_s1 + $0xc0] ss:$8 sps:$4 sm:$0xff]  }
 0xc2f   : > { %6188 = vmatprep.subr.bf16.mxu1 %v18484_v43 }
 0xc95   : > { %v5355_v58 = vpop.f32.mrf.mxu0 }
 0xc97   : > { %v5357_v45 = vpop.f32.mrf.mxu0 }
 0xc99   : > { %v5129_v47 = vpop.f32.mrf.mxu1  ;;  %v5359_v50 = vpop.f32.mrf.mxu0 }
 0xc9b   : > { %v5131_v51 = vpop.f32.mrf.mxu1  ;;  %v5361_v62 = vpop.f32.mrf.mxu0 }
 0xc9d   : > { %v5133_v57 = vpop.f32.mrf.mxu1 }
 0xc9f   : > { %v5135_v59 = vpop.f32.mrf.mxu1 }
 0xcad   : > { %v5603_v0 = vpop.f32.mrf.mxu0 }
 0xcaf   : > { %v5605_v55 = vpop.f32.mrf.mxu0 }
 0xcb1   : > { %v5235_v60 = vpop.f32.mrf.mxu1  ;;  %v5607_v17 = vpop.f32.mrf.mxu0 }
 0xcb2   : > { %v5236_v1 = vadd.f32 %v5235_v60, %v5129_v47  ;;  %v18516_v47 = vld [vmem:[%s24113_s1 + $0xc4] ss:$8 sps:$4 sm:$0xff]  }
 0xcb3   : > { %v5237_v61 = vpop.f32.mrf.mxu1  ;;  %v5609_v27 = vpop.f32.mrf.mxu0 }
 0xcb4   : > { %v5238_v3 = vadd.f32 %v5237_v61, %v5131_v51  ;;  %v5364_v6 = vadd.f32 %v5355_v58, %v5236_v1  ;;  %v21265_v51 = vld [vmem:[%s19662_s25 + $0x30] sm:$0xff]   ;;  %v18528_v61 = vld [vmem:[%s24113_s1 + $0x1c4] ss:$8 sps:$4 sm:$0xff]  }
 0xcb5   : > { %v5239_v63 = vpop.f32.mrf.mxu1  ;;  %v18520_v58 = vld [vmem:[%s24113_s1 + $0x1d0] ss:$8 sps:$4 sm:$0xff]   ;;  %v18540_v1 = vld [vmem:[%s24113_s1 + $0x1a4] ss:$8 sps:$4 sm:$0xff]  }
 0xcb6   : > { %v5240_v5 = vadd.f32 %v5239_v63, %v5133_v57  ;;  %v5365_v11 = vadd.f32 %v5357_v45, %v5238_v3  ;;  %v21268_v57 = vld [vmem:[%s19662_s25 + $0x38] sm:$0xff]   ;;  %v6115_v45 = vrot.slane %v21265_v51, 1  ;;  %v18538_v3 = vld [vmem:[%s24113_s1 + $0x1a0] ss:$8 sps:$4 sm:$0xff]  }
 0xcb7   : > { %v5241_v4 = vpop.f32.mrf.mxu1  ;;  %v6116_v60 = vrot.slane %v21268_v57, 1  ;;  %v18532_v63 = vld [vmem:[%s24113_s1 + $0x1b0] ss:$8 sps:$4 sm:$0xff]   ;;  %v5862_v43 = vshrl.u32 %v21268_v57, 16 }
 0xcb8   : > { %v5242_v10 = vadd.f32 %v5241_v4, %v5135_v59  ;;  %v5366_v16 = vadd.f32 %v5359_v50, %v5240_v5  ;;  %v18522_v59 = vld [vmem:[%s24113_s1 + $0x1d4] ss:$8 sps:$4 sm:$0xff]   ;;  %v18544_v4 = vld [vmem:[%s24113_s1 + $0x190] ss:$8 sps:$4 sm:$0xff]  }
 0xcb9   : > { %v6117_v50 = vsel %vm802_vm2, %v6115_v45, %v6116_v60  ;;  %v18546_v5 = vld [vmem:[%s24113_s1 + $0x194] ss:$8 sps:$4 sm:$0xff]   ;;  %v18531_v45 = vld [vmem:[%s24113_s1 + $0x164] ss:$8 sps:$4 sm:$0xff]  }
 0xcba   : > { %v5367_v21 = vadd.f32 %v5361_v62, %v5242_v10  ;;  %v18526_v62 = vld [vmem:[%s24113_s1 + $0x1c0] ss:$8 sps:$4 sm:$0xff]   ;;  %v6404_v10 = vrot.slane %v21268_v57, 2 }
 0xcc9   : > { %v5480_v9 = vpop.f32.mrf.mxu1 }
 0xcca   : > { %v5489_v13 = vadd.f32 %v5480_v9, %v5364_v6  ;;  %v18552_v6 = vld [vmem:[%s24113_s1 + $0x184] ss:$8 sps:$4 sm:$0xff]   ;;  %v6403_v9 = vrot.slane %v21265_v51, 2 }
 0xccb   : > { %v5482_v14 = vpop.f32.mrf.mxu1 }
 0xccc   : > { %v5490_v15 = vadd.f32 %v5482_v14, %v5365_v11  ;;  %v5612_v22 = vadd.f32 %v5603_v0, %v5489_v13  ;;  %v18534_v0 = vld [vmem:[%s24113_s1 + $0x1b4] ss:$8 sps:$4 sm:$0xff]   ;;  %v6405_v11 = vsel %vm1094_vm4, %v6403_v9, %v6404_v10 }
 0xccd   : > { %v5484_v18 = vpop.f32.mrf.mxu1 }
 0xcce   : > { %v5613_v56 = vadd.f32 %v5605_v55, %v5490_v15  ;;  %v5491_v20 = vadd.f32 %v5484_v18, %v5366_v16  ;;  %v5628_v31 = vadd.f32 %v5621_v23, %v5612_v22  ;;  %v18550_v55 = vld [vmem:[%s24113_s1 + $0x180] ss:$8 sps:$4 sm:$0xff]   ;;  %v18466_v16 = vld [vmem:[%s24113_s1 + $0xb4] ss:$8 sps:$4 sm:$0xff]  }
 0xccf   : > { %v5486_v24 = vpop.f32.mrf.mxu1  ;;  %v18472_v22 = vld [vmem:[%s24113_s1 + $0x94] ss:$8 sps:$4 sm:$0xff]  }
 0xcd0   : > { %v5614_v25 = vadd.f32 %v5607_v17, %v5491_v20  ;;  %v5492_v26 = vadd.f32 %v5486_v24, %v5367_v21  ;;  %v5629_v28 = vadd.f32 %v5625_v19, %v5613_v56  ;;  %v5632_v36 = vmax.f32 %v5628_v31, 0.0  ;;  %v5762_v56 = vld [vmem:[%s24119_s7] sm:$0x7]  ;;  %v18469_v20 = vld [vmem:[%s24113_s1 + $0xa4] ss:$8 sps:$4 sm:$0xff]  }
 0xcd1   : > { %v18467_v21 = vld [vmem:[%s24113_s1 + $0xa0] ss:$8 sps:$4 sm:$0xff]   ;;  %v18475_v24 = vld [vmem:[%s24113_s1 + $0x84] ss:$8 sps:$4 sm:$0xff]   ;;  %v5858_v31 = vshll.u32 %v21268_v57, 16 }
 0xcd2   : > { %v5630_v29 = vadd.f32 %v5621_v23, %v5614_v25  ;;  %v5615_v30 = vadd.f32 %v5609_v27, %v5492_v26  ;;  %v5633_v34 = vmax.f32 %v5629_v28, 0.0  ;;  %v18470_v23 = vld [vmem:[%s24113_s1 + $0x90] ss:$8 sps:$4 sm:$0xff]   ;;  %v18473_v25 = vld [vmem:[%s24113_s1 + $0x80] ss:$8 sps:$4 sm:$0xff]   ;;  %v5853_v26 = vshll.u32 %v21265_v51, 16 }
 0xcd3   : > { %v18478_v27 = vld [vmem:[%s24113_s1 + $0x74] ss:$8 sps:$4 sm:$0xff]   ;;  %v18476_v28 = vld [vmem:[%s24113_s1 + $0x70] ss:$8 sps:$4 sm:$0xff]  }
 0xcd4   : > { %v5631_v32 = vadd.f32 %v5625_v19, %v5615_v30  ;;  %v5634_v33 = vmax.f32 %v5630_v29, 0.0  ;;  %v18464_v19 = vld [vmem:[%s24113_s1 + $0xb0] ss:$8 sps:$4 sm:$0xff]   ;;  %v5851_v29 = vshrl.u32 %v21265_v51, 16  ;;  %v5855_v30 = vrot.slane %v5853_v26, 1 }
 0xcd6   : > { %v5635_v35 = vmax.f32 %v5631_v32, 0.0  ;;  %v5636_v39 = vpack.c.bf16 %v5634_v33, %v5632_v36  ;;  %v18481_v32 = vld [vmem:[%s24113_s1 + $0x64] ss:$8 sps:$4 sm:$0xff]   ;;  %v18479_v33 = vld [vmem:[%s24113_s1 + $0x60] ss:$8 sps:$4 sm:$0xff]  }
 0xcd7   : > { %v18489_v36 = vld [vmem:[%s24113_s1 + $0x54] ss:$8 sps:$4 sm:$0xff]  }
 0xcd8   : > { %v5637_v37 = vpack.c.bf16 %v5635_v35, %v5633_v34  ;;  %v5856_v34 = vor.u32 %v5855_v30, %v5851_v29  ;;  %v5860_v35 = vrot.slane %v5858_v31, 1 }
 0xcda   : > { %16133 = vmatprep.mubr.msk.bf16.mxu1 %vm2182_vm11, %v5637_v37 }
 0xcdb   : > { %5754 = vmatmul.mubr.bf16.vlgmr.msra.gmra.mxu1 %v5636_v39  ;;  %v18487_v39 = vld [vmem:[%s24113_s1 + $0x50] ss:$8 sps:$4 sm:$0xff]  }
 0xcdc   : > { %6216 = vmatprep.mubr.bf16.mxu1 %v19506_v2  ;;  %6189 = vmatpush1.bf16.msra.mxu1 %v18482_v42  ;;  %v18495_v42 = vld [vmem:[%s24113_s1 + $0x44] ss:$8 sps:$4 sm:$0xff]  }
 0xcdd   : > { %6190 = vmatprep.subr.bf16.mxu1 %v18492_v46  ;;  %v18493_v46 = vld [vmem:[%s24113_s1 + $0x40] ss:$8 sps:$4 sm:$0xff]  }
 0xce0   : > { %6191 = vmatpush1.bf16.msra.mxu1 %v18490_v41  ;;  %v18501_v41 = vld [vmem:[%s24113_s1 + $0x34] ss:$8 sps:$4 sm:$0xff]  }
 0xce1   : > { %6192 = vmatprep.subr.bf16.mxu1 %v18498_v44  ;;  %v18499_v44 = vld [vmem:[%s24113_s1 + $0x30] ss:$8 sps:$4 sm:$0xff]  }
 0xce4   : > { %6193 = vmatpush1.bf16.msra.mxu1 %v18496_v38  ;;  %v5864_v38 = vor.u32 %v5862_v43, %v5860_v35 }
 0xce5   : > { %6194 = vmatprep.subr.bf16.mxu1 %v18504_v49  ;;  %v18505_v49 = vld [vmem:[%s24113_s1 + $0x20] ss:$8 sps:$4 sm:$0xff]  }
 0xce8   : > { %6195 = vmatpush1.bf16.msra.mxu1 %v18502_v48  ;;  %v18507_v48 = vld [vmem:[%s24113_s1 + $0x24] ss:$8 sps:$4 sm:$0xff]  }
 0xce9   : > { %6196 = vmatprep.subr.bf16.mxu1 %v18510_v52  ;;  %v18511_v52 = vld [vmem:[%s24113_s1 + $0x10] ss:$8 sps:$4 sm:$0xff]  }
 0xcec   : > { %6197 = vmatpush1.bf16.msra.mxu1 %v18508_v40  ;;  %v18513_v40 = vld [vmem:[%s24113_s1 + $0x14] ss:$8 sps:$4 sm:$0xff]  }
 0xced   : > { %6198 = vmatprep.subr.bf16.mxu1 %v18516_v47  ;;  %v18517_v47 = vld [vmem:[%s24113_s1] ss:$8 sps:$4 sm:$0xff]  }
 0xcf0   : > { %6199 = vmatpush1.bf16.msra.mxu1 %v18514_v53  ;;  %v18519_v53 = vld [vmem:[%s24113_s1 + $0x4] ss:$8 sps:$4 sm:$0xff]  }
 0xcf1   : > { %6476 = vmatprep.subr.bf16.mxu1 %v18522_v59  ;;  %v18523_v59 = vld [vmem:[%s24113_s1 + $0x170] ss:$8 sps:$4 sm:$0xff]  }
 0xcf3   : > { %16205 = vmatmul.mubr.msk.bf16.vlgmr.msra.gmra.mxu1 %vm610_vm1, %v6117_v50  ;;  %v18537_v50 = vld [vmem:[%s24113_s1 + $0x154] ss:$8 sps:$4 sm:$0xff]  }
 0xcf4   : > { %6477 = vmatpush1.bf16.msra.mxu1 %v18520_v58  ;;  %6226 = vmatprep.mubr.bf16.mxu1 %v19506_v2  ;;  %v18525_v58 = vld [vmem:[%s24113_s1 + $0x174] ss:$8 sps:$4 sm:$0xff]  }
 0xcf5   : > { %6478 = vmatprep.subr.bf16.mxu1 %v18528_v61  ;;  %v18535_v61 = vld [vmem:[%s24113_s1 + $0x150] ss:$8 sps:$4 sm:$0xff]  }
 0xcf8   : > { %6479 = vmatpush1.bf16.msra.mxu1 %v18526_v62  ;;  %v18543_v62 = vld [vmem:[%s24113_s1 + $0x144] ss:$8 sps:$4 sm:$0xff]  }
 0xcf9   : > { %6480 = vmatprep.subr.bf16.mxu1 %v18534_v0  ;;  %v18549_v0 = vld [vmem:[%s24113_s1 + $0x134] ss:$8 sps:$4 sm:$0xff]  }
 0xcfb   : > { %16206 = vmatmul.mubr.msk.bf16.gmra.mxu1 %vm610_vm1, %v6116_v60  ;;  %v18529_v60 = vld [vmem:[%s24113_s1 + $0x160] ss:$8 sps:$4 sm:$0xff]  }
 0xcfc   : > { %6481 = vmatpush1.bf16.msra.mxu1 %v18532_v63  ;;  %6504 = vmatprep.mubr.bf16.mxu1 %v19506_v2  ;;  %v18541_v63 = vld [vmem:[%s24113_s1 + $0x140] ss:$8 sps:$4 sm:$0xff]  }
 0xcfd   : > { %6482 = vmatprep.subr.bf16.mxu1 %v18540_v1  ;;  %v6257_v1 = vrot.slane %v5851_v29, 1 }
 0xd00   : > { %6483 = vmatpush1.bf16.msra.mxu1 %v18538_v3  ;;  %v6261_v3 = vrot.slane %v5858_v31, 2 }
 0xd01   : > { %6484 = vmatprep.subr.bf16.mxu1 %v18546_v5  ;;  %v6258_v5 = vrot.slane %v5853_v26, 2 }
 0xd03   : > { %v6259_v9 = vor.u32 %v6258_v5, %v6257_v1 }
 0xd04   : > { %6485 = vmatpush1.bf16.msra.mxu1 %v18544_v4  ;;  %v6260_v4 = vrot.slane %v5862_v43, 1 }
 0xd05   : > { %6486 = vmatprep.subr.bf16.mxu1 %v18552_v6  ;;  %v18553_v6 = vld [vmem:[%s24113_s1 + $0x120] ss:$8 sps:$4 sm:$0xff]  }
 0xd08   : > { %6487 = vmatpush1.bf16.msra.mxu1 %v18550_v55  ;;  %v18555_v55 = vld [vmem:[%s24113_s1 + $0x124] ss:$8 sps:$4 sm:$0xff]  }
 0xd09   : > { %17680 = vmatprep.subr.bf16.mxu1 %v19507_v8 }
 0xd0b   : > { %16257 = vmatmul.mubr.msk.bf16.vlgmr.msra.gmra.mxu1 %vm610_vm1, %v6405_v11 }
 0xd0c   : > { %6514 = vmatprep.mubr.bf16.mxu1 %v19506_v2 }
 0xd13   : > { %16258 = vmatmul.mubr.msk.bf16.gmra.mxu1 %vm610_vm1, %v6404_v10  ;;  %v6262_v10 = vor.u32 %v6261_v3, %v6260_v4 }
 0xd14   : > { %17684 = vmatprep.mubr.msk.bf16.mxu1 %vm19508_vm7, %v19507_v8 }
 0xd9b   : > { %v5755_v13 = vpop.f32.mrf.mxu1 }
 0xd9d   : > { %v5757_v14 = vpop.f32.mrf.mxu1 }
 0xd9e   : > { %v18558_v14 = vld [vmem:[%s24116_s4 + $0x28] sm:$0xff]  }
 0xd9f   : > { %v5758_v54 = vpop.f32.mrf.mxu1 }
 0xda0   : > { %v5763_v15 = vpack.c.bf16 %v5758_v54, %v5755_v13  ;;  %v18557_v13 = vld [vmem:[%s24116_s4 + $0x30] sm:$0xff]   ;;  %v18559_v54 = vld [vmem:[%s24116_s4 + $0x20] sm:$0xff]  }
 0xda1   : > { %v5760_v17 = vpop.f32.mrf.mxu1 }
 0xda2   : > { %v5768_v18 = vsel %vm2233_vm12, %v5763_v15, 0  ;;  %v18560_v15 = vld [vmem:[%s24116_s4 + $0x18] sm:$0xff]   ;;  %v18562_v17 = vld [vmem:[%s24116_s4 + $0x8] sm:$0xff]  }
 0xda3   : > { %17675 = vmatpush3.bf16.msra.mxu0 %v5768_v18  ;;  %v18563_v18 = vld [vmem:[%s24116_s4] sm:$0xff]  }
 0xda4   : > { %5935 = vmatprep.subr.bf16.mxu0 %v18466_v16  ;;  %v18561_v16 = vld [vmem:[%s24116_s4 + $0x10] sm:$0xff]  }
 0xda6   : > { %17677 = vmatmul.mubr.msk.bf16.vlgmr.msra.gmra.mxu0 %vm24135_vm13, %v5762_v56  ;;  %vm24136_vm13 = vsmask.f32 7424  ;;  %v18564_v56 = vld [vmem:[%s24116_s4 + $0x50] ss:$0 sps:$4 sm:$0xff]  }
 0xda7   : > { %5936 = vmatpush1.bf16.msra.mxu0 %v18464_v19  ;;  %5963 = vmatprep.mubr.bf16.mxu0 %v19506_v2  ;;  %v5861_v37 = vsel %vm24136_vm13, %v5856_v34, %v5860_v35  ;;  %vm24137_vm13 = vsmask.f32 6400 }
 0xda8   : > { %5937 = vmatprep.subr.bf16.mxu0 %v18469_v20  ;;  %v6263_v11 = vsel %vm24137_vm13, %v6259_v9, %v6262_v10  ;;  %vm24138_vm13 = vcmask 1043456   ;;  %v18565_v20 = vld [vmem:[%s24116_s4 + $0x48] sm:$0xff]  }
 0xda9   : > { %v6656_v19 = vsel %vm24138_vm13, %v18564_v56, 0  ;;  %vm24139_vm13 = vcmask 80896  }
 0xdab   : > { %5938 = vmatpush1.bf16.msra.mxu0 %v18467_v21  ;;  %v18566_v21 = vld [vmem:[%s24116_s4 + $0x40] sm:$0xff]  }
 0xdac   : > { %5939 = vmatprep.subr.bf16.mxu0 %v18472_v22 }
 0xdaf   : > { %5940 = vmatpush1.bf16.msra.mxu0 %v18470_v23 }
 0xdb0   : > { %5941 = vmatprep.subr.bf16.mxu0 %v18475_v24 }
 0xdb3   : > { %5942 = vmatpush1.bf16.msra.mxu0 %v18473_v25  ;;  %v6218_v30 = vpop.f32.mrf.mxu1 }
 0xdb4   : > { %5943 = vmatprep.subr.bf16.mxu0 %v18478_v27 }
 0xdb7   : > { %5944 = vmatpush1.bf16.msra.mxu0 %v18476_v28 }
 0xdb8   : > { %5945 = vmatprep.subr.bf16.mxu0 %v18481_v32  ;;  %v6220_v32 = vpop.f32.mrf.mxu1 }
 0xdba   : > { %v6222_v34 = vpop.f32.mrf.mxu1 }
 0xdbb   : > { %5946 = vmatpush1.bf16.msra.mxu0 %v18479_v33 }
 0xdbc   : > { %6052 = vmatprep.subr.bf16.mxu0 %v18489_v36  ;;  %v6224_v36 = vpop.f32.mrf.mxu1 }
 0xdbe   : > { %16165 = vmatmul.mubr.msk.bf16.vlgmr.msra.gmra.mxu0 %vm610_vm1, %v5861_v37 }
 0xdbf   : > { %6053 = vmatpush1.bf16.msra.mxu0 %v18487_v39  ;;  %5973 = vmatprep.mubr.bf16.mxu0 %v19506_v2  ;;  %v6228_v39 = vpop.f32.mrf.mxu1 }
 0xdc0   : > { %6054 = vmatprep.subr.bf16.mxu0 %v18495_v42 }
 0xdc3   : > { %6055 = vmatpush1.bf16.msra.mxu0 %v18493_v46  ;;  %v6230_v46 = vpop.f32.mrf.mxu1 }
 0xdc4   : > { %6056 = vmatprep.subr.bf16.mxu0 %v18501_v41 }
 0xdc6   : > { %16166 = vmatmul.mubr.msk.bf16.gmra.mxu0 %vm610_vm1, %v5864_v38 }
 0xdc7   : > { %6057 = vmatpush1.bf16.msra.mxu0 %v18499_v44  ;;  %6080 = vmatprep.mubr.bf16.mxu0 %v19506_v2  ;;  %v6232_v44 = vpop.f32.mrf.mxu1 }
 0xdc8   : > { %6058 = vmatprep.subr.bf16.mxu0 %v18507_v48 }
 0xdcb   : > { %6059 = vmatpush1.bf16.msra.mxu0 %v18505_v49  ;;  %v6234_v49 = vpop.f32.mrf.mxu1 }
 0xdcc   : > { %6060 = vmatprep.subr.bf16.mxu0 %v18513_v40 }
 0xdcd   : > { %v6506_v40 = vpop.f32.mrf.mxu1 }
 0xdcf   : > { %6061 = vmatpush1.bf16.msra.mxu0 %v18511_v52 }
 0xdd0   : > { %6062 = vmatprep.subr.bf16.mxu0 %v18519_v53  ;;  %v6508_v53 = vpop.f32.mrf.mxu1 }
 0xdd3   : > { %6063 = vmatpush1.bf16.msra.mxu0 %v18517_v47 }
 0xdd4   : > { %6334 = vmatprep.subr.bf16.mxu0 %v18525_v58 }
 0xdd6   : > { %16179 = vmatmul.mubr.msk.bf16.vlgmr.msra.gmra.mxu0 %vm610_vm1, %v21265_v51  ;;  %v18556_v51 = vld [vmem:[%s24116_s4 + $0x38] sm:$0xff]  }
 0xdd7   : > { %6335 = vmatpush1.bf16.msra.mxu0 %v18523_v59  ;;  %6090 = vmatprep.mubr.bf16.mxu0 %v19506_v2  ;;  %v6510_v59 = vpop.f32.mrf.mxu1 }
 0xdd8   : > { %6336 = vmatprep.subr.bf16.mxu0 %v18531_v45 }
 0xddb   : > { %6337 = vmatpush1.bf16.msra.mxu0 %v18529_v60 }
 0xddc   : > { %6338 = vmatprep.subr.bf16.mxu0 %v18537_v50 }
 0xdde   : > { %16180 = vmatmul.mubr.msk.bf16.gmra.mxu0 %vm610_vm1, %v21268_v57  ;;  %v18547_v57 = vld [vmem:[%s24113_s1 + $0x130] ss:$8 sps:$4 sm:$0xff]  }
 0xddf   : > { %6339 = vmatpush1.bf16.msra.mxu0 %v18535_v61  ;;  %6362 = vmatprep.mubr.bf16.mxu0 %v19506_v2 }
 0xde0   : > { %6340 = vmatprep.subr.bf16.mxu0 %v18543_v62 }
 0xde3   : > { %6341 = vmatpush1.bf16.msra.mxu0 %v18541_v63  ;;  %v6512_v63 = vpop.f32.mrf.mxu1 }
 0xde4   : > { %6342 = vmatprep.subr.bf16.mxu0 %v18549_v0 }
 0xde7   : > { %6343 = vmatpush1.bf16.msra.mxu0 %v18547_v57  ;;  %v6533_v57 = vld [vmem:[%s24114_s2] sm:$0x3] }
 0xde8   : > { %6344 = vmatprep.subr.bf16.mxu0 %v18555_v55 }
 0xdeb   : > { %6345 = vmatpush1.bf16.msra.mxu0 %v18553_v6 }
 0xdec   : > { %6658 = vmatprep.subr.bf16.mxu0 %v19506_v2 }
 0xdee   : > { %16231 = vmatmul.mubr.msk.bf16.vlgmr.msra.gmra.mxu0 %vm610_vm1, %v6263_v11  ;;  %v6516_v11 = vpop.f32.mrf.mxu1 }
 0xdef   : > { %6372 = vmatprep.mubr.bf16.mxu0 %v19506_v2  ;;  %6659 = vmatpush1.bf16.msra.mxu0 %v18556_v51 }
 0xdf0   : > { %6660 = vmatprep.subr.bf16.mxu0 %v19506_v2 }
 0xdf3   : > { %6661 = vmatpush1.bf16.msra.mxu0 %v18557_v13  ;;  %v6542_v13 = vrot.slane %v6533_v57, %v19870_v7 }
 0xdf4   : > { %6662 = vmatprep.subr.bf16.mxu0 %v19506_v2 }
 0xdf6   : > { %16232 = vmatmul.mubr.msk.bf16.gmra.mxu0 %vm610_vm1, %v6262_v10 }
 0xdf7   : > { %6663 = vmatpush1.bf16.msra.mxu0 %v18558_v14 }
 0xdf8   : > { %6664 = vmatprep.subr.bf16.mxu0 %v19506_v2 }
 0xdfb   : > { %6665 = vmatpush1.bf16.msra.mxu0 %v18559_v54 }
 0xdfc   : > { %6666 = vmatprep.subr.bf16.mxu0 %v19506_v2 }
 0xdff   : > { %6667 = vmatpush1.bf16.msra.mxu0 %v18560_v15 }
 0xe00   : > { %6668 = vmatprep.subr.bf16.mxu0 %v19506_v2 }
 0xe03   : > { %6669 = vmatpush1.bf16.msra.mxu0 %v18561_v16  ;;  %v6538_v16 = vrot.slane %v6533_v57, %v19875_v12 }
 0xe04   : > { %6670 = vmatprep.subr.bf16.mxu0 %v19506_v2 }
 0xe07   : > { %6671 = vmatpush1.bf16.msra.mxu0 %v18562_v17 }
 0xe08   : > { %6672 = vmatprep.subr.bf16.mxu0 %v19506_v2 }
 0xe0b   : > { %6673 = vmatpush1.bf16.msra.mxu0 %v18563_v18 }
 0xe0c   : > { %6684 = vmatprep.subr.bf16.mxu0 %v19506_v2 }
 0xe0f   : > { %6685 = vmatpush2.bf16.msra.mxu0 %v6656_v19 }
 0xe10   : > { %6686 = vmatprep.subr.bf16.mxu0 %v19506_v2 }
 0xe13   : > { %6687 = vmatpush2.bf16.msra.mxu0 %v18565_v20 }
 0xe14   : > { %6688 = vmatprep.subr.bf16.mxu0 %v19506_v2 }
 0xe17   : > { %6689 = vmatpush2.bf16.msra.mxu0 %v18566_v21 }
 0xe66   : > { %v5804_v22 = vpop.f32.mrf.mxu0 }
 0xe67   : > { %5810 = vst.msk [vmem:[#allocation2 + $0x2] sm:$0x1] %vm2277_vm14, %v5804_v22 }
 0xe68   : > { %5811 = vst.msk [vmem:[#allocation2 + $0x9] sm:$0x2] %vm2280_vm15, %v5804_v22  ;;  %v17678_v23 = vpop.f32.mrf.mxu0 }
 0xe69   : > { %5812 = vst.msk [vmem:[#allocation2 + $0x10] sm:$0x4] %vm2283_vm3, %v5804_v22 }
 0xe6a   : > { %5813 = vst.msk [vmem:[#allocation2 + $0x17] sm:$0x8] %vm2286_vm0, %v5804_v22  ;;  %v5807_v24 = vpop.f32.mrf.mxu0 }
 0xe6b   : > { %5814 = vst.msk [vmem:[#allocation2 + $0x1e] sm:$0x10] %vm2289_vm5, %v5804_v22  ;;  %v6518_v22 = vpop.f32.mrf.mxu1 }
 0xe6c   : > { %v17679_v25 = vpop.f32.mrf.mxu0 }
 0xe7e   : > { %v5965_v26 = vpop.f32.mrf.mxu0 }
 0xe80   : > { %v5967_v27 = vpop.f32.mrf.mxu0 }
 0xe82   : > { %v5969_v28 = vpop.f32.mrf.mxu0 }
 0xe84   : > { %v5971_v29 = vpop.f32.mrf.mxu0 }
 0xe86   : > { %v5975_v31 = vpop.f32.mrf.mxu0 }
 0xe88   : > { %v5977_v33 = vpop.f32.mrf.mxu0 }
 0xe8a   : > { %v5979_v35 = vpop.f32.mrf.mxu0 }
 0xe8c   : > { %v5981_v37 = vpop.f32.mrf.mxu0 }
 0xe96   : > { %v6082_v42 = vpop.f32.mrf.mxu0 }
 0xe97   : > { %v6083_v58 = vadd.f32 %v6082_v42, %v5965_v26 }
 0xe98   : > { %v6084_v43 = vpop.f32.mrf.mxu0 }
 0xe99   : > { %v6085_v45 = vadd.f32 %v6084_v43, %v5967_v27  ;;  %v6237_v61 = vadd.f32 %v6218_v30, %v6083_v58 }
 0xe9a   : > { %v6086_v41 = vpop.f32.mrf.mxu0 }
 0xe9b   : > { %v6087_v50 = vadd.f32 %v6086_v41, %v5969_v28  ;;  %v6238_v1 = vadd.f32 %v6220_v32, %v6085_v45 }
 0xe9c   : > { %v6088_v38 = vpop.f32.mrf.mxu0 }
 0xe9d   : > { %v6089_v0 = vadd.f32 %v6088_v38, %v5971_v29  ;;  %v6239_v55 = vadd.f32 %v6222_v34, %v6087_v50 }
 0xe9e   : > { %v6092_v48 = vpop.f32.mrf.mxu0 }
 0xe9f   : > { %v6093_v6 = vadd.f32 %v6092_v48, %v5975_v31  ;;  %v6240_v54 = vadd.f32 %v6224_v36, %v6089_v0  ;;  %v6520_v36 = vpop.f32.mrf.mxu1 }
 0xea0   : > { %v6094_v52 = vpop.f32.mrf.mxu0 }
 0xea1   : > { %v6095_v9 = vadd.f32 %v6094_v52, %v5977_v33  ;;  %v6241_v19 = vadd.f32 %v6228_v39, %v6093_v6  ;;  %v18570_v6 = vld [vmem:[%s24117_s5 + $0x40] ss:$8 sps:$4 sm:$0xff]  }
 0xea2   : > { %v6096_v47 = vpop.f32.mrf.mxu0 }
 0xea3   : > { %v6097_v20 = vadd.f32 %v6096_v47, %v5979_v35  ;;  %v6242_v21 = vadd.f32 %v6230_v46, %v6095_v9  ;;  %v6522_v47 = vpop.f32.mrf.mxu1  ;;  %v18577_v9 = vld [vmem:[%s24117_s5 + $0x34] ss:$8 sps:$4 sm:$0xff]  }
 0xea4   : > { %v6098_v60 = vpop.f32.mrf.mxu0 }
 0xea5   : > { %v6099_v24 = vadd.f32 %v6098_v60, %v5981_v37  ;;  %v6243_v33 = vadd.f32 %v6232_v44, %v6097_v20 }
 0xea7   : > { %v6244_v43 = vadd.f32 %v6234_v49, %v6099_v24 }
 0xeae   : > { %v6364_v62 = vpop.f32.mrf.mxu0 }
 0xeaf   : > { %v6383_v3 = vadd.f32 %v6364_v62, %v6237_v61 }
 0xeb0   : > { %v6366_v4 = vpop.f32.mrf.mxu0 }
 0xeb1   : > { %v6384_v5 = vadd.f32 %v6366_v4, %v6238_v1  ;;  %v6525_v15 = vadd.f32 %v6506_v40, %v6383_v3  ;;  %v6774_v3 = vld [vmem:[%s24117_s5 + $0x50] sm:$0x33] }
 0xeb2   : > { %v6368_v10 = vpop.f32.mrf.mxu0  ;;  %v16310_v4 = vcombine.high %v6774_v3, %v6774_v3  ;;  %v16309_v57 = vcombine.low %v6774_v3, %v6774_v3  ;;  %v18614_v3 = vld [vmem:[%s24117_s5 + $0xf4] ss:$8 sps:$4 sm:$0xff]  }
 0xeb3   : > { %v6526_v51 = vadd.f32 %v6508_v53, %v6384_v5  ;;  %v6385_v14 = vadd.f32 %v6368_v10, %v6239_v55  ;;  %v6545_v28 = vadd.f32 %v6538_v16, %v6525_v15  ;;  %v18572_v5 = vld [vmem:[%s24117_s5 + $0x44] ss:$8 sps:$4 sm:$0xff]   ;;  %v18575_v10 = vld [vmem:[%s24117_s5 + $0x30] ss:$8 sps:$4 sm:$0xff]  }
 0xeb4   : > { %v6370_v17 = vpop.f32.mrf.mxu0  ;;  %16311 = vmatprep.subr.msk.bf16.mxu0 %vm1549_vm8, %v16310_v4  ;;  %v6958_v55 = vsel %vm1549_vm8, %v16309_v57, 0  ;;  %v18609_v4 = vld [vmem:[%s24117_s5 + $0x138] ss:$8 sps:$4 sm:$0xff]   ;;  %v18617_v57 = vld [vmem:[%s24117_s5 + $0x12c] ss:$8 sps:$4 sm:$0xff]  }
 0xeb5   : > { %v6527_v18 = vadd.f32 %v6510_v59, %v6385_v14  ;;  %v6386_v56 = vadd.f32 %v6370_v17, %v6240_v54  ;;  %v6546_v25 = vadd.f32 %v6542_v13, %v6526_v51  ;;  %v6553_v46 = vmax.f32 %v6545_v28, 0.0  ;;  %v18581_v51 = vld [vmem:[%s24117_s5 + $0x20] ss:$8 sps:$4 sm:$0xff]   ;;  %v18587_v14 = vld [vmem:[%s24117_s5 + $0x10] ss:$8 sps:$4 sm:$0xff]  }
 0xeb6   : > { %v6374_v23 = vpop.f32.mrf.mxu0 }
 0xeb7   : > { %v6547_v26 = vadd.f32 %v6538_v16, %v6527_v18  ;;  %v6528_v27 = vadd.f32 %v6512_v63, %v6386_v56  ;;  %v6387_v29 = vadd.f32 %v6374_v23, %v6241_v19  ;;  %v6554_v41 = vmax.f32 %v6546_v25, 0.0 }
 0xeb8   : > { %v6376_v30 = vpop.f32.mrf.mxu0 }
 0xeb9   : > { %v6548_v31 = vadd.f32 %v6542_v13, %v6528_v27  ;;  %v6388_v32 = vadd.f32 %v6376_v30, %v6242_v21  ;;  %v6555_v34 = vmax.f32 %v6547_v26, 0.0  ;;  %v6529_v38 = vadd.f32 %v6516_v11, %v6387_v29  ;;  %v18583_v11 = vld [vmem:[%s24117_s5 + $0x24] ss:$8 sps:$4 sm:$0xff]   ;;  %v18578_v30 = vld [vmem:[%s24117_s5 + $0x98] ss:$8 sps:$4 sm:$0xff]  }
 0xeba   : > { %v6378_v42 = vpop.f32.mrf.mxu0  ;;  %v18567_v27 = vld [vmem:[%s24115_s3] sm:$0x7f]  }
 0xebb   : > { %v6556_v39 = vmax.f32 %v6548_v31, 0.0  ;;  %v6530_v35 = vadd.f32 %v6518_v22, %v6388_v32  ;;  %v6389_v48 = vadd.f32 %v6378_v42, %v6243_v33  ;;  %v6561_v53 = vpack.c.bf16 %v6555_v34, %v6553_v46  ;;  %v16284_v22 = vld [vmem:[%s24117_s5 + $0xa8] sm:$0x33]  ;;  %v18580_v29 = vld [vmem:[%s24117_s5 + $0x9c] ss:$8 sps:$4 sm:$0xff]  }
 0xebc   : > { %v6380_v37 = vpop.f32.mrf.mxu0  ;;  %v6549_v44 = vadd.f32 %v6538_v16, %v6529_v38  ;;  %v16296_v24 = vcombine.high %v16284_v22, %v16284_v22  ;;  %v16295_v25 = vcombine.low %v16284_v22, %v16284_v22  ;;  %v18586_v31 = vld [vmem:[%s24117_s5 + $0x8c] ss:$8 sps:$4 sm:$0xff]   ;;  %v18584_v32 = vld [vmem:[%s24117_s5 + $0x88] ss:$8 sps:$4 sm:$0xff]   ;;  %v18592_v33 = vld [vmem:[%s24117_s5 + $0x7c] ss:$8 sps:$4 sm:$0xff]  }
 0xebd   : > { %v6390_v40 = vadd.f32 %v6380_v37, %v6244_v43  ;;  %v6562_v52 = vpack.c.bf16 %v6556_v39, %v6554_v41  ;;  %v6531_v58 = vadd.f32 %v6520_v36, %v6389_v48  ;;  %v6550_v59 = vadd.f32 %v6542_v13, %v6530_v35  ;;  %v18590_v34 = vld [vmem:[%s24117_s5 + $0x78] ss:$8 sps:$4 sm:$0xff]   ;;  %v18595_v36 = vld [vmem:[%s24117_s5 + $0x4] ss:$8 sps:$4 sm:$0xff]   ;;  %v18596_v41 = vld [vmem:[%s24117_s5 + $0x68] ss:$8 sps:$4 sm:$0xff]  }
 0xebe   : > { %v6557_v63 = vmax.f32 %v6549_v44, 0.0  ;;  %v6852_v28 = vsel %vm1549_vm8, %v16295_v25, 0  ;;  %v18593_v42 = vld [vmem:[%s24117_s5] ss:$8 sps:$4 sm:$0xff]   ;;  %v18598_v43 = vld [vmem:[%s24117_s5 + $0x6c] ss:$8 sps:$4 sm:$0xff]  }
 0xebf   : > { %v6532_v45 = vadd.f32 %v6522_v47, %v6390_v40  ;;  %16270 = vmatprep.mubr.msk.bf16.mxu0 %vm1341_vm6, %v6562_v52  ;;  %v6551_v60 = vadd.f32 %v6538_v16, %v6531_v58  ;;  %v6558_v61 = vmax.f32 %v6550_v59, 0.0  ;;  %v16348_v39 = vld [vmem:[%s24117_s5 + $0x158] sm:$0x33]  ;;  %v16323_v48 = vld [vmem:[%s24117_s5 + $0x100] sm:$0x33] }
 0xec0   : > { %6691 = vmatmul.mubr.bf16.vlgmr.msra.gmra.mxu0 %v6561_v53  ;;  %v16360_v35 = vcombine.high %v16348_v39, %v16348_v39  ;;  %v18603_v46 = vld [vmem:[%s24117_s5 + $0x5c] ss:$8 sps:$4 sm:$0xff]   ;;  %v18601_v38 = vld [vmem:[%s24117_s5 + $0x58] ss:$8 sps:$4 sm:$0xff]   ;;  %v16335_v37 = vcombine.high %v16323_v48, %v16323_v48  ;;  %v16359_v52 = vcombine.low %v16348_v39, %v16348_v39  ;;  %v18655_v39 = vld [vmem:[%s24120_s8 + $0x28] sm:$0xff]  }
 0xec1   : > { %v6552_v49 = vadd.f32 %v6542_v13, %v6532_v45  ;;  %v6559_v50 = vmax.f32 %v6551_v60, 0.0  ;;  %6968 = vmatpush1.bf16.msra.mxu0 %v6958_v55  ;;  %v18589_v13 = vld [vmem:[%s24117_s5 + $0x14] ss:$8 sps:$4 sm:$0xff]   ;;  %v18620_v55 = vld [vmem:[%s24117_s5 + $0xe4] ss:$8 sps:$4 sm:$0xff]  }
 0xec2   : > { %6969 = vmatprep.subr.bf16.mxu0 %v18572_v5  ;;  %v7203_v59 = vsel %vm1549_vm8, %v16359_v52, 0  ;;  %v18606_v45 = vld [vmem:[%s24117_s5 + $0x14c] ss:$8 sps:$4 sm:$0xff]   ;;  %v18612_v5 = vld [vmem:[%s24117_s5 + $0xf0] ss:$8 sps:$4 sm:$0xff]   ;;  %v18662_v52 = vld [vmem:[%s24120_s8 + $0x40] sm:$0xff]  }
 0xec3   : > { %v6560_v62 = vmax.f32 %v6552_v49, 0.0  ;;  %v6563_v1 = vpack.c.bf16 %v6559_v50, %v6557_v63  ;;  %v16334_v49 = vcombine.low %v16323_v48, %v16323_v48  ;;  %v18604_v50 = vld [vmem:[%s24117_s5 + $0x148] ss:$8 sps:$4 sm:$0xff]   ;;  %v18611_v63 = vld [vmem:[%s24117_s5 + $0x13c] ss:$8 sps:$4 sm:$0xff]  }
 0xec4   : > { %v18659_v48 = vld [vmem:[%s24120_s8 + $0x8] sm:$0xff]  }
 0xec5   : > { %v6564_v0 = vpack.c.bf16 %v6560_v62, %v6558_v61  ;;  %6970 = vmatpush1.bf16.msra.mxu0 %v18570_v6  ;;  %v18615_v6 = vld [vmem:[%s24117_s5 + $0x128] ss:$8 sps:$4 sm:$0xff]  }
 0xec6   : > { %6971 = vmatprep.subr.bf16.mxu0 %v18577_v9  ;;  %v18623_v9 = vld [vmem:[%s24117_s5 + $0x11c] ss:$8 sps:$4 sm:$0xff]  }
 0xec7   : > { %16271 = vmatprep.mubr.msk.bf16.mxu0 %vm1341_vm6, %v6564_v0 }
 0xec8   : > { %6699 = vmatmul.mubr.bf16.gmra.mxu0 %v6563_v1  ;;  %v7078_v1 = vsel %vm1549_vm8, %v16334_v49, 0 }
 0xec9   : > { %6995 = vmatprep.mubr.bf16.mxu0 %v19506_v2  ;;  %6972 = vmatpush1.bf16.msra.mxu0 %v18575_v10  ;;  %v18618_v10 = vld [vmem:[%s24117_s5 + $0xe0] ss:$8 sps:$4 sm:$0xff]  }
 0xeca   : > { %6973 = vmatprep.subr.bf16.mxu0 %v18583_v11  ;;  %v18626_v11 = vld [vmem:[%s24117_s5 + $0xd4] ss:$8 sps:$4 sm:$0xff]  }
 0xecd   : > { %6974 = vmatpush1.bf16.msra.mxu0 %v18581_v51  ;;  %v18621_v51 = vld [vmem:[%s24117_s5 + $0x118] ss:$8 sps:$4 sm:$0xff]  }
 0xece   : > { %6975 = vmatprep.subr.bf16.mxu0 %v18589_v13  ;;  %v18629_v13 = vld [vmem:[%s24117_s5 + $0x10c] ss:$8 sps:$4 sm:$0xff]  }
 0xed1   : > { %6976 = vmatpush1.bf16.msra.mxu0 %v18587_v14  ;;  %v18624_v14 = vld [vmem:[%s24117_s5 + $0xd0] ss:$8 sps:$4 sm:$0xff]  }
 0xed2   : > { %6977 = vmatprep.subr.bf16.mxu0 %v18595_v36  ;;  %v18650_v36 = vld [vmem:[%s24117_s5 + $0x160] ss:$8 sps:$4 sm:$0xff]  }
 0xed5   : > { %6978 = vmatpush1.bf16.msra.mxu0 %v18593_v42 }
 0xed6   : > { %16361 = vmatprep.subr.msk.bf16.mxu0 %vm1549_vm8, %v16360_v35  ;;  %v18656_v35 = vld [vmem:[%s24120_s8 + $0x20] sm:$0xff]  }
 0xf80   : > { %v6692_v54 = vpop.f32.mrf.mxu0 }
 0xf82   : > { %v6694_v15 = vpop.f32.mrf.mxu0 }
 0xf83   : > { %v18627_v15 = vld [vmem:[%s24117_s5 + $0x108] ss:$8 sps:$4 sm:$0xff]  }
 0xf84   : > { %v6695_v16 = vpop.f32.mrf.mxu0 }
 0xf85   : > { %v6709_v26 = vpack.c.bf16 %v6695_v16, %v6692_v54  ;;  %v18632_v54 = vld [vmem:[%s24117_s5 + $0xc4] ss:$8 sps:$4 sm:$0xff]  }
 0xf86   : > { %v6697_v17 = vpop.f32.mrf.mxu0 }
 0xf88   : > { %v6700_v18 = vpop.f32.mrf.mxu0 }
 0xf8a   : > { %v6702_v56 = vpop.f32.mrf.mxu0 }
 0xf8b   : > { %v18635_v56 = vld [vmem:[%s24117_s5 + $0xb4] ss:$8 sps:$4 sm:$0xff]  }
 0xf8c   : > { %v6703_v19 = vpop.f32.mrf.mxu0 }
 0xf8d   : > { %v6710_v20 = vpack.c.bf16 %v6703_v19, %v6700_v18  ;;  %v18630_v18 = vld [vmem:[%s24117_s5 + $0xc0] ss:$8 sps:$4 sm:$0xff]   ;;  %v16373_v19 = vld [vmem:[%s24117_s5 + $0x1b0] sm:$0x33] }
 0xf8e   : > { %v6705_v21 = vpop.f32.mrf.mxu0  ;;  %v16385_v22 = vcombine.high %v16373_v19, %v16373_v19 }
 0xf8f   : > { %v6720_v23 = vsel %vm1094_vm4, %v6710_v20, 0  ;;  %v18633_v21 = vld [vmem:[%s24117_s5 + $0xb0] ss:$8 sps:$4 sm:$0xff]  }
 0xf90   : > { %17681 = vmatpush3.bf16.msra.mxu1 %v6720_v23  ;;  %v16384_v23 = vcombine.low %v16373_v19, %v16373_v19 }
 0xf91   : > { %17682 = vmatprep.subr.bf16.mxu1 %v19507_v8 }
 0xf92   : > { %v7326_v25 = vsel %vm1549_vm8, %v16384_v23, 0 }
 0xf94   : > { %17683 = vmatpush3.bf16.msra.mxu1 %v6709_v26  ;;  %v18640_v26 = vld [vmem:[%s24117_s5 + $0x1a4] ss:$8 sps:$4 sm:$0xff]  }
 0xf95   : > { %16297 = vmatprep.subr.msk.bf16.mxu1 %vm1549_vm8, %v16296_v24 }
 0xf97   : > { %17685 = vmatmul.mubr.msk.bf16.vlgmr.msra.gmra.mxu1 %vm1410_vm9, %v18567_v27  ;;  %v18638_v27 = vld [vmem:[%s24117_s5 + $0x1a0] ss:$8 sps:$4 sm:$0xff]  }
 0xf98   : > { %6862 = vmatpush1.bf16.msra.mxu1 %v6852_v28  ;;  %6889 = vmatprep.mubr.bf16.mxu1 %v19506_v2  ;;  %v18643_v28 = vld [vmem:[%s24117_s5 + $0x194] ss:$8 sps:$4 sm:$0xff]  }
 0xf99   : > { %6863 = vmatprep.subr.bf16.mxu1 %v18580_v29  ;;  %v18641_v29 = vld [vmem:[%s24117_s5 + $0x190] ss:$8 sps:$4 sm:$0xff]  }
 0xf9c   : > { %6864 = vmatpush1.bf16.msra.mxu1 %v18578_v30  ;;  %v18646_v30 = vld [vmem:[%s24117_s5 + $0x184] ss:$8 sps:$4 sm:$0xff]  }
 0xf9d   : > { %6865 = vmatprep.subr.bf16.mxu1 %v18586_v31  ;;  %v18644_v31 = vld [vmem:[%s24117_s5 + $0x180] ss:$8 sps:$4 sm:$0xff]  }
 0xfa0   : > { %6866 = vmatpush1.bf16.msra.mxu1 %v18584_v32  ;;  %v18649_v32 = vld [vmem:[%s24117_s5 + $0x174] ss:$8 sps:$4 sm:$0xff]  }
 0xfa1   : > { %6867 = vmatprep.subr.bf16.mxu1 %v18592_v33  ;;  %v18647_v33 = vld [vmem:[%s24117_s5 + $0x170] ss:$8 sps:$4 sm:$0xff]  }
 0xfa4   : > { %6868 = vmatpush1.bf16.msra.mxu1 %v18590_v34  ;;  %v18652_v34 = vld [vmem:[%s24117_s5 + $0x164] ss:$8 sps:$4 sm:$0xff]  }
 0xfa5   : > { %6869 = vmatprep.subr.bf16.mxu1 %v18598_v43  ;;  %v18653_v43 = vld [vmem:[%s24120_s8 + $0x38] sm:$0xff]  }
 0xfa8   : > { %6870 = vmatpush1.bf16.msra.mxu1 %v18596_v41  ;;  %v18654_v41 = vld [vmem:[%s24120_s8 + $0x30] sm:$0xff]  }
 0xfa9   : > { %6871 = vmatprep.subr.bf16.mxu1 %v18603_v46  ;;  %v18657_v46 = vld [vmem:[%s24120_s8 + $0x18] sm:$0xff]  }
 0xfac   : > { %6872 = vmatpush1.bf16.msra.mxu1 %v18601_v38  ;;  %v18658_v38 = vld [vmem:[%s24120_s8 + $0x10] sm:$0xff]  }
 0xfad   : > { %16336 = vmatprep.subr.msk.bf16.mxu1 %vm1549_vm8, %v16335_v37  ;;  %v18660_v37 = vld [vmem:[%s24120_s8] sm:$0xff]  }
0x1057   : > { %v6756_v40 = vpop.f32.mrf.mxu1 }
0x1059   : > { %v17686_v53 = vpop.f32.mrf.mxu1 }
0x105b   : > { %v6759_v47 = vpop.f32.mrf.mxu1 }
0x105c   : > { %v21602_v58 = vpack.c.bf16 %v6759_v47, %v6756_v40  ;;  %v18661_v40 = vld [vmem:[%s24120_s8 + $0x48] sm:$0xff]  }
0x105d   : > { %v17687_v44 = vpop.f32.mrf.mxu1 }
0x105e   : > { %v6789_v60 = vshll.u32 %v21602_v58, 16  ;;  %16312 = vmatmul.mubr.msk.bf16.vlgmr.msra.gmra.mxu0 %vm1545_vm10, %v21602_v58  ;;  %v6787_v61 = vshrl.u32 %v21602_v58, 16  ;;  %v7018_v24 = vrot.slane %v21602_v58, 1  ;;  %v7266_v42 = vrot.slane %v21602_v58, 2 }
0x105f   : > { %7213 = vmatpush1.bf16.msra.mxu0 %v7203_v59  ;;  %7240 = vmatprep.mubr.bf16.mxu0 %v19506_v2 }
0x1060   : > { %v6791_v62 = vrot.slane %v6789_v60, 1  ;;  %7214 = vmatprep.subr.bf16.mxu0 %v18606_v45  ;;  %v7141_v16 = vrot.slane %v6787_v61, 1  ;;  %v7142_v17 = vrot.slane %v6789_v60, 2 }
0x1062   : > { %v6792_v0 = vor.u32 %v6791_v62, %v6787_v61  ;;  %v7143_v20 = vor.u32 %v7142_v17, %v7141_v16 }
0x1063   : > { %7215 = vmatpush1.bf16.msra.mxu0 %v18604_v50 }
0x1064   : > { %16298 = vmatmul.mubr.msk.bf16.vlgmr.msra.gmra.mxu1 %vm1545_vm10, %v6792_v0  ;;  %7216 = vmatprep.subr.bf16.mxu0 %v18611_v63 }
0x1065   : > { %7088 = vmatpush1.bf16.msra.mxu1 %v7078_v1  ;;  %7115 = vmatprep.mubr.bf16.mxu1 %v19506_v2 }
0x1066   : > { %7089 = vmatprep.subr.bf16.mxu1 %v18614_v3 }
0x1067   : > { %7217 = vmatpush1.bf16.msra.mxu0 %v18609_v4 }
0x1068   : > { %7218 = vmatprep.subr.bf16.mxu0 %v18617_v57 }
0x1069   : > { %7090 = vmatpush1.bf16.msra.mxu1 %v18612_v5 }
0x106a   : > { %7091 = vmatprep.subr.bf16.mxu1 %v18620_v55 }
0x106b   : > { %7219 = vmatpush1.bf16.msra.mxu0 %v18615_v6 }
0x106c   : > { %7220 = vmatprep.subr.bf16.mxu0 %v18623_v9 }
0x106d   : > { %7092 = vmatpush1.bf16.msra.mxu1 %v18618_v10 }
0x106e   : > { %7093 = vmatprep.subr.bf16.mxu1 %v18626_v11 }
0x106f   : > { %7221 = vmatpush1.bf16.msra.mxu0 %v18621_v51 }
0x1070   : > { %7222 = vmatprep.subr.bf16.mxu0 %v18629_v13  ;;  %v7378_v13 = vld [vmem:[%s24118_s6] sm:$0x3] }
0x1071   : > { %7094 = vmatpush1.bf16.msra.mxu1 %v18624_v14  ;;  %v7387_v17 = vrot.slane %v7378_v13, %v19870_v7 }
0x1072   : > { %7095 = vmatprep.subr.bf16.mxu1 %v18632_v54 }
0x1073   : > { %7223 = vmatpush1.bf16.msra.mxu0 %v18627_v15 }
0x1074   : > { %7483 = vmatprep.subr.bf16.mxu0 %v19506_v2 }
0x1075   : > { %7096 = vmatpush1.bf16.msra.mxu1 %v18630_v18 }
0x1076   : > { %16362 = vmatmul.mubr.msk.bf16.vlgmr.msra.gmra.mxu0 %vm1545_vm10, %v7143_v20  ;;  %7097 = vmatprep.subr.bf16.mxu1 %v18635_v56  ;;  %v7383_v20 = vrot.slane %v7378_v13, %v19875_v12 }
0x1077   : > { %7484 = vmatpush1.bf16.msra.mxu0 %v18653_v43  ;;  %v18683_v43 = vld [vmem:[%s24113_s1 + $0x114] ss:$8 sps:$4 sm:$0xff]  }
0x1078   : > { %7485 = vmatprep.subr.bf16.mxu0 %v19506_v2 }
0x1079   : > { %7098 = vmatpush1.bf16.msra.mxu1 %v18633_v21 }
0x107a   : > { %16386 = vmatprep.subr.msk.bf16.mxu1 %vm1549_vm8, %v16385_v22 }
0x107b   : > { %7486 = vmatpush1.bf16.msra.mxu0 %v18654_v41  ;;  %v18691_v41 = vld [vmem:[%s24113_s1 + $0x104] ss:$8 sps:$4 sm:$0xff]  }
0x107c   : > { %16337 = vmatmul.mubr.msk.bf16.vlgmr.msra.gmra.mxu1 %vm1545_vm10, %v7018_v24  ;;  %7487 = vmatprep.subr.bf16.mxu0 %v19506_v2 }
0x107d   : > { %7336 = vmatpush1.bf16.msra.mxu1 %v7326_v25  ;;  %7363 = vmatprep.mubr.bf16.mxu1 %v19506_v2 }
0x107e   : > { %7337 = vmatprep.subr.bf16.mxu1 %v18640_v26 }
0x107f   : > { %7488 = vmatpush1.bf16.msra.mxu0 %v18655_v39  ;;  %v18689_v39 = vld [vmem:[%s24113_s1 + $0x100] ss:$8 sps:$4 sm:$0xff]  }
0x1080   : > { %7489 = vmatprep.subr.bf16.mxu0 %v19506_v2 }
0x1081   : > { %7338 = vmatpush1.bf16.msra.mxu1 %v18638_v27 }
0x1082   : > { %7339 = vmatprep.subr.bf16.mxu1 %v18643_v28 }
0x1083   : > { %7490 = vmatpush1.bf16.msra.mxu0 %v18656_v35  ;;  %v18695_v35 = vld [vmem:[%s24113_s1 + $0xf0] ss:$8 sps:$4 sm:$0xff]  }
0x1084   : > { %7491 = vmatprep.subr.bf16.mxu0 %v19506_v2 }
0x1085   : > { %7340 = vmatpush1.bf16.msra.mxu1 %v18641_v29 }
0x1086   : > { %7341 = vmatprep.subr.bf16.mxu1 %v18646_v30 }
0x1087   : > { %7492 = vmatpush1.bf16.msra.mxu0 %v18657_v46  ;;  %v18697_v46 = vld [vmem:[%s24113_s1 + $0xf4] ss:$8 sps:$4 sm:$0xff]  }
0x1088   : > { %7493 = vmatprep.subr.bf16.mxu0 %v19506_v2 }
0x1089   : > { %7342 = vmatpush1.bf16.msra.mxu1 %v18644_v31 }
0x108a   : > { %7343 = vmatprep.subr.bf16.mxu1 %v18649_v32 }
0x108b   : > { %7494 = vmatpush1.bf16.msra.mxu0 %v18658_v38  ;;  %v18701_v38 = vld [vmem:[%s24113_s1 + $0xe0] ss:$8 sps:$4 sm:$0xff]  }
0x108c   : > { %7495 = vmatprep.subr.bf16.mxu0 %v19506_v2 }
0x108d   : > { %7344 = vmatpush1.bf16.msra.mxu1 %v18647_v33 }
0x108e   : > { %7345 = vmatprep.subr.bf16.mxu1 %v18652_v34 }
0x108f   : > { %7496 = vmatpush1.bf16.msra.mxu0 %v18659_v48  ;;  %v18703_v48 = vld [vmem:[%s24113_s1 + $0xe4] ss:$8 sps:$4 sm:$0xff]  }
0x1090   : > { %7497 = vmatprep.subr.bf16.mxu0 %v19506_v2 }
0x1091   : > { %7346 = vmatpush1.bf16.msra.mxu1 %v18650_v36 }
0x1092   : > { %17688 = vmatprep.subr.bf16.mxu1 %v19507_v8 }
0x1093   : > { %7498 = vmatpush1.bf16.msra.mxu0 %v18660_v37  ;;  %v18707_v37 = vld [vmem:[%s24113_s1 + $0xd0] ss:$8 sps:$4 sm:$0xff]  }
0x1094   : > { %16387 = vmatmul.mubr.msk.bf16.vlgmr.msra.gmra.mxu1 %vm1545_vm10, %v7266_v42  ;;  %7511 = vmatprep.subr.bf16.mxu0 %v19506_v2  ;;  %v18681_v42 = vld [vmem:[%s24113_s1 + $0x110] ss:$8 sps:$4 sm:$0xff]  }
0x1095   : > { %17690 = vmatprep.mubr.msk.bf16.mxu1 %vm19508_vm7, %v19507_v8 }
0x1097   : > { %7512 = vmatpush2.bf16.msra.mxu0 %v18661_v40  ;;  %v18709_v40 = vld [vmem:[%s24113_s1 + $0xd4] ss:$8 sps:$4 sm:$0xff]  }
0x1098   : > { %7513 = vmatprep.subr.bf16.mxu0 %v19506_v2 }
0x109b   : > { %7514 = vmatpush2.bf16.msra.mxu0 %v18662_v52  ;;  %v18713_v52 = vld [vmem:[%s24113_s1 + $0xc0] ss:$8 sps:$4 sm:$0xff]  }
0x109c   : > { %7950 = vmatprep.subr.bf16.mxu0 %v18683_v43 }
0x111e   : > { %v6997_v58 = vpop.f32.mrf.mxu0 }
0x1120   : > { %v6999_v45 = vpop.f32.mrf.mxu0 }
0x1122   : > { %v7001_v60 = vpop.f32.mrf.mxu0 }
0x1124   : > { %v6891_v53 = vpop.f32.mrf.mxu1  ;;  %v7003_v50 = vpop.f32.mrf.mxu0 }
0x1125   : > { %v6998_v1 = vadd.f32 %v6997_v58, %v6891_v53  ;;  %v18715_v53 = vld [vmem:[%s24113_s1 + $0xc4] ss:$8 sps:$4 sm:$0xff]  }
0x1126   : > { %v6893_v47 = vpop.f32.mrf.mxu1  ;;  %v21804_v58 = vld [vmem:[%s19662_s25 + $0x48] sm:$0xff]  }
0x1127   : > { %v7000_v0 = vadd.f32 %v6999_v45, %v6893_v47  ;;  %v21801_v47 = vld [vmem:[%s19662_s25 + $0x40] sm:$0xff]   ;;  %v18721_v45 = vld [vmem:[%s24113_s1 + $0x1d4] ss:$8 sps:$4 sm:$0xff]   ;;  %v7624_v43 = vshrl.u32 %v21804_v58, 16 }
0x1128   : > { %v6895_v59 = vpop.f32.mrf.mxu1 }
0x1129   : > { %v7002_v4 = vadd.f32 %v7001_v60, %v6895_v59  ;;  %v18719_v59 = vld [vmem:[%s24113_s1 + $0x1d0] ss:$8 sps:$4 sm:$0xff]   ;;  %v7878_v60 = vrot.slane %v21804_v58, 1 }
0x112a   : > { %v6897_v44 = vpop.f32.mrf.mxu1 }
0x112b   : > { %v7004_v6 = vadd.f32 %v7003_v50, %v6897_v44  ;;  %v7877_v44 = vrot.slane %v21801_v47, 1  ;;  %v18727_v50 = vld [vmem:[%s24113_s1 + $0x1c4] ss:$8 sps:$4 sm:$0xff]  }
0x1136   : > { %v7242_v62 = vpop.f32.mrf.mxu0 }
0x1138   : > { %v7244_v3 = vpop.f32.mrf.mxu0 }
0x113a   : > { %v7246_v10 = vpop.f32.mrf.mxu0 }
0x113c   : > { %v7117_v49 = vpop.f32.mrf.mxu1  ;;  %v7248_v56 = vpop.f32.mrf.mxu0 }
0x113d   : > { %v7126_v5 = vadd.f32 %v7117_v49, %v6998_v1  ;;  %v7879_v49 = vsel %vm802_vm2, %v7877_v44, %v7878_v60  ;;  %v18737_v1 = vld [vmem:[%s24113_s1 + $0x1a0] ss:$8 sps:$4 sm:$0xff]   ;;  %v18730_v44 = vld [vmem:[%s24113_s1 + $0x164] ss:$8 sps:$4 sm:$0xff]  }
0x113e   : > { %v7119_v61 = vpop.f32.mrf.mxu1 }
0x113f   : > { %v7127_v57 = vadd.f32 %v7119_v61, %v7000_v0  ;;  %v7251_v54 = vadd.f32 %v7242_v62, %v7126_v5  ;;  %v18725_v61 = vld [vmem:[%s24113_s1 + $0x1c0] ss:$8 sps:$4 sm:$0xff]   ;;  %v18731_v62 = vld [vmem:[%s24113_s1 + $0x1b0] ss:$8 sps:$4 sm:$0xff]   ;;  %v18739_v0 = vld [vmem:[%s24113_s1 + $0x1a4] ss:$8 sps:$4 sm:$0xff]  }
0x1140   : > { %v7121_v63 = vpop.f32.mrf.mxu1  ;;  %v18751_v5 = vld [vmem:[%s24113_s1 + $0x184] ss:$8 sps:$4 sm:$0xff]  }
0x1141   : > { %v7128_v9 = vadd.f32 %v7121_v63, %v7002_v4  ;;  %v7252_v14 = vadd.f32 %v7244_v3, %v7127_v57  ;;  %v18733_v63 = vld [vmem:[%s24113_s1 + $0x1b4] ss:$8 sps:$4 sm:$0xff]   ;;  %v18743_v3 = vld [vmem:[%s24113_s1 + $0x190] ss:$8 sps:$4 sm:$0xff]   ;;  %v18749_v57 = vld [vmem:[%s24113_s1 + $0x180] ss:$8 sps:$4 sm:$0xff]  }
0x1142   : > { %v7123_v55 = vpop.f32.mrf.mxu1  ;;  %v18745_v4 = vld [vmem:[%s24113_s1 + $0x194] ss:$8 sps:$4 sm:$0xff]  }
0x1143   : > { %v7129_v51 = vadd.f32 %v7123_v55, %v7004_v6  ;;  %v7253_v18 = vadd.f32 %v7246_v10, %v7128_v9  ;;  %v8165_v55 = vrot.slane %v21801_v47, 2  ;;  %v8166_v6 = vrot.slane %v21804_v58, 2 }
0x1145   : > { %v7254_v23 = vadd.f32 %v7248_v56, %v7129_v51  ;;  %v8167_v9 = vsel %vm1094_vm4, %v8165_v55, %v8166_v6  ;;  %v18666_v56 = vld [vmem:[%s24113_s1 + $0xa0] ss:$8 sps:$4 sm:$0xff]  }
0x1154   : > { %v7365_v11 = vpop.f32.mrf.mxu1 }
0x1155   : > { %v7374_v19 = vadd.f32 %v7365_v11, %v7251_v54 }
0x1156   : > { %v7367_v15 = vpop.f32.mrf.mxu1 }
0x1157   : > { %v7375_v16 = vadd.f32 %v7367_v15, %v7252_v14  ;;  %v7390_v28 = vadd.f32 %v7383_v20, %v7374_v19  ;;  %v18665_v14 = vld [vmem:[%s24113_s1 + $0xb4] ss:$8 sps:$4 sm:$0xff]  }
0x1158   : > { %v7369_v21 = vpop.f32.mrf.mxu1  ;;  %v18671_v19 = vld [vmem:[%s24113_s1 + $0x94] ss:$8 sps:$4 sm:$0xff]  }
0x1159   : > { %v7376_v22 = vadd.f32 %v7369_v21, %v7253_v18  ;;  %v7391_v25 = vadd.f32 %v7387_v17, %v7375_v16  ;;  %v7394_v33 = vmax.f32 %v7390_v28, 0.0  ;;  %v7524_v16 = vld [vmem:[%s24119_s7] sm:$0x7]  ;;  %v18668_v18 = vld [vmem:[%s24113_s1 + $0xa4] ss:$8 sps:$4 sm:$0xff]   ;;  %v7620_v28 = vshll.u32 %v21804_v58, 16 }
0x115a   : > { %v7371_v24 = vpop.f32.mrf.mxu1  ;;  %v18674_v21 = vld [vmem:[%s24113_s1 + $0x84] ss:$8 sps:$4 sm:$0xff]  }
0x115b   : > { %v7392_v26 = vadd.f32 %v7383_v20, %v7376_v22  ;;  %v7377_v27 = vadd.f32 %v7371_v24, %v7254_v23  ;;  %v7395_v31 = vmax.f32 %v7391_v25, 0.0  ;;  %v18669_v20 = vld [vmem:[%s24113_s1 + $0x90] ss:$8 sps:$4 sm:$0xff]   ;;  %v18672_v22 = vld [vmem:[%s24113_s1 + $0x80] ss:$8 sps:$4 sm:$0xff]   ;;  %v7615_v23 = vshll.u32 %v21801_v47, 16 }
0x115c   : > { %v18677_v24 = vld [vmem:[%s24113_s1 + $0x74] ss:$8 sps:$4 sm:$0xff]   ;;  %v18675_v25 = vld [vmem:[%s24113_s1 + $0x70] ss:$8 sps:$4 sm:$0xff]  }
0x115d   : > { %v7393_v29 = vadd.f32 %v7387_v17, %v7377_v27  ;;  %v7396_v30 = vmax.f32 %v7392_v26, 0.0  ;;  %v18663_v17 = vld [vmem:[%s24113_s1 + $0xb0] ss:$8 sps:$4 sm:$0xff]   ;;  %v7613_v26 = vshrl.u32 %v21801_v47, 16  ;;  %v7617_v27 = vrot.slane %v7615_v23, 1 }
0x115f   : > { %v7397_v32 = vmax.f32 %v7393_v29, 0.0  ;;  %v7398_v36 = vpack.c.bf16 %v7396_v30, %v7394_v33  ;;  %v18680_v29 = vld [vmem:[%s24113_s1 + $0x64] ss:$8 sps:$4 sm:$0xff]   ;;  %v18678_v30 = vld [vmem:[%s24113_s1 + $0x60] ss:$8 sps:$4 sm:$0xff]  }
0x1160   : > { %v18688_v33 = vld [vmem:[%s24113_s1 + $0x54] ss:$8 sps:$4 sm:$0xff]  }
0x1161   : > { %v7399_v34 = vpack.c.bf16 %v7397_v32, %v7395_v31  ;;  %v7618_v31 = vor.u32 %v7617_v27, %v7613_v26  ;;  %v7622_v32 = vrot.slane %v7620_v28, 1 }
0x1163   : > { %16398 = vmatprep.mubr.msk.bf16.mxu0 %vm2182_vm11, %v7399_v34 }
0x1164   : > { %7516 = vmatmul.mubr.bf16.vlgmr.msra.gmra.mxu0 %v7398_v36  ;;  %v18686_v36 = vld [vmem:[%s24113_s1 + $0x50] ss:$8 sps:$4 sm:$0xff]  }
0x1165   : > { %7978 = vmatprep.mubr.bf16.mxu0 %v19506_v2  ;;  %7951 = vmatpush1.bf16.msra.mxu0 %v18681_v42  ;;  %v18694_v42 = vld [vmem:[%s24113_s1 + $0x44] ss:$8 sps:$4 sm:$0xff]  }
0x1166   : > { %7952 = vmatprep.subr.bf16.mxu0 %v18691_v41  ;;  %v18692_v41 = vld [vmem:[%s24113_s1 + $0x40] ss:$8 sps:$4 sm:$0xff]  }
0x1169   : > { %7953 = vmatpush1.bf16.msra.mxu0 %v18689_v39  ;;  %v18700_v39 = vld [vmem:[%s24113_s1 + $0x34] ss:$8 sps:$4 sm:$0xff]  }
0x116a   : > { %7954 = vmatprep.subr.bf16.mxu0 %v18697_v46  ;;  %v18698_v46 = vld [vmem:[%s24113_s1 + $0x30] ss:$8 sps:$4 sm:$0xff]  }
0x116d   : > { %7955 = vmatpush1.bf16.msra.mxu0 %v18695_v35  ;;  %v7626_v35 = vor.u32 %v7624_v43, %v7622_v32 }
0x116e   : > { %7956 = vmatprep.subr.bf16.mxu0 %v18703_v48  ;;  %v18704_v48 = vld [vmem:[%s24113_s1 + $0x20] ss:$8 sps:$4 sm:$0xff]  }
0x1171   : > { %7957 = vmatpush1.bf16.msra.mxu0 %v18701_v38  ;;  %v18706_v38 = vld [vmem:[%s24113_s1 + $0x24] ss:$8 sps:$4 sm:$0xff]  }
0x1172   : > { %7958 = vmatprep.subr.bf16.mxu0 %v18709_v40  ;;  %v18710_v40 = vld [vmem:[%s24113_s1 + $0x10] ss:$8 sps:$4 sm:$0xff]  }
0x1175   : > { %7959 = vmatpush1.bf16.msra.mxu0 %v18707_v37  ;;  %v18712_v37 = vld [vmem:[%s24113_s1 + $0x14] ss:$8 sps:$4 sm:$0xff]  }
0x1176   : > { %7960 = vmatprep.subr.bf16.mxu0 %v18715_v53  ;;  %v18716_v53 = vld [vmem:[%s24113_s1] ss:$8 sps:$4 sm:$0xff]  }
0x1179   : > { %7961 = vmatpush1.bf16.msra.mxu0 %v18713_v52  ;;  %v18718_v52 = vld [vmem:[%s24113_s1 + $0x4] ss:$8 sps:$4 sm:$0xff]  }
0x117a   : > { %8238 = vmatprep.subr.bf16.mxu0 %v18721_v45  ;;  %v18722_v45 = vld [vmem:[%s24113_s1 + $0x170] ss:$8 sps:$4 sm:$0xff]  }
0x117c   : > { %16470 = vmatmul.mubr.msk.bf16.vlgmr.msra.gmra.mxu0 %vm610_vm1, %v7879_v49  ;;  %v18736_v49 = vld [vmem:[%s24113_s1 + $0x154] ss:$8 sps:$4 sm:$0xff]  }
0x117d   : > { %8239 = vmatpush1.bf16.msra.mxu0 %v18719_v59  ;;  %7988 = vmatprep.mubr.bf16.mxu0 %v19506_v2  ;;  %v18724_v59 = vld [vmem:[%s24113_s1 + $0x174] ss:$8 sps:$4 sm:$0xff]  }
0x117e   : > { %8240 = vmatprep.subr.bf16.mxu0 %v18727_v50  ;;  %v18734_v50 = vld [vmem:[%s24113_s1 + $0x150] ss:$8 sps:$4 sm:$0xff]  }
0x1181   : > { %8241 = vmatpush1.bf16.msra.mxu0 %v18725_v61  ;;  %v18742_v61 = vld [vmem:[%s24113_s1 + $0x144] ss:$8 sps:$4 sm:$0xff]  }
0x1182   : > { %8242 = vmatprep.subr.bf16.mxu0 %v18733_v63  ;;  %v18748_v63 = vld [vmem:[%s24113_s1 + $0x134] ss:$8 sps:$4 sm:$0xff]  }
0x1184   : > { %16471 = vmatmul.mubr.msk.bf16.gmra.mxu0 %vm610_vm1, %v7878_v60  ;;  %v18728_v60 = vld [vmem:[%s24113_s1 + $0x160] ss:$8 sps:$4 sm:$0xff]  }
0x1185   : > { %8243 = vmatpush1.bf16.msra.mxu0 %v18731_v62  ;;  %8266 = vmatprep.mubr.bf16.mxu0 %v19506_v2  ;;  %v18740_v62 = vld [vmem:[%s24113_s1 + $0x140] ss:$8 sps:$4 sm:$0xff]  }
0x1186   : > { %8244 = vmatprep.subr.bf16.mxu0 %v18739_v0  ;;  %v8019_v0 = vrot.slane %v7613_v26, 1 }
0x1189   : > { %8245 = vmatpush1.bf16.msra.mxu0 %v18737_v1  ;;  %v8023_v1 = vrot.slane %v7620_v28, 2 }
0x118a   : > { %8246 = vmatprep.subr.bf16.mxu0 %v18745_v4  ;;  %v8020_v4 = vrot.slane %v7615_v23, 2 }
0x118c   : > { %v8021_v55 = vor.u32 %v8020_v4, %v8019_v0 }
0x118d   : > { %8247 = vmatpush1.bf16.msra.mxu0 %v18743_v3  ;;  %v8022_v3 = vrot.slane %v7624_v43, 1 }
0x118e   : > { %8248 = vmatprep.subr.bf16.mxu0 %v18751_v5  ;;  %v18752_v5 = vld [vmem:[%s24113_s1 + $0x120] ss:$8 sps:$4 sm:$0xff]  }
0x1191   : > { %8249 = vmatpush1.bf16.msra.mxu0 %v18749_v57  ;;  %v18754_v57 = vld [vmem:[%s24113_s1 + $0x124] ss:$8 sps:$4 sm:$0xff]  }
0x1192   : > { %17694 = vmatprep.subr.bf16.mxu0 %v19507_v8 }
0x1194   : > { %16522 = vmatmul.mubr.msk.bf16.vlgmr.msra.gmra.mxu0 %vm610_vm1, %v8167_v9 }
0x1195   : > { %8276 = vmatprep.mubr.bf16.mxu0 %v19506_v2 }
0x119c   : > { %16523 = vmatmul.mubr.msk.bf16.gmra.mxu0 %vm610_vm1, %v8166_v6  ;;  %v8024_v6 = vor.u32 %v8023_v1, %v8022_v3 }
0x119d   : > { %17698 = vmatprep.mubr.msk.bf16.mxu0 %vm19508_vm7, %v19507_v8 }
0x1224   : > { %v7517_v10 = vpop.f32.mrf.mxu0 }
0x1226   : > { %v7519_v11 = vpop.f32.mrf.mxu0 }
0x1227   : > { %v18757_v11 = vld [vmem:[%s24116_s4 + $0x28] sm:$0xff]  }
0x1228   : > { %v7520_v51 = vpop.f32.mrf.mxu0 }
0x1229   : > { %v7525_v13 = vpack.c.bf16 %v7520_v51, %v7517_v10  ;;  %v18756_v10 = vld [vmem:[%s24116_s4 + $0x30] sm:$0xff]   ;;  %v18758_v51 = vld [vmem:[%s24116_s4 + $0x20] sm:$0xff]  }
0x122a   : > { %v7522_v54 = vpop.f32.mrf.mxu0 }
0x122b   : > { %v7530_v15 = vsel %vm2233_vm12, %v7525_v13, 0  ;;  %v18759_v13 = vld [vmem:[%s24116_s4 + $0x18] sm:$0xff]   ;;  %v18761_v54 = vld [vmem:[%s24116_s4 + $0x8] sm:$0xff]  }
0x122c   : > { %17689 = vmatpush3.bf16.msra.mxu1 %v7530_v15  ;;  %v18762_v15 = vld [vmem:[%s24116_s4] sm:$0xff]  }
0x122d   : > { %7697 = vmatprep.subr.bf16.mxu1 %v18665_v14  ;;  %v18760_v14 = vld [vmem:[%s24116_s4 + $0x10] sm:$0xff]  }
0x122f   : > { %17691 = vmatmul.mubr.msk.bf16.vlgmr.msra.gmra.mxu1 %vm24139_vm13, %v7524_v16  ;;  %vm24140_vm13 = vsmask.f32 7424  ;;  %v18763_v16 = vld [vmem:[%s24116_s4 + $0x50] ss:$0 sps:$4 sm:$0xff]  }
0x1230   : > { %7698 = vmatpush1.bf16.msra.mxu1 %v18663_v17  ;;  %7725 = vmatprep.mubr.bf16.mxu1 %v19506_v2  ;;  %v7623_v34 = vsel %vm24140_vm13, %v7618_v31, %v7622_v32  ;;  %vm24141_vm13 = vsmask.f32 6400 }
0x1231   : > { %7699 = vmatprep.subr.bf16.mxu1 %v18668_v18  ;;  %v8025_v9 = vsel %vm24141_vm13, %v8021_v55, %v8024_v6  ;;  %vm24142_vm13 = vcmask 1043456   ;;  %v18764_v18 = vld [vmem:[%s24116_s4 + $0x48] sm:$0xff]  }
0x1232   : > { %v8418_v17 = vsel %vm24142_vm13, %v18763_v16, 0  ;;  %vm24143_vm13 = vcmask 80896  }
0x1234   : > { %7700 = vmatpush1.bf16.msra.mxu1 %v18666_v56  ;;  %v18765_v56 = vld [vmem:[%s24116_s4 + $0x40] sm:$0xff]  }
0x1235   : > { %7701 = vmatprep.subr.bf16.mxu1 %v18671_v19 }
0x1238   : > { %7702 = vmatpush1.bf16.msra.mxu1 %v18669_v20 }
0x1239   : > { %7703 = vmatprep.subr.bf16.mxu1 %v18674_v21 }
0x123c   : > { %7704 = vmatpush1.bf16.msra.mxu1 %v18672_v22  ;;  %v7980_v27 = vpop.f32.mrf.mxu0 }
0x123d   : > { %7705 = vmatprep.subr.bf16.mxu1 %v18677_v24 }
0x1240   : > { %7706 = vmatpush1.bf16.msra.mxu1 %v18675_v25 }
0x1241   : > { %7707 = vmatprep.subr.bf16.mxu1 %v18680_v29  ;;  %v7982_v29 = vpop.f32.mrf.mxu0 }
0x1243   : > { %v7984_v31 = vpop.f32.mrf.mxu0 }
0x1244   : > { %7708 = vmatpush1.bf16.msra.mxu1 %v18678_v30 }
0x1245   : > { %7814 = vmatprep.subr.bf16.mxu1 %v18688_v33  ;;  %v7986_v33 = vpop.f32.mrf.mxu0 }
0x1247   : > { %16430 = vmatmul.mubr.msk.bf16.vlgmr.msra.gmra.mxu1 %vm610_vm1, %v7623_v34 }
0x1248   : > { %7815 = vmatpush1.bf16.msra.mxu1 %v18686_v36  ;;  %7735 = vmatprep.mubr.bf16.mxu1 %v19506_v2  ;;  %v7990_v36 = vpop.f32.mrf.mxu0 }
0x1249   : > { %7816 = vmatprep.subr.bf16.mxu1 %v18694_v42 }
0x124c   : > { %7817 = vmatpush1.bf16.msra.mxu1 %v18692_v41  ;;  %v7992_v41 = vpop.f32.mrf.mxu0 }
0x124d   : > { %7818 = vmatprep.subr.bf16.mxu1 %v18700_v39 }
0x124f   : > { %16431 = vmatmul.mubr.msk.bf16.gmra.mxu1 %vm610_vm1, %v7626_v35 }
0x1250   : > { %7819 = vmatpush1.bf16.msra.mxu1 %v18698_v46  ;;  %7842 = vmatprep.mubr.bf16.mxu1 %v19506_v2  ;;  %v7994_v46 = vpop.f32.mrf.mxu0 }
0x1251   : > { %7820 = vmatprep.subr.bf16.mxu1 %v18706_v38 }
0x1254   : > { %7821 = vmatpush1.bf16.msra.mxu1 %v18704_v48  ;;  %v7996_v48 = vpop.f32.mrf.mxu0 }
0x1255   : > { %7822 = vmatprep.subr.bf16.mxu1 %v18712_v37 }
0x1256   : > { %v8268_v37 = vpop.f32.mrf.mxu0 }
0x1258   : > { %7823 = vmatpush1.bf16.msra.mxu1 %v18710_v40 }
0x1259   : > { %7824 = vmatprep.subr.bf16.mxu1 %v18718_v52  ;;  %v8270_v52 = vpop.f32.mrf.mxu0 }
0x125c   : > { %7825 = vmatpush1.bf16.msra.mxu1 %v18716_v53 }
0x125d   : > { %8096 = vmatprep.subr.bf16.mxu1 %v18724_v59 }
0x125f   : > { %16444 = vmatmul.mubr.msk.bf16.vlgmr.msra.gmra.mxu1 %vm610_vm1, %v21801_v47  ;;  %v18755_v47 = vld [vmem:[%s24116_s4 + $0x38] sm:$0xff]  }
0x1260   : > { %8097 = vmatpush1.bf16.msra.mxu1 %v18722_v45  ;;  %7852 = vmatprep.mubr.bf16.mxu1 %v19506_v2  ;;  %v8272_v45 = vpop.f32.mrf.mxu0 }
0x1261   : > { %8098 = vmatprep.subr.bf16.mxu1 %v18730_v44 }
0x1264   : > { %8099 = vmatpush1.bf16.msra.mxu1 %v18728_v60 }
0x1265   : > { %8100 = vmatprep.subr.bf16.mxu1 %v18736_v49 }
0x1267   : > { %16445 = vmatmul.mubr.msk.bf16.gmra.mxu1 %vm610_vm1, %v21804_v58  ;;  %v18746_v58 = vld [vmem:[%s24113_s1 + $0x130] ss:$8 sps:$4 sm:$0xff]  }
0x1268   : > { %8101 = vmatpush1.bf16.msra.mxu1 %v18734_v50  ;;  %8124 = vmatprep.mubr.bf16.mxu1 %v19506_v2 }
0x1269   : > { %8102 = vmatprep.subr.bf16.mxu1 %v18742_v61 }
0x126c   : > { %8103 = vmatpush1.bf16.msra.mxu1 %v18740_v62  ;;  %v8274_v62 = vpop.f32.mrf.mxu0 }
0x126d   : > { %8104 = vmatprep.subr.bf16.mxu1 %v18748_v63 }
0x1270   : > { %8105 = vmatpush1.bf16.msra.mxu1 %v18746_v58  ;;  %v8295_v58 = vld [vmem:[%s24114_s2] sm:$0x3] }
0x1271   : > { %8106 = vmatprep.subr.bf16.mxu1 %v18754_v57 }
0x1274   : > { %8107 = vmatpush1.bf16.msra.mxu1 %v18752_v5 }
0x1275   : > { %8420 = vmatprep.subr.bf16.mxu1 %v19506_v2 }
0x1277   : > { %16496 = vmatmul.mubr.msk.bf16.vlgmr.msra.gmra.mxu1 %vm610_vm1, %v8025_v9  ;;  %v8278_v9 = vpop.f32.mrf.mxu0 }
0x1278   : > { %8134 = vmatprep.mubr.bf16.mxu1 %v19506_v2  ;;  %8421 = vmatpush1.bf16.msra.mxu1 %v18755_v47 }
0x1279   : > { %8422 = vmatprep.subr.bf16.mxu1 %v19506_v2 }
0x127c   : > { %8423 = vmatpush1.bf16.msra.mxu1 %v18756_v10  ;;  %v8304_v10 = vrot.slane %v8295_v58, %v19870_v7 }
0x127d   : > { %8424 = vmatprep.subr.bf16.mxu1 %v19506_v2 }
0x127f   : > { %16497 = vmatmul.mubr.msk.bf16.gmra.mxu1 %vm610_vm1, %v8024_v6 }
0x1280   : > { %8425 = vmatpush1.bf16.msra.mxu1 %v18757_v11 }
0x1281   : > { %8426 = vmatprep.subr.bf16.mxu1 %v19506_v2 }
0x1284   : > { %8427 = vmatpush1.bf16.msra.mxu1 %v18758_v51 }
0x1285   : > { %8428 = vmatprep.subr.bf16.mxu1 %v19506_v2 }
0x1288   : > { %8429 = vmatpush1.bf16.msra.mxu1 %v18759_v13 }
0x1289   : > { %8430 = vmatprep.subr.bf16.mxu1 %v19506_v2 }
0x128c   : > { %8431 = vmatpush1.bf16.msra.mxu1 %v18760_v14  ;;  %v8300_v14 = vrot.slane %v8295_v58, %v19875_v12 }
0x128d   : > { %8432 = vmatprep.subr.bf16.mxu1 %v19506_v2 }
0x1290   : > { %8433 = vmatpush1.bf16.msra.mxu1 %v18761_v54 }
0x1291   : > { %8434 = vmatprep.subr.bf16.mxu1 %v19506_v2 }
0x1294   : > { %8435 = vmatpush1.bf16.msra.mxu1 %v18762_v15 }
0x1295   : > { %8446 = vmatprep.subr.bf16.mxu1 %v19506_v2 }
0x1298   : > { %8447 = vmatpush2.bf16.msra.mxu1 %v8418_v17 }
0x1299   : > { %8448 = vmatprep.subr.bf16.mxu1 %v19506_v2 }
0x129c   : > { %8449 = vmatpush2.bf16.msra.mxu1 %v18764_v18 }
0x129d   : > { %8450 = vmatprep.subr.bf16.mxu1 %v19506_v2 }
0x12a0   : > { %8451 = vmatpush2.bf16.msra.mxu1 %v18765_v56 }
0x12ef   : > { %v7566_v19 = vpop.f32.mrf.mxu1 }
0x12f0   : > { %7572 = vst.msk [vmem:[#allocation2 + $0x3] sm:$0x1] %vm2277_vm14, %v7566_v19 }
0x12f1   : > { %7573 = vst.msk [vmem:[#allocation2 + $0xa] sm:$0x2] %vm2280_vm15, %v7566_v19  ;;  %v17692_v20 = vpop.f32.mrf.mxu1 }
0x12f2   : > { %7574 = vst.msk [vmem:[#allocation2 + $0x11] sm:$0x4] %vm2283_vm3, %v7566_v19 }
0x12f3   : > { %7575 = vst.msk [vmem:[#allocation2 + $0x18] sm:$0x8] %vm2286_vm0, %v7566_v19  ;;  %v7569_v21 = vpop.f32.mrf.mxu1 }
0x12f4   : > { %7576 = vst.msk [vmem:[#allocation2 + $0x1f] sm:$0x10] %vm2289_vm5, %v7566_v19  ;;  %v8280_v19 = vpop.f32.mrf.mxu0 }
0x12f5   : > { %v17693_v22 = vpop.f32.mrf.mxu1 }
0x1307   : > { %v7727_v23 = vpop.f32.mrf.mxu1 }
0x1309   : > { %v7729_v24 = vpop.f32.mrf.mxu1 }
0x130b   : > { %v7731_v25 = vpop.f32.mrf.mxu1 }
0x130d   : > { %v7733_v26 = vpop.f32.mrf.mxu1 }
0x130f   : > { %v7737_v28 = vpop.f32.mrf.mxu1 }
0x1311   : > { %v7739_v30 = vpop.f32.mrf.mxu1 }
0x1313   : > { %v7741_v32 = vpop.f32.mrf.mxu1 }
0x1315   : > { %v7743_v34 = vpop.f32.mrf.mxu1 }
0x131f   : > { %v7844_v42 = vpop.f32.mrf.mxu1 }
0x1320   : > { %v7845_v59 = vadd.f32 %v7844_v42, %v7727_v23 }
0x1321   : > { %v7846_v43 = vpop.f32.mrf.mxu1 }
0x1322   : > { %v7847_v44 = vadd.f32 %v7846_v43, %v7729_v24  ;;  %v7999_v50 = vadd.f32 %v7980_v27, %v7845_v59 }
0x1323   : > { %v7848_v39 = vpop.f32.mrf.mxu1 }
0x1324   : > { %v7849_v49 = vadd.f32 %v7848_v39, %v7731_v25  ;;  %v8000_v0 = vadd.f32 %v7982_v29, %v7847_v44 }
0x1325   : > { %v7850_v35 = vpop.f32.mrf.mxu1 }
0x1326   : > { %v7851_v63 = vadd.f32 %v7850_v35, %v7733_v26  ;;  %v8001_v57 = vadd.f32 %v7984_v31, %v7849_v49 }
0x1327   : > { %v7854_v38 = vpop.f32.mrf.mxu1 }
0x1328   : > { %v7855_v5 = vadd.f32 %v7854_v38, %v7737_v28  ;;  %v8002_v51 = vadd.f32 %v7986_v33, %v7851_v63  ;;  %v8282_v33 = vpop.f32.mrf.mxu0 }
0x1329   : > { %v7856_v40 = vpop.f32.mrf.mxu1 }
0x132a   : > { %v7857_v55 = vadd.f32 %v7856_v40, %v7739_v30  ;;  %v8003_v17 = vadd.f32 %v7990_v36, %v7855_v5  ;;  %v18769_v5 = vld [vmem:[%s24117_s5 + $0x40] ss:$8 sps:$4 sm:$0xff]  }
0x132b   : > { %v7858_v53 = vpop.f32.mrf.mxu1 }
0x132c   : > { %v7859_v18 = vadd.f32 %v7858_v53, %v7741_v32  ;;  %v8004_v56 = vadd.f32 %v7992_v41, %v7857_v55  ;;  %v8284_v53 = vpop.f32.mrf.mxu0  ;;  %v18776_v55 = vld [vmem:[%s24117_s5 + $0x34] ss:$8 sps:$4 sm:$0xff]  }
0x132d   : > { %v7860_v60 = vpop.f32.mrf.mxu1 }
0x132e   : > { %v7861_v21 = vadd.f32 %v7860_v60, %v7743_v34  ;;  %v8005_v30 = vadd.f32 %v7994_v46, %v7859_v18 }
0x1330   : > { %v8006_v43 = vadd.f32 %v7996_v48, %v7861_v21 }
0x1337   : > { %v8126_v61 = vpop.f32.mrf.mxu1 }
0x1338   : > { %v8145_v1 = vadd.f32 %v8126_v61, %v7999_v50 }
0x1339   : > { %v8128_v3 = vpop.f32.mrf.mxu1 }
0x133a   : > { %v8146_v4 = vadd.f32 %v8128_v3, %v8000_v0  ;;  %v8287_v13 = vadd.f32 %v8268_v37, %v8145_v1  ;;  %v8536_v1 = vld [vmem:[%s24117_s5 + $0x50] sm:$0x33] }
0x133b   : > { %v8130_v6 = vpop.f32.mrf.mxu1  ;;  %v16575_v3 = vcombine.high %v8536_v1, %v8536_v1  ;;  %v16574_v58 = vcombine.low %v8536_v1, %v8536_v1  ;;  %v18813_v1 = vld [vmem:[%s24117_s5 + $0xf4] ss:$8 sps:$4 sm:$0xff]  }
0x133c   : > { %v8288_v47 = vadd.f32 %v8270_v52, %v8146_v4  ;;  %v8147_v11 = vadd.f32 %v8130_v6, %v8001_v57  ;;  %v8307_v25 = vadd.f32 %v8300_v14, %v8287_v13  ;;  %v18771_v4 = vld [vmem:[%s24117_s5 + $0x44] ss:$8 sps:$4 sm:$0xff]   ;;  %v18774_v6 = vld [vmem:[%s24117_s5 + $0x30] ss:$8 sps:$4 sm:$0xff]  }
0x133d   : > { %v8132_v54 = vpop.f32.mrf.mxu1  ;;  %16576 = vmatprep.subr.msk.bf16.mxu1 %vm1549_vm8, %v16575_v3  ;;  %v8720_v57 = vsel %vm1549_vm8, %v16574_v58, 0  ;;  %v18808_v3 = vld [vmem:[%s24117_s5 + $0x138] ss:$8 sps:$4 sm:$0xff]   ;;  %v18816_v58 = vld [vmem:[%s24117_s5 + $0x12c] ss:$8 sps:$4 sm:$0xff]  }
0x133e   : > { %v8289_v15 = vadd.f32 %v8272_v45, %v8147_v11  ;;  %v8148_v16 = vadd.f32 %v8132_v54, %v8002_v51  ;;  %v8308_v22 = vadd.f32 %v8304_v10, %v8288_v47  ;;  %v8315_v41 = vmax.f32 %v8307_v25, 0.0  ;;  %v18780_v47 = vld [vmem:[%s24117_s5 + $0x20] ss:$8 sps:$4 sm:$0xff]   ;;  %v18786_v11 = vld [vmem:[%s24117_s5 + $0x10] ss:$8 sps:$4 sm:$0xff]  }
0x133f   : > { %v8136_v20 = vpop.f32.mrf.mxu1 }
0x1340   : > { %v8309_v23 = vadd.f32 %v8300_v14, %v8289_v15  ;;  %v8290_v24 = vadd.f32 %v8274_v62, %v8148_v16  ;;  %v8149_v26 = vadd.f32 %v8136_v20, %v8003_v17  ;;  %v8316_v39 = vmax.f32 %v8308_v22, 0.0 }
0x1341   : > { %v8138_v27 = vpop.f32.mrf.mxu1 }
0x1342   : > { %v8310_v28 = vadd.f32 %v8304_v10, %v8290_v24  ;;  %v8150_v29 = vadd.f32 %v8138_v27, %v8004_v56  ;;  %v8317_v31 = vmax.f32 %v8309_v23, 0.0  ;;  %v8291_v35 = vadd.f32 %v8278_v9, %v8149_v26  ;;  %v18782_v9 = vld [vmem:[%s24117_s5 + $0x24] ss:$8 sps:$4 sm:$0xff]   ;;  %v18777_v27 = vld [vmem:[%s24117_s5 + $0x98] ss:$8 sps:$4 sm:$0xff]  }
0x1343   : > { %v8140_v42 = vpop.f32.mrf.mxu1  ;;  %v18766_v24 = vld [vmem:[%s24115_s3] sm:$0x7f]  }
0x1344   : > { %v8318_v36 = vmax.f32 %v8310_v28, 0.0  ;;  %v8292_v32 = vadd.f32 %v8280_v19, %v8150_v29  ;;  %v8151_v38 = vadd.f32 %v8140_v42, %v8005_v30  ;;  %v8323_v52 = vpack.c.bf16 %v8317_v31, %v8315_v41  ;;  %v16549_v19 = vld [vmem:[%s24117_s5 + $0xa8] sm:$0x33]  ;;  %v18779_v26 = vld [vmem:[%s24117_s5 + $0x9c] ss:$8 sps:$4 sm:$0xff]  }
0x1345   : > { %v8142_v34 = vpop.f32.mrf.mxu1  ;;  %v8311_v46 = vadd.f32 %v8300_v14, %v8291_v35  ;;  %v16561_v21 = vcombine.high %v16549_v19, %v16549_v19  ;;  %v16560_v22 = vcombine.low %v16549_v19, %v16549_v19  ;;  %v18785_v28 = vld [vmem:[%s24117_s5 + $0x8c] ss:$8 sps:$4 sm:$0xff]   ;;  %v18783_v29 = vld [vmem:[%s24117_s5 + $0x88] ss:$8 sps:$4 sm:$0xff]   ;;  %v18791_v30 = vld [vmem:[%s24117_s5 + $0x7c] ss:$8 sps:$4 sm:$0xff]  }
0x1346   : > { %v8152_v37 = vadd.f32 %v8142_v34, %v8006_v43  ;;  %v8324_v40 = vpack.c.bf16 %v8318_v36, %v8316_v39  ;;  %v8293_v59 = vadd.f32 %v8282_v33, %v8151_v38  ;;  %v8312_v45 = vadd.f32 %v8304_v10, %v8292_v32  ;;  %v18789_v31 = vld [vmem:[%s24117_s5 + $0x78] ss:$8 sps:$4 sm:$0xff]   ;;  %v18794_v33 = vld [vmem:[%s24117_s5 + $0x4] ss:$8 sps:$4 sm:$0xff]   ;;  %v18795_v39 = vld [vmem:[%s24117_s5 + $0x68] ss:$8 sps:$4 sm:$0xff]  }
0x1347   : > { %v8319_v62 = vmax.f32 %v8311_v46, 0.0  ;;  %v8614_v25 = vsel %vm1549_vm8, %v16560_v22, 0  ;;  %v18792_v42 = vld [vmem:[%s24117_s5] ss:$8 sps:$4 sm:$0xff]   ;;  %v18797_v43 = vld [vmem:[%s24117_s5 + $0x6c] ss:$8 sps:$4 sm:$0xff]  }
0x1348   : > { %v8294_v44 = vadd.f32 %v8284_v53, %v8152_v37  ;;  %16535 = vmatprep.mubr.msk.bf16.mxu1 %vm1341_vm6, %v8324_v40  ;;  %v8313_v60 = vadd.f32 %v8300_v14, %v8293_v59  ;;  %v8320_v50 = vmax.f32 %v8312_v45, 0.0  ;;  %v16613_v36 = vld [vmem:[%s24117_s5 + $0x158] sm:$0x33]  ;;  %v16588_v38 = vld [vmem:[%s24117_s5 + $0x100] sm:$0x33] }
0x1349   : > { %8453 = vmatmul.mubr.bf16.vlgmr.msra.gmra.mxu1 %v8323_v52  ;;  %v16625_v32 = vcombine.high %v16613_v36, %v16613_v36  ;;  %v18802_v41 = vld [vmem:[%s24117_s5 + $0x5c] ss:$8 sps:$4 sm:$0xff]   ;;  %v18800_v35 = vld [vmem:[%s24117_s5 + $0x58] ss:$8 sps:$4 sm:$0xff]   ;;  %v16600_v34 = vcombine.high %v16588_v38, %v16588_v38  ;;  %v16624_v40 = vcombine.low %v16613_v36, %v16613_v36  ;;  %v18854_v36 = vld [vmem:[%s24120_s8 + $0x28] sm:$0xff]  }
0x134a   : > { %v8314_v48 = vadd.f32 %v8304_v10, %v8294_v44  ;;  %v8321_v49 = vmax.f32 %v8313_v60, 0.0  ;;  %8730 = vmatpush1.bf16.msra.mxu1 %v8720_v57  ;;  %v18788_v10 = vld [vmem:[%s24117_s5 + $0x14] ss:$8 sps:$4 sm:$0xff]   ;;  %v18819_v57 = vld [vmem:[%s24117_s5 + $0xe4] ss:$8 sps:$4 sm:$0xff]  }
0x134b   : > { %8731 = vmatprep.subr.bf16.mxu1 %v18771_v4  ;;  %v8965_v45 = vsel %vm1549_vm8, %v16624_v40, 0  ;;  %v18805_v44 = vld [vmem:[%s24117_s5 + $0x14c] ss:$8 sps:$4 sm:$0xff]   ;;  %v18811_v4 = vld [vmem:[%s24117_s5 + $0xf0] ss:$8 sps:$4 sm:$0xff]   ;;  %v18861_v40 = vld [vmem:[%s24120_s8 + $0x40] sm:$0xff]  }
0x134c   : > { %v8322_v61 = vmax.f32 %v8314_v48, 0.0  ;;  %v8325_v0 = vpack.c.bf16 %v8321_v49, %v8319_v62  ;;  %v16599_v48 = vcombine.low %v16588_v38, %v16588_v38  ;;  %v18803_v49 = vld [vmem:[%s24117_s5 + $0x148] ss:$8 sps:$4 sm:$0xff]   ;;  %v18810_v62 = vld [vmem:[%s24117_s5 + $0x13c] ss:$8 sps:$4 sm:$0xff]  }
0x134d   : > { %v18858_v38 = vld [vmem:[%s24120_s8 + $0x8] sm:$0xff]  }
0x134e   : > { %v8326_v63 = vpack.c.bf16 %v8322_v61, %v8320_v50  ;;  %8732 = vmatpush1.bf16.msra.mxu1 %v18769_v5  ;;  %v18814_v5 = vld [vmem:[%s24117_s5 + $0x128] ss:$8 sps:$4 sm:$0xff]  }
0x134f   : > { %8733 = vmatprep.subr.bf16.mxu1 %v18776_v55  ;;  %v18822_v55 = vld [vmem:[%s24117_s5 + $0x11c] ss:$8 sps:$4 sm:$0xff]  }
0x1350   : > { %16536 = vmatprep.mubr.msk.bf16.mxu1 %vm1341_vm6, %v8326_v63 }
0x1351   : > { %8461 = vmatmul.mubr.bf16.gmra.mxu1 %v8325_v0  ;;  %v8840_v0 = vsel %vm1549_vm8, %v16599_v48, 0 }
0x1352   : > { %8757 = vmatprep.mubr.bf16.mxu1 %v19506_v2  ;;  %8734 = vmatpush1.bf16.msra.mxu1 %v18774_v6  ;;  %v18817_v6 = vld [vmem:[%s24117_s5 + $0xe0] ss:$8 sps:$4 sm:$0xff]  }
0x1353   : > { %8735 = vmatprep.subr.bf16.mxu1 %v18782_v9  ;;  %v18825_v9 = vld [vmem:[%s24117_s5 + $0xd4] ss:$8 sps:$4 sm:$0xff]  }
0x1356   : > { %8736 = vmatpush1.bf16.msra.mxu1 %v18780_v47  ;;  %v18820_v47 = vld [vmem:[%s24117_s5 + $0x118] ss:$8 sps:$4 sm:$0xff]  }
0x1357   : > { %8737 = vmatprep.subr.bf16.mxu1 %v18788_v10  ;;  %v18828_v10 = vld [vmem:[%s24117_s5 + $0x10c] ss:$8 sps:$4 sm:$0xff]  }
0x135a   : > { %8738 = vmatpush1.bf16.msra.mxu1 %v18786_v11  ;;  %v18823_v11 = vld [vmem:[%s24117_s5 + $0xd0] ss:$8 sps:$4 sm:$0xff]  }
0x135b   : > { %8739 = vmatprep.subr.bf16.mxu1 %v18794_v33  ;;  %v18849_v33 = vld [vmem:[%s24117_s5 + $0x160] ss:$8 sps:$4 sm:$0xff]  }
0x135e   : > { %8740 = vmatpush1.bf16.msra.mxu1 %v18792_v42 }
0x135f   : > { %16626 = vmatprep.subr.msk.bf16.mxu1 %vm1549_vm8, %v16625_v32  ;;  %v18855_v32 = vld [vmem:[%s24120_s8 + $0x20] sm:$0xff]  }
0x1409   : > { %v8454_v51 = vpop.f32.mrf.mxu1 }
0x140b   : > { %v8456_v13 = vpop.f32.mrf.mxu1 }
0x140c   : > { %v18826_v13 = vld [vmem:[%s24117_s5 + $0x108] ss:$8 sps:$4 sm:$0xff]  }
0x140d   : > { %v8457_v14 = vpop.f32.mrf.mxu1 }
0x140e   : > { %v8471_v23 = vpack.c.bf16 %v8457_v14, %v8454_v51  ;;  %v18831_v51 = vld [vmem:[%s24117_s5 + $0xc4] ss:$8 sps:$4 sm:$0xff]  }
0x140f   : > { %v8459_v54 = vpop.f32.mrf.mxu1 }
0x1411   : > { %v8462_v15 = vpop.f32.mrf.mxu1 }
0x1413   : > { %v8464_v16 = vpop.f32.mrf.mxu1 }
0x1414   : > { %v18834_v16 = vld [vmem:[%s24117_s5 + $0xb4] ss:$8 sps:$4 sm:$0xff]  }
0x1415   : > { %v8465_v17 = vpop.f32.mrf.mxu1 }
0x1416   : > { %v8472_v18 = vpack.c.bf16 %v8465_v17, %v8462_v15  ;;  %v18829_v15 = vld [vmem:[%s24117_s5 + $0xc0] ss:$8 sps:$4 sm:$0xff]   ;;  %v16638_v17 = vld [vmem:[%s24117_s5 + $0x1b0] sm:$0x33] }
0x1417   : > { %v8467_v56 = vpop.f32.mrf.mxu1  ;;  %v16650_v19 = vcombine.high %v16638_v17, %v16638_v17 }
0x1418   : > { %v8482_v20 = vsel %vm1094_vm4, %v8472_v18, 0  ;;  %v18832_v56 = vld [vmem:[%s24117_s5 + $0xb0] ss:$8 sps:$4 sm:$0xff]  }
0x1419   : > { %17695 = vmatpush3.bf16.msra.mxu0 %v8482_v20  ;;  %v16649_v20 = vcombine.low %v16638_v17, %v16638_v17 }
0x141a   : > { %17696 = vmatprep.subr.bf16.mxu0 %v19507_v8 }
0x141b   : > { %v9088_v22 = vsel %vm1549_vm8, %v16649_v20, 0 }
0x141d   : > { %17697 = vmatpush3.bf16.msra.mxu0 %v8471_v23  ;;  %v18839_v23 = vld [vmem:[%s24117_s5 + $0x1a4] ss:$8 sps:$4 sm:$0xff]  }
0x141e   : > { %16562 = vmatprep.subr.msk.bf16.mxu0 %vm1549_vm8, %v16561_v21 }
0x1420   : > { %17699 = vmatmul.mubr.msk.bf16.vlgmr.msra.gmra.mxu0 %vm1410_vm9, %v18766_v24  ;;  %v18837_v24 = vld [vmem:[%s24117_s5 + $0x1a0] ss:$8 sps:$4 sm:$0xff]  }
0x1421   : > { %8624 = vmatpush1.bf16.msra.mxu0 %v8614_v25  ;;  %8651 = vmatprep.mubr.bf16.mxu0 %v19506_v2  ;;  %v18842_v25 = vld [vmem:[%s24117_s5 + $0x194] ss:$8 sps:$4 sm:$0xff]  }
0x1422   : > { %8625 = vmatprep.subr.bf16.mxu0 %v18779_v26  ;;  %v18840_v26 = vld [vmem:[%s24117_s5 + $0x190] ss:$8 sps:$4 sm:$0xff]  }
0x1425   : > { %8626 = vmatpush1.bf16.msra.mxu0 %v18777_v27  ;;  %v18845_v27 = vld [vmem:[%s24117_s5 + $0x184] ss:$8 sps:$4 sm:$0xff]  }
0x1426   : > { %8627 = vmatprep.subr.bf16.mxu0 %v18785_v28  ;;  %v18843_v28 = vld [vmem:[%s24117_s5 + $0x180] ss:$8 sps:$4 sm:$0xff]  }
0x1429   : > { %8628 = vmatpush1.bf16.msra.mxu0 %v18783_v29  ;;  %v18848_v29 = vld [vmem:[%s24117_s5 + $0x174] ss:$8 sps:$4 sm:$0xff]  }
0x142a   : > { %8629 = vmatprep.subr.bf16.mxu0 %v18791_v30  ;;  %v18846_v30 = vld [vmem:[%s24117_s5 + $0x170] ss:$8 sps:$4 sm:$0xff]  }
0x142d   : > { %8630 = vmatpush1.bf16.msra.mxu0 %v18789_v31  ;;  %v18851_v31 = vld [vmem:[%s24117_s5 + $0x164] ss:$8 sps:$4 sm:$0xff]  }
0x142e   : > { %8631 = vmatprep.subr.bf16.mxu0 %v18797_v43  ;;  %v18852_v43 = vld [vmem:[%s24120_s8 + $0x38] sm:$0xff]  }
0x1431   : > { %8632 = vmatpush1.bf16.msra.mxu0 %v18795_v39  ;;  %v18853_v39 = vld [vmem:[%s24120_s8 + $0x30] sm:$0xff]  }
0x1432   : > { %8633 = vmatprep.subr.bf16.mxu0 %v18802_v41  ;;  %v18856_v41 = vld [vmem:[%s24120_s8 + $0x18] sm:$0xff]  }
0x1435   : > { %8634 = vmatpush1.bf16.msra.mxu0 %v18800_v35  ;;  %v18857_v35 = vld [vmem:[%s24120_s8 + $0x10] sm:$0xff]  }
0x1436   : > { %16601 = vmatprep.subr.msk.bf16.mxu0 %vm1549_vm8, %v16600_v34  ;;  %v18859_v34 = vld [vmem:[%s24120_s8] sm:$0xff]  }
0x14e0   : > { %v8518_v37 = vpop.f32.mrf.mxu0 }
0x14e2   : > { %v17700_v52 = vpop.f32.mrf.mxu0 }
0x14e4   : > { %v8521_v53 = vpop.f32.mrf.mxu0 }
0x14e5   : > { %v22138_v59 = vpack.c.bf16 %v8521_v53, %v8518_v37  ;;  %v18860_v37 = vld [vmem:[%s24120_s8 + $0x48] sm:$0xff]  }
0x14e6   : > { %v17701_v46 = vpop.f32.mrf.mxu0 }
0x14e7   : > { %v8551_v60 = vshll.u32 %v22138_v59, 16  ;;  %16577 = vmatmul.mubr.msk.bf16.vlgmr.msra.gmra.mxu1 %vm1545_vm10, %v22138_v59  ;;  %v8549_v50 = vshrl.u32 %v22138_v59, 16  ;;  %v8780_v21 = vrot.slane %v22138_v59, 1  ;;  %v9028_v42 = vrot.slane %v22138_v59, 2 }
0x14e8   : > { %8975 = vmatpush1.bf16.msra.mxu1 %v8965_v45  ;;  %9002 = vmatprep.mubr.bf16.mxu1 %v19506_v2 }
0x14e9   : > { %v8553_v61 = vrot.slane %v8551_v60, 1  ;;  %8976 = vmatprep.subr.bf16.mxu1 %v18805_v44  ;;  %v8903_v14 = vrot.slane %v8549_v50, 1  ;;  %v8904_v54 = vrot.slane %v8551_v60, 2 }
0x14eb   : > { %v8554_v63 = vor.u32 %v8553_v61, %v8549_v50  ;;  %v8905_v18 = vor.u32 %v8904_v54, %v8903_v14 }
0x14ec   : > { %8977 = vmatpush1.bf16.msra.mxu1 %v18803_v49 }
0x14ed   : > { %16563 = vmatmul.mubr.msk.bf16.vlgmr.msra.gmra.mxu0 %vm1545_vm10, %v8554_v63  ;;  %8978 = vmatprep.subr.bf16.mxu1 %v18810_v62 }
0x14ee   : > { %8850 = vmatpush1.bf16.msra.mxu0 %v8840_v0  ;;  %8877 = vmatprep.mubr.bf16.mxu0 %v19506_v2 }
0x14ef   : > { %8851 = vmatprep.subr.bf16.mxu0 %v18813_v1 }
0x14f0   : > { %8979 = vmatpush1.bf16.msra.mxu1 %v18808_v3 }
0x14f1   : > { %8980 = vmatprep.subr.bf16.mxu1 %v18816_v58 }
0x14f2   : > { %8852 = vmatpush1.bf16.msra.mxu0 %v18811_v4 }
0x14f3   : > { %8853 = vmatprep.subr.bf16.mxu0 %v18819_v57 }
0x14f4   : > { %8981 = vmatpush1.bf16.msra.mxu1 %v18814_v5 }
0x14f5   : > { %8982 = vmatprep.subr.bf16.mxu1 %v18822_v55 }
0x14f6   : > { %8854 = vmatpush1.bf16.msra.mxu0 %v18817_v6 }
0x14f7   : > { %8855 = vmatprep.subr.bf16.mxu0 %v18825_v9 }
0x14f8   : > { %8983 = vmatpush1.bf16.msra.mxu1 %v18820_v47 }
0x14f9   : > { %8984 = vmatprep.subr.bf16.mxu1 %v18828_v10  ;;  %v9140_v10 = vld [vmem:[%s24118_s6] sm:$0x3] }
0x14fa   : > { %8856 = vmatpush1.bf16.msra.mxu0 %v18823_v11  ;;  %v9149_v54 = vrot.slane %v9140_v10, %v19870_v7 }
0x14fb   : > { %8857 = vmatprep.subr.bf16.mxu0 %v18831_v51 }
0x14fc   : > { %8985 = vmatpush1.bf16.msra.mxu1 %v18826_v13 }
0x14fd   : > { %9245 = vmatprep.subr.bf16.mxu1 %v19506_v2 }
0x14fe   : > { %8858 = vmatpush1.bf16.msra.mxu0 %v18829_v15 }
0x14ff   : > { %16627 = vmatmul.mubr.msk.bf16.vlgmr.msra.gmra.mxu1 %vm1545_vm10, %v8905_v18  ;;  %8859 = vmatprep.subr.bf16.mxu0 %v18834_v16  ;;  %v9145_v18 = vrot.slane %v9140_v10, %v19875_v12 }
0x1500   : > { %9246 = vmatpush1.bf16.msra.mxu1 %v18852_v43  ;;  %v18882_v43 = vld [vmem:[%s24113_s1 + $0x114] ss:$8 sps:$4 sm:$0xff]  }
0x1501   : > { %9247 = vmatprep.subr.bf16.mxu1 %v19506_v2 }
0x1502   : > { %8860 = vmatpush1.bf16.msra.mxu0 %v18832_v56 }
0x1503   : > { %16651 = vmatprep.subr.msk.bf16.mxu0 %vm1549_vm8, %v16650_v19 }
0x1504   : > { %9248 = vmatpush1.bf16.msra.mxu1 %v18853_v39  ;;  %v18890_v39 = vld [vmem:[%s24113_s1 + $0x104] ss:$8 sps:$4 sm:$0xff]  }
0x1505   : > { %16602 = vmatmul.mubr.msk.bf16.vlgmr.msra.gmra.mxu0 %vm1545_vm10, %v8780_v21  ;;  %9249 = vmatprep.subr.bf16.mxu1 %v19506_v2 }
0x1506   : > { %9098 = vmatpush1.bf16.msra.mxu0 %v9088_v22  ;;  %9125 = vmatprep.mubr.bf16.mxu0 %v19506_v2 }
0x1507   : > { %9099 = vmatprep.subr.bf16.mxu0 %v18839_v23 }
0x1508   : > { %9250 = vmatpush1.bf16.msra.mxu1 %v18854_v36  ;;  %v18888_v36 = vld [vmem:[%s24113_s1 + $0x100] ss:$8 sps:$4 sm:$0xff]  }
0x1509   : > { %9251 = vmatprep.subr.bf16.mxu1 %v19506_v2 }
0x150a   : > { %9100 = vmatpush1.bf16.msra.mxu0 %v18837_v24 }
0x150b   : > { %9101 = vmatprep.subr.bf16.mxu0 %v18842_v25 }
0x150c   : > { %9252 = vmatpush1.bf16.msra.mxu1 %v18855_v32  ;;  %v18894_v32 = vld [vmem:[%s24113_s1 + $0xf0] ss:$8 sps:$4 sm:$0xff]  }
0x150d   : > { %9253 = vmatprep.subr.bf16.mxu1 %v19506_v2 }
0x150e   : > { %9102 = vmatpush1.bf16.msra.mxu0 %v18840_v26 }
0x150f   : > { %9103 = vmatprep.subr.bf16.mxu0 %v18845_v27 }
0x1510   : > { %9254 = vmatpush1.bf16.msra.mxu1 %v18856_v41  ;;  %v18896_v41 = vld [vmem:[%s24113_s1 + $0xf4] ss:$8 sps:$4 sm:$0xff]  }
0x1511   : > { %9255 = vmatprep.subr.bf16.mxu1 %v19506_v2 }
0x1512   : > { %9104 = vmatpush1.bf16.msra.mxu0 %v18843_v28 }
0x1513   : > { %9105 = vmatprep.subr.bf16.mxu0 %v18848_v29 }
0x1514   : > { %9256 = vmatpush1.bf16.msra.mxu1 %v18857_v35  ;;  %v18900_v35 = vld [vmem:[%s24113_s1 + $0xe0] ss:$8 sps:$4 sm:$0xff]  }
0x1515   : > { %9257 = vmatprep.subr.bf16.mxu1 %v19506_v2 }
0x1516   : > { %9106 = vmatpush1.bf16.msra.mxu0 %v18846_v30 }
0x1517   : > { %9107 = vmatprep.subr.bf16.mxu0 %v18851_v31 }
0x1518   : > { %9258 = vmatpush1.bf16.msra.mxu1 %v18858_v38  ;;  %v18902_v38 = vld [vmem:[%s24113_s1 + $0xe4] ss:$8 sps:$4 sm:$0xff]  }
0x1519   : > { %9259 = vmatprep.subr.bf16.mxu1 %v19506_v2 }
0x151a   : > { %9108 = vmatpush1.bf16.msra.mxu0 %v18849_v33 }
0x151b   : > { %17702 = vmatprep.subr.bf16.mxu0 %v19507_v8 }
0x151c   : > { %9260 = vmatpush1.bf16.msra.mxu1 %v18859_v34  ;;  %v18906_v34 = vld [vmem:[%s24113_s1 + $0xd0] ss:$8 sps:$4 sm:$0xff]  }
0x151d   : > { %16652 = vmatmul.mubr.msk.bf16.vlgmr.msra.gmra.mxu0 %vm1545_vm10, %v9028_v42  ;;  %9273 = vmatprep.subr.bf16.mxu1 %v19506_v2  ;;  %v18880_v42 = vld [vmem:[%s24113_s1 + $0x110] ss:$8 sps:$4 sm:$0xff]  }
0x151e   : > { %17704 = vmatprep.mubr.msk.bf16.mxu0 %vm19508_vm7, %v19507_v8 }
0x1520   : > { %9274 = vmatpush2.bf16.msra.mxu1 %v18860_v37  ;;  %v18908_v37 = vld [vmem:[%s24113_s1 + $0xd4] ss:$8 sps:$4 sm:$0xff]  }
0x1521   : > { %9275 = vmatprep.subr.bf16.mxu1 %v19506_v2 }
0x1524   : > { %9276 = vmatpush2.bf16.msra.mxu1 %v18861_v40  ;;  %v18912_v40 = vld [vmem:[%s24113_s1 + $0xc0] ss:$8 sps:$4 sm:$0xff]  }
0x1525   : > { %9712 = vmatprep.subr.bf16.mxu1 %v18882_v43 }
0x15a7   : > { %v8759_v59 = vpop.f32.mrf.mxu1 }
0x15a9   : > { %v8761_v44 = vpop.f32.mrf.mxu1 }
0x15ab   : > { %v8763_v60 = vpop.f32.mrf.mxu1 }
0x15ad   : > { %v8653_v52 = vpop.f32.mrf.mxu0  ;;  %v8765_v49 = vpop.f32.mrf.mxu1 }
0x15ae   : > { %v8760_v0 = vadd.f32 %v8759_v59, %v8653_v52  ;;  %v18914_v52 = vld [vmem:[%s24113_s1 + $0xc4] ss:$8 sps:$4 sm:$0xff]   ;;  %v22340_v59 = vld [vmem:[%s19662_s25 + $0x58] sm:$0xff]  }
0x15af   : > { %v8655_v53 = vpop.f32.mrf.mxu0  ;;  %v9386_v43 = vshrl.u32 %v22340_v59, 16 }
0x15b0   : > { %v8762_v63 = vadd.f32 %v8761_v44, %v8655_v53  ;;  %v22337_v53 = vld [vmem:[%s19662_s25 + $0x50] sm:$0xff]  }
0x15b1   : > { %v8657_v45 = vpop.f32.mrf.mxu0  ;;  %v18920_v44 = vld [vmem:[%s24113_s1 + $0x1d4] ss:$8 sps:$4 sm:$0xff]  }
0x15b2   : > { %v8764_v3 = vadd.f32 %v8763_v60, %v8657_v45  ;;  %v18918_v45 = vld [vmem:[%s24113_s1 + $0x1d0] ss:$8 sps:$4 sm:$0xff]   ;;  %v9640_v60 = vrot.slane %v22340_v59, 1 }
0x15b3   : > { %v8659_v46 = vpop.f32.mrf.mxu0 }
0x15b4   : > { %v8766_v5 = vadd.f32 %v8765_v49, %v8659_v46  ;;  %v9639_v46 = vrot.slane %v22337_v53, 1  ;;  %v18926_v49 = vld [vmem:[%s24113_s1 + $0x1c4] ss:$8 sps:$4 sm:$0xff]  }
0x15bf   : > { %v9004_v61 = vpop.f32.mrf.mxu1 }
0x15c1   : > { %v9006_v1 = vpop.f32.mrf.mxu1 }
0x15c3   : > { %v9008_v6 = vpop.f32.mrf.mxu1 }
0x15c5   : > { %v8879_v48 = vpop.f32.mrf.mxu0  ;;  %v9010_v16 = vpop.f32.mrf.mxu1 }
0x15c6   : > { %v8888_v4 = vadd.f32 %v8879_v48, %v8760_v0  ;;  %v9641_v48 = vsel %vm802_vm2, %v9639_v46, %v9640_v60  ;;  %v18936_v0 = vld [vmem:[%s24113_s1 + $0x1a0] ss:$8 sps:$4 sm:$0xff]   ;;  %v18929_v46 = vld [vmem:[%s24113_s1 + $0x164] ss:$8 sps:$4 sm:$0xff]  }
0x15c7   : > { %v8881_v50 = vpop.f32.mrf.mxu0 }
0x15c8   : > { %v8889_v58 = vadd.f32 %v8881_v50, %v8762_v63  ;;  %v9013_v51 = vadd.f32 %v9004_v61, %v8888_v4  ;;  %v18924_v50 = vld [vmem:[%s24113_s1 + $0x1c0] ss:$8 sps:$4 sm:$0xff]   ;;  %v18930_v61 = vld [vmem:[%s24113_s1 + $0x1b0] ss:$8 sps:$4 sm:$0xff]   ;;  %v18938_v63 = vld [vmem:[%s24113_s1 + $0x1a4] ss:$8 sps:$4 sm:$0xff]  }
0x15c9   : > { %v8883_v62 = vpop.f32.mrf.mxu0  ;;  %v18950_v4 = vld [vmem:[%s24113_s1 + $0x184] ss:$8 sps:$4 sm:$0xff]  }
0x15ca   : > { %v8890_v55 = vadd.f32 %v8883_v62, %v8764_v3  ;;  %v9014_v11 = vadd.f32 %v9006_v1, %v8889_v58  ;;  %v18932_v62 = vld [vmem:[%s24113_s1 + $0x1b4] ss:$8 sps:$4 sm:$0xff]   ;;  %v18942_v1 = vld [vmem:[%s24113_s1 + $0x190] ss:$8 sps:$4 sm:$0xff]   ;;  %v18948_v58 = vld [vmem:[%s24113_s1 + $0x180] ss:$8 sps:$4 sm:$0xff]  }
0x15cb   : > { %v8885_v57 = vpop.f32.mrf.mxu0  ;;  %v18944_v3 = vld [vmem:[%s24113_s1 + $0x194] ss:$8 sps:$4 sm:$0xff]  }
0x15cc   : > { %v8891_v47 = vadd.f32 %v8885_v57, %v8766_v5  ;;  %v9015_v15 = vadd.f32 %v9008_v6, %v8890_v55  ;;  %v9927_v57 = vrot.slane %v22337_v53, 2  ;;  %v9928_v5 = vrot.slane %v22340_v59, 2 }
0x15ce   : > { %v9016_v20 = vadd.f32 %v9010_v16, %v8891_v47  ;;  %v9929_v55 = vsel %vm1094_vm4, %v9927_v57, %v9928_v5  ;;  %v18865_v16 = vld [vmem:[%s24113_s1 + $0xa0] ss:$8 sps:$4 sm:$0xff]  }
0x15dd   : > { %v9127_v9 = vpop.f32.mrf.mxu0 }
0x15de   : > { %v9136_v17 = vadd.f32 %v9127_v9, %v9013_v51 }
0x15df   : > { %v9129_v13 = vpop.f32.mrf.mxu0 }
0x15e0   : > { %v9137_v14 = vadd.f32 %v9129_v13, %v9014_v11  ;;  %v9152_v25 = vadd.f32 %v9145_v18, %v9136_v17  ;;  %v18864_v11 = vld [vmem:[%s24113_s1 + $0xb4] ss:$8 sps:$4 sm:$0xff]  }
0x15e1   : > { %v9131_v56 = vpop.f32.mrf.mxu0  ;;  %v18870_v17 = vld [vmem:[%s24113_s1 + $0x94] ss:$8 sps:$4 sm:$0xff]  }
0x15e2   : > { %v9138_v19 = vadd.f32 %v9131_v56, %v9015_v15  ;;  %v9153_v22 = vadd.f32 %v9149_v54, %v9137_v14  ;;  %v9156_v30 = vmax.f32 %v9152_v25, 0.0  ;;  %v9286_v14 = vld [vmem:[%s24119_s7] sm:$0x7]  ;;  %v18867_v15 = vld [vmem:[%s24113_s1 + $0xa4] ss:$8 sps:$4 sm:$0xff]   ;;  %v9382_v25 = vshll.u32 %v22340_v59, 16 }
0x15e3   : > { %v9133_v21 = vpop.f32.mrf.mxu0  ;;  %v18873_v56 = vld [vmem:[%s24113_s1 + $0x84] ss:$8 sps:$4 sm:$0xff]  }
0x15e4   : > { %v9154_v23 = vadd.f32 %v9145_v18, %v9138_v19  ;;  %v9139_v24 = vadd.f32 %v9133_v21, %v9016_v20  ;;  %v9157_v28 = vmax.f32 %v9153_v22, 0.0  ;;  %v18868_v18 = vld [vmem:[%s24113_s1 + $0x90] ss:$8 sps:$4 sm:$0xff]   ;;  %v18871_v19 = vld [vmem:[%s24113_s1 + $0x80] ss:$8 sps:$4 sm:$0xff]   ;;  %v9377_v20 = vshll.u32 %v22337_v53, 16 }
0x15e5   : > { %v18876_v21 = vld [vmem:[%s24113_s1 + $0x74] ss:$8 sps:$4 sm:$0xff]   ;;  %v18874_v22 = vld [vmem:[%s24113_s1 + $0x70] ss:$8 sps:$4 sm:$0xff]  }
0x15e6   : > { %v9155_v26 = vadd.f32 %v9149_v54, %v9139_v24  ;;  %v9158_v27 = vmax.f32 %v9154_v23, 0.0  ;;  %v18862_v54 = vld [vmem:[%s24113_s1 + $0xb0] ss:$8 sps:$4 sm:$0xff]   ;;  %v9375_v23 = vshrl.u32 %v22337_v53, 16  ;;  %v9379_v24 = vrot.slane %v9377_v20, 1 }
0x15e8   : > { %v9159_v29 = vmax.f32 %v9155_v26, 0.0  ;;  %v9160_v33 = vpack.c.bf16 %v9158_v27, %v9156_v30  ;;  %v18879_v26 = vld [vmem:[%s24113_s1 + $0x64] ss:$8 sps:$4 sm:$0xff]   ;;  %v18877_v27 = vld [vmem:[%s24113_s1 + $0x60] ss:$8 sps:$4 sm:$0xff]  }
0x15e9   : > { %v18887_v30 = vld [vmem:[%s24113_s1 + $0x54] ss:$8 sps:$4 sm:$0xff]  }
0x15ea   : > { %v9161_v31 = vpack.c.bf16 %v9159_v29, %v9157_v28  ;;  %v9380_v28 = vor.u32 %v9379_v24, %v9375_v23  ;;  %v9384_v29 = vrot.slane %v9382_v25, 1 }
0x15ec   : > { %16663 = vmatprep.mubr.msk.bf16.mxu1 %vm2182_vm11, %v9161_v31 }
0x15ed   : > { %9278 = vmatmul.mubr.bf16.vlgmr.msra.gmra.mxu1 %v9160_v33  ;;  %v18885_v33 = vld [vmem:[%s24113_s1 + $0x50] ss:$8 sps:$4 sm:$0xff]  }
0x15ee   : > { %9740 = vmatprep.mubr.bf16.mxu1 %v19506_v2  ;;  %9713 = vmatpush1.bf16.msra.mxu1 %v18880_v42  ;;  %v18893_v42 = vld [vmem:[%s24113_s1 + $0x44] ss:$8 sps:$4 sm:$0xff]  }
0x15ef   : > { %9714 = vmatprep.subr.bf16.mxu1 %v18890_v39  ;;  %v18891_v39 = vld [vmem:[%s24113_s1 + $0x40] ss:$8 sps:$4 sm:$0xff]  }
0x15f2   : > { %9715 = vmatpush1.bf16.msra.mxu1 %v18888_v36  ;;  %v18899_v36 = vld [vmem:[%s24113_s1 + $0x34] ss:$8 sps:$4 sm:$0xff]  }
0x15f3   : > { %9716 = vmatprep.subr.bf16.mxu1 %v18896_v41  ;;  %v18897_v41 = vld [vmem:[%s24113_s1 + $0x30] ss:$8 sps:$4 sm:$0xff]  }
0x15f6   : > { %9717 = vmatpush1.bf16.msra.mxu1 %v18894_v32  ;;  %v9388_v32 = vor.u32 %v9386_v43, %v9384_v29 }
0x15f7   : > { %9718 = vmatprep.subr.bf16.mxu1 %v18902_v38  ;;  %v18903_v38 = vld [vmem:[%s24113_s1 + $0x20] ss:$8 sps:$4 sm:$0xff]  }
0x15fa   : > { %9719 = vmatpush1.bf16.msra.mxu1 %v18900_v35  ;;  %v18905_v35 = vld [vmem:[%s24113_s1 + $0x24] ss:$8 sps:$4 sm:$0xff]  }
0x15fb   : > { %9720 = vmatprep.subr.bf16.mxu1 %v18908_v37  ;;  %v18909_v37 = vld [vmem:[%s24113_s1 + $0x10] ss:$8 sps:$4 sm:$0xff]  }
0x15fe   : > { %9721 = vmatpush1.bf16.msra.mxu1 %v18906_v34  ;;  %v18911_v34 = vld [vmem:[%s24113_s1 + $0x14] ss:$8 sps:$4 sm:$0xff]  }
0x15ff   : > { %9722 = vmatprep.subr.bf16.mxu1 %v18914_v52  ;;  %v18915_v52 = vld [vmem:[%s24113_s1] ss:$8 sps:$4 sm:$0xff]  }
0x1602   : > { %9723 = vmatpush1.bf16.msra.mxu1 %v18912_v40  ;;  %v18917_v40 = vld [vmem:[%s24113_s1 + $0x4] ss:$8 sps:$4 sm:$0xff]  }
0x1603   : > { %10000 = vmatprep.subr.bf16.mxu1 %v18920_v44  ;;  %v18921_v44 = vld [vmem:[%s24113_s1 + $0x170] ss:$8 sps:$4 sm:$0xff]  }
0x1605   : > { %16735 = vmatmul.mubr.msk.bf16.vlgmr.msra.gmra.mxu1 %vm610_vm1, %v9641_v48  ;;  %v18935_v48 = vld [vmem:[%s24113_s1 + $0x154] ss:$8 sps:$4 sm:$0xff]  }
0x1606   : > { %10001 = vmatpush1.bf16.msra.mxu1 %v18918_v45  ;;  %9750 = vmatprep.mubr.bf16.mxu1 %v19506_v2  ;;  %v18923_v45 = vld [vmem:[%s24113_s1 + $0x174] ss:$8 sps:$4 sm:$0xff]  }
0x1607   : > { %10002 = vmatprep.subr.bf16.mxu1 %v18926_v49  ;;  %v18933_v49 = vld [vmem:[%s24113_s1 + $0x150] ss:$8 sps:$4 sm:$0xff]  }
0x160a   : > { %10003 = vmatpush1.bf16.msra.mxu1 %v18924_v50  ;;  %v18941_v50 = vld [vmem:[%s24113_s1 + $0x144] ss:$8 sps:$4 sm:$0xff]  }
0x160b   : > { %10004 = vmatprep.subr.bf16.mxu1 %v18932_v62  ;;  %v18947_v62 = vld [vmem:[%s24113_s1 + $0x134] ss:$8 sps:$4 sm:$0xff]  }
0x160d   : > { %16736 = vmatmul.mubr.msk.bf16.gmra.mxu1 %vm610_vm1, %v9640_v60  ;;  %v18927_v60 = vld [vmem:[%s24113_s1 + $0x160] ss:$8 sps:$4 sm:$0xff]  }
0x160e   : > { %10005 = vmatpush1.bf16.msra.mxu1 %v18930_v61  ;;  %10028 = vmatprep.mubr.bf16.mxu1 %v19506_v2  ;;  %v18939_v61 = vld [vmem:[%s24113_s1 + $0x140] ss:$8 sps:$4 sm:$0xff]  }
0x160f   : > { %10006 = vmatprep.subr.bf16.mxu1 %v18938_v63  ;;  %v9781_v63 = vrot.slane %v9375_v23, 1 }
0x1612   : > { %10007 = vmatpush1.bf16.msra.mxu1 %v18936_v0  ;;  %v9785_v0 = vrot.slane %v9382_v25, 2 }
0x1613   : > { %10008 = vmatprep.subr.bf16.mxu1 %v18944_v3  ;;  %v9782_v3 = vrot.slane %v9377_v20, 2 }
0x1615   : > { %v9783_v57 = vor.u32 %v9782_v3, %v9781_v63 }
0x1616   : > { %10009 = vmatpush1.bf16.msra.mxu1 %v18942_v1  ;;  %v9784_v1 = vrot.slane %v9386_v43, 1 }
0x1617   : > { %10010 = vmatprep.subr.bf16.mxu1 %v18950_v4  ;;  %v18951_v4 = vld [vmem:[%s24113_s1 + $0x120] ss:$8 sps:$4 sm:$0xff]  }
0x161a   : > { %10011 = vmatpush1.bf16.msra.mxu1 %v18948_v58  ;;  %v18953_v58 = vld [vmem:[%s24113_s1 + $0x124] ss:$8 sps:$4 sm:$0xff]  }
0x161b   : > { %17708 = vmatprep.subr.bf16.mxu1 %v19507_v8 }
0x161d   : > { %16787 = vmatmul.mubr.msk.bf16.vlgmr.msra.gmra.mxu1 %vm610_vm1, %v9929_v55 }
0x161e   : > { %10038 = vmatprep.mubr.bf16.mxu1 %v19506_v2 }
0x1625   : > { %16788 = vmatmul.mubr.msk.bf16.gmra.mxu1 %vm610_vm1, %v9928_v5  ;;  %v9786_v5 = vor.u32 %v9785_v0, %v9784_v1 }
0x1626   : > { %17712 = vmatprep.mubr.msk.bf16.mxu1 %vm19508_vm7, %v19507_v8 }
0x16ad   : > { %v9279_v6 = vpop.f32.mrf.mxu1 }
0x16af   : > { %v9281_v9 = vpop.f32.mrf.mxu1 }
0x16b0   : > { %v18956_v9 = vld [vmem:[%s24116_s4 + $0x28] sm:$0xff]  }
0x16b1   : > { %v9282_v47 = vpop.f32.mrf.mxu1 }
0x16b2   : > { %v9287_v10 = vpack.c.bf16 %v9282_v47, %v9279_v6  ;;  %v18955_v6 = vld [vmem:[%s24116_s4 + $0x30] sm:$0xff]   ;;  %v18957_v47 = vld [vmem:[%s24116_s4 + $0x20] sm:$0xff]  }
0x16b3   : > { %v9284_v51 = vpop.f32.mrf.mxu1 }
0x16b4   : > { %v9292_v13 = vsel %vm2233_vm12, %v9287_v10, 0  ;;  %v18958_v10 = vld [vmem:[%s24116_s4 + $0x18] sm:$0xff]   ;;  %v18960_v51 = vld [vmem:[%s24116_s4 + $0x8] sm:$0xff]  }
0x16b5   : > { %17703 = vmatpush3.bf16.msra.mxu0 %v9292_v13  ;;  %v18961_v13 = vld [vmem:[%s24116_s4] sm:$0xff]  }
0x16b6   : > { %9459 = vmatprep.subr.bf16.mxu0 %v18864_v11  ;;  %v18959_v11 = vld [vmem:[%s24116_s4 + $0x10] sm:$0xff]  }
0x16b8   : > { %17705 = vmatmul.mubr.msk.bf16.vlgmr.msra.gmra.mxu0 %vm24143_vm13, %v9286_v14  ;;  %vm24144_vm13 = vsmask.f32 7424  ;;  %v18962_v14 = vld [vmem:[%s24116_s4 + $0x50] ss:$0 sps:$4 sm:$0xff]  }
0x16b9   : > { %9460 = vmatpush1.bf16.msra.mxu0 %v18862_v54  ;;  %9487 = vmatprep.mubr.bf16.mxu0 %v19506_v2  ;;  %v9385_v31 = vsel %vm24144_vm13, %v9380_v28, %v9384_v29  ;;  %vm24145_vm13 = vsmask.f32 6400 }
0x16ba   : > { %9461 = vmatprep.subr.bf16.mxu0 %v18867_v15  ;;  %v9787_v55 = vsel %vm24145_vm13, %v9783_v57, %v9786_v5  ;;  %vm24146_vm13 = vcmask 1043456   ;;  %v18963_v15 = vld [vmem:[%s24116_s4 + $0x48] sm:$0xff]  }
0x16bb   : > { %v10180_v54 = vsel %vm24146_vm13, %v18962_v14, 0  ;;  %vm24147_vm13 = vcmask 80896  }
0x16bd   : > { %9462 = vmatpush1.bf16.msra.mxu0 %v18865_v16  ;;  %v18964_v16 = vld [vmem:[%s24116_s4 + $0x40] sm:$0xff]  }
0x16be   : > { %9463 = vmatprep.subr.bf16.mxu0 %v18870_v17 }
0x16c1   : > { %9464 = vmatpush1.bf16.msra.mxu0 %v18868_v18 }
0x16c2   : > { %9465 = vmatprep.subr.bf16.mxu0 %v18873_v56 }
0x16c5   : > { %9466 = vmatpush1.bf16.msra.mxu0 %v18871_v19  ;;  %v9742_v24 = vpop.f32.mrf.mxu1 }
0x16c6   : > { %9467 = vmatprep.subr.bf16.mxu0 %v18876_v21 }
0x16c9   : > { %9468 = vmatpush1.bf16.msra.mxu0 %v18874_v22 }
0x16ca   : > { %9469 = vmatprep.subr.bf16.mxu0 %v18879_v26  ;;  %v9744_v26 = vpop.f32.mrf.mxu1 }
0x16cc   : > { %v9746_v28 = vpop.f32.mrf.mxu1 }
0x16cd   : > { %9470 = vmatpush1.bf16.msra.mxu0 %v18877_v27 }
0x16ce   : > { %9576 = vmatprep.subr.bf16.mxu0 %v18887_v30  ;;  %v9748_v30 = vpop.f32.mrf.mxu1 }
0x16d0   : > { %16695 = vmatmul.mubr.msk.bf16.vlgmr.msra.gmra.mxu0 %vm610_vm1, %v9385_v31 }
0x16d1   : > { %9577 = vmatpush1.bf16.msra.mxu0 %v18885_v33  ;;  %9497 = vmatprep.mubr.bf16.mxu0 %v19506_v2  ;;  %v9752_v33 = vpop.f32.mrf.mxu1 }
0x16d2   : > { %9578 = vmatprep.subr.bf16.mxu0 %v18893_v42 }
0x16d5   : > { %9579 = vmatpush1.bf16.msra.mxu0 %v18891_v39  ;;  %v9754_v39 = vpop.f32.mrf.mxu1 }
0x16d6   : > { %9580 = vmatprep.subr.bf16.mxu0 %v18899_v36 }
0x16d8   : > { %16696 = vmatmul.mubr.msk.bf16.gmra.mxu0 %vm610_vm1, %v9388_v32 }
0x16d9   : > { %9581 = vmatpush1.bf16.msra.mxu0 %v18897_v41  ;;  %9604 = vmatprep.mubr.bf16.mxu0 %v19506_v2  ;;  %v9756_v41 = vpop.f32.mrf.mxu1 }
0x16da   : > { %9582 = vmatprep.subr.bf16.mxu0 %v18905_v35 }
0x16dd   : > { %9583 = vmatpush1.bf16.msra.mxu0 %v18903_v38  ;;  %v9758_v38 = vpop.f32.mrf.mxu1 }
0x16de   : > { %9584 = vmatprep.subr.bf16.mxu0 %v18911_v34 }
0x16df   : > { %v10030_v34 = vpop.f32.mrf.mxu1 }
0x16e1   : > { %9585 = vmatpush1.bf16.msra.mxu0 %v18909_v37 }
0x16e2   : > { %9586 = vmatprep.subr.bf16.mxu0 %v18917_v40  ;;  %v10032_v40 = vpop.f32.mrf.mxu1 }
0x16e5   : > { %9587 = vmatpush1.bf16.msra.mxu0 %v18915_v52 }
0x16e6   : > { %9858 = vmatprep.subr.bf16.mxu0 %v18923_v45 }
0x16e8   : > { %16709 = vmatmul.mubr.msk.bf16.vlgmr.msra.gmra.mxu0 %vm610_vm1, %v22337_v53  ;;  %v18954_v53 = vld [vmem:[%s24116_s4 + $0x38] sm:$0xff]  }
0x16e9   : > { %9859 = vmatpush1.bf16.msra.mxu0 %v18921_v44  ;;  %9614 = vmatprep.mubr.bf16.mxu0 %v19506_v2  ;;  %v10034_v44 = vpop.f32.mrf.mxu1 }
0x16ea   : > { %9860 = vmatprep.subr.bf16.mxu0 %v18929_v46 }
0x16ed   : > { %9861 = vmatpush1.bf16.msra.mxu0 %v18927_v60 }
0x16ee   : > { %9862 = vmatprep.subr.bf16.mxu0 %v18935_v48 }
0x16f0   : > { %16710 = vmatmul.mubr.msk.bf16.gmra.mxu0 %vm610_vm1, %v22340_v59  ;;  %v18945_v59 = vld [vmem:[%s24113_s1 + $0x130] ss:$8 sps:$4 sm:$0xff]  }
0x16f1   : > { %9863 = vmatpush1.bf16.msra.mxu0 %v18933_v49  ;;  %9886 = vmatprep.mubr.bf16.mxu0 %v19506_v2 }
0x16f2   : > { %9864 = vmatprep.subr.bf16.mxu0 %v18941_v50 }
0x16f5   : > { %9865 = vmatpush1.bf16.msra.mxu0 %v18939_v61  ;;  %v10036_v61 = vpop.f32.mrf.mxu1 }
0x16f6   : > { %9866 = vmatprep.subr.bf16.mxu0 %v18947_v62 }
0x16f9   : > { %9867 = vmatpush1.bf16.msra.mxu0 %v18945_v59  ;;  %v10057_v59 = vld [vmem:[%s24114_s2] sm:$0x3] }
0x16fa   : > { %9868 = vmatprep.subr.bf16.mxu0 %v18953_v58 }
0x16fd   : > { %9869 = vmatpush1.bf16.msra.mxu0 %v18951_v4 }
0x16fe   : > { %10182 = vmatprep.subr.bf16.mxu0 %v19506_v2 }
0x1700   : > { %16761 = vmatmul.mubr.msk.bf16.vlgmr.msra.gmra.mxu0 %vm610_vm1, %v9787_v55  ;;  %v10040_v55 = vpop.f32.mrf.mxu1 }
0x1701   : > { %9896 = vmatprep.mubr.bf16.mxu0 %v19506_v2  ;;  %10183 = vmatpush1.bf16.msra.mxu0 %v18954_v53 }
0x1702   : > { %10184 = vmatprep.subr.bf16.mxu0 %v19506_v2 }
0x1705   : > { %10185 = vmatpush1.bf16.msra.mxu0 %v18955_v6  ;;  %v10066_v6 = vrot.slane %v10057_v59, %v19870_v7 }
0x1706   : > { %10186 = vmatprep.subr.bf16.mxu0 %v19506_v2 }
0x1708   : > { %16762 = vmatmul.mubr.msk.bf16.gmra.mxu0 %vm610_vm1, %v9786_v5 }
0x1709   : > { %10187 = vmatpush1.bf16.msra.mxu0 %v18956_v9 }
0x170a   : > { %10188 = vmatprep.subr.bf16.mxu0 %v19506_v2 }
0x170d   : > { %10189 = vmatpush1.bf16.msra.mxu0 %v18957_v47 }
0x170e   : > { %10190 = vmatprep.subr.bf16.mxu0 %v19506_v2 }
0x1711   : > { %10191 = vmatpush1.bf16.msra.mxu0 %v18958_v10 }
0x1712   : > { %10192 = vmatprep.subr.bf16.mxu0 %v19506_v2 }
0x1715   : > { %10193 = vmatpush1.bf16.msra.mxu0 %v18959_v11  ;;  %v10062_v11 = vrot.slane %v10057_v59, %v19875_v12 }
0x1716   : > { %10194 = vmatprep.subr.bf16.mxu0 %v19506_v2 }
0x1719   : > { %10195 = vmatpush1.bf16.msra.mxu0 %v18960_v51 }
0x171a   : > { %10196 = vmatprep.subr.bf16.mxu0 %v19506_v2 }
0x171d   : > { %10197 = vmatpush1.bf16.msra.mxu0 %v18961_v13 }
0x171e   : > { %10208 = vmatprep.subr.bf16.mxu0 %v19506_v2 }
0x1721   : > { %10209 = vmatpush2.bf16.msra.mxu0 %v10180_v54 }
0x1722   : > { %10210 = vmatprep.subr.bf16.mxu0 %v19506_v2 }
0x1725   : > { %10211 = vmatpush2.bf16.msra.mxu0 %v18963_v15 }
0x1726   : > { %10212 = vmatprep.subr.bf16.mxu0 %v19506_v2 }
0x1729   : > { %10213 = vmatpush2.bf16.msra.mxu0 %v18964_v16 }
0x1778   : > { %v9328_v17 = vpop.f32.mrf.mxu0 }
0x1779   : > { %9334 = vst.msk [vmem:[#allocation2 + $0x4] sm:$0x1] %vm2277_vm14, %v9328_v17 }
0x177a   : > { %9335 = vst.msk [vmem:[#allocation2 + $0xb] sm:$0x2] %vm2280_vm15, %v9328_v17  ;;  %v17706_v18 = vpop.f32.mrf.mxu0 }
0x177b   : > { %9336 = vst.msk [vmem:[#allocation2 + $0x12] sm:$0x4] %vm2283_vm3, %v9328_v17 }
0x177c   : > { %9337 = vst.msk [vmem:[#allocation2 + $0x19] sm:$0x8] %vm2286_vm0, %v9328_v17  ;;  %v9331_v56 = vpop.f32.mrf.mxu0 }
0x177d   : > { %9338 = vst.msk [vmem:[#allocation2 + $0x20] sm:$0x10] %vm2289_vm5, %v9328_v17  ;;  %v10042_v17 = vpop.f32.mrf.mxu1 }
0x177e   : > { %v17707_v19 = vpop.f32.mrf.mxu0 }
0x1790   : > { %v9489_v20 = vpop.f32.mrf.mxu0 }
0x1792   : > { %v9491_v21 = vpop.f32.mrf.mxu0 }
0x1794   : > { %v9493_v22 = vpop.f32.mrf.mxu0 }
0x1796   : > { %v9495_v23 = vpop.f32.mrf.mxu0 }
0x1798   : > { %v9499_v25 = vpop.f32.mrf.mxu0 }
0x179a   : > { %v9501_v27 = vpop.f32.mrf.mxu0 }
0x179c   : > { %v9503_v29 = vpop.f32.mrf.mxu0 }
0x179e   : > { %v9505_v31 = vpop.f32.mrf.mxu0 }
0x17a8   : > { %v9606_v42 = vpop.f32.mrf.mxu0 }
0x17a9   : > { %v9607_v45 = vadd.f32 %v9606_v42, %v9489_v20 }
0x17aa   : > { %v9608_v43 = vpop.f32.mrf.mxu0 }
0x17ab   : > { %v9609_v46 = vadd.f32 %v9608_v43, %v9491_v21  ;;  %v9761_v49 = vadd.f32 %v9742_v24, %v9607_v45 }
0x17ac   : > { %v9610_v36 = vpop.f32.mrf.mxu0 }
0x17ad   : > { %v9611_v48 = vadd.f32 %v9610_v36, %v9493_v22  ;;  %v9762_v63 = vadd.f32 %v9744_v26, %v9609_v46 }
0x17ae   : > { %v9612_v32 = vpop.f32.mrf.mxu0 }
0x17af   : > { %v9613_v62 = vadd.f32 %v9612_v32, %v9495_v23  ;;  %v9763_v58 = vadd.f32 %v9746_v28, %v9611_v48 }
0x17b0   : > { %v9616_v35 = vpop.f32.mrf.mxu0 }
0x17b1   : > { %v9617_v4 = vadd.f32 %v9616_v35, %v9499_v25  ;;  %v9764_v47 = vadd.f32 %v9748_v30, %v9613_v62  ;;  %v10044_v30 = vpop.f32.mrf.mxu1 }
0x17b2   : > { %v9618_v37 = vpop.f32.mrf.mxu0 }
0x17b3   : > { %v9619_v57 = vadd.f32 %v9618_v37, %v9501_v27  ;;  %v9765_v54 = vadd.f32 %v9752_v33, %v9617_v4  ;;  %v18968_v4 = vld [vmem:[%s24117_s5 + $0x40] ss:$8 sps:$4 sm:$0xff]  }
0x17b4   : > { %v9620_v52 = vpop.f32.mrf.mxu0 }
0x17b5   : > { %v9621_v15 = vadd.f32 %v9620_v52, %v9503_v29  ;;  %v9766_v16 = vadd.f32 %v9754_v39, %v9619_v57  ;;  %v10046_v52 = vpop.f32.mrf.mxu1  ;;  %v18975_v57 = vld [vmem:[%s24117_s5 + $0x34] ss:$8 sps:$4 sm:$0xff]  }
0x17b6   : > { %v9622_v60 = vpop.f32.mrf.mxu0 }
0x17b7   : > { %v9623_v56 = vadd.f32 %v9622_v60, %v9505_v31  ;;  %v9767_v27 = vadd.f32 %v9756_v41, %v9621_v15 }
0x17b9   : > { %v9768_v43 = vadd.f32 %v9758_v38, %v9623_v56 }
0x17c0   : > { %v9888_v50 = vpop.f32.mrf.mxu0 }
0x17c1   : > { %v9907_v0 = vadd.f32 %v9888_v50, %v9761_v49 }
0x17c2   : > { %v9890_v1 = vpop.f32.mrf.mxu0 }
0x17c3   : > { %v9908_v3 = vadd.f32 %v9890_v1, %v9762_v63  ;;  %v10049_v10 = vadd.f32 %v10030_v34, %v9907_v0  ;;  %v10298_v0 = vld [vmem:[%s24117_s5 + $0x50] sm:$0x33] }
0x17c4   : > { %v9892_v5 = vpop.f32.mrf.mxu0  ;;  %v16840_v1 = vcombine.high %v10298_v0, %v10298_v0  ;;  %v16839_v59 = vcombine.low %v10298_v0, %v10298_v0  ;;  %v19012_v0 = vld [vmem:[%s24117_s5 + $0xf4] ss:$8 sps:$4 sm:$0xff]  }
0x17c5   : > { %v10050_v53 = vadd.f32 %v10032_v40, %v9908_v3  ;;  %v9909_v9 = vadd.f32 %v9892_v5, %v9763_v58  ;;  %v10069_v22 = vadd.f32 %v10062_v11, %v10049_v10  ;;  %v18970_v3 = vld [vmem:[%s24117_s5 + $0x44] ss:$8 sps:$4 sm:$0xff]   ;;  %v18973_v5 = vld [vmem:[%s24117_s5 + $0x30] ss:$8 sps:$4 sm:$0xff]  }
0x17c6   : > { %v9894_v51 = vpop.f32.mrf.mxu0  ;;  %16841 = vmatprep.subr.msk.bf16.mxu0 %vm1549_vm8, %v16840_v1  ;;  %v10482_v58 = vsel %vm1549_vm8, %v16839_v59, 0  ;;  %v19007_v1 = vld [vmem:[%s24117_s5 + $0x138] ss:$8 sps:$4 sm:$0xff]   ;;  %v19015_v59 = vld [vmem:[%s24117_s5 + $0x12c] ss:$8 sps:$4 sm:$0xff]  }
0x17c7   : > { %v10051_v13 = vadd.f32 %v10034_v44, %v9909_v9  ;;  %v9910_v14 = vadd.f32 %v9894_v51, %v9764_v47  ;;  %v10070_v19 = vadd.f32 %v10066_v6, %v10050_v53  ;;  %v10077_v39 = vmax.f32 %v10069_v22, 0.0  ;;  %v18979_v53 = vld [vmem:[%s24117_s5 + $0x20] ss:$8 sps:$4 sm:$0xff]   ;;  %v18985_v9 = vld [vmem:[%s24117_s5 + $0x10] ss:$8 sps:$4 sm:$0xff]  }
0x17c8   : > { %v9898_v18 = vpop.f32.mrf.mxu0 }
0x17c9   : > { %v10071_v20 = vadd.f32 %v10062_v11, %v10051_v13  ;;  %v10052_v21 = vadd.f32 %v10036_v61, %v9910_v14  ;;  %v9911_v23 = vadd.f32 %v9898_v18, %v9765_v54  ;;  %v10078_v36 = vmax.f32 %v10070_v19, 0.0 }
0x17ca   : > { %v9900_v24 = vpop.f32.mrf.mxu0 }
0x17cb   : > { %v10072_v25 = vadd.f32 %v10066_v6, %v10052_v21  ;;  %v9912_v26 = vadd.f32 %v9900_v24, %v9766_v16  ;;  %v10079_v28 = vmax.f32 %v10071_v20, 0.0  ;;  %v10053_v32 = vadd.f32 %v10040_v55, %v9911_v23  ;;  %v18981_v55 = vld [vmem:[%s24117_s5 + $0x24] ss:$8 sps:$4 sm:$0xff]   ;;  %v18976_v24 = vld [vmem:[%s24117_s5 + $0x98] ss:$8 sps:$4 sm:$0xff]  }
0x17cc   : > { %v9902_v42 = vpop.f32.mrf.mxu0  ;;  %v18965_v21 = vld [vmem:[%s24115_s3] sm:$0x7f]  }
0x17cd   : > { %v10080_v33 = vmax.f32 %v10072_v25, 0.0  ;;  %v10054_v29 = vadd.f32 %v10042_v17, %v9912_v26  ;;  %v9913_v35 = vadd.f32 %v9902_v42, %v9767_v27  ;;  %v10085_v40 = vpack.c.bf16 %v10079_v28, %v10077_v39  ;;  %v16814_v17 = vld [vmem:[%s24117_s5 + $0xa8] sm:$0x33]  ;;  %v18978_v23 = vld [vmem:[%s24117_s5 + $0x9c] ss:$8 sps:$4 sm:$0xff]  }
0x17ce   : > { %v9904_v31 = vpop.f32.mrf.mxu0  ;;  %v10073_v41 = vadd.f32 %v10062_v11, %v10053_v32  ;;  %v16826_v56 = vcombine.high %v16814_v17, %v16814_v17  ;;  %v16825_v19 = vcombine.low %v16814_v17, %v16814_v17  ;;  %v18984_v25 = vld [vmem:[%s24117_s5 + $0x8c] ss:$8 sps:$4 sm:$0xff]   ;;  %v18982_v26 = vld [vmem:[%s24117_s5 + $0x88] ss:$8 sps:$4 sm:$0xff]   ;;  %v18990_v27 = vld [vmem:[%s24117_s5 + $0x7c] ss:$8 sps:$4 sm:$0xff]  }
0x17cf   : > { %v9914_v34 = vadd.f32 %v9904_v31, %v9768_v43  ;;  %v10086_v37 = vpack.c.bf16 %v10080_v33, %v10078_v36  ;;  %v10055_v45 = vadd.f32 %v10044_v30, %v9913_v35  ;;  %v10074_v44 = vadd.f32 %v10066_v6, %v10054_v29  ;;  %v18988_v28 = vld [vmem:[%s24117_s5 + $0x78] ss:$8 sps:$4 sm:$0xff]   ;;  %v18993_v30 = vld [vmem:[%s24117_s5 + $0x4] ss:$8 sps:$4 sm:$0xff]   ;;  %v18994_v36 = vld [vmem:[%s24117_s5 + $0x68] ss:$8 sps:$4 sm:$0xff]  }
0x17d0   : > { %v10081_v61 = vmax.f32 %v10073_v41, 0.0  ;;  %v10376_v22 = vsel %vm1549_vm8, %v16825_v19, 0  ;;  %v18991_v42 = vld [vmem:[%s24117_s5] ss:$8 sps:$4 sm:$0xff]   ;;  %v18996_v43 = vld [vmem:[%s24117_s5 + $0x6c] ss:$8 sps:$4 sm:$0xff]  }
0x17d1   : > { %v10056_v46 = vadd.f32 %v10046_v52, %v9914_v34  ;;  %16800 = vmatprep.mubr.msk.bf16.mxu0 %vm1341_vm6, %v10086_v37  ;;  %v10075_v60 = vadd.f32 %v10062_v11, %v10055_v45  ;;  %v10082_v49 = vmax.f32 %v10074_v44, 0.0  ;;  %v16878_v33 = vld [vmem:[%s24117_s5 + $0x158] sm:$0x33]  ;;  %v16853_v35 = vld [vmem:[%s24117_s5 + $0x100] sm:$0x33] }
0x17d2   : > { %10215 = vmatmul.mubr.bf16.vlgmr.msra.gmra.mxu0 %v10085_v40  ;;  %v16890_v29 = vcombine.high %v16878_v33, %v16878_v33  ;;  %v19001_v39 = vld [vmem:[%s24117_s5 + $0x5c] ss:$8 sps:$4 sm:$0xff]   ;;  %v18999_v32 = vld [vmem:[%s24117_s5 + $0x58] ss:$8 sps:$4 sm:$0xff]   ;;  %v16865_v31 = vcombine.high %v16853_v35, %v16853_v35  ;;  %v16889_v37 = vcombine.low %v16878_v33, %v16878_v33  ;;  %v19053_v33 = vld [vmem:[%s24120_s8 + $0x28] sm:$0xff]  }
0x17d3   : > { %v10076_v38 = vadd.f32 %v10066_v6, %v10056_v46  ;;  %v10083_v48 = vmax.f32 %v10075_v60, 0.0  ;;  %10492 = vmatpush1.bf16.msra.mxu0 %v10482_v58  ;;  %v18987_v6 = vld [vmem:[%s24117_s5 + $0x14] ss:$8 sps:$4 sm:$0xff]   ;;  %v19018_v58 = vld [vmem:[%s24117_s5 + $0xe4] ss:$8 sps:$4 sm:$0xff]  }
0x17d4   : > { %10493 = vmatprep.subr.bf16.mxu0 %v18970_v3  ;;  %v10727_v44 = vsel %vm1549_vm8, %v16889_v37, 0  ;;  %v19004_v46 = vld [vmem:[%s24117_s5 + $0x14c] ss:$8 sps:$4 sm:$0xff]   ;;  %v19010_v3 = vld [vmem:[%s24117_s5 + $0xf0] ss:$8 sps:$4 sm:$0xff]   ;;  %v19060_v37 = vld [vmem:[%s24120_s8 + $0x40] sm:$0xff]  }
0x17d5   : > { %v10084_v50 = vmax.f32 %v10076_v38, 0.0  ;;  %v10087_v63 = vpack.c.bf16 %v10083_v48, %v10081_v61  ;;  %v16864_v38 = vcombine.low %v16853_v35, %v16853_v35  ;;  %v19002_v48 = vld [vmem:[%s24117_s5 + $0x148] ss:$8 sps:$4 sm:$0xff]   ;;  %v19009_v61 = vld [vmem:[%s24117_s5 + $0x13c] ss:$8 sps:$4 sm:$0xff]  }
0x17d6   : > { %v19057_v35 = vld [vmem:[%s24120_s8 + $0x8] sm:$0xff]  }
0x17d7   : > { %v10088_v62 = vpack.c.bf16 %v10084_v50, %v10082_v49  ;;  %10494 = vmatpush1.bf16.msra.mxu0 %v18968_v4  ;;  %v19013_v4 = vld [vmem:[%s24117_s5 + $0x128] ss:$8 sps:$4 sm:$0xff]  }
0x17d8   : > { %10495 = vmatprep.subr.bf16.mxu0 %v18975_v57  ;;  %v19021_v57 = vld [vmem:[%s24117_s5 + $0x11c] ss:$8 sps:$4 sm:$0xff]  }
0x17d9   : > { %16801 = vmatprep.mubr.msk.bf16.mxu0 %vm1341_vm6, %v10088_v62 }
0x17da   : > { %10223 = vmatmul.mubr.bf16.gmra.mxu0 %v10087_v63  ;;  %v10602_v63 = vsel %vm1549_vm8, %v16864_v38, 0 }
0x17db   : > { %10519 = vmatprep.mubr.bf16.mxu0 %v19506_v2  ;;  %10496 = vmatpush1.bf16.msra.mxu0 %v18973_v5  ;;  %v19016_v5 = vld [vmem:[%s24117_s5 + $0xe0] ss:$8 sps:$4 sm:$0xff]  }
0x17dc   : > { %10497 = vmatprep.subr.bf16.mxu0 %v18981_v55  ;;  %v19024_v55 = vld [vmem:[%s24117_s5 + $0xd4] ss:$8 sps:$4 sm:$0xff]  }
0x17df   : > { %10498 = vmatpush1.bf16.msra.mxu0 %v18979_v53  ;;  %v19019_v53 = vld [vmem:[%s24117_s5 + $0x118] ss:$8 sps:$4 sm:$0xff]  }
0x17e0   : > { %10499 = vmatprep.subr.bf16.mxu0 %v18987_v6  ;;  %v19027_v6 = vld [vmem:[%s24117_s5 + $0x10c] ss:$8 sps:$4 sm:$0xff]  }
0x17e3   : > { %10500 = vmatpush1.bf16.msra.mxu0 %v18985_v9  ;;  %v19022_v9 = vld [vmem:[%s24117_s5 + $0xd0] ss:$8 sps:$4 sm:$0xff]  }
0x17e4   : > { %10501 = vmatprep.subr.bf16.mxu0 %v18993_v30  ;;  %v19048_v30 = vld [vmem:[%s24117_s5 + $0x160] ss:$8 sps:$4 sm:$0xff]  }
0x17e7   : > { %10502 = vmatpush1.bf16.msra.mxu0 %v18991_v42 }
0x17e8   : > { %16891 = vmatprep.subr.msk.bf16.mxu0 %vm1549_vm8, %v16890_v29  ;;  %v19054_v29 = vld [vmem:[%s24120_s8 + $0x20] sm:$0xff]  }
0x1892   : > { %v10216_v47 = vpop.f32.mrf.mxu0 }
0x1894   : > { %v10218_v10 = vpop.f32.mrf.mxu0 }
0x1895   : > { %v19025_v10 = vld [vmem:[%s24117_s5 + $0x108] ss:$8 sps:$4 sm:$0xff]  }
0x1896   : > { %v10219_v11 = vpop.f32.mrf.mxu0 }
0x1897   : > { %v10233_v20 = vpack.c.bf16 %v10219_v11, %v10216_v47  ;;  %v19030_v47 = vld [vmem:[%s24117_s5 + $0xc4] ss:$8 sps:$4 sm:$0xff]  }
0x1898   : > { %v10221_v51 = vpop.f32.mrf.mxu0 }
0x189a   : > { %v10224_v13 = vpop.f32.mrf.mxu0 }
0x189c   : > { %v10226_v14 = vpop.f32.mrf.mxu0 }
0x189d   : > { %v19033_v14 = vld [vmem:[%s24117_s5 + $0xb4] ss:$8 sps:$4 sm:$0xff]  }
0x189e   : > { %v10227_v54 = vpop.f32.mrf.mxu0 }
0x189f   : > { %v10234_v15 = vpack.c.bf16 %v10227_v54, %v10224_v13  ;;  %v19028_v13 = vld [vmem:[%s24117_s5 + $0xc0] ss:$8 sps:$4 sm:$0xff]   ;;  %v16903_v54 = vld [vmem:[%s24117_s5 + $0x1b0] sm:$0x33] }
0x18a0   : > { %v10229_v16 = vpop.f32.mrf.mxu0  ;;  %v16915_v17 = vcombine.high %v16903_v54, %v16903_v54 }
0x18a1   : > { %v10244_v18 = vsel %vm1094_vm4, %v10234_v15, 0  ;;  %v19031_v16 = vld [vmem:[%s24117_s5 + $0xb0] ss:$8 sps:$4 sm:$0xff]  }
0x18a2   : > { %17709 = vmatpush3.bf16.msra.mxu1 %v10244_v18  ;;  %v16914_v18 = vcombine.low %v16903_v54, %v16903_v54 }
0x18a3   : > { %17710 = vmatprep.subr.bf16.mxu1 %v19507_v8 }
0x18a4   : > { %v10850_v19 = vsel %vm1549_vm8, %v16914_v18, 0 }
0x18a6   : > { %17711 = vmatpush3.bf16.msra.mxu1 %v10233_v20  ;;  %v19038_v20 = vld [vmem:[%s24117_s5 + $0x1a4] ss:$8 sps:$4 sm:$0xff]  }
0x18a7   : > { %16827 = vmatprep.subr.msk.bf16.mxu1 %vm1549_vm8, %v16826_v56 }
0x18a9   : > { %17713 = vmatmul.mubr.msk.bf16.vlgmr.msra.gmra.mxu1 %vm1410_vm9, %v18965_v21  ;;  %v19036_v21 = vld [vmem:[%s24117_s5 + $0x1a0] ss:$8 sps:$4 sm:$0xff]  }
0x18aa   : > { %10386 = vmatpush1.bf16.msra.mxu1 %v10376_v22  ;;  %10413 = vmatprep.mubr.bf16.mxu1 %v19506_v2  ;;  %v19041_v22 = vld [vmem:[%s24117_s5 + $0x194] ss:$8 sps:$4 sm:$0xff]  }
0x18ab   : > { %10387 = vmatprep.subr.bf16.mxu1 %v18978_v23  ;;  %v19039_v23 = vld [vmem:[%s24117_s5 + $0x190] ss:$8 sps:$4 sm:$0xff]  }
0x18ae   : > { %10388 = vmatpush1.bf16.msra.mxu1 %v18976_v24  ;;  %v19044_v24 = vld [vmem:[%s24117_s5 + $0x184] ss:$8 sps:$4 sm:$0xff]  }
0x18af   : > { %10389 = vmatprep.subr.bf16.mxu1 %v18984_v25  ;;  %v19042_v25 = vld [vmem:[%s24117_s5 + $0x180] ss:$8 sps:$4 sm:$0xff]  }
0x18b2   : > { %10390 = vmatpush1.bf16.msra.mxu1 %v18982_v26  ;;  %v19047_v26 = vld [vmem:[%s24117_s5 + $0x174] ss:$8 sps:$4 sm:$0xff]  }
0x18b3   : > { %10391 = vmatprep.subr.bf16.mxu1 %v18990_v27  ;;  %v19045_v27 = vld [vmem:[%s24117_s5 + $0x170] ss:$8 sps:$4 sm:$0xff]  }
0x18b6   : > { %10392 = vmatpush1.bf16.msra.mxu1 %v18988_v28  ;;  %v19050_v28 = vld [vmem:[%s24117_s5 + $0x164] ss:$8 sps:$4 sm:$0xff]  }
0x18b7   : > { %10393 = vmatprep.subr.bf16.mxu1 %v18996_v43  ;;  %v19051_v43 = vld [vmem:[%s24120_s8 + $0x38] sm:$0xff]  }
0x18ba   : > { %10394 = vmatpush1.bf16.msra.mxu1 %v18994_v36  ;;  %v19052_v36 = vld [vmem:[%s24120_s8 + $0x30] sm:$0xff]  }
0x18bb   : > { %10395 = vmatprep.subr.bf16.mxu1 %v19001_v39  ;;  %v19055_v39 = vld [vmem:[%s24120_s8 + $0x18] sm:$0xff]  }
0x18be   : > { %10396 = vmatpush1.bf16.msra.mxu1 %v18999_v32  ;;  %v19056_v32 = vld [vmem:[%s24120_s8 + $0x10] sm:$0xff]  }
0x18bf   : > { %16866 = vmatprep.subr.msk.bf16.mxu1 %vm1549_vm8, %v16865_v31  ;;  %v19058_v31 = vld [vmem:[%s24120_s8] sm:$0xff]  }
0x1969   : > { %v10280_v34 = vpop.f32.mrf.mxu1 }
0x196b   : > { %v17714_v40 = vpop.f32.mrf.mxu1 }
0x196d   : > { %v10283_v52 = vpop.f32.mrf.mxu1 }
0x196e   : > { %v22674_v45 = vpack.c.bf16 %v10283_v52, %v10280_v34  ;;  %v19059_v34 = vld [vmem:[%s24120_s8 + $0x48] sm:$0xff]  }
0x196f   : > { %v17715_v41 = vpop.f32.mrf.mxu1 }
0x1970   : > { %v10313_v60 = vshll.u32 %v22674_v45, 16  ;;  %16842 = vmatmul.mubr.msk.bf16.vlgmr.msra.gmra.mxu0 %vm1545_vm10, %v22674_v45  ;;  %v10311_v49 = vshrl.u32 %v22674_v45, 16  ;;  %v10542_v56 = vrot.slane %v22674_v45, 1  ;;  %v10790_v42 = vrot.slane %v22674_v45, 2 }
0x1971   : > { %10737 = vmatpush1.bf16.msra.mxu0 %v10727_v44  ;;  %10764 = vmatprep.mubr.bf16.mxu0 %v19506_v2 }
0x1972   : > { %v10315_v50 = vrot.slane %v10313_v60, 1  ;;  %10738 = vmatprep.subr.bf16.mxu0 %v19004_v46  ;;  %v10665_v11 = vrot.slane %v10311_v49, 1  ;;  %v10666_v51 = vrot.slane %v10313_v60, 2 }
0x1974   : > { %v10316_v62 = vor.u32 %v10315_v50, %v10311_v49  ;;  %v10667_v15 = vor.u32 %v10666_v51, %v10665_v11 }
0x1975   : > { %10739 = vmatpush1.bf16.msra.mxu0 %v19002_v48 }
0x1976   : > { %16828 = vmatmul.mubr.msk.bf16.vlgmr.msra.gmra.mxu1 %vm1545_vm10, %v10316_v62  ;;  %10740 = vmatprep.subr.bf16.mxu0 %v19009_v61 }
0x1977   : > { %10612 = vmatpush1.bf16.msra.mxu1 %v10602_v63  ;;  %10639 = vmatprep.mubr.bf16.mxu1 %v19506_v2 }
0x1978   : > { %10613 = vmatprep.subr.bf16.mxu1 %v19012_v0 }
0x1979   : > { %10741 = vmatpush1.bf16.msra.mxu0 %v19007_v1 }
0x197a   : > { %10742 = vmatprep.subr.bf16.mxu0 %v19015_v59 }
0x197b   : > { %10614 = vmatpush1.bf16.msra.mxu1 %v19010_v3 }
0x197c   : > { %10615 = vmatprep.subr.bf16.mxu1 %v19018_v58 }
0x197d   : > { %10743 = vmatpush1.bf16.msra.mxu0 %v19013_v4 }
0x197e   : > { %10744 = vmatprep.subr.bf16.mxu0 %v19021_v57 }
0x197f   : > { %10616 = vmatpush1.bf16.msra.mxu1 %v19016_v5 }
0x1980   : > { %10617 = vmatprep.subr.bf16.mxu1 %v19024_v55 }
0x1981   : > { %10745 = vmatpush1.bf16.msra.mxu0 %v19019_v53 }
0x1982   : > { %10746 = vmatprep.subr.bf16.mxu0 %v19027_v6  ;;  %v10902_v6 = vld [vmem:[%s24118_s6] sm:$0x3] }
0x1983   : > { %10618 = vmatpush1.bf16.msra.mxu1 %v19022_v9  ;;  %v10911_v51 = vrot.slane %v10902_v6, %v19870_v7 }
0x1984   : > { %10619 = vmatprep.subr.bf16.mxu1 %v19030_v47 }
0x1985   : > { %10747 = vmatpush1.bf16.msra.mxu0 %v19025_v10 }
0x1986   : > { %11007 = vmatprep.subr.bf16.mxu0 %v19506_v2 }
0x1987   : > { %10620 = vmatpush1.bf16.msra.mxu1 %v19028_v13 }
0x1988   : > { %16892 = vmatmul.mubr.msk.bf16.vlgmr.msra.gmra.mxu0 %vm1545_vm10, %v10667_v15  ;;  %10621 = vmatprep.subr.bf16.mxu1 %v19033_v14  ;;  %v10907_v15 = vrot.slane %v10902_v6, %v19875_v12 }
0x1989   : > { %11008 = vmatpush1.bf16.msra.mxu0 %v19051_v43  ;;  %v19081_v43 = vld [vmem:[%s24113_s1 + $0x114] ss:$8 sps:$4 sm:$0xff]  }
0x198a   : > { %11009 = vmatprep.subr.bf16.mxu0 %v19506_v2 }
0x198b   : > { %10622 = vmatpush1.bf16.msra.mxu1 %v19031_v16 }
0x198c   : > { %16916 = vmatprep.subr.msk.bf16.mxu1 %vm1549_vm8, %v16915_v17 }
0x198d   : > { %11010 = vmatpush1.bf16.msra.mxu0 %v19052_v36  ;;  %v19089_v36 = vld [vmem:[%s24113_s1 + $0x104] ss:$8 sps:$4 sm:$0xff]  }
0x198e   : > { %16867 = vmatmul.mubr.msk.bf16.vlgmr.msra.gmra.mxu1 %vm1545_vm10, %v10542_v56  ;;  %11011 = vmatprep.subr.bf16.mxu0 %v19506_v2 }
0x198f   : > { %10860 = vmatpush1.bf16.msra.mxu1 %v10850_v19  ;;  %10887 = vmatprep.mubr.bf16.mxu1 %v19506_v2 }
0x1990   : > { %10861 = vmatprep.subr.bf16.mxu1 %v19038_v20 }
0x1991   : > { %11012 = vmatpush1.bf16.msra.mxu0 %v19053_v33  ;;  %v19087_v33 = vld [vmem:[%s24113_s1 + $0x100] ss:$8 sps:$4 sm:$0xff]  }
0x1992   : > { %11013 = vmatprep.subr.bf16.mxu0 %v19506_v2 }
0x1993   : > { %10862 = vmatpush1.bf16.msra.mxu1 %v19036_v21 }
0x1994   : > { %10863 = vmatprep.subr.bf16.mxu1 %v19041_v22 }
0x1995   : > { %11014 = vmatpush1.bf16.msra.mxu0 %v19054_v29  ;;  %v19093_v29 = vld [vmem:[%s24113_s1 + $0xf0] ss:$8 sps:$4 sm:$0xff]  }
0x1996   : > { %11015 = vmatprep.subr.bf16.mxu0 %v19506_v2 }
0x1997   : > { %10864 = vmatpush1.bf16.msra.mxu1 %v19039_v23 }
0x1998   : > { %10865 = vmatprep.subr.bf16.mxu1 %v19044_v24 }
0x1999   : > { %11016 = vmatpush1.bf16.msra.mxu0 %v19055_v39  ;;  %v19095_v39 = vld [vmem:[%s24113_s1 + $0xf4] ss:$8 sps:$4 sm:$0xff]  }
0x199a   : > { %11017 = vmatprep.subr.bf16.mxu0 %v19506_v2 }
0x199b   : > { %10866 = vmatpush1.bf16.msra.mxu1 %v19042_v25 }
0x199c   : > { %10867 = vmatprep.subr.bf16.mxu1 %v19047_v26 }
0x199d   : > { %11018 = vmatpush1.bf16.msra.mxu0 %v19056_v32  ;;  %v19099_v32 = vld [vmem:[%s24113_s1 + $0xe0] ss:$8 sps:$4 sm:$0xff]  }
0x199e   : > { %11019 = vmatprep.subr.bf16.mxu0 %v19506_v2 }
0x199f   : > { %10868 = vmatpush1.bf16.msra.mxu1 %v19045_v27 }
0x19a0   : > { %10869 = vmatprep.subr.bf16.mxu1 %v19050_v28 }
0x19a1   : > { %11020 = vmatpush1.bf16.msra.mxu0 %v19057_v35  ;;  %v19101_v35 = vld [vmem:[%s24113_s1 + $0xe4] ss:$8 sps:$4 sm:$0xff]  }
0x19a2   : > { %11021 = vmatprep.subr.bf16.mxu0 %v19506_v2 }
0x19a3   : > { %10870 = vmatpush1.bf16.msra.mxu1 %v19048_v30 }
0x19a4   : > { %17716 = vmatprep.subr.bf16.mxu1 %v19507_v8 }
0x19a5   : > { %11022 = vmatpush1.bf16.msra.mxu0 %v19058_v31  ;;  %v19105_v31 = vld [vmem:[%s24113_s1 + $0xd0] ss:$8 sps:$4 sm:$0xff]  }
0x19a6   : > { %16917 = vmatmul.mubr.msk.bf16.vlgmr.msra.gmra.mxu1 %vm1545_vm10, %v10790_v42  ;;  %11035 = vmatprep.subr.bf16.mxu0 %v19506_v2  ;;  %v19079_v42 = vld [vmem:[%s24113_s1 + $0x110] ss:$8 sps:$4 sm:$0xff]  }
0x19a7   : > { %17718 = vmatprep.mubr.msk.bf16.mxu1 %vm19508_vm7, %v19507_v8 }
0x19a9   : > { %11036 = vmatpush2.bf16.msra.mxu0 %v19059_v34  ;;  %v19107_v34 = vld [vmem:[%s24113_s1 + $0xd4] ss:$8 sps:$4 sm:$0xff]  }
0x19aa   : > { %11037 = vmatprep.subr.bf16.mxu0 %v19506_v2 }
0x19ad   : > { %11038 = vmatpush2.bf16.msra.mxu0 %v19060_v37  ;;  %v19111_v37 = vld [vmem:[%s24113_s1 + $0xc0] ss:$8 sps:$4 sm:$0xff]  }
0x19ae   : > { %11474 = vmatprep.subr.bf16.mxu0 %v19081_v43 }
0x1a30   : > { %v10521_v45 = vpop.f32.mrf.mxu0 }
0x1a32   : > { %v10523_v46 = vpop.f32.mrf.mxu0 }
0x1a34   : > { %v10525_v60 = vpop.f32.mrf.mxu0 }
0x1a36   : > { %v10415_v40 = vpop.f32.mrf.mxu1  ;;  %v10527_v48 = vpop.f32.mrf.mxu0 }
0x1a37   : > { %v10522_v63 = vadd.f32 %v10521_v45, %v10415_v40  ;;  %v19113_v40 = vld [vmem:[%s24113_s1 + $0xc4] ss:$8 sps:$4 sm:$0xff]  }
0x1a38   : > { %v10417_v52 = vpop.f32.mrf.mxu1  ;;  %v22876_v45 = vld [vmem:[%s19662_s25 + $0x68] sm:$0xff]  }
0x1a39   : > { %v10524_v62 = vadd.f32 %v10523_v46, %v10417_v52  ;;  %v22873_v52 = vld [vmem:[%s19662_s25 + $0x60] sm:$0xff]   ;;  %v19119_v46 = vld [vmem:[%s24113_s1 + $0x1d4] ss:$8 sps:$4 sm:$0xff]   ;;  %v11148_v43 = vshrl.u32 %v22876_v45, 16 }
0x1a3a   : > { %v10419_v44 = vpop.f32.mrf.mxu1 }
0x1a3b   : > { %v10526_v1 = vadd.f32 %v10525_v60, %v10419_v44  ;;  %v19117_v44 = vld [vmem:[%s24113_s1 + $0x1d0] ss:$8 sps:$4 sm:$0xff]   ;;  %v11402_v60 = vrot.slane %v22876_v45, 1 }
0x1a3c   : > { %v10421_v41 = vpop.f32.mrf.mxu1 }
0x1a3d   : > { %v10528_v4 = vadd.f32 %v10527_v48, %v10421_v41  ;;  %v11401_v41 = vrot.slane %v22873_v52, 1  ;;  %v19125_v48 = vld [vmem:[%s24113_s1 + $0x1c4] ss:$8 sps:$4 sm:$0xff]  }
0x1a48   : > { %v10766_v50 = vpop.f32.mrf.mxu0 }
0x1a4a   : > { %v10768_v0 = vpop.f32.mrf.mxu0 }
0x1a4c   : > { %v10770_v5 = vpop.f32.mrf.mxu0 }
0x1a4e   : > { %v10641_v38 = vpop.f32.mrf.mxu1  ;;  %v10772_v14 = vpop.f32.mrf.mxu0 }
0x1a4f   : > { %v10650_v3 = vadd.f32 %v10641_v38, %v10522_v63  ;;  %v11403_v38 = vsel %vm802_vm2, %v11401_v41, %v11402_v60  ;;  %v19135_v63 = vld [vmem:[%s24113_s1 + $0x1a0] ss:$8 sps:$4 sm:$0xff]   ;;  %v19128_v41 = vld [vmem:[%s24113_s1 + $0x164] ss:$8 sps:$4 sm:$0xff]  }
0x1a50   : > { %v10643_v49 = vpop.f32.mrf.mxu1 }
0x1a51   : > { %v10651_v59 = vadd.f32 %v10643_v49, %v10524_v62  ;;  %v10775_v47 = vadd.f32 %v10766_v50, %v10650_v3  ;;  %v19123_v49 = vld [vmem:[%s24113_s1 + $0x1c0] ss:$8 sps:$4 sm:$0xff]   ;;  %v19129_v50 = vld [vmem:[%s24113_s1 + $0x1b0] ss:$8 sps:$4 sm:$0xff]   ;;  %v19137_v62 = vld [vmem:[%s24113_s1 + $0x1a4] ss:$8 sps:$4 sm:$0xff]  }
0x1a52   : > { %v10645_v61 = vpop.f32.mrf.mxu1  ;;  %v19149_v3 = vld [vmem:[%s24113_s1 + $0x184] ss:$8 sps:$4 sm:$0xff]  }
0x1a53   : > { %v10652_v57 = vadd.f32 %v10645_v61, %v10526_v1  ;;  %v10776_v9 = vadd.f32 %v10768_v0, %v10651_v59  ;;  %v19131_v61 = vld [vmem:[%s24113_s1 + $0x1b4] ss:$8 sps:$4 sm:$0xff]   ;;  %v19141_v0 = vld [vmem:[%s24113_s1 + $0x190] ss:$8 sps:$4 sm:$0xff]   ;;  %v19147_v59 = vld [vmem:[%s24113_s1 + $0x180] ss:$8 sps:$4 sm:$0xff]  }
0x1a54   : > { %v10647_v58 = vpop.f32.mrf.mxu1  ;;  %v19143_v1 = vld [vmem:[%s24113_s1 + $0x194] ss:$8 sps:$4 sm:$0xff]  }
0x1a55   : > { %v10653_v53 = vadd.f32 %v10647_v58, %v10528_v4  ;;  %v10777_v13 = vadd.f32 %v10770_v5, %v10652_v57  ;;  %v11689_v58 = vrot.slane %v22873_v52, 2  ;;  %v11690_v4 = vrot.slane %v22876_v45, 2 }
0x1a57   : > { %v10778_v18 = vadd.f32 %v10772_v14, %v10653_v53  ;;  %v11691_v57 = vsel %vm1094_vm4, %v11689_v58, %v11690_v4  ;;  %v19064_v14 = vld [vmem:[%s24113_s1 + $0xa0] ss:$8 sps:$4 sm:$0xff]  }
0x1a66   : > { %v10889_v55 = vpop.f32.mrf.mxu1 }
0x1a67   : > { %v10898_v54 = vadd.f32 %v10889_v55, %v10775_v47 }
0x1a68   : > { %v10891_v10 = vpop.f32.mrf.mxu1 }
0x1a69   : > { %v10899_v11 = vadd.f32 %v10891_v10, %v10776_v9  ;;  %v10914_v22 = vadd.f32 %v10907_v15, %v10898_v54  ;;  %v19063_v9 = vld [vmem:[%s24113_s1 + $0xb4] ss:$8 sps:$4 sm:$0xff]  }
0x1a6a   : > { %v10893_v16 = vpop.f32.mrf.mxu1  ;;  %v19069_v54 = vld [vmem:[%s24113_s1 + $0x94] ss:$8 sps:$4 sm:$0xff]  }
0x1a6b   : > { %v10900_v17 = vadd.f32 %v10893_v16, %v10777_v13  ;;  %v10915_v19 = vadd.f32 %v10911_v51, %v10899_v11  ;;  %v10918_v27 = vmax.f32 %v10914_v22, 0.0  ;;  %v11048_v11 = vld [vmem:[%s24119_s7] sm:$0x7]  ;;  %v19066_v13 = vld [vmem:[%s24113_s1 + $0xa4] ss:$8 sps:$4 sm:$0xff]   ;;  %v11144_v22 = vshll.u32 %v22876_v45, 16 }
0x1a6c   : > { %v10895_v56 = vpop.f32.mrf.mxu1  ;;  %v19072_v16 = vld [vmem:[%s24113_s1 + $0x84] ss:$8 sps:$4 sm:$0xff]  }
0x1a6d   : > { %v10916_v20 = vadd.f32 %v10907_v15, %v10900_v17  ;;  %v10901_v21 = vadd.f32 %v10895_v56, %v10778_v18  ;;  %v10919_v25 = vmax.f32 %v10915_v19, 0.0  ;;  %v19067_v15 = vld [vmem:[%s24113_s1 + $0x90] ss:$8 sps:$4 sm:$0xff]   ;;  %v19070_v17 = vld [vmem:[%s24113_s1 + $0x80] ss:$8 sps:$4 sm:$0xff]   ;;  %v11139_v18 = vshll.u32 %v22873_v52, 16 }
0x1a6e   : > { %v19075_v56 = vld [vmem:[%s24113_s1 + $0x74] ss:$8 sps:$4 sm:$0xff]   ;;  %v19073_v19 = vld [vmem:[%s24113_s1 + $0x70] ss:$8 sps:$4 sm:$0xff]  }
0x1a6f   : > { %v10917_v23 = vadd.f32 %v10911_v51, %v10901_v21  ;;  %v10920_v24 = vmax.f32 %v10916_v20, 0.0  ;;  %v19061_v51 = vld [vmem:[%s24113_s1 + $0xb0] ss:$8 sps:$4 sm:$0xff]   ;;  %v11137_v20 = vshrl.u32 %v22873_v52, 16  ;;  %v11141_v21 = vrot.slane %v11139_v18, 1 }
0x1a71   : > { %v10921_v26 = vmax.f32 %v10917_v23, 0.0  ;;  %v10922_v30 = vpack.c.bf16 %v10920_v24, %v10918_v27  ;;  %v19078_v23 = vld [vmem:[%s24113_s1 + $0x64] ss:$8 sps:$4 sm:$0xff]   ;;  %v19076_v24 = vld [vmem:[%s24113_s1 + $0x60] ss:$8 sps:$4 sm:$0xff]  }
0x1a72   : > { %v19086_v27 = vld [vmem:[%s24113_s1 + $0x54] ss:$8 sps:$4 sm:$0xff]  }
0x1a73   : > { %v10923_v28 = vpack.c.bf16 %v10921_v26, %v10919_v25  ;;  %v11142_v25 = vor.u32 %v11141_v21, %v11137_v20  ;;  %v11146_v26 = vrot.slane %v11144_v22, 1 }
0x1a75   : > { %16928 = vmatprep.mubr.msk.bf16.mxu0 %vm2182_vm11, %v10923_v28 }
0x1a76   : > { %11040 = vmatmul.mubr.bf16.vlgmr.msra.gmra.mxu0 %v10922_v30  ;;  %v19084_v30 = vld [vmem:[%s24113_s1 + $0x50] ss:$8 sps:$4 sm:$0xff]  }
0x1a77   : > { %11502 = vmatprep.mubr.bf16.mxu0 %v19506_v2  ;;  %11475 = vmatpush1.bf16.msra.mxu0 %v19079_v42  ;;  %v19092_v42 = vld [vmem:[%s24113_s1 + $0x44] ss:$8 sps:$4 sm:$0xff]  }
0x1a78   : > { %11476 = vmatprep.subr.bf16.mxu0 %v19089_v36  ;;  %v19090_v36 = vld [vmem:[%s24113_s1 + $0x40] ss:$8 sps:$4 sm:$0xff]  }
0x1a7b   : > { %11477 = vmatpush1.bf16.msra.mxu0 %v19087_v33  ;;  %v19098_v33 = vld [vmem:[%s24113_s1 + $0x34] ss:$8 sps:$4 sm:$0xff]  }
0x1a7c   : > { %11478 = vmatprep.subr.bf16.mxu0 %v19095_v39  ;;  %v19096_v39 = vld [vmem:[%s24113_s1 + $0x30] ss:$8 sps:$4 sm:$0xff]  }
0x1a7f   : > { %11479 = vmatpush1.bf16.msra.mxu0 %v19093_v29  ;;  %v11150_v29 = vor.u32 %v11148_v43, %v11146_v26 }
0x1a80   : > { %11480 = vmatprep.subr.bf16.mxu0 %v19101_v35  ;;  %v19102_v35 = vld [vmem:[%s24113_s1 + $0x20] ss:$8 sps:$4 sm:$0xff]  }
0x1a83   : > { %11481 = vmatpush1.bf16.msra.mxu0 %v19099_v32  ;;  %v19104_v32 = vld [vmem:[%s24113_s1 + $0x24] ss:$8 sps:$4 sm:$0xff]  }
0x1a84   : > { %11482 = vmatprep.subr.bf16.mxu0 %v19107_v34  ;;  %v19108_v34 = vld [vmem:[%s24113_s1 + $0x10] ss:$8 sps:$4 sm:$0xff]  }
0x1a87   : > { %11483 = vmatpush1.bf16.msra.mxu0 %v19105_v31  ;;  %v19110_v31 = vld [vmem:[%s24113_s1 + $0x14] ss:$8 sps:$4 sm:$0xff]  }
0x1a88   : > { %11484 = vmatprep.subr.bf16.mxu0 %v19113_v40  ;;  %v19114_v40 = vld [vmem:[%s24113_s1] ss:$8 sps:$4 sm:$0xff]  }
0x1a8b   : > { %11485 = vmatpush1.bf16.msra.mxu0 %v19111_v37  ;;  %v19116_v37 = vld [vmem:[%s24113_s1 + $0x4] ss:$8 sps:$4 sm:$0xff]  }
0x1a8c   : > { %11762 = vmatprep.subr.bf16.mxu0 %v19119_v46  ;;  %v19120_v46 = vld [vmem:[%s24113_s1 + $0x170] ss:$8 sps:$4 sm:$0xff]  }
0x1a8e   : > { %17000 = vmatmul.mubr.msk.bf16.vlgmr.msra.gmra.mxu0 %vm610_vm1, %v11403_v38  ;;  %v19134_v38 = vld [vmem:[%s24113_s1 + $0x154] ss:$8 sps:$4 sm:$0xff]  }
0x1a8f   : > { %11763 = vmatpush1.bf16.msra.mxu0 %v19117_v44  ;;  %11512 = vmatprep.mubr.bf16.mxu0 %v19506_v2  ;;  %v19122_v44 = vld [vmem:[%s24113_s1 + $0x174] ss:$8 sps:$4 sm:$0xff]  }
0x1a90   : > { %11764 = vmatprep.subr.bf16.mxu0 %v19125_v48  ;;  %v19132_v48 = vld [vmem:[%s24113_s1 + $0x150] ss:$8 sps:$4 sm:$0xff]  }
0x1a93   : > { %11765 = vmatpush1.bf16.msra.mxu0 %v19123_v49  ;;  %v19140_v49 = vld [vmem:[%s24113_s1 + $0x144] ss:$8 sps:$4 sm:$0xff]  }
0x1a94   : > { %11766 = vmatprep.subr.bf16.mxu0 %v19131_v61  ;;  %v19146_v61 = vld [vmem:[%s24113_s1 + $0x134] ss:$8 sps:$4 sm:$0xff]  }
0x1a96   : > { %17001 = vmatmul.mubr.msk.bf16.gmra.mxu0 %vm610_vm1, %v11402_v60  ;;  %v19126_v60 = vld [vmem:[%s24113_s1 + $0x160] ss:$8 sps:$4 sm:$0xff]  }
0x1a97   : > { %11767 = vmatpush1.bf16.msra.mxu0 %v19129_v50  ;;  %11790 = vmatprep.mubr.bf16.mxu0 %v19506_v2  ;;  %v19138_v50 = vld [vmem:[%s24113_s1 + $0x140] ss:$8 sps:$4 sm:$0xff]  }
0x1a98   : > { %11768 = vmatprep.subr.bf16.mxu0 %v19137_v62  ;;  %v11543_v62 = vrot.slane %v11137_v20, 1 }
0x1a9b   : > { %11769 = vmatpush1.bf16.msra.mxu0 %v19135_v63  ;;  %v11547_v63 = vrot.slane %v11144_v22, 2 }
0x1a9c   : > { %11770 = vmatprep.subr.bf16.mxu0 %v19143_v1  ;;  %v11544_v1 = vrot.slane %v11139_v18, 2 }
0x1a9e   : > { %v11545_v58 = vor.u32 %v11544_v1, %v11543_v62 }
0x1a9f   : > { %11771 = vmatpush1.bf16.msra.mxu0 %v19141_v0  ;;  %v11546_v0 = vrot.slane %v11148_v43, 1 }
0x1aa0   : > { %11772 = vmatprep.subr.bf16.mxu0 %v19149_v3  ;;  %v19150_v3 = vld [vmem:[%s24113_s1 + $0x120] ss:$8 sps:$4 sm:$0xff]  }
0x1aa3   : > { %11773 = vmatpush1.bf16.msra.mxu0 %v19147_v59  ;;  %v19152_v59 = vld [vmem:[%s24113_s1 + $0x124] ss:$8 sps:$4 sm:$0xff]  }
0x1aa4   : > { %17722 = vmatprep.subr.bf16.mxu0 %v19507_v8 }
0x1aa6   : > { %17052 = vmatmul.mubr.msk.bf16.vlgmr.msra.gmra.mxu0 %vm610_vm1, %v11691_v57 }
0x1aa7   : > { %11800 = vmatprep.mubr.bf16.mxu0 %v19506_v2 }
0x1aae   : > { %17053 = vmatmul.mubr.msk.bf16.gmra.mxu0 %vm610_vm1, %v11690_v4  ;;  %v11548_v4 = vor.u32 %v11547_v63, %v11546_v0 }
0x1aaf   : > { %17726 = vmatprep.mubr.msk.bf16.mxu0 %vm19508_vm7, %v19507_v8 }
0x1b36   : > { %v11041_v5 = vpop.f32.mrf.mxu0 }
0x1b38   : > { %v11043_v55 = vpop.f32.mrf.mxu0 }
0x1b39   : > { %v19155_v55 = vld [vmem:[%s24116_s4 + $0x28] sm:$0xff]  }
0x1b3a   : > { %v11044_v53 = vpop.f32.mrf.mxu0 }
0x1b3b   : > { %v11049_v6 = vpack.c.bf16 %v11044_v53, %v11041_v5  ;;  %v19154_v5 = vld [vmem:[%s24116_s4 + $0x30] sm:$0xff]   ;;  %v19156_v53 = vld [vmem:[%s24116_s4 + $0x20] sm:$0xff]  }
0x1b3c   : > { %v11046_v47 = vpop.f32.mrf.mxu0 }
0x1b3d   : > { %v11054_v10 = vsel %vm2233_vm12, %v11049_v6, 0  ;;  %v19157_v6 = vld [vmem:[%s24116_s4 + $0x18] sm:$0xff]   ;;  %v19159_v47 = vld [vmem:[%s24116_s4 + $0x8] sm:$0xff]  }
0x1b3e   : > { %17717 = vmatpush3.bf16.msra.mxu1 %v11054_v10  ;;  %v19160_v10 = vld [vmem:[%s24116_s4] sm:$0xff]  }
0x1b3f   : > { %11221 = vmatprep.subr.bf16.mxu1 %v19063_v9  ;;  %v19158_v9 = vld [vmem:[%s24116_s4 + $0x10] sm:$0xff]  }
0x1b41   : > { %17719 = vmatmul.mubr.msk.bf16.vlgmr.msra.gmra.mxu1 %vm24147_vm13, %v11048_v11  ;;  %vm24148_vm13 = vsmask.f32 7424  ;;  %v19161_v11 = vld [vmem:[%s24116_s4 + $0x50] ss:$0 sps:$4 sm:$0xff]  }
0x1b42   : > { %11222 = vmatpush1.bf16.msra.mxu1 %v19061_v51  ;;  %11249 = vmatprep.mubr.bf16.mxu1 %v19506_v2  ;;  %v11147_v28 = vsel %vm24148_vm13, %v11142_v25, %v11146_v26  ;;  %vm24149_vm13 = vsmask.f32 6400 }
0x1b43   : > { %11223 = vmatprep.subr.bf16.mxu1 %v19066_v13  ;;  %v11549_v57 = vsel %vm24149_vm13, %v11545_v58, %v11548_v4  ;;  %vm24150_vm13 = vcmask 1043456   ;;  %v19162_v13 = vld [vmem:[%s24116_s4 + $0x48] sm:$0xff]  }
0x1b44   : > { %v11942_v51 = vsel %vm24150_vm13, %v19161_v11, 0  ;;  %vm24152_vm13 = vsmask.f32 7424 }
0x1b46   : > { %11224 = vmatpush1.bf16.msra.mxu1 %v19064_v14  ;;  %v19163_v14 = vld [vmem:[%s24116_s4 + $0x40] sm:$0xff]  }
0x1b47   : > { %11225 = vmatprep.subr.bf16.mxu1 %v19069_v54 }
0x1b4a   : > { %11226 = vmatpush1.bf16.msra.mxu1 %v19067_v15 }
0x1b4b   : > { %11227 = vmatprep.subr.bf16.mxu1 %v19072_v16 }
0x1b4e   : > { %11228 = vmatpush1.bf16.msra.mxu1 %v19070_v17  ;;  %v11504_v21 = vpop.f32.mrf.mxu0 }
0x1b4f   : > { %11229 = vmatprep.subr.bf16.mxu1 %v19075_v56 }
0x1b52   : > { %11230 = vmatpush1.bf16.msra.mxu1 %v19073_v19 }
0x1b53   : > { %11231 = vmatprep.subr.bf16.mxu1 %v19078_v23  ;;  %v11506_v23 = vpop.f32.mrf.mxu0 }
0x1b55   : > { %v11508_v25 = vpop.f32.mrf.mxu0 }
0x1b56   : > { %11232 = vmatpush1.bf16.msra.mxu1 %v19076_v24 }
0x1b57   : > { %11338 = vmatprep.subr.bf16.mxu1 %v19086_v27  ;;  %v11510_v27 = vpop.f32.mrf.mxu0 }
0x1b59   : > { %16960 = vmatmul.mubr.msk.bf16.vlgmr.msra.gmra.mxu1 %vm610_vm1, %v11147_v28 }
0x1b5a   : > { %11339 = vmatpush1.bf16.msra.mxu1 %v19084_v30  ;;  %11259 = vmatprep.mubr.bf16.mxu1 %v19506_v2  ;;  %v11514_v30 = vpop.f32.mrf.mxu0 }
0x1b5b   : > { %11340 = vmatprep.subr.bf16.mxu1 %v19092_v42 }
0x1b5e   : > { %11341 = vmatpush1.bf16.msra.mxu1 %v19090_v36  ;;  %v11516_v36 = vpop.f32.mrf.mxu0 }
0x1b5f   : > { %11342 = vmatprep.subr.bf16.mxu1 %v19098_v33 }
0x1b61   : > { %16961 = vmatmul.mubr.msk.bf16.gmra.mxu1 %vm610_vm1, %v11150_v29 }
0x1b62   : > { %11343 = vmatpush1.bf16.msra.mxu1 %v19096_v39  ;;  %11366 = vmatprep.mubr.bf16.mxu1 %v19506_v2  ;;  %v11518_v39 = vpop.f32.mrf.mxu0 }
0x1b63   : > { %11344 = vmatprep.subr.bf16.mxu1 %v19104_v32 }
0x1b66   : > { %11345 = vmatpush1.bf16.msra.mxu1 %v19102_v35  ;;  %v11520_v35 = vpop.f32.mrf.mxu0 }
0x1b67   : > { %11346 = vmatprep.subr.bf16.mxu1 %v19110_v31 }
0x1b68   : > { %v11792_v31 = vpop.f32.mrf.mxu0 }
0x1b6a   : > { %11347 = vmatpush1.bf16.msra.mxu1 %v19108_v34 }
0x1b6b   : > { %11348 = vmatprep.subr.bf16.mxu1 %v19116_v37  ;;  %v11794_v37 = vpop.f32.mrf.mxu0 }
0x1b6e   : > { %11349 = vmatpush1.bf16.msra.mxu1 %v19114_v40 }
0x1b6f   : > { %11620 = vmatprep.subr.bf16.mxu1 %v19122_v44 }
0x1b71   : > { %16974 = vmatmul.mubr.msk.bf16.vlgmr.msra.gmra.mxu1 %vm610_vm1, %v22873_v52  ;;  %v19153_v52 = vld [vmem:[%s24116_s4 + $0x38] sm:$0xff]  }
0x1b72   : > { %11621 = vmatpush1.bf16.msra.mxu1 %v19120_v46  ;;  %11376 = vmatprep.mubr.bf16.mxu1 %v19506_v2  ;;  %v11796_v46 = vpop.f32.mrf.mxu0 }
0x1b73   : > { %11622 = vmatprep.subr.bf16.mxu1 %v19128_v41 }
0x1b76   : > { %11623 = vmatpush1.bf16.msra.mxu1 %v19126_v60 }
0x1b77   : > { %11624 = vmatprep.subr.bf16.mxu1 %v19134_v38 }
0x1b79   : > { %16975 = vmatmul.mubr.msk.bf16.gmra.mxu1 %vm610_vm1, %v22876_v45  ;;  %v19144_v45 = vld [vmem:[%s24113_s1 + $0x130] ss:$8 sps:$4 sm:$0xff]  }
0x1b7a   : > { %11625 = vmatpush1.bf16.msra.mxu1 %v19132_v48  ;;  %11648 = vmatprep.mubr.bf16.mxu1 %v19506_v2 }
0x1b7b   : > { %11626 = vmatprep.subr.bf16.mxu1 %v19140_v49 }
0x1b7e   : > { %11627 = vmatpush1.bf16.msra.mxu1 %v19138_v50  ;;  %v11798_v50 = vpop.f32.mrf.mxu0 }
0x1b7f   : > { %11628 = vmatprep.subr.bf16.mxu1 %v19146_v61 }
0x1b82   : > { %11629 = vmatpush1.bf16.msra.mxu1 %v19144_v45  ;;  %v11819_v45 = vld [vmem:[%s24114_s2] sm:$0x3] }
0x1b83   : > { %11630 = vmatprep.subr.bf16.mxu1 %v19152_v59 }
0x1b86   : > { %11631 = vmatpush1.bf16.msra.mxu1 %v19150_v3 }
0x1b87   : > { %11944 = vmatprep.subr.bf16.mxu1 %v19506_v2 }
0x1b89   : > { %17026 = vmatmul.mubr.msk.bf16.vlgmr.msra.gmra.mxu1 %vm610_vm1, %v11549_v57  ;;  %v11802_v57 = vpop.f32.mrf.mxu0 }
0x1b8a   : > { %11658 = vmatprep.mubr.bf16.mxu1 %v19506_v2  ;;  %11945 = vmatpush1.bf16.msra.mxu1 %v19153_v52 }
0x1b8b   : > { %11946 = vmatprep.subr.bf16.mxu1 %v19506_v2 }
0x1b8e   : > { %11947 = vmatpush1.bf16.msra.mxu1 %v19154_v5  ;;  %v11828_v5 = vrot.slane %v11819_v45, %v19870_v7 }
0x1b8f   : > { %11948 = vmatprep.subr.bf16.mxu1 %v19506_v2 }
0x1b91   : > { %17027 = vmatmul.mubr.msk.bf16.gmra.mxu1 %vm610_vm1, %v11548_v4 }
0x1b92   : > { %11949 = vmatpush1.bf16.msra.mxu1 %v19155_v55 }
0x1b93   : > { %11950 = vmatprep.subr.bf16.mxu1 %v19506_v2 }
0x1b96   : > { %11951 = vmatpush1.bf16.msra.mxu1 %v19156_v53 }
0x1b97   : > { %11952 = vmatprep.subr.bf16.mxu1 %v19506_v2 }
0x1b9a   : > { %11953 = vmatpush1.bf16.msra.mxu1 %v19157_v6 }
0x1b9b   : > { %11954 = vmatprep.subr.bf16.mxu1 %v19506_v2 }
0x1b9e   : > { %11955 = vmatpush1.bf16.msra.mxu1 %v19158_v9  ;;  %v11824_v9 = vrot.slane %v11819_v45, %v19875_v12 }
0x1b9f   : > { %11956 = vmatprep.subr.bf16.mxu1 %v19506_v2 }
0x1ba2   : > { %11957 = vmatpush1.bf16.msra.mxu1 %v19159_v47 }
0x1ba3   : > { %11958 = vmatprep.subr.bf16.mxu1 %v19506_v2 }
0x1ba6   : > { %11959 = vmatpush1.bf16.msra.mxu1 %v19160_v10 }
0x1ba7   : > { %11970 = vmatprep.subr.bf16.mxu1 %v19506_v2 }
0x1baa   : > { %11971 = vmatpush2.bf16.msra.mxu1 %v11942_v51 }
0x1bab   : > { %11972 = vmatprep.subr.bf16.mxu1 %v19506_v2 }
0x1bae   : > { %11973 = vmatpush2.bf16.msra.mxu1 %v19162_v13 }
0x1baf   : > { %11974 = vmatprep.subr.bf16.mxu1 %v19506_v2 }
0x1bb2   : > { %11975 = vmatpush2.bf16.msra.mxu1 %v19163_v14 }
0x1c01   : > { %v11090_v54 = vpop.f32.mrf.mxu1 }
0x1c02   : > { %11096 = vst.msk [vmem:[#allocation2 + $0x5] sm:$0x1] %vm2277_vm14, %v11090_v54 }
0x1c03   : > { %11097 = vst.msk [vmem:[#allocation2 + $0xc] sm:$0x2] %vm2280_vm15, %v11090_v54  ;;  %v17720_v15 = vpop.f32.mrf.mxu1 }
0x1c04   : > { %11098 = vst.msk [vmem:[#allocation2 + $0x13] sm:$0x4] %vm2283_vm3, %v11090_v54 }
0x1c05   : > { %11099 = vst.msk [vmem:[#allocation2 + $0x1a] sm:$0x8] %vm2286_vm0, %v11090_v54  ;;  %v11093_v16 = vpop.f32.mrf.mxu1 }
0x1c06   : > { %11100 = vst.msk [vmem:[#allocation2 + $0x21] sm:$0x10] %vm2289_vm5, %v11090_v54  ;;  %v11804_v54 = vpop.f32.mrf.mxu0 }
0x1c07   : > { %v17721_v17 = vpop.f32.mrf.mxu1 }
0x1c19   : > { %v11251_v18 = vpop.f32.mrf.mxu1 }
0x1c1b   : > { %v11253_v56 = vpop.f32.mrf.mxu1 }
0x1c1d   : > { %v11255_v19 = vpop.f32.mrf.mxu1 }
0x1c1f   : > { %v11257_v20 = vpop.f32.mrf.mxu1 }
0x1c21   : > { %v11261_v22 = vpop.f32.mrf.mxu1 }
0x1c23   : > { %v11263_v24 = vpop.f32.mrf.mxu1 }
0x1c25   : > { %v11265_v26 = vpop.f32.mrf.mxu1 }
0x1c27   : > { %v11267_v28 = vpop.f32.mrf.mxu1 }
0x1c31   : > { %v11368_v42 = vpop.f32.mrf.mxu1 }
0x1c32   : > { %v11369_v44 = vadd.f32 %v11368_v42, %v11251_v18 }
0x1c33   : > { %v11370_v43 = vpop.f32.mrf.mxu1 }
0x1c34   : > { %v11371_v41 = vadd.f32 %v11370_v43, %v11253_v56  ;;  %v11523_v48 = vadd.f32 %v11504_v21, %v11369_v44 }
0x1c35   : > { %v11372_v33 = vpop.f32.mrf.mxu1 }
0x1c36   : > { %v11373_v38 = vadd.f32 %v11372_v33, %v11255_v19  ;;  %v11524_v62 = vadd.f32 %v11506_v23, %v11371_v41 }
0x1c37   : > { %v11374_v29 = vpop.f32.mrf.mxu1 }
0x1c38   : > { %v11375_v61 = vadd.f32 %v11374_v29, %v11257_v20  ;;  %v11525_v59 = vadd.f32 %v11508_v25, %v11373_v38 }
0x1c39   : > { %v11378_v32 = vpop.f32.mrf.mxu1 }
0x1c3a   : > { %v11379_v3 = vadd.f32 %v11378_v32, %v11261_v22  ;;  %v11526_v53 = vadd.f32 %v11510_v27, %v11375_v61  ;;  %v11806_v27 = vpop.f32.mrf.mxu0 }
0x1c3b   : > { %v11380_v34 = vpop.f32.mrf.mxu1 }
0x1c3c   : > { %v11381_v58 = vadd.f32 %v11380_v34, %v11263_v24  ;;  %v11527_v51 = vadd.f32 %v11514_v30, %v11379_v3  ;;  %v19167_v3 = vld [vmem:[%s24117_s5 + $0x40] ss:$8 sps:$4 sm:$0xff]  }
0x1c3d   : > { %v11382_v40 = vpop.f32.mrf.mxu1 }
0x1c3e   : > { %v11383_v13 = vadd.f32 %v11382_v40, %v11265_v26  ;;  %v11528_v14 = vadd.f32 %v11516_v36, %v11381_v58  ;;  %v11808_v40 = vpop.f32.mrf.mxu0  ;;  %v19174_v58 = vld [vmem:[%s24117_s5 + $0x34] ss:$8 sps:$4 sm:$0xff]  }
0x1c3f   : > { %v11384_v60 = vpop.f32.mrf.mxu1 }
0x1c40   : > { %v11385_v16 = vadd.f32 %v11384_v60, %v11267_v28  ;;  %v11529_v24 = vadd.f32 %v11518_v39, %v11383_v13 }
0x1c42   : > { %v11530_v43 = vadd.f32 %v11520_v35, %v11385_v16 }
0x1c49   : > { %v11650_v49 = vpop.f32.mrf.mxu1 }
0x1c4a   : > { %v11669_v63 = vadd.f32 %v11650_v49, %v11523_v48 }
0x1c4b   : > { %v11652_v0 = vpop.f32.mrf.mxu1 }
0x1c4c   : > { %v11670_v1 = vadd.f32 %v11652_v0, %v11524_v62  ;;  %v11811_v6 = vadd.f32 %v11792_v31, %v11669_v63  ;;  %v12060_v63 = vld [vmem:[%s24117_s5 + $0x50] sm:$0x33] }
0x1c4d   : > { %v11654_v4 = vpop.f32.mrf.mxu1  ;;  %v17105_v0 = vcombine.high %v12060_v63, %v12060_v63  ;;  %v17104_v45 = vcombine.low %v12060_v63, %v12060_v63  ;;  %v19211_v63 = vld [vmem:[%s24117_s5 + $0xf4] ss:$8 sps:$4 sm:$0xff]  }
0x1c4e   : > { %v11812_v52 = vadd.f32 %v11794_v37, %v11670_v1  ;;  %v11671_v55 = vadd.f32 %v11654_v4, %v11525_v59  ;;  %v11831_v19 = vadd.f32 %v11824_v9, %v11811_v6  ;;  %v19169_v1 = vld [vmem:[%s24117_s5 + $0x44] ss:$8 sps:$4 sm:$0xff]   ;;  %v19172_v4 = vld [vmem:[%s24117_s5 + $0x30] ss:$8 sps:$4 sm:$0xff]  }
0x1c4f   : > { %v11656_v47 = vpop.f32.mrf.mxu1  ;;  %17106 = vmatprep.subr.msk.bf16.mxu1 %vm1549_vm8, %v17105_v0  ;;  %v12244_v59 = vsel %vm1549_vm8, %v17104_v45, 0  ;;  %v19206_v0 = vld [vmem:[%s24117_s5 + $0x138] ss:$8 sps:$4 sm:$0xff]   ;;  %v19214_v45 = vld [vmem:[%s24117_s5 + $0x12c] ss:$8 sps:$4 sm:$0xff]  }
0x1c50   : > { %v11813_v10 = vadd.f32 %v11796_v46, %v11671_v55  ;;  %v11672_v11 = vadd.f32 %v11656_v47, %v11526_v53  ;;  %v11832_v17 = vadd.f32 %v11828_v5, %v11812_v52  ;;  %v11839_v36 = vmax.f32 %v11831_v19, 0.0  ;;  %v19178_v52 = vld [vmem:[%s24117_s5 + $0x20] ss:$8 sps:$4 sm:$0xff]   ;;  %v19184_v55 = vld [vmem:[%s24117_s5 + $0x10] ss:$8 sps:$4 sm:$0xff]  }
0x1c51   : > { %v11660_v15 = vpop.f32.mrf.mxu1 }
0x1c52   : > { %v11833_v18 = vadd.f32 %v11824_v9, %v11813_v10  ;;  %v11814_v56 = vadd.f32 %v11798_v50, %v11672_v11  ;;  %v11673_v20 = vadd.f32 %v11660_v15, %v11527_v51  ;;  %v11840_v33 = vmax.f32 %v11832_v17, 0.0 }
0x1c53   : > { %v11662_v21 = vpop.f32.mrf.mxu1 }
0x1c54   : > { %v11834_v22 = vadd.f32 %v11828_v5, %v11814_v56  ;;  %v11674_v23 = vadd.f32 %v11662_v21, %v11528_v14  ;;  %v11841_v25 = vmax.f32 %v11833_v18, 0.0  ;;  %v11815_v29 = vadd.f32 %v11802_v57, %v11673_v20  ;;  %v19180_v57 = vld [vmem:[%s24117_s5 + $0x24] ss:$8 sps:$4 sm:$0xff]   ;;  %v19175_v21 = vld [vmem:[%s24117_s5 + $0x98] ss:$8 sps:$4 sm:$0xff]  }
0x1c55   : > { %v11664_v42 = vpop.f32.mrf.mxu1  ;;  %v19164_v56 = vld [vmem:[%s24115_s3] sm:$0x7f]  }
0x1c56   : > { %v11842_v30 = vmax.f32 %v11834_v22, 0.0  ;;  %v11816_v26 = vadd.f32 %v11804_v54, %v11674_v23  ;;  %v11675_v32 = vadd.f32 %v11664_v42, %v11529_v24  ;;  %v11847_v37 = vpack.c.bf16 %v11841_v25, %v11839_v36  ;;  %v17079_v54 = vld [vmem:[%s24117_s5 + $0xa8] sm:$0x33]  ;;  %v19177_v20 = vld [vmem:[%s24117_s5 + $0x9c] ss:$8 sps:$4 sm:$0xff]  }
0x1c57   : > { %v11666_v28 = vpop.f32.mrf.mxu1  ;;  %v11835_v39 = vadd.f32 %v11824_v9, %v11815_v29  ;;  %v17091_v16 = vcombine.high %v17079_v54, %v17079_v54  ;;  %v17090_v17 = vcombine.low %v17079_v54, %v17079_v54  ;;  %v19183_v22 = vld [vmem:[%s24117_s5 + $0x8c] ss:$8 sps:$4 sm:$0xff]   ;;  %v19181_v23 = vld [vmem:[%s24117_s5 + $0x88] ss:$8 sps:$4 sm:$0xff]   ;;  %v19189_v24 = vld [vmem:[%s24117_s5 + $0x7c] ss:$8 sps:$4 sm:$0xff]  }
0x1c58   : > { %v11848_v31 = vpack.c.bf16 %v11842_v30, %v11840_v33  ;;  %v11676_v34 = vadd.f32 %v11666_v28, %v11530_v43  ;;  %v11817_v44 = vadd.f32 %v11806_v27, %v11675_v32  ;;  %v11836_v46 = vadd.f32 %v11828_v5, %v11816_v26  ;;  %v19187_v25 = vld [vmem:[%s24117_s5 + $0x78] ss:$8 sps:$4 sm:$0xff]   ;;  %v19192_v27 = vld [vmem:[%s24117_s5 + $0x4] ss:$8 sps:$4 sm:$0xff]   ;;  %v19193_v33 = vld [vmem:[%s24117_s5 + $0x68] ss:$8 sps:$4 sm:$0xff]  }
0x1c59   : > { %v11843_v50 = vmax.f32 %v11835_v39, 0.0  ;;  %v12138_v19 = vsel %vm1549_vm8, %v17090_v17, 0  ;;  %v19190_v42 = vld [vmem:[%s24117_s5] ss:$8 sps:$4 sm:$0xff]   ;;  %v19195_v43 = vld [vmem:[%s24117_s5 + $0x6c] ss:$8 sps:$4 sm:$0xff]  }
0x1c5a   : > { %v11818_v41 = vadd.f32 %v11808_v40, %v11676_v34  ;;  %17065 = vmatprep.mubr.msk.bf16.mxu1 %vm1341_vm6, %v11848_v31  ;;  %v11837_v60 = vadd.f32 %v11824_v9, %v11817_v44  ;;  %v11844_v48 = vmax.f32 %v11836_v46, 0.0  ;;  %v17143_v30 = vld [vmem:[%s24117_s5 + $0x158] sm:$0x33]  ;;  %v17118_v32 = vld [vmem:[%s24117_s5 + $0x100] sm:$0x33] }
0x1c5b   : > { %11977 = vmatmul.mubr.bf16.vlgmr.msra.gmra.mxu1 %v11847_v37  ;;  %v17155_v26 = vcombine.high %v17143_v30, %v17143_v30  ;;  %v19200_v36 = vld [vmem:[%s24117_s5 + $0x5c] ss:$8 sps:$4 sm:$0xff]   ;;  %v19198_v29 = vld [vmem:[%s24117_s5 + $0x58] ss:$8 sps:$4 sm:$0xff]   ;;  %v17130_v28 = vcombine.high %v17118_v32, %v17118_v32  ;;  %v17154_v34 = vcombine.low %v17143_v30, %v17143_v30  ;;  %v19252_v30 = vld [vmem:[%s24120_s8 + $0x28] sm:$0xff]  }
0x1c5c   : > { %v11838_v35 = vadd.f32 %v11828_v5, %v11818_v41  ;;  %v11845_v38 = vmax.f32 %v11837_v60, 0.0  ;;  %12254 = vmatpush1.bf16.msra.mxu1 %v12244_v59  ;;  %v19186_v5 = vld [vmem:[%s24117_s5 + $0x14] ss:$8 sps:$4 sm:$0xff]   ;;  %v19217_v59 = vld [vmem:[%s24117_s5 + $0xe4] ss:$8 sps:$4 sm:$0xff]  }
0x1c5d   : > { %12255 = vmatprep.subr.bf16.mxu1 %v19169_v1  ;;  %v12489_v46 = vsel %vm1549_vm8, %v17154_v34, 0  ;;  %v19203_v41 = vld [vmem:[%s24117_s5 + $0x14c] ss:$8 sps:$4 sm:$0xff]   ;;  %v19209_v1 = vld [vmem:[%s24117_s5 + $0xf0] ss:$8 sps:$4 sm:$0xff]   ;;  %v19259_v34 = vld [vmem:[%s24120_s8 + $0x40] sm:$0xff]  }
0x1c5e   : > { %v11846_v49 = vmax.f32 %v11838_v35, 0.0  ;;  %v11849_v62 = vpack.c.bf16 %v11845_v38, %v11843_v50  ;;  %v17129_v35 = vcombine.low %v17118_v32, %v17118_v32  ;;  %v19201_v38 = vld [vmem:[%s24117_s5 + $0x148] ss:$8 sps:$4 sm:$0xff]   ;;  %v19208_v50 = vld [vmem:[%s24117_s5 + $0x13c] ss:$8 sps:$4 sm:$0xff]  }
0x1c5f   : > { %v19256_v32 = vld [vmem:[%s24120_s8 + $0x8] sm:$0xff]  }
0x1c60   : > { %v11850_v61 = vpack.c.bf16 %v11846_v49, %v11844_v48  ;;  %12256 = vmatpush1.bf16.msra.mxu1 %v19167_v3  ;;  %v19212_v3 = vld [vmem:[%s24117_s5 + $0x128] ss:$8 sps:$4 sm:$0xff]  }
0x1c61   : > { %12257 = vmatprep.subr.bf16.mxu1 %v19174_v58  ;;  %v19220_v58 = vld [vmem:[%s24117_s5 + $0x11c] ss:$8 sps:$4 sm:$0xff]  }
0x1c62   : > { %17066 = vmatprep.mubr.msk.bf16.mxu1 %vm1341_vm6, %v11850_v61 }
0x1c63   : > { %11985 = vmatmul.mubr.bf16.gmra.mxu1 %v11849_v62  ;;  %v12364_v62 = vsel %vm1549_vm8, %v17129_v35, 0 }
0x1c64   : > { %12281 = vmatprep.mubr.bf16.mxu1 %v19506_v2  ;;  %12258 = vmatpush1.bf16.msra.mxu1 %v19172_v4  ;;  %v19215_v4 = vld [vmem:[%s24117_s5 + $0xe0] ss:$8 sps:$4 sm:$0xff]  }
0x1c65   : > { %12259 = vmatprep.subr.bf16.mxu1 %v19180_v57  ;;  %v19223_v57 = vld [vmem:[%s24117_s5 + $0xd4] ss:$8 sps:$4 sm:$0xff]  }
0x1c68   : > { %12260 = vmatpush1.bf16.msra.mxu1 %v19178_v52  ;;  %v19218_v52 = vld [vmem:[%s24117_s5 + $0x118] ss:$8 sps:$4 sm:$0xff]  }
0x1c69   : > { %12261 = vmatprep.subr.bf16.mxu1 %v19186_v5  ;;  %v19226_v5 = vld [vmem:[%s24117_s5 + $0x10c] ss:$8 sps:$4 sm:$0xff]  }
0x1c6c   : > { %12262 = vmatpush1.bf16.msra.mxu1 %v19184_v55  ;;  %v19221_v55 = vld [vmem:[%s24117_s5 + $0xd0] ss:$8 sps:$4 sm:$0xff]  }
0x1c6d   : > { %12263 = vmatprep.subr.bf16.mxu1 %v19192_v27  ;;  %v19247_v27 = vld [vmem:[%s24117_s5 + $0x160] ss:$8 sps:$4 sm:$0xff]  }
0x1c70   : > { %12264 = vmatpush1.bf16.msra.mxu1 %v19190_v42 }
0x1c71   : > { %17156 = vmatprep.subr.msk.bf16.mxu1 %vm1549_vm8, %v17155_v26  ;;  %v19253_v26 = vld [vmem:[%s24120_s8 + $0x20] sm:$0xff]  }
0x1d1b   : > { %v11978_v53 = vpop.f32.mrf.mxu1 }
0x1d1d   : > { %v11980_v6 = vpop.f32.mrf.mxu1 }
0x1d1e   : > { %v19224_v6 = vld [vmem:[%s24117_s5 + $0x108] ss:$8 sps:$4 sm:$0xff]  }
0x1d1f   : > { %v11981_v9 = vpop.f32.mrf.mxu1 }
0x1d20   : > { %v11995_v18 = vpack.c.bf16 %v11981_v9, %v11978_v53  ;;  %v19229_v53 = vld [vmem:[%s24117_s5 + $0xc4] ss:$8 sps:$4 sm:$0xff]  }
0x1d21   : > { %v11983_v47 = vpop.f32.mrf.mxu1 }
0x1d23   : > { %v11986_v10 = vpop.f32.mrf.mxu1 }
0x1d25   : > { %v11988_v11 = vpop.f32.mrf.mxu1 }
0x1d26   : > { %v19232_v11 = vld [vmem:[%s24117_s5 + $0xb4] ss:$8 sps:$4 sm:$0xff]  }
0x1d27   : > { %v11989_v51 = vpop.f32.mrf.mxu1 }
0x1d28   : > { %v11996_v13 = vpack.c.bf16 %v11989_v51, %v11986_v10  ;;  %v19227_v10 = vld [vmem:[%s24117_s5 + $0xc0] ss:$8 sps:$4 sm:$0xff]   ;;  %v17168_v51 = vld [vmem:[%s24117_s5 + $0x1b0] sm:$0x33] }
0x1d29   : > { %v11991_v14 = vpop.f32.mrf.mxu1  ;;  %v17180_v54 = vcombine.high %v17168_v51, %v17168_v51 }
0x1d2a   : > { %v12006_v15 = vsel %vm1094_vm4, %v11996_v13, 0  ;;  %v19230_v14 = vld [vmem:[%s24117_s5 + $0xb0] ss:$8 sps:$4 sm:$0xff]  }
0x1d2b   : > { %17723 = vmatpush3.bf16.msra.mxu0 %v12006_v15  ;;  %v17179_v15 = vcombine.low %v17168_v51, %v17168_v51 }
0x1d2c   : > { %17724 = vmatprep.subr.bf16.mxu0 %v19507_v8 }
0x1d2d   : > { %v12612_v17 = vsel %vm1549_vm8, %v17179_v15, 0 }
0x1d2f   : > { %17725 = vmatpush3.bf16.msra.mxu0 %v11995_v18  ;;  %v19237_v18 = vld [vmem:[%s24117_s5 + $0x1a4] ss:$8 sps:$4 sm:$0xff]  }
0x1d30   : > { %17092 = vmatprep.subr.msk.bf16.mxu0 %vm1549_vm8, %v17091_v16 }
0x1d32   : > { %17727 = vmatmul.mubr.msk.bf16.vlgmr.msra.gmra.mxu0 %vm1410_vm9, %v19164_v56  ;;  %v19235_v56 = vld [vmem:[%s24117_s5 + $0x1a0] ss:$8 sps:$4 sm:$0xff]  }
0x1d33   : > { %12148 = vmatpush1.bf16.msra.mxu0 %v12138_v19  ;;  %12175 = vmatprep.mubr.bf16.mxu0 %v19506_v2  ;;  %v19240_v19 = vld [vmem:[%s24117_s5 + $0x194] ss:$8 sps:$4 sm:$0xff]  }
0x1d34   : > { %12149 = vmatprep.subr.bf16.mxu0 %v19177_v20  ;;  %v19238_v20 = vld [vmem:[%s24117_s5 + $0x190] ss:$8 sps:$4 sm:$0xff]  }
0x1d37   : > { %12150 = vmatpush1.bf16.msra.mxu0 %v19175_v21  ;;  %v19243_v21 = vld [vmem:[%s24117_s5 + $0x184] ss:$8 sps:$4 sm:$0xff]  }
0x1d38   : > { %12151 = vmatprep.subr.bf16.mxu0 %v19183_v22  ;;  %v19241_v22 = vld [vmem:[%s24117_s5 + $0x180] ss:$8 sps:$4 sm:$0xff]  }
0x1d3b   : > { %12152 = vmatpush1.bf16.msra.mxu0 %v19181_v23  ;;  %v19246_v23 = vld [vmem:[%s24117_s5 + $0x174] ss:$8 sps:$4 sm:$0xff]  }
0x1d3c   : > { %12153 = vmatprep.subr.bf16.mxu0 %v19189_v24  ;;  %v19244_v24 = vld [vmem:[%s24117_s5 + $0x170] ss:$8 sps:$4 sm:$0xff]  }
0x1d3f   : > { %12154 = vmatpush1.bf16.msra.mxu0 %v19187_v25  ;;  %v19249_v25 = vld [vmem:[%s24117_s5 + $0x164] ss:$8 sps:$4 sm:$0xff]  }
0x1d40   : > { %12155 = vmatprep.subr.bf16.mxu0 %v19195_v43  ;;  %v19250_v43 = vld [vmem:[%s24120_s8 + $0x38] sm:$0xff]  }
0x1d43   : > { %12156 = vmatpush1.bf16.msra.mxu0 %v19193_v33  ;;  %v19251_v33 = vld [vmem:[%s24120_s8 + $0x30] sm:$0xff]  }
0x1d44   : > { %12157 = vmatprep.subr.bf16.mxu0 %v19200_v36  ;;  %v19254_v36 = vld [vmem:[%s24120_s8 + $0x18] sm:$0xff]  }
0x1d47   : > { %12158 = vmatpush1.bf16.msra.mxu0 %v19198_v29  ;;  %v19255_v29 = vld [vmem:[%s24120_s8 + $0x10] sm:$0xff]  }
0x1d48   : > { %17131 = vmatprep.subr.msk.bf16.mxu0 %vm1549_vm8, %v17130_v28  ;;  %v19257_v28 = vld [vmem:[%s24120_s8] sm:$0xff]  }
0x1df2   : > { %v12042_v31 = vpop.f32.mrf.mxu0 }
0x1df4   : > { %v17728_v37 = vpop.f32.mrf.mxu0 }
0x1df6   : > { %v12045_v40 = vpop.f32.mrf.mxu0 }
0x1df7   : > { %v23210_v44 = vpack.c.bf16 %v12045_v40, %v12042_v31  ;;  %v19258_v31 = vld [vmem:[%s24120_s8 + $0x48] sm:$0xff]  }
0x1df8   : > { %v17729_v39 = vpop.f32.mrf.mxu0 }
0x1df9   : > { %v12075_v60 = vshll.u32 %v23210_v44, 16  ;;  %17107 = vmatmul.mubr.msk.bf16.vlgmr.msra.gmra.mxu1 %vm1545_vm10, %v23210_v44  ;;  %v12073_v48 = vshrl.u32 %v23210_v44, 16  ;;  %v12304_v16 = vrot.slane %v23210_v44, 1  ;;  %v12552_v42 = vrot.slane %v23210_v44, 2 }
0x1dfa   : > { %12499 = vmatpush1.bf16.msra.mxu1 %v12489_v46  ;;  %12526 = vmatprep.mubr.bf16.mxu1 %v19506_v2 }
0x1dfb   : > { %v12077_v49 = vrot.slane %v12075_v60, 1  ;;  %12500 = vmatprep.subr.bf16.mxu1 %v19203_v41  ;;  %v12427_v9 = vrot.slane %v12073_v48, 1  ;;  %v12428_v47 = vrot.slane %v12075_v60, 2 }
0x1dfd   : > { %v12078_v61 = vor.u32 %v12077_v49, %v12073_v48  ;;  %v12429_v13 = vor.u32 %v12428_v47, %v12427_v9 }
0x1dfe   : > { %12501 = vmatpush1.bf16.msra.mxu1 %v19201_v38 }
0x1dff   : > { %17093 = vmatmul.mubr.msk.bf16.vlgmr.msra.gmra.mxu0 %vm1545_vm10, %v12078_v61  ;;  %12502 = vmatprep.subr.bf16.mxu1 %v19208_v50 }
0x1e00   : > { %12374 = vmatpush1.bf16.msra.mxu0 %v12364_v62  ;;  %12401 = vmatprep.mubr.bf16.mxu0 %v19506_v2 }
0x1e01   : > { %12375 = vmatprep.subr.bf16.mxu0 %v19211_v63 }
0x1e02   : > { %12503 = vmatpush1.bf16.msra.mxu1 %v19206_v0 }
0x1e03   : > { %12504 = vmatprep.subr.bf16.mxu1 %v19214_v45 }
0x1e04   : > { %12376 = vmatpush1.bf16.msra.mxu0 %v19209_v1 }
0x1e05   : > { %12377 = vmatprep.subr.bf16.mxu0 %v19217_v59 }
0x1e06   : > { %12505 = vmatpush1.bf16.msra.mxu1 %v19212_v3 }
0x1e07   : > { %12506 = vmatprep.subr.bf16.mxu1 %v19220_v58 }
0x1e08   : > { %12378 = vmatpush1.bf16.msra.mxu0 %v19215_v4 }
0x1e09   : > { %12379 = vmatprep.subr.bf16.mxu0 %v19223_v57 }
0x1e0a   : > { %12507 = vmatpush1.bf16.msra.mxu1 %v19218_v52 }
0x1e0b   : > { %12508 = vmatprep.subr.bf16.mxu1 %v19226_v5  ;;  %v12664_v5 = vld [vmem:[%s24118_s6] sm:$0x3] }
0x1e0c   : > { %12380 = vmatpush1.bf16.msra.mxu0 %v19221_v55  ;;  %v12673_v47 = vrot.slane %v12664_v5, %v19870_v7 }
0x1e0d   : > { %12381 = vmatprep.subr.bf16.mxu0 %v19229_v53 }
0x1e0e   : > { %12509 = vmatpush1.bf16.msra.mxu1 %v19224_v6 }
0x1e0f   : > { %12769 = vmatprep.subr.bf16.mxu1 %v19506_v2 }
0x1e10   : > { %12382 = vmatpush1.bf16.msra.mxu0 %v19227_v10 }
0x1e11   : > { %17157 = vmatmul.mubr.msk.bf16.vlgmr.msra.gmra.mxu1 %vm1545_vm10, %v12429_v13  ;;  %12383 = vmatprep.subr.bf16.mxu0 %v19232_v11  ;;  %v12669_v13 = vrot.slane %v12664_v5, %v19875_v12 }
0x1e12   : > { %12770 = vmatpush1.bf16.msra.mxu1 %v19250_v43  ;;  %v19280_v43 = vld [vmem:[%s24113_s1 + $0x114] ss:$8 sps:$4 sm:$0xff]  }
0x1e13   : > { %12771 = vmatprep.subr.bf16.mxu1 %v19506_v2 }
0x1e14   : > { %12384 = vmatpush1.bf16.msra.mxu0 %v19230_v14 }
0x1e15   : > { %17181 = vmatprep.subr.msk.bf16.mxu0 %vm1549_vm8, %v17180_v54 }
0x1e16   : > { %12772 = vmatpush1.bf16.msra.mxu1 %v19251_v33  ;;  %v19288_v33 = vld [vmem:[%s24113_s1 + $0x104] ss:$8 sps:$4 sm:$0xff]  }
0x1e17   : > { %17132 = vmatmul.mubr.msk.bf16.vlgmr.msra.gmra.mxu0 %vm1545_vm10, %v12304_v16  ;;  %12773 = vmatprep.subr.bf16.mxu1 %v19506_v2 }
0x1e18   : > { %12622 = vmatpush1.bf16.msra.mxu0 %v12612_v17  ;;  %12649 = vmatprep.mubr.bf16.mxu0 %v19506_v2 }
0x1e19   : > { %12623 = vmatprep.subr.bf16.mxu0 %v19237_v18 }
0x1e1a   : > { %12774 = vmatpush1.bf16.msra.mxu1 %v19252_v30  ;;  %v19286_v30 = vld [vmem:[%s24113_s1 + $0x100] ss:$8 sps:$4 sm:$0xff]  }
0x1e1b   : > { %12775 = vmatprep.subr.bf16.mxu1 %v19506_v2 }
0x1e1c   : > { %12624 = vmatpush1.bf16.msra.mxu0 %v19235_v56 }
0x1e1d   : > { %12625 = vmatprep.subr.bf16.mxu0 %v19240_v19 }
0x1e1e   : > { %12776 = vmatpush1.bf16.msra.mxu1 %v19253_v26  ;;  %v19292_v26 = vld [vmem:[%s24113_s1 + $0xf0] ss:$8 sps:$4 sm:$0xff]  }
0x1e1f   : > { %12777 = vmatprep.subr.bf16.mxu1 %v19506_v2 }
0x1e20   : > { %12626 = vmatpush1.bf16.msra.mxu0 %v19238_v20 }
0x1e21   : > { %12627 = vmatprep.subr.bf16.mxu0 %v19243_v21 }
0x1e22   : > { %12778 = vmatpush1.bf16.msra.mxu1 %v19254_v36  ;;  %v19294_v36 = vld [vmem:[%s24113_s1 + $0xf4] ss:$8 sps:$4 sm:$0xff]  }
0x1e23   : > { %12779 = vmatprep.subr.bf16.mxu1 %v19506_v2 }
0x1e24   : > { %12628 = vmatpush1.bf16.msra.mxu0 %v19241_v22 }
0x1e25   : > { %12629 = vmatprep.subr.bf16.mxu0 %v19246_v23 }
0x1e26   : > { %12780 = vmatpush1.bf16.msra.mxu1 %v19255_v29  ;;  %v19298_v29 = vld [vmem:[%s24113_s1 + $0xe0] ss:$8 sps:$4 sm:$0xff]  }
0x1e27   : > { %12781 = vmatprep.subr.bf16.mxu1 %v19506_v2 }
0x1e28   : > { %12630 = vmatpush1.bf16.msra.mxu0 %v19244_v24 }
0x1e29   : > { %12631 = vmatprep.subr.bf16.mxu0 %v19249_v25 }
0x1e2a   : > { %12782 = vmatpush1.bf16.msra.mxu1 %v19256_v32  ;;  %v19300_v32 = vld [vmem:[%s24113_s1 + $0xe4] ss:$8 sps:$4 sm:$0xff]  }
0x1e2b   : > { %12783 = vmatprep.subr.bf16.mxu1 %v19506_v2 }
0x1e2c   : > { %12632 = vmatpush1.bf16.msra.mxu0 %v19247_v27 }
0x1e2d   : > { %17730 = vmatprep.subr.bf16.mxu0 %v19507_v8 }
0x1e2e   : > { %12784 = vmatpush1.bf16.msra.mxu1 %v19257_v28  ;;  %v19304_v28 = vld [vmem:[%s24113_s1 + $0xd0] ss:$8 sps:$4 sm:$0xff]  }
0x1e2f   : > { %17182 = vmatmul.mubr.msk.bf16.vlgmr.msra.gmra.mxu0 %vm1545_vm10, %v12552_v42  ;;  %12797 = vmatprep.subr.bf16.mxu1 %v19506_v2  ;;  %v19278_v42 = vld [vmem:[%s24113_s1 + $0x110] ss:$8 sps:$4 sm:$0xff]  }
0x1e30   : > { %17732 = vmatprep.mubr.msk.bf16.mxu0 %vm19508_vm7, %v19507_v8 }
0x1e32   : > { %12798 = vmatpush2.bf16.msra.mxu1 %v19258_v31  ;;  %v19306_v31 = vld [vmem:[%s24113_s1 + $0xd4] ss:$8 sps:$4 sm:$0xff]  }
0x1e33   : > { %12799 = vmatprep.subr.bf16.mxu1 %v19506_v2 }
0x1e36   : > { %12800 = vmatpush2.bf16.msra.mxu1 %v19259_v34  ;;  %v19310_v34 = vld [vmem:[%s24113_s1 + $0xc0] ss:$8 sps:$4 sm:$0xff]  }
0x1e37   : > { %13236 = vmatprep.subr.bf16.mxu1 %v19280_v43 }
0x1eb9   : > { %v12283_v44 = vpop.f32.mrf.mxu1 }
0x1ebb   : > { %v12285_v41 = vpop.f32.mrf.mxu1 }
0x1ebd   : > { %v12287_v60 = vpop.f32.mrf.mxu1 }
0x1ebf   : > { %v12177_v37 = vpop.f32.mrf.mxu0  ;;  %v12289_v38 = vpop.f32.mrf.mxu1 }
0x1ec0   : > { %v12284_v62 = vadd.f32 %v12283_v44, %v12177_v37  ;;  %v19312_v37 = vld [vmem:[%s24113_s1 + $0xc4] ss:$8 sps:$4 sm:$0xff]   ;;  %v23412_v44 = vld [vmem:[%s19662_s25 + $0x78] sm:$0xff]  }
0x1ec1   : > { %v12179_v40 = vpop.f32.mrf.mxu0  ;;  %v12910_v43 = vshrl.u32 %v23412_v44, 16 }
0x1ec2   : > { %v12286_v61 = vadd.f32 %v12285_v41, %v12179_v40  ;;  %v23409_v40 = vld [vmem:[%s19662_s25 + $0x70] sm:$0xff]  }
0x1ec3   : > { %v12181_v46 = vpop.f32.mrf.mxu0  ;;  %v19318_v41 = vld [vmem:[%s24113_s1 + $0x1d4] ss:$8 sps:$4 sm:$0xff]  }
0x1ec4   : > { %v12288_v0 = vadd.f32 %v12287_v60, %v12181_v46  ;;  %v19316_v46 = vld [vmem:[%s24113_s1 + $0x1d0] ss:$8 sps:$4 sm:$0xff]   ;;  %v13164_v60 = vrot.slane %v23412_v44, 1 }
0x1ec5   : > { %v12183_v39 = vpop.f32.mrf.mxu0 }
0x1ec6   : > { %v12290_v3 = vadd.f32 %v12289_v38, %v12183_v39  ;;  %v13163_v39 = vrot.slane %v23409_v40, 1  ;;  %v19324_v38 = vld [vmem:[%s24113_s1 + $0x1c4] ss:$8 sps:$4 sm:$0xff]  }
0x1ed1   : > { %v12528_v49 = vpop.f32.mrf.mxu1 }
0x1ed3   : > { %v12530_v63 = vpop.f32.mrf.mxu1 }
0x1ed5   : > { %v12532_v4 = vpop.f32.mrf.mxu1 }
0x1ed7   : > { %v12403_v35 = vpop.f32.mrf.mxu0  ;;  %v12534_v11 = vpop.f32.mrf.mxu1 }
0x1ed8   : > { %v12412_v1 = vadd.f32 %v12403_v35, %v12284_v62  ;;  %v13165_v35 = vsel %vm802_vm2, %v13163_v39, %v13164_v60  ;;  %v19334_v62 = vld [vmem:[%s24113_s1 + $0x1a0] ss:$8 sps:$4 sm:$0xff]   ;;  %vm24151_vm2 = vcmask 80896   ;;  %v19327_v39 = vld [vmem:[%s24113_s1 + $0x164] ss:$8 sps:$4 sm:$0xff]  }
0x1ed9   : > { %v12405_v48 = vpop.f32.mrf.mxu0 }
0x1eda   : > { %v12413_v45 = vadd.f32 %v12405_v48, %v12286_v61  ;;  %v12537_v53 = vadd.f32 %v12528_v49, %v12412_v1  ;;  %v19322_v48 = vld [vmem:[%s24113_s1 + $0x1c0] ss:$8 sps:$4 sm:$0xff]   ;;  %v19328_v49 = vld [vmem:[%s24113_s1 + $0x1b0] ss:$8 sps:$4 sm:$0xff]   ;;  %v19336_v61 = vld [vmem:[%s24113_s1 + $0x1a4] ss:$8 sps:$4 sm:$0xff]  }
0x1edb   : > { %v12407_v50 = vpop.f32.mrf.mxu0  ;;  %v19348_v1 = vld [vmem:[%s24113_s1 + $0x184] ss:$8 sps:$4 sm:$0xff]  }
0x1edc   : > { %v12414_v58 = vadd.f32 %v12407_v50, %v12288_v0  ;;  %v12538_v55 = vadd.f32 %v12530_v63, %v12413_v45  ;;  %v19330_v50 = vld [vmem:[%s24113_s1 + $0x1b4] ss:$8 sps:$4 sm:$0xff]   ;;  %v19340_v63 = vld [vmem:[%s24113_s1 + $0x190] ss:$8 sps:$4 sm:$0xff]   ;;  %v19346_v45 = vld [vmem:[%s24113_s1 + $0x180] ss:$8 sps:$4 sm:$0xff]  }
0x1edd   : > { %v12409_v59 = vpop.f32.mrf.mxu0  ;;  %v19342_v0 = vld [vmem:[%s24113_s1 + $0x194] ss:$8 sps:$4 sm:$0xff]  }
0x1ede   : > { %v12415_v52 = vadd.f32 %v12409_v59, %v12290_v3  ;;  %v12539_v10 = vadd.f32 %v12532_v4, %v12414_v58  ;;  %v13451_v59 = vrot.slane %v23409_v40, 2  ;;  %v13452_v3 = vrot.slane %v23412_v44, 2 }
0x1ee0   : > { %v12540_v15 = vadd.f32 %v12534_v11, %v12415_v52  ;;  %v13453_v58 = vsel %vm1094_vm4, %v13451_v59, %v13452_v3  ;;  %v19263_v11 = vld [vmem:[%s24113_s1 + $0xa0] ss:$8 sps:$4 sm:$0xff]  }
0x1eef   : > { %v12651_v57 = vpop.f32.mrf.mxu0 }
0x1ef0   : > { %v12660_v51 = vadd.f32 %v12651_v57, %v12537_v53 }
0x1ef1   : > { %v12653_v6 = vpop.f32.mrf.mxu0 }
0x1ef2   : > { %v12661_v9 = vadd.f32 %v12653_v6, %v12538_v55  ;;  %v12676_v19 = vadd.f32 %v12669_v13, %v12660_v51  ;;  %v19262_v55 = vld [vmem:[%s24113_s1 + $0xb4] ss:$8 sps:$4 sm:$0xff]  }
0x1ef3   : > { %v12655_v14 = vpop.f32.mrf.mxu0  ;;  %v19268_v51 = vld [vmem:[%s24113_s1 + $0x94] ss:$8 sps:$4 sm:$0xff]  }
0x1ef4   : > { %v12662_v54 = vadd.f32 %v12655_v14, %v12539_v10  ;;  %v12677_v17 = vadd.f32 %v12673_v47, %v12661_v9  ;;  %v12680_v24 = vmax.f32 %v12676_v19, 0.0  ;;  %v12810_v9 = vld [vmem:[%s24119_s7] sm:$0x7]  ;;  %v19265_v10 = vld [vmem:[%s24113_s1 + $0xa4] ss:$8 sps:$4 sm:$0xff]   ;;  %v12906_v19 = vshll.u32 %v23412_v44, 16 }
0x1ef5   : > { %v12657_v16 = vpop.f32.mrf.mxu0  ;;  %v19271_v14 = vld [vmem:[%s24113_s1 + $0x84] ss:$8 sps:$4 sm:$0xff]  }
0x1ef6   : > { %v12678_v18 = vadd.f32 %v12669_v13, %v12662_v54  ;;  %v12663_v56 = vadd.f32 %v12657_v16, %v12540_v15  ;;  %v12681_v22 = vmax.f32 %v12677_v17, 0.0  ;;  %v19266_v13 = vld [vmem:[%s24113_s1 + $0x90] ss:$8 sps:$4 sm:$0xff]   ;;  %v19269_v54 = vld [vmem:[%s24113_s1 + $0x80] ss:$8 sps:$4 sm:$0xff]   ;;  %v12901_v15 = vshll.u32 %v23409_v40, 16 }
0x1ef7   : > { %v19274_v16 = vld [vmem:[%s24113_s1 + $0x74] ss:$8 sps:$4 sm:$0xff]   ;;  %v19272_v17 = vld [vmem:[%s24113_s1 + $0x70] ss:$8 sps:$4 sm:$0xff]  }
0x1ef8   : > { %v12679_v20 = vadd.f32 %v12673_v47, %v12663_v56  ;;  %v12682_v21 = vmax.f32 %v12678_v18, 0.0  ;;  %v19260_v47 = vld [vmem:[%s24113_s1 + $0xb0] ss:$8 sps:$4 sm:$0xff]   ;;  %v12899_v18 = vshrl.u32 %v23409_v40, 16  ;;  %v12903_v56 = vrot.slane %v12901_v15, 1 }
0x1efa   : > { %v12683_v23 = vmax.f32 %v12679_v20, 0.0  ;;  %v12684_v27 = vpack.c.bf16 %v12682_v21, %v12680_v24  ;;  %v19277_v20 = vld [vmem:[%s24113_s1 + $0x64] ss:$8 sps:$4 sm:$0xff]   ;;  %v19275_v21 = vld [vmem:[%s24113_s1 + $0x60] ss:$8 sps:$4 sm:$0xff]  }
0x1efb   : > { %v19285_v24 = vld [vmem:[%s24113_s1 + $0x54] ss:$8 sps:$4 sm:$0xff]  }
0x1efc   : > { %v12685_v25 = vpack.c.bf16 %v12683_v23, %v12681_v22  ;;  %v12904_v22 = vor.u32 %v12903_v56, %v12899_v18  ;;  %v12908_v23 = vrot.slane %v12906_v19, 1 }
0x1efe   : > { %17193 = vmatprep.mubr.msk.bf16.mxu1 %vm2182_vm11, %v12685_v25  ;;  %v12909_v25 = vsel %vm24152_vm13, %v12904_v22, %v12908_v23 }
0x1eff   : > { %12802 = vmatmul.mubr.bf16.vlgmr.msra.gmra.mxu1 %v12684_v27  ;;  %v19283_v27 = vld [vmem:[%s24113_s1 + $0x50] ss:$8 sps:$4 sm:$0xff]  }
0x1f00   : > { %13264 = vmatprep.mubr.bf16.mxu1 %v19506_v2  ;;  %13237 = vmatpush1.bf16.msra.mxu1 %v19278_v42  ;;  %v19291_v42 = vld [vmem:[%s24113_s1 + $0x44] ss:$8 sps:$4 sm:$0xff]  }
0x1f01   : > { %13238 = vmatprep.subr.bf16.mxu1 %v19288_v33  ;;  %v19289_v33 = vld [vmem:[%s24113_s1 + $0x40] ss:$8 sps:$4 sm:$0xff]  }
0x1f04   : > { %13239 = vmatpush1.bf16.msra.mxu1 %v19286_v30  ;;  %v19297_v30 = vld [vmem:[%s24113_s1 + $0x34] ss:$8 sps:$4 sm:$0xff]  }
0x1f05   : > { %13240 = vmatprep.subr.bf16.mxu1 %v19294_v36  ;;  %v19295_v36 = vld [vmem:[%s24113_s1 + $0x30] ss:$8 sps:$4 sm:$0xff]  }
0x1f08   : > { %13241 = vmatpush1.bf16.msra.mxu1 %v19292_v26  ;;  %v12912_v26 = vor.u32 %v12910_v43, %v12908_v23 }
0x1f09   : > { %13242 = vmatprep.subr.bf16.mxu1 %v19300_v32  ;;  %v19301_v32 = vld [vmem:[%s24113_s1 + $0x20] ss:$8 sps:$4 sm:$0xff]  }
0x1f0c   : > { %13243 = vmatpush1.bf16.msra.mxu1 %v19298_v29  ;;  %v19303_v29 = vld [vmem:[%s24113_s1 + $0x24] ss:$8 sps:$4 sm:$0xff]  }
0x1f0d   : > { %13244 = vmatprep.subr.bf16.mxu1 %v19306_v31  ;;  %v19307_v31 = vld [vmem:[%s24113_s1 + $0x10] ss:$8 sps:$4 sm:$0xff]  }
0x1f10   : > { %13245 = vmatpush1.bf16.msra.mxu1 %v19304_v28  ;;  %v19309_v28 = vld [vmem:[%s24113_s1 + $0x14] ss:$8 sps:$4 sm:$0xff]  }
0x1f11   : > { %13246 = vmatprep.subr.bf16.mxu1 %v19312_v37  ;;  %v19313_v37 = vld [vmem:[%s24113_s1] ss:$8 sps:$4 sm:$0xff]  }
0x1f14   : > { %13247 = vmatpush1.bf16.msra.mxu1 %v19310_v34  ;;  %v19315_v34 = vld [vmem:[%s24113_s1 + $0x4] ss:$8 sps:$4 sm:$0xff]  }
0x1f15   : > { %13524 = vmatprep.subr.bf16.mxu1 %v19318_v41  ;;  %v19319_v41 = vld [vmem:[%s24113_s1 + $0x170] ss:$8 sps:$4 sm:$0xff]  }
0x1f17   : > { %17265 = vmatmul.mubr.msk.bf16.vlgmr.msra.gmra.mxu1 %vm610_vm1, %v13165_v35  ;;  %v19333_v35 = vld [vmem:[%s24113_s1 + $0x154] ss:$8 sps:$4 sm:$0xff]  }
0x1f18   : > { %13525 = vmatpush1.bf16.msra.mxu1 %v19316_v46  ;;  %13274 = vmatprep.mubr.bf16.mxu1 %v19506_v2  ;;  %v19321_v46 = vld [vmem:[%s24113_s1 + $0x174] ss:$8 sps:$4 sm:$0xff]  }
0x1f19   : > { %13526 = vmatprep.subr.bf16.mxu1 %v19324_v38  ;;  %v19331_v38 = vld [vmem:[%s24113_s1 + $0x150] ss:$8 sps:$4 sm:$0xff]  }
0x1f1c   : > { %13527 = vmatpush1.bf16.msra.mxu1 %v19322_v48  ;;  %v19339_v48 = vld [vmem:[%s24113_s1 + $0x144] ss:$8 sps:$4 sm:$0xff]  }
0x1f1d   : > { %13528 = vmatprep.subr.bf16.mxu1 %v19330_v50  ;;  %v19345_v50 = vld [vmem:[%s24113_s1 + $0x134] ss:$8 sps:$4 sm:$0xff]  }
0x1f1f   : > { %17266 = vmatmul.mubr.msk.bf16.gmra.mxu1 %vm610_vm1, %v13164_v60  ;;  %v19325_v60 = vld [vmem:[%s24113_s1 + $0x160] ss:$8 sps:$4 sm:$0xff]  }
0x1f20   : > { %13529 = vmatpush1.bf16.msra.mxu1 %v19328_v49  ;;  %13552 = vmatprep.mubr.bf16.mxu1 %v19506_v2  ;;  %v19337_v49 = vld [vmem:[%s24113_s1 + $0x140] ss:$8 sps:$4 sm:$0xff]  }
0x1f21   : > { %13530 = vmatprep.subr.bf16.mxu1 %v19336_v61  ;;  %v13305_v61 = vrot.slane %v12899_v18, 1 }
0x1f24   : > { %13531 = vmatpush1.bf16.msra.mxu1 %v19334_v62  ;;  %v13309_v62 = vrot.slane %v12906_v19, 2 }
0x1f25   : > { %13532 = vmatprep.subr.bf16.mxu1 %v19342_v0  ;;  %v13306_v0 = vrot.slane %v12901_v15, 2 }
0x1f27   : > { %v13307_v59 = vor.u32 %v13306_v0, %v13305_v61 }
0x1f28   : > { %13533 = vmatpush1.bf16.msra.mxu1 %v19340_v63  ;;  %v13308_v63 = vrot.slane %v12910_v43, 1 }
0x1f29   : > { %13534 = vmatprep.subr.bf16.mxu1 %v19348_v1  ;;  %v19349_v1 = vld [vmem:[%s24113_s1 + $0x120] ss:$8 sps:$4 sm:$0xff]  }
0x1f2c   : > { %13535 = vmatpush1.bf16.msra.mxu1 %v19346_v45  ;;  %v19351_v45 = vld [vmem:[%s24113_s1 + $0x124] ss:$8 sps:$4 sm:$0xff]  }
0x1f2d   : > { %17736 = vmatprep.subr.bf16.mxu1 %v19507_v8 }
0x1f2f   : > { %17317 = vmatmul.mubr.msk.bf16.vlgmr.msra.gmra.mxu1 %vm610_vm1, %v13453_v58 }
0x1f30   : > { %13562 = vmatprep.mubr.bf16.mxu1 %v19506_v2 }
0x1f37   : > { %17318 = vmatmul.mubr.msk.bf16.gmra.mxu1 %vm610_vm1, %v13452_v3  ;;  %v13310_v3 = vor.u32 %v13309_v62, %v13308_v63 }
0x1f38   : > { %17740 = vmatprep.mubr.msk.bf16.mxu1 %vm19508_vm7, %v19507_v8 }
0x1fbf   : > { %v12803_v4 = vpop.f32.mrf.mxu1 }
0x1fc1   : > { %v12805_v57 = vpop.f32.mrf.mxu1 }
0x1fc2   : > { %v19354_v57 = vld [vmem:[%s24116_s4 + $0x28] sm:$0xff]  }
0x1fc3   : > { %v12806_v52 = vpop.f32.mrf.mxu1 }
0x1fc4   : > { %v12811_v5 = vpack.c.bf16 %v12806_v52, %v12803_v4  ;;  %v19353_v4 = vld [vmem:[%s24116_s4 + $0x30] sm:$0xff]   ;;  %v19355_v52 = vld [vmem:[%s24116_s4 + $0x20] sm:$0xff]  }
0x1fc5   : > { %v12808_v53 = vpop.f32.mrf.mxu1 }
0x1fc6   : > { %v12816_v6 = vsel %vm2233_vm12, %v12811_v5, 0  ;;  %v19356_v5 = vld [vmem:[%s24116_s4 + $0x18] sm:$0xff]   ;;  %v19358_v53 = vld [vmem:[%s24116_s4 + $0x8] sm:$0xff]  }
0x1fc7   : > { %17731 = vmatpush3.bf16.msra.mxu0 %v12816_v6  ;;  %v19359_v6 = vld [vmem:[%s24116_s4] sm:$0xff]  }
0x1fc8   : > { %12983 = vmatprep.subr.bf16.mxu0 %v19262_v55  ;;  %v19357_v55 = vld [vmem:[%s24116_s4 + $0x10] sm:$0xff]  }
0x1fca   : > { %17733 = vmatmul.mubr.msk.bf16.vlgmr.msra.gmra.mxu0 %vm24151_vm2, %v12810_v9  ;;  %vm24153_vm2 = vsmask.f32 6400  ;;  %v19360_v9 = vld [vmem:[%s24116_s4 + $0x50] ss:$0 sps:$4 sm:$0xff]  }
0x1fcb   : > { %12984 = vmatpush1.bf16.msra.mxu0 %v19260_v47  ;;  %13011 = vmatprep.mubr.bf16.mxu0 %v19506_v2  ;;  %v13311_v58 = vsel %vm24153_vm2, %v13307_v59, %v13310_v3 }
0x1fcc   : > { %12985 = vmatprep.subr.bf16.mxu0 %v19265_v10  ;;  %v19361_v10 = vld [vmem:[%s24116_s4 + $0x48] sm:$0xff]  }
0x1fcf   : > { %12986 = vmatpush1.bf16.msra.mxu0 %v19263_v11  ;;  %v19362_v11 = vld [vmem:[%s24116_s4 + $0x40] sm:$0xff]  }
0x1fd0   : > { %12987 = vmatprep.subr.bf16.mxu0 %v19268_v51 }
0x1fd3   : > { %12988 = vmatpush1.bf16.msra.mxu0 %v19266_v13 }
0x1fd4   : > { %12989 = vmatprep.subr.bf16.mxu0 %v19271_v14 }
0x1fd7   : > { %12990 = vmatpush1.bf16.msra.mxu0 %v19269_v54  ;;  %v13266_v56 = vpop.f32.mrf.mxu1 }
0x1fd8   : > { %12991 = vmatprep.subr.bf16.mxu0 %v19274_v16 }
0x1fdb   : > { %12992 = vmatpush1.bf16.msra.mxu0 %v19272_v17 }
0x1fdc   : > { %12993 = vmatprep.subr.bf16.mxu0 %v19277_v20  ;;  %v13268_v20 = vpop.f32.mrf.mxu1 }
0x1fde   : > { %v13270_v22 = vpop.f32.mrf.mxu1 }
0x1fdf   : > { %12994 = vmatpush1.bf16.msra.mxu0 %v19275_v21 }
0x1fe0   : > { %13100 = vmatprep.subr.bf16.mxu0 %v19285_v24  ;;  %v13272_v24 = vpop.f32.mrf.mxu1 }
0x1fe2   : > { %17225 = vmatmul.mubr.msk.bf16.vlgmr.msra.gmra.mxu0 %vm610_vm1, %v12909_v25 }
0x1fe3   : > { %13101 = vmatpush1.bf16.msra.mxu0 %v19283_v27  ;;  %13021 = vmatprep.mubr.bf16.mxu0 %v19506_v2  ;;  %v13276_v27 = vpop.f32.mrf.mxu1 }
0x1fe4   : > { %13102 = vmatprep.subr.bf16.mxu0 %v19291_v42 }
0x1fe7   : > { %13103 = vmatpush1.bf16.msra.mxu0 %v19289_v33  ;;  %v13278_v33 = vpop.f32.mrf.mxu1 }
0x1fe8   : > { %13104 = vmatprep.subr.bf16.mxu0 %v19297_v30 }
0x1fea   : > { %17226 = vmatmul.mubr.msk.bf16.gmra.mxu0 %vm610_vm1, %v12912_v26 }
0x1feb   : > { %13105 = vmatpush1.bf16.msra.mxu0 %v19295_v36  ;;  %13128 = vmatprep.mubr.bf16.mxu0 %v19506_v2  ;;  %v13280_v36 = vpop.f32.mrf.mxu1 }
0x1fec   : > { %13106 = vmatprep.subr.bf16.mxu0 %v19303_v29 }
0x1fef   : > { %13107 = vmatpush1.bf16.msra.mxu0 %v19301_v32  ;;  %v13282_v32 = vpop.f32.mrf.mxu1 }
0x1ff0   : > { %13108 = vmatprep.subr.bf16.mxu0 %v19309_v28 }
0x1ff1   : > { %v13554_v28 = vpop.f32.mrf.mxu1 }
0x1ff3   : > { %13109 = vmatpush1.bf16.msra.mxu0 %v19307_v31 }
0x1ff4   : > { %13110 = vmatprep.subr.bf16.mxu0 %v19315_v34  ;;  %v13556_v34 = vpop.f32.mrf.mxu1 }
0x1ff7   : > { %13111 = vmatpush1.bf16.msra.mxu0 %v19313_v37 }
0x1ff8   : > { %13382 = vmatprep.subr.bf16.mxu0 %v19321_v46 }
0x1ffa   : > { %17239 = vmatmul.mubr.msk.bf16.vlgmr.msra.gmra.mxu0 %vm610_vm1, %v23409_v40  ;;  %v19352_v40 = vld [vmem:[%s24116_s4 + $0x38] sm:$0xff]  }
0x1ffb   : > { %13383 = vmatpush1.bf16.msra.mxu0 %v19319_v41  ;;  %13138 = vmatprep.mubr.bf16.mxu0 %v19506_v2  ;;  %v13558_v41 = vpop.f32.mrf.mxu1 }
0x1ffc   : > { %13384 = vmatprep.subr.bf16.mxu0 %v19327_v39 }
0x1fff   : > { %13385 = vmatpush1.bf16.msra.mxu0 %v19325_v60 }
0x2000   : > { %13386 = vmatprep.subr.bf16.mxu0 %v19333_v35 }
0x2002   : > { %17240 = vmatmul.mubr.msk.bf16.gmra.mxu0 %vm610_vm1, %v23412_v44  ;;  %v19343_v44 = vld [vmem:[%s24113_s1 + $0x130] ss:$8 sps:$4 sm:$0xff]  }
0x2003   : > { %13387 = vmatpush1.bf16.msra.mxu0 %v19331_v38  ;;  %13410 = vmatprep.mubr.bf16.mxu0 %v19506_v2 }
0x2004   : > { %13388 = vmatprep.subr.bf16.mxu0 %v19339_v48 }
0x2007   : > { %13389 = vmatpush1.bf16.msra.mxu0 %v19337_v49  ;;  %v13560_v49 = vpop.f32.mrf.mxu1 }
0x2008   : > { %13390 = vmatprep.subr.bf16.mxu0 %v19345_v50 }
0x200b   : > { %13391 = vmatpush1.bf16.msra.mxu0 %v19343_v44  ;;  %v13581_v44 = vld [vmem:[%s24114_s2] sm:$0x3] }
0x200c   : > { %13392 = vmatprep.subr.bf16.mxu0 %v19351_v45 }
0x200f   : > { %13393 = vmatpush1.bf16.msra.mxu0 %v19349_v1 }
0x2010   : > { %13706 = vmatprep.subr.bf16.mxu0 %v19506_v2 }
0x2012   : > { %17291 = vmatmul.mubr.msk.bf16.vlgmr.msra.gmra.mxu0 %vm610_vm1, %v13311_v58  ;;  %v13564_v58 = vpop.f32.mrf.mxu1 }
0x2013   : > { %13420 = vmatprep.mubr.bf16.mxu0 %v19506_v2  ;;  %13707 = vmatpush1.bf16.msra.mxu0 %v19352_v40 }
0x2014   : > { %13708 = vmatprep.subr.bf16.mxu0 %v19506_v2 }
0x2017   : > { %13709 = vmatpush1.bf16.msra.mxu0 %v19353_v4  ;;  %v13590_v4 = vrot.slane %v13581_v44, %v19870_v7 }
0x2018   : > { %13710 = vmatprep.subr.bf16.mxu0 %v19506_v2 }
0x201a   : > { %17292 = vmatmul.mubr.msk.bf16.gmra.mxu0 %vm610_vm1, %v13310_v3  ;;  %vm24154_vm1 = vcmask 1043456  }
0x201b   : > { %13711 = vmatpush1.bf16.msra.mxu0 %v19354_v57  ;;  %v13704_v47 = vsel %vm24154_vm1, %v19360_v9, 0 }
0x201c   : > { %13712 = vmatprep.subr.bf16.mxu0 %v19506_v2 }
0x201f   : > { %13713 = vmatpush1.bf16.msra.mxu0 %v19355_v52 }
0x2020   : > { %13714 = vmatprep.subr.bf16.mxu0 %v19506_v2 }
0x2023   : > { %13715 = vmatpush1.bf16.msra.mxu0 %v19356_v5 }
0x2024   : > { %13716 = vmatprep.subr.bf16.mxu0 %v19506_v2 }
0x2027   : > { %13717 = vmatpush1.bf16.msra.mxu0 %v19357_v55  ;;  %v13586_v55 = vrot.slane %v13581_v44, %v19875_v12 }
0x2028   : > { %13718 = vmatprep.subr.bf16.mxu0 %v19506_v2 }
0x202b   : > { %13719 = vmatpush1.bf16.msra.mxu0 %v19358_v53 }
0x202c   : > { %13720 = vmatprep.subr.bf16.mxu0 %v19506_v2 }
0x202f   : > { %13721 = vmatpush1.bf16.msra.mxu0 %v19359_v6 }
0x2030   : > { %13732 = vmatprep.subr.bf16.mxu0 %v19506_v2 }
0x2033   : > { %13733 = vmatpush2.bf16.msra.mxu0 %v13704_v47 }
0x2034   : > { %13734 = vmatprep.subr.bf16.mxu0 %v19506_v2 }
0x2037   : > { %13735 = vmatpush2.bf16.msra.mxu0 %v19361_v10 }
0x2038   : > { %13736 = vmatprep.subr.bf16.mxu0 %v19506_v2 }
0x203b   : > { %13737 = vmatpush2.bf16.msra.mxu0 %v19362_v11 }
0x208a   : > { %v12852_v51 = vpop.f32.mrf.mxu0 }
0x208b   : > { %12858 = vst.msk [vmem:[#allocation2 + $0x6] sm:$0x1] %vm2277_vm14, %v12852_v51 }
0x208c   : > { %12859 = vst.msk [vmem:[#allocation2 + $0xd] sm:$0x2] %vm2280_vm15, %v12852_v51  ;;  %v17734_v13 = vpop.f32.mrf.mxu0 }
0x208d   : > { %12860 = vst.msk [vmem:[#allocation2 + $0x14] sm:$0x4] %vm2283_vm3, %v12852_v51 }
0x208e   : > { %12861 = vst.msk [vmem:[#allocation2 + $0x1b] sm:$0x8] %vm2286_vm0, %v12852_v51  ;;  %v12855_v14 = vpop.f32.mrf.mxu0 }
0x208f   : > { %12862 = vst.msk [vmem:[#allocation2 + $0x22] sm:$0x10] %vm2289_vm5, %v12852_v51  ;;  %v13566_v51 = vpop.f32.mrf.mxu1 }
0x2090   : > { %v17735_v54 = vpop.f32.mrf.mxu0 }
0x20a2   : > { %v13013_v15 = vpop.f32.mrf.mxu0 }
0x20a4   : > { %v13015_v16 = vpop.f32.mrf.mxu0 }
0x20a6   : > { %v13017_v17 = vpop.f32.mrf.mxu0 }
0x20a8   : > { %v13019_v18 = vpop.f32.mrf.mxu0 }
0x20aa   : > { %v13023_v19 = vpop.f32.mrf.mxu0 }
0x20ac   : > { %v13025_v21 = vpop.f32.mrf.mxu0 }
0x20ae   : > { %v13027_v23 = vpop.f32.mrf.mxu0 }
0x20b0   : > { %v13029_v25 = vpop.f32.mrf.mxu0 }
0x20ba   : > { %v13130_v42 = vpop.f32.mrf.mxu0 }
0x20bb   : > { %v13131_v46 = vadd.f32 %v13130_v42, %v13013_v15 }
0x20bc   : > { %v13132_v43 = vpop.f32.mrf.mxu0 }
0x20bd   : > { %v13133_v39 = vadd.f32 %v13132_v43, %v13015_v16  ;;  %v13285_v38 = vadd.f32 %v13266_v56, %v13131_v46 }
0x20be   : > { %v13134_v30 = vpop.f32.mrf.mxu0 }
0x20bf   : > { %v13135_v35 = vadd.f32 %v13134_v30, %v13017_v17  ;;  %v13286_v61 = vadd.f32 %v13268_v20, %v13133_v39 }
0x20c0   : > { %v13136_v26 = vpop.f32.mrf.mxu0 }
0x20c1   : > { %v13137_v50 = vadd.f32 %v13136_v26, %v13019_v18  ;;  %v13287_v45 = vadd.f32 %v13270_v22, %v13135_v35 }
0x20c2   : > { %v13140_v29 = vpop.f32.mrf.mxu0 }
0x20c3   : > { %v13141_v1 = vadd.f32 %v13140_v29, %v13023_v19  ;;  %v13288_v52 = vadd.f32 %v13272_v24, %v13137_v50  ;;  %v13568_v24 = vpop.f32.mrf.mxu1 }
0x20c4   : > { %v13142_v31 = vpop.f32.mrf.mxu0 }
0x20c5   : > { %v13143_v59 = vadd.f32 %v13142_v31, %v13025_v21  ;;  %v13289_v47 = vadd.f32 %v13276_v27, %v13141_v1  ;;  %v19366_v1 = vld [vmem:[%s24117_s5 + $0x40] ss:$8 sps:$4 sm:$0xff]  }
0x20c6   : > { %v13144_v37 = vpop.f32.mrf.mxu0 }
0x20c7   : > { %v13145_v10 = vadd.f32 %v13144_v37, %v13027_v23  ;;  %v13290_v11 = vadd.f32 %v13278_v33, %v13143_v59  ;;  %v13570_v37 = vpop.f32.mrf.mxu1  ;;  %v19373_v59 = vld [vmem:[%s24117_s5 + $0x34] ss:$8 sps:$4 sm:$0xff]  }
0x20c8   : > { %v13146_v60 = vpop.f32.mrf.mxu0 }
0x20c9   : > { %v13147_v14 = vadd.f32 %v13146_v60, %v13029_v25  ;;  %v13291_v21 = vadd.f32 %v13280_v36, %v13145_v10 }
0x20cb   : > { %v13292_v43 = vadd.f32 %v13282_v32, %v13147_v14 }
0x20d2   : > { %v13412_v48 = vpop.f32.mrf.mxu0 }
0x20d3   : > { %v13431_v62 = vadd.f32 %v13412_v48, %v13285_v38 }
0x20d4   : > { %v13414_v63 = vpop.f32.mrf.mxu0 }
0x20d5   : > { %v13432_v0 = vadd.f32 %v13414_v63, %v13286_v61  ;;  %v13573_v5 = vadd.f32 %v13554_v28, %v13431_v62  ;;  %v13822_v62 = vld [vmem:[%s24117_s5 + $0x50] sm:$0x33] }
0x20d6   : > { %v13416_v3 = vpop.f32.mrf.mxu0  ;;  %v17370_v63 = vcombine.high %v13822_v62, %v13822_v62  ;;  %v17369_v44 = vcombine.low %v13822_v62, %v13822_v62  ;;  %v19410_v62 = vld [vmem:[%s24117_s5 + $0xf4] ss:$8 sps:$4 sm:$0xff]  }
0x20d7   : > { %v13574_v40 = vadd.f32 %v13556_v34, %v13432_v0  ;;  %v13433_v57 = vadd.f32 %v13416_v3, %v13287_v45  ;;  %v13593_v17 = vadd.f32 %v13586_v55, %v13573_v5  ;;  %v19368_v0 = vld [vmem:[%s24117_s5 + $0x44] ss:$8 sps:$4 sm:$0xff]   ;;  %v19371_v3 = vld [vmem:[%s24117_s5 + $0x30] ss:$8 sps:$4 sm:$0xff]  }
0x20d8   : > { %v13418_v53 = vpop.f32.mrf.mxu0  ;;  %17371 = vmatprep.subr.msk.bf16.mxu0 %vm1549_vm8, %v17370_v63  ;;  %v14006_v45 = vsel %vm1549_vm8, %v17369_v44, 0  ;;  %v19405_v63 = vld [vmem:[%s24117_s5 + $0x138] ss:$8 sps:$4 sm:$0xff]   ;;  %v19413_v44 = vld [vmem:[%s24117_s5 + $0x12c] ss:$8 sps:$4 sm:$0xff]  }
0x20d9   : > { %v13575_v6 = vadd.f32 %v13558_v41, %v13433_v57  ;;  %v13434_v9 = vadd.f32 %v13418_v53, %v13288_v52  ;;  %v13594_v54 = vadd.f32 %v13590_v4, %v13574_v40  ;;  %v13601_v33 = vmax.f32 %v13593_v17, 0.0  ;;  %v19377_v40 = vld [vmem:[%s24117_s5 + $0x20] ss:$8 sps:$4 sm:$0xff]   ;;  %v19383_v57 = vld [vmem:[%s24117_s5 + $0x10] ss:$8 sps:$4 sm:$0xff]  }
0x20da   : > { %v13422_v13 = vpop.f32.mrf.mxu0 }
0x20db   : > { %v13595_v15 = vadd.f32 %v13586_v55, %v13575_v6  ;;  %v13576_v16 = vadd.f32 %v13560_v49, %v13434_v9  ;;  %v13435_v18 = vadd.f32 %v13422_v13, %v13289_v47  ;;  %v13602_v30 = vmax.f32 %v13594_v54, 0.0 }
0x20dc   : > { %v13424_v56 = vpop.f32.mrf.mxu0 }
0x20dd   : > { %v13596_v19 = vadd.f32 %v13590_v4, %v13576_v16  ;;  %v13436_v20 = vadd.f32 %v13424_v56, %v13290_v11  ;;  %v13603_v22 = vmax.f32 %v13595_v15, 0.0  ;;  %v13577_v26 = vadd.f32 %v13564_v58, %v13435_v18  ;;  %v19379_v58 = vld [vmem:[%s24117_s5 + $0x24] ss:$8 sps:$4 sm:$0xff]   ;;  %v19374_v56 = vld [vmem:[%s24117_s5 + $0x98] ss:$8 sps:$4 sm:$0xff]  }
0x20de   : > { %v13426_v42 = vpop.f32.mrf.mxu0  ;;  %v19363_v16 = vld [vmem:[%s24115_s3] sm:$0x7f]  }
0x20df   : > { %v13604_v27 = vmax.f32 %v13596_v19, 0.0  ;;  %v13578_v23 = vadd.f32 %v13566_v51, %v13436_v20  ;;  %v13437_v29 = vadd.f32 %v13426_v42, %v13291_v21  ;;  %v13609_v34 = vpack.c.bf16 %v13603_v22, %v13601_v33  ;;  %v17344_v51 = vld [vmem:[%s24117_s5 + $0xa8] sm:$0x33]  ;;  %v19376_v18 = vld [vmem:[%s24117_s5 + $0x9c] ss:$8 sps:$4 sm:$0xff]  }
0x20e0   : > { %v13428_v25 = vpop.f32.mrf.mxu0  ;;  %v13597_v36 = vadd.f32 %v13586_v55, %v13577_v26  ;;  %v17356_v14 = vcombine.high %v17344_v51, %v17344_v51  ;;  %v17355_v54 = vcombine.low %v17344_v51, %v17344_v51  ;;  %v19382_v19 = vld [vmem:[%s24117_s5 + $0x8c] ss:$8 sps:$4 sm:$0xff]   ;;  %v19380_v20 = vld [vmem:[%s24117_s5 + $0x88] ss:$8 sps:$4 sm:$0xff]   ;;  %v19388_v21 = vld [vmem:[%s24117_s5 + $0x7c] ss:$8 sps:$4 sm:$0xff]  }
0x20e1   : > { %v13610_v28 = vpack.c.bf16 %v13604_v27, %v13602_v30  ;;  %v13438_v31 = vadd.f32 %v13428_v25, %v13292_v43  ;;  %v13579_v46 = vadd.f32 %v13568_v24, %v13437_v29  ;;  %v13598_v41 = vadd.f32 %v13590_v4, %v13578_v23  ;;  %v19386_v22 = vld [vmem:[%s24117_s5 + $0x78] ss:$8 sps:$4 sm:$0xff]   ;;  %v19391_v24 = vld [vmem:[%s24117_s5 + $0x4] ss:$8 sps:$4 sm:$0xff]   ;;  %v19392_v30 = vld [vmem:[%s24117_s5 + $0x68] ss:$8 sps:$4 sm:$0xff]  }
0x20e2   : > { %v13605_v49 = vmax.f32 %v13597_v36, 0.0  ;;  %v13900_v17 = vsel %vm1549_vm8, %v17355_v54, 0  ;;  %v19389_v42 = vld [vmem:[%s24117_s5] ss:$8 sps:$4 sm:$0xff]   ;;  %v19394_v43 = vld [vmem:[%s24117_s5 + $0x6c] ss:$8 sps:$4 sm:$0xff]  }
0x20e3   : > { %v13580_v39 = vadd.f32 %v13570_v37, %v13438_v31  ;;  %17330 = vmatprep.mubr.msk.bf16.mxu0 %vm1341_vm6, %v13610_v28  ;;  %v13599_v60 = vadd.f32 %v13586_v55, %v13579_v46  ;;  %v13606_v38 = vmax.f32 %v13598_v41, 0.0  ;;  %v17408_v27 = vld [vmem:[%s24117_s5 + $0x158] sm:$0x33]  ;;  %v17383_v29 = vld [vmem:[%s24117_s5 + $0x100] sm:$0x33] }
0x20e4   : > { %13739 = vmatmul.mubr.bf16.vlgmr.msra.gmra.mxu0 %v13609_v34  ;;  %v17420_v23 = vcombine.high %v17408_v27, %v17408_v27  ;;  %v19399_v33 = vld [vmem:[%s24117_s5 + $0x5c] ss:$8 sps:$4 sm:$0xff]   ;;  %v19397_v26 = vld [vmem:[%s24117_s5 + $0x58] ss:$8 sps:$4 sm:$0xff]   ;;  %v17395_v25 = vcombine.high %v17383_v29, %v17383_v29  ;;  %v17419_v31 = vcombine.low %v17408_v27, %v17408_v27  ;;  %v19451_v27 = vld [vmem:[%s24120_s8 + $0x28] sm:$0xff]  }
0x20e5   : > { %v13600_v32 = vadd.f32 %v13590_v4, %v13580_v39  ;;  %v13607_v35 = vmax.f32 %v13599_v60, 0.0  ;;  %14016 = vmatpush1.bf16.msra.mxu0 %v14006_v45  ;;  %v19385_v4 = vld [vmem:[%s24117_s5 + $0x14] ss:$8 sps:$4 sm:$0xff]   ;;  %v19416_v45 = vld [vmem:[%s24117_s5 + $0xe4] ss:$8 sps:$4 sm:$0xff]  }
0x20e6   : > { %14017 = vmatprep.subr.bf16.mxu0 %v19368_v0  ;;  %v14251_v41 = vsel %vm1549_vm8, %v17419_v31, 0  ;;  %v19402_v39 = vld [vmem:[%s24117_s5 + $0x14c] ss:$8 sps:$4 sm:$0xff]   ;;  %v19408_v0 = vld [vmem:[%s24117_s5 + $0xf0] ss:$8 sps:$4 sm:$0xff]   ;;  %v19458_v31 = vld [vmem:[%s24120_s8 + $0x40] sm:$0xff]  }
0x20e7   : > { %v13608_v48 = vmax.f32 %v13600_v32, 0.0  ;;  %v13611_v61 = vpack.c.bf16 %v13607_v35, %v13605_v49  ;;  %v17394_v32 = vcombine.low %v17383_v29, %v17383_v29  ;;  %v19400_v35 = vld [vmem:[%s24117_s5 + $0x148] ss:$8 sps:$4 sm:$0xff]   ;;  %v19407_v49 = vld [vmem:[%s24117_s5 + $0x13c] ss:$8 sps:$4 sm:$0xff]  }
0x20e8   : > { %v19455_v29 = vld [vmem:[%s24120_s8 + $0x8] sm:$0xff]  }
0x20e9   : > { %v13612_v50 = vpack.c.bf16 %v13608_v48, %v13606_v38  ;;  %14018 = vmatpush1.bf16.msra.mxu0 %v19366_v1  ;;  %v19411_v1 = vld [vmem:[%s24117_s5 + $0x128] ss:$8 sps:$4 sm:$0xff]  }
0x20ea   : > { %14019 = vmatprep.subr.bf16.mxu0 %v19373_v59  ;;  %v19419_v59 = vld [vmem:[%s24117_s5 + $0x11c] ss:$8 sps:$4 sm:$0xff]  }
0x20eb   : > { %17331 = vmatprep.mubr.msk.bf16.mxu0 %vm1341_vm6, %v13612_v50  ;;  %vm14680_vm6 = vcmask 654336  }
0x20ec   : > { %13747 = vmatmul.mubr.bf16.gmra.mxu0 %v13611_v61  ;;  %v14126_v61 = vsel %vm1549_vm8, %v17394_v32, 0 }
0x20ed   : > { %14043 = vmatprep.mubr.bf16.mxu0 %v19506_v2  ;;  %14020 = vmatpush1.bf16.msra.mxu0 %v19371_v3  ;;  %v19414_v3 = vld [vmem:[%s24117_s5 + $0xe0] ss:$8 sps:$4 sm:$0xff]  }
0x20ee   : > { %14021 = vmatprep.subr.bf16.mxu0 %v19379_v58  ;;  %v19422_v58 = vld [vmem:[%s24117_s5 + $0xd4] ss:$8 sps:$4 sm:$0xff]  }
0x20f1   : > { %14022 = vmatpush1.bf16.msra.mxu0 %v19377_v40  ;;  %v19417_v40 = vld [vmem:[%s24117_s5 + $0x118] ss:$8 sps:$4 sm:$0xff]  }
0x20f2   : > { %14023 = vmatprep.subr.bf16.mxu0 %v19385_v4  ;;  %v19425_v4 = vld [vmem:[%s24117_s5 + $0x10c] ss:$8 sps:$4 sm:$0xff]  }
0x20f5   : > { %14024 = vmatpush1.bf16.msra.mxu0 %v19383_v57  ;;  %v19420_v57 = vld [vmem:[%s24117_s5 + $0xd0] ss:$8 sps:$4 sm:$0xff]  }
0x20f6   : > { %14025 = vmatprep.subr.bf16.mxu0 %v19391_v24  ;;  %v19446_v24 = vld [vmem:[%s24117_s5 + $0x160] ss:$8 sps:$4 sm:$0xff]  }
0x20f9   : > { %14026 = vmatpush1.bf16.msra.mxu0 %v19389_v42 }
0x20fa   : > { %17421 = vmatprep.subr.msk.bf16.mxu0 %vm1549_vm8, %v17420_v23  ;;  %v19452_v23 = vld [vmem:[%s24120_s8 + $0x20] sm:$0xff]  }
0x21a4   : > { %v13740_v52 = vpop.f32.mrf.mxu0 }
0x21a6   : > { %v13742_v5 = vpop.f32.mrf.mxu0 }
0x21a7   : > { %v19423_v5 = vld [vmem:[%s24117_s5 + $0x108] ss:$8 sps:$4 sm:$0xff]  }
0x21a8   : > { %v13743_v55 = vpop.f32.mrf.mxu0 }
0x21a9   : > { %v13757_v15 = vpack.c.bf16 %v13743_v55, %v13740_v52  ;;  %v19428_v52 = vld [vmem:[%s24117_s5 + $0xc4] ss:$8 sps:$4 sm:$0xff]  }
0x21aa   : > { %v13745_v53 = vpop.f32.mrf.mxu0 }
0x21ac   : > { %v13748_v6 = vpop.f32.mrf.mxu0 }
0x21ae   : > { %v13750_v9 = vpop.f32.mrf.mxu0 }
0x21af   : > { %v19431_v9 = vld [vmem:[%s24117_s5 + $0xb4] ss:$8 sps:$4 sm:$0xff]  }
0x21b0   : > { %v13751_v47 = vpop.f32.mrf.mxu0 }
0x21b1   : > { %v13758_v10 = vpack.c.bf16 %v13751_v47, %v13748_v6  ;;  %v19426_v6 = vld [vmem:[%s24117_s5 + $0xc0] ss:$8 sps:$4 sm:$0xff]   ;;  %v17433_v47 = vld [vmem:[%s24117_s5 + $0x1b0] sm:$0x33] }
0x21b2   : > { %v13753_v11 = vpop.f32.mrf.mxu0  ;;  %v17445_v51 = vcombine.high %v17433_v47, %v17433_v47 }
0x21b3   : > { %v13768_v13 = vsel %vm1094_vm4, %v13758_v10, 0  ;;  %v19429_v11 = vld [vmem:[%s24117_s5 + $0xb0] ss:$8 sps:$4 sm:$0xff]   ;;  %vm24155_vm4 = vcmask 80896  }
0x21b4   : > { %17737 = vmatpush3.bf16.msra.mxu1 %v13768_v13  ;;  %v17444_v13 = vcombine.low %v17433_v47, %v17433_v47 }
0x21b5   : > { %17738 = vmatprep.subr.bf16.mxu1 %v19507_v8 }
0x21b6   : > { %v14374_v54 = vsel %vm1549_vm8, %v17444_v13, 0 }
0x21b8   : > { %17739 = vmatpush3.bf16.msra.mxu1 %v13757_v15  ;;  %v19436_v15 = vld [vmem:[%s24117_s5 + $0x1a4] ss:$8 sps:$4 sm:$0xff]  }
0x21b9   : > { %17357 = vmatprep.subr.msk.bf16.mxu1 %vm1549_vm8, %v17356_v14 }
0x21bb   : > { %17741 = vmatmul.mubr.msk.bf16.vlgmr.msra.gmra.mxu1 %vm1410_vm9, %v19363_v16  ;;  %v19434_v16 = vld [vmem:[%s24117_s5 + $0x1a0] ss:$8 sps:$4 sm:$0xff]  }
0x21bc   : > { %13910 = vmatpush1.bf16.msra.mxu1 %v13900_v17  ;;  %13937 = vmatprep.mubr.bf16.mxu1 %v19506_v2  ;;  %v19439_v17 = vld [vmem:[%s24117_s5 + $0x194] ss:$8 sps:$4 sm:$0xff]  }
0x21bd   : > { %13911 = vmatprep.subr.bf16.mxu1 %v19376_v18  ;;  %v19437_v18 = vld [vmem:[%s24117_s5 + $0x190] ss:$8 sps:$4 sm:$0xff]  }
0x21c0   : > { %13912 = vmatpush1.bf16.msra.mxu1 %v19374_v56  ;;  %v19442_v56 = vld [vmem:[%s24117_s5 + $0x184] ss:$8 sps:$4 sm:$0xff]  }
0x21c1   : > { %13913 = vmatprep.subr.bf16.mxu1 %v19382_v19  ;;  %v19440_v19 = vld [vmem:[%s24117_s5 + $0x180] ss:$8 sps:$4 sm:$0xff]  }
0x21c4   : > { %13914 = vmatpush1.bf16.msra.mxu1 %v19380_v20  ;;  %v19445_v20 = vld [vmem:[%s24117_s5 + $0x174] ss:$8 sps:$4 sm:$0xff]  }
0x21c5   : > { %13915 = vmatprep.subr.bf16.mxu1 %v19388_v21  ;;  %v19443_v21 = vld [vmem:[%s24117_s5 + $0x170] ss:$8 sps:$4 sm:$0xff]  }
0x21c8   : > { %13916 = vmatpush1.bf16.msra.mxu1 %v19386_v22  ;;  %v19448_v22 = vld [vmem:[%s24117_s5 + $0x164] ss:$8 sps:$4 sm:$0xff]  }
0x21c9   : > { %13917 = vmatprep.subr.bf16.mxu1 %v19394_v43  ;;  %v19449_v43 = vld [vmem:[%s24120_s8 + $0x38] sm:$0xff]  }
0x21cc   : > { %13918 = vmatpush1.bf16.msra.mxu1 %v19392_v30  ;;  %v19450_v30 = vld [vmem:[%s24120_s8 + $0x30] sm:$0xff]  }
0x21cd   : > { %13919 = vmatprep.subr.bf16.mxu1 %v19399_v33  ;;  %v19453_v33 = vld [vmem:[%s24120_s8 + $0x18] sm:$0xff]  }
0x21d0   : > { %13920 = vmatpush1.bf16.msra.mxu1 %v19397_v26  ;;  %v19454_v26 = vld [vmem:[%s24120_s8 + $0x10] sm:$0xff]  }
0x21d1   : > { %17396 = vmatprep.subr.msk.bf16.mxu1 %vm1549_vm8, %v17395_v25  ;;  %v19456_v25 = vld [vmem:[%s24120_s8] sm:$0xff]  }
0x227b   : > { %v13804_v28 = vpop.f32.mrf.mxu1 }
0x227d   : > { %v17742_v34 = vpop.f32.mrf.mxu1 }
0x227f   : > { %v13807_v37 = vpop.f32.mrf.mxu1 }
0x2280   : > { %v23746_v46 = vpack.c.bf16 %v13807_v37, %v13804_v28  ;;  %v19457_v28 = vld [vmem:[%s24120_s8 + $0x48] sm:$0xff]  }
0x2281   : > { %v17743_v36 = vpop.f32.mrf.mxu1 }
0x2282   : > { %v13837_v60 = vshll.u32 %v23746_v46, 16  ;;  %17372 = vmatmul.mubr.msk.bf16.vlgmr.msra.gmra.mxu0 %vm1545_vm10, %v23746_v46  ;;  %v13835_v38 = vshrl.u32 %v23746_v46, 16  ;;  %v14066_v14 = vrot.slane %v23746_v46, 1  ;;  %v14314_v42 = vrot.slane %v23746_v46, 2 }
0x2283   : > { %14261 = vmatpush1.bf16.msra.mxu0 %v14251_v41  ;;  %14288 = vmatprep.mubr.bf16.mxu0 %v19506_v2 }
0x2284   : > { %v13839_v48 = vrot.slane %v13837_v60, 1  ;;  %14262 = vmatprep.subr.bf16.mxu0 %v19402_v39  ;;  %v14189_v55 = vrot.slane %v13835_v38, 1  ;;  %v14190_v53 = vrot.slane %v13837_v60, 2 }
0x2286   : > { %v13840_v50 = vor.u32 %v13839_v48, %v13835_v38  ;;  %v14191_v10 = vor.u32 %v14190_v53, %v14189_v55 }
0x2287   : > { %14263 = vmatpush1.bf16.msra.mxu0 %v19400_v35 }
0x2288   : > { %17358 = vmatmul.mubr.msk.bf16.vlgmr.msra.gmra.mxu1 %vm1545_vm10, %v13840_v50  ;;  %14264 = vmatprep.subr.bf16.mxu0 %v19407_v49 }
0x2289   : > { %14136 = vmatpush1.bf16.msra.mxu1 %v14126_v61  ;;  %14163 = vmatprep.mubr.bf16.mxu1 %v19506_v2 }
0x228a   : > { %14137 = vmatprep.subr.bf16.mxu1 %v19410_v62 }
0x228b   : > { %14265 = vmatpush1.bf16.msra.mxu0 %v19405_v63 }
0x228c   : > { %14266 = vmatprep.subr.bf16.mxu0 %v19413_v44 }
0x228d   : > { %14138 = vmatpush1.bf16.msra.mxu1 %v19408_v0 }
0x228e   : > { %14139 = vmatprep.subr.bf16.mxu1 %v19416_v45 }
0x228f   : > { %14267 = vmatpush1.bf16.msra.mxu0 %v19411_v1 }
0x2290   : > { %14268 = vmatprep.subr.bf16.mxu0 %v19419_v59 }
0x2291   : > { %14140 = vmatpush1.bf16.msra.mxu1 %v19414_v3 }
0x2292   : > { %14141 = vmatprep.subr.bf16.mxu1 %v19422_v58 }
0x2293   : > { %14269 = vmatpush1.bf16.msra.mxu0 %v19417_v40  ;;  %v14426_v40 = vld [vmem:[%s24118_s6] sm:$0x3] }
0x2294   : > { %14270 = vmatprep.subr.bf16.mxu0 %v19425_v4  ;;  %v14435_v55 = vrot.slane %v14426_v40, %v19870_v7  ;;  %v14431_v47 = vrot.slane %v14426_v40, %v19875_v12  ;;  %v19460_v12 = vld [vmem:[%s24121_s9 + $0x70] sm:$0xff]  }
0x2295   : > { %14142 = vmatpush1.bf16.msra.mxu1 %v19420_v57 }
0x2296   : > { %14143 = vmatprep.subr.bf16.mxu1 %v19428_v52 }
0x2297   : > { %14271 = vmatpush1.bf16.msra.mxu0 %v19423_v5 }
0x2298   : > { %14531 = vmatprep.subr.bf16.mxu0 %v19506_v2 }
0x2299   : > { %14144 = vmatpush1.bf16.msra.mxu1 %v19426_v6 }
0x229a   : > { %17422 = vmatmul.mubr.msk.bf16.vlgmr.msra.gmra.mxu0 %vm1545_vm10, %v14191_v10  ;;  %14145 = vmatprep.subr.bf16.mxu1 %v19431_v9 }
0x229b   : > { %14532 = vmatpush1.bf16.msra.mxu0 %v19449_v43 }
0x229c   : > { %14533 = vmatprep.subr.bf16.mxu0 %v19506_v2 }
0x229d   : > { %14146 = vmatpush1.bf16.msra.mxu1 %v19429_v11 }
0x229e   : > { %17446 = vmatprep.subr.msk.bf16.mxu1 %vm1549_vm8, %v17445_v51 }
0x229f   : > { %14534 = vmatpush1.bf16.msra.mxu0 %v19450_v30 }
0x22a0   : > { %17397 = vmatmul.mubr.msk.bf16.vlgmr.msra.gmra.mxu1 %vm1545_vm10, %v14066_v14  ;;  %14535 = vmatprep.subr.bf16.mxu0 %v19506_v2 }
0x22a1   : > { %14384 = vmatpush1.bf16.msra.mxu1 %v14374_v54  ;;  %14411 = vmatprep.mubr.bf16.mxu1 %v19506_v2 }
0x22a2   : > { %14385 = vmatprep.subr.bf16.mxu1 %v19436_v15 }
0x22a3   : > { %14536 = vmatpush1.bf16.msra.mxu0 %v19451_v27 }
0x22a4   : > { %14537 = vmatprep.subr.bf16.mxu0 %v19506_v2 }
0x22a5   : > { %14386 = vmatpush1.bf16.msra.mxu1 %v19434_v16 }
0x22a6   : > { %14387 = vmatprep.subr.bf16.mxu1 %v19439_v17 }
0x22a7   : > { %14538 = vmatpush1.bf16.msra.mxu0 %v19452_v23 }
0x22a8   : > { %14539 = vmatprep.subr.bf16.mxu0 %v19506_v2 }
0x22a9   : > { %14388 = vmatpush1.bf16.msra.mxu1 %v19437_v18 }
0x22aa   : > { %14389 = vmatprep.subr.bf16.mxu1 %v19442_v56 }
0x22ab   : > { %14540 = vmatpush1.bf16.msra.mxu0 %v19453_v33 }
0x22ac   : > { %14541 = vmatprep.subr.bf16.mxu0 %v19506_v2 }
0x22ad   : > { %14390 = vmatpush1.bf16.msra.mxu1 %v19440_v19 }
0x22ae   : > { %14391 = vmatprep.subr.bf16.mxu1 %v19445_v20 }
0x22af   : > { %14542 = vmatpush1.bf16.msra.mxu0 %v19454_v26  ;;  %v14572_v26 = vld [vmem:[%s24119_s7] sm:$0x7] }
0x22b0   : > { %14543 = vmatprep.subr.bf16.mxu0 %v19506_v2 }
0x22b1   : > { %14392 = vmatpush1.bf16.msra.mxu1 %v19443_v21 }
0x22b2   : > { %14393 = vmatprep.subr.bf16.mxu1 %v19448_v22  ;;  %v19462_v22 = vld [vmem:[%s24121_s9 + $0x68] sm:$0xff]  }
0x22b3   : > { %14544 = vmatpush1.bf16.msra.mxu0 %v19455_v29  ;;  %v19459_v29 = vld [vmem:[%s24121_s9 + $0x48] sm:$0xff]  }
0x22b4   : > { %14545 = vmatprep.subr.bf16.mxu0 %v19506_v2 }
0x22b5   : > { %14394 = vmatpush1.bf16.msra.mxu1 %v19446_v24  ;;  %v19464_v24 = vld [vmem:[%s24121_s9 + $0x60] sm:$0xff]  }
0x22b6   : > { %17744 = vmatprep.subr.bf16.mxu1 %v19507_v8 }
0x22b7   : > { %14546 = vmatpush1.bf16.msra.mxu0 %v19456_v25  ;;  %v19461_v25 = vld [vmem:[%s24121_s9 + $0x40] sm:$0xff]  }
0x22b8   : > { %17447 = vmatmul.mubr.msk.bf16.vlgmr.msra.gmra.mxu1 %vm1545_vm10, %v14314_v42  ;;  %14559 = vmatprep.subr.bf16.mxu0 %v19506_v2 }
0x22b9   : > { %17746 = vmatprep.mubr.msk.bf16.mxu1 %vm19508_vm7, %v19507_v8 }
0x22bb   : > { %14560 = vmatpush2.bf16.msra.mxu0 %v19457_v28  ;;  %v19463_v28 = vld [vmem:[%s24121_s9 + $0x38] sm:$0xff]  }
0x22bc   : > { %14561 = vmatprep.subr.bf16.mxu0 %v19506_v2 }
0x22bf   : > { %14562 = vmatpush2.bf16.msra.mxu0 %v19458_v31  ;;  %v19465_v31 = vld [vmem:[%s24121_s9 + $0x30] sm:$0xff]  }
0x22c0   : > { %17778 = vmatprep.subr.bf16.mxu0 %v19507_v8 }
0x2342   : > { %v14045_v46 = vpop.f32.mrf.mxu0 }
0x2344   : > { %v14047_v39 = vpop.f32.mrf.mxu0 }
0x2346   : > { %v14049_v60 = vpop.f32.mrf.mxu0 }
0x2348   : > { %v13939_v34 = vpop.f32.mrf.mxu1  ;;  %v14051_v35 = vpop.f32.mrf.mxu0 }
0x2349   : > { %v14046_v50 = vadd.f32 %v14045_v46, %v13939_v34  ;;  %v19466_v34 = vld [vmem:[%s24121_s9 + $0x58] sm:$0xff]   ;;  %v19468_v46 = vld [vmem:[%s24121_s9 + $0x50] sm:$0xff]  }
0x234a   : > { %v13941_v37 = vpop.f32.mrf.mxu1 }
0x234b   : > { %v14048_v2 = vadd.f32 %v14047_v39, %v13941_v37  ;;  %v19467_v37 = vld [vmem:[%s24121_s9 + $0x28] sm:$0xff]  }
0x234c   : > { %v13943_v41 = vpop.f32.mrf.mxu1 }
0x234d   : > { %v14050_v62 = vadd.f32 %v14049_v60, %v13943_v41 }
0x234e   : > { %v13945_v36 = vpop.f32.mrf.mxu1 }
0x234f   : > { %v14052_v45 = vadd.f32 %v14051_v35, %v13945_v36 }
0x235a   : > { %v14290_v48 = vpop.f32.mrf.mxu0 }
0x235c   : > { %v14292_v61 = vpop.f32.mrf.mxu0 }
0x235e   : > { %v14294_v59 = vpop.f32.mrf.mxu0 }
0x2360   : > { %v14165_v32 = vpop.f32.mrf.mxu1  ;;  %v14296_v6 = vpop.f32.mrf.mxu0 }
0x2361   : > { %v14174_v44 = vadd.f32 %v14165_v32, %v14046_v50  ;;  %v19469_v32 = vld [vmem:[%s24121_s9 + $0x20] sm:$0xff]   ;;  %v19471_v50 = vld [vmem:[%s24121_s9 + $0x18] sm:$0xff]  }
0x2362   : > { %v14167_v38 = vpop.f32.mrf.mxu1 }
0x2363   : > { %v14175_v63 = vadd.f32 %v14167_v38, %v14048_v2  ;;  %v14299_v57 = vadd.f32 %v14290_v48, %v14174_v44  ;;  %v19470_v48 = vld [vmem:[%s24121_s9 + $0xc0] sm:$0xff]   ;;  %v19475_v44 = vld [vmem:[%s24121_s9 + $0x8] sm:$0xff]  }
0x2364   : > { %v14169_v49 = vpop.f32.mrf.mxu1 }
0x2365   : > { %v14176_v1 = vadd.f32 %v14169_v49, %v14050_v62  ;;  %v14300_v4 = vadd.f32 %v14292_v61, %v14175_v63  ;;  %v19472_v61 = vld [vmem:[%s24121_s9 + $0xb8] sm:$0xff]   ;;  %v19473_v62 = vld [vmem:[%s24121_s9 + $0x10] sm:$0xff]  }
0x2366   : > { %v14171_v0 = vpop.f32.mrf.mxu1  ;;  %v19474_v63 = vld [vmem:[%s24121_s9 + $0xb0] sm:$0xff]  }
0x2367   : > { %v14177_v58 = vadd.f32 %v14171_v0, %v14052_v45  ;;  %v14301_v53 = vadd.f32 %v14294_v59, %v14176_v1  ;;  %v19476_v0 = vld [vmem:[%s24121_s9 + $0xa8] sm:$0xff]   ;;  %v19477_v45 = vld [vmem:[%s24121_s9] sm:$0xff]  }
0x2368   : > { %v19478_v1 = vld [vmem:[%s24121_s9 + $0xa0] sm:$0xff]  }
0x2369   : > { %v14302_v51 = vadd.f32 %v14296_v6, %v14177_v58  ;;  %v19479_v58 = vld [vmem:[%s24121_s9 + $0x98] sm:$0xff]  }
0x2378   : > { %v14413_v3 = vpop.f32.mrf.mxu1 }
0x2379   : > { %v14422_v9 = vadd.f32 %v14413_v3, %v14299_v57  ;;  %v19480_v57 = vld [vmem:[%s24121_s9 + $0x90] sm:$0xff]  }
0x237a   : > { %v14415_v52 = vpop.f32.mrf.mxu1 }
0x237b   : > { %v14423_v5 = vadd.f32 %v14415_v52, %v14300_v4  ;;  %v14438_v16 = vadd.f32 %v14431_v47, %v14422_v9  ;;  %v19481_v52 = vld [vmem:[%s24121_s9 + $0x88] sm:$0xff]   ;;  %v19484_v9 = vld [vmem:[%s24123_s11 + $0x38] ss:$0 sps:$4 sm:$0xff]  }
0x237c   : > { %v14417_v10 = vpop.f32.mrf.mxu1 }
0x237d   : > { %v14424_v11 = vadd.f32 %v14417_v10, %v14301_v53  ;;  %v14439_v14 = vadd.f32 %v14435_v55, %v14423_v5  ;;  %v14442_v20 = vmax.f32 %v14438_v16, 0.0  ;;  %v19482_v5 = vld [vmem:[%s24121_s9 + $0x80] sm:$0xff]   ;;  %v19485_v10 = vld [vmem:[%s24123_s11 + $0x30] sm:$0xff]   ;;  %v19492_v16 = vld [vmem:[%s24125_s13 + $0x28] ss:$0 sps:$4 sm:$0x33]  }
0x237e   : > { %v14419_v13 = vpop.f32.mrf.mxu1 }
0x237f   : > { %v14440_v54 = vadd.f32 %v14431_v47, %v14424_v11  ;;  %v14425_v15 = vadd.f32 %v14419_v13, %v14302_v51  ;;  %v14443_v56 = vmax.f32 %v14439_v14, 0.0  ;;  %v19486_v11 = vld [vmem:[%s24123_s11 + $0x28] sm:$0xff]   ;;  %v19487_v51 = vld [vmem:[%s24123_s11 + $0x20] sm:$0xff]   ;;  %v19488_v13 = vld [vmem:[%s24123_s11 + $0x18] sm:$0xff]  }
0x2380   : > { %v19489_v14 = vld [vmem:[%s24123_s11 + $0x10] sm:$0xff]  }
0x2381   : > { %v14441_v17 = vadd.f32 %v14435_v55, %v14425_v15  ;;  %v14444_v18 = vmax.f32 %v14440_v54, 0.0  ;;  %v19483_v55 = vld [vmem:[%s24121_s9 + $0x78] sm:$0xff]   ;;  %v19490_v54 = vld [vmem:[%s24123_s11 + $0x8] sm:$0xff]   ;;  %v19491_v15 = vld [vmem:[%s24123_s11] sm:$0xff]  }
0x2383   : > { %v14445_v19 = vmax.f32 %v14441_v17, 0.0  ;;  %v14446_v7 = vpack.c.bf16 %v14444_v18, %v14442_v20  ;;  %v15239_v17 = vsel %vm1549_vm8, %v19492_v16, 0  ;;  %v19493_v18 = vld [vmem:[%s24125_s13 + $0x20] sm:$0xff]  }
0x2385   : > { %v14447_v21 = vpack.c.bf16 %v14445_v19, %v14443_v56  ;;  %v19494_v56 = vld [vmem:[%s24125_s13 + $0x18] sm:$0xff]   ;;  %v19495_v19 = vld [vmem:[%s24125_s13 + $0x10] sm:$0xff]  }
0x2387   : > { %17458 = vmatprep.mubr.msk.bf16.mxu0 %vm2182_vm11, %v14447_v21 }
0x2388   : > { %14564 = vmatmul.mubr.bf16.vlgmr.msra.gmra.mxu0 %v14446_v7 }
0x2389   : > { %17788 = vmatprep.mubr.msk.bf16.mxu0 %vm19508_vm7, %v19507_v8  ;;  %17779 = vmatpush3.bf16.msra.mxu0 %v19460_v12 }
0x238a   : > { %17780 = vmatprep.subr.bf16.mxu0 %v19507_v8 }
0x238d   : > { %17781 = vmatpush3.bf16.msra.mxu0 %v19462_v22 }
0x238e   : > { %17782 = vmatprep.subr.bf16.mxu0 %v19507_v8 }
0x2391   : > { %17783 = vmatpush3.bf16.msra.mxu0 %v19464_v24 }
0x2392   : > { %17784 = vmatprep.subr.bf16.mxu0 %v19507_v8 }
0x2395   : > { %17785 = vmatpush3.bf16.msra.mxu0 %v19466_v34 }
0x2396   : > { %17786 = vmatprep.subr.bf16.mxu0 %v19507_v8 }
0x2399   : > { %17787 = vmatpush3.bf16.msra.mxu0 %v19468_v46 }
0x239a   : > { %17806 = vmatprep.subr.bf16.mxu0 %v19507_v8 }
0x2448   : > { %v14565_v42 = vpop.f32.mrf.mxu0 }
0x244a   : > { %v14567_v43 = vpop.f32.mrf.mxu0 }
0x244c   : > { %v14568_v30 = vpop.f32.mrf.mxu0 }
0x244d   : > { %v14573_v27 = vpack.c.bf16 %v14568_v30, %v14565_v42 }
0x244e   : > { %v14570_v23 = vpop.f32.mrf.mxu0 }
0x244f   : > { %v14578_v33 = vsel %vm2233_vm12, %v14573_v27, 0 }
0x2450   : > { %17745 = vmatpush3.bf16.msra.mxu1 %v14578_v33 }
0x2451   : > { %17750 = vmatprep.subr.bf16.mxu1 %v19507_v8 }
0x2453   : > { %17747 = vmatmul.mubr.msk.bf16.vlgmr.msra.gmra.mxu1 %vm24155_vm4, %v14572_v26 }
0x2454   : > { %17751 = vmatpush3.bf16.msra.mxu1 %v19459_v29  ;;  %17760 = vmatprep.mubr.msk.bf16.mxu1 %vm19508_vm7, %v19507_v8 }
0x2455   : > { %17752 = vmatprep.subr.bf16.mxu1 %v19507_v8 }
0x2458   : > { %17753 = vmatpush3.bf16.msra.mxu1 %v19461_v25 }
0x2459   : > { %17754 = vmatprep.subr.bf16.mxu1 %v19507_v8 }
0x245c   : > { %17755 = vmatpush3.bf16.msra.mxu1 %v19463_v28 }
0x245d   : > { %17756 = vmatprep.subr.bf16.mxu1 %v19507_v8 }
0x2460   : > { %17757 = vmatpush3.bf16.msra.mxu1 %v19465_v31 }
0x2461   : > { %17758 = vmatprep.subr.bf16.mxu1 %v19507_v8 }
0x2464   : > { %17759 = vmatpush3.bf16.msra.mxu1 %v19467_v37 }
0x2465   : > { %17764 = vmatprep.subr.bf16.mxu1 %v19507_v8 }
0x2513   : > { %v14614_v41 = vpop.f32.mrf.mxu1 }
0x2514   : > { %14620 = vst.msk [vmem:[#allocation2 + $0x7] sm:$0x1] %vm2277_vm14, %v14614_v41 }
0x2515   : > { %14621 = vst.msk [vmem:[#allocation2 + $0xe] sm:$0x2] %vm2280_vm15, %v14614_v41  ;;  %v17748_v39 = vpop.f32.mrf.mxu1 }
0x2516   : > { %14622 = vst.msk [vmem:[#allocation2 + $0x15] sm:$0x4] %vm2283_vm3, %v14614_v41  ;;  %vm15135_vm3 = vcmask 982016  }
0x2517   : > { %14623 = vst.msk [vmem:[#allocation2 + $0x1c] sm:$0x8] %vm2286_vm0, %v14614_v41  ;;  %v14617_v36 = vpop.f32.mrf.mxu1  ;;  %vm24156_vm0 = vmmov %vm24154_vm1 }
0x2518   : > { %14624 = vst.msk [vmem:[#allocation2 + $0x23] sm:$0x10] %vm2289_vm5, %v14614_v41  ;;  %v15140_v47 = vsel %vm24156_vm0, %v19484_v9, 0  ;;  %v17530_v41 = vld [vmem:[%s24122_s10] ss:$0 sm:$0xff] }
0x2519   : > { %v17749_v60 = vpop.f32.mrf.mxu1 }
0x251b   : > { %v14625_v59 = vld [vmem:[#allocation2] sm:$0xff] }
0x251c   : > { %v14637_v35 = vld [vmem:[#allocation2 + $0x8] sm:$0xff]  ;;  %v14626_v40 = vpack.c.bf16 %v14625_v59, %v14625_v59 }
0x251d   : > { %v14797_v38 = vld [vmem:[#allocation2 + $0x10] sm:$0xff]  ;;  %v14638_v49 = vpack.c.bf16 %v14637_v35, %v14637_v35 }
0x251e   : > { %v14798_v2 = vpack.c.bf16 %v14797_v38, %v14797_v38  ;;  %v14884_v53 = vld [vmem:[#allocation2 + $0x18] sm:$0xff] }
0x251f   : > { %17761 = vmatmul.mubr.msk.bf16.vlgmr.msra.gmra.mxu1 %vm14680_vm6, %v14638_v49  ;;  %v14971_v3 = vld [vmem:[#allocation2 + $0x20] sm:$0xff]  ;;  %v14885_v6 = vpack.c.bf16 %v14884_v53, %v14884_v53  ;;  %v19496_v49 = vld [vmem:[%s24125_s13 + $0x8] sm:$0xff]  }
0x2520   : > { %17789 = vmatmul.mubr.msk.bf16.vlgmr.msra.gmra.mxu0 %vm14680_vm6, %v14798_v2  ;;  %17765 = vmatpush3.bf16.msra.mxu1 %v19469_v32  ;;  %v14972_v4 = vpack.c.bf16 %v14971_v3, %v14971_v3  ;;  %v19497_v2 = vld [vmem:[%s24125_s13] sm:$0xff]  }
0x2521   : > { %17807 = vmatpush3.bf16.msra.mxu0 %v19470_v48  ;;  %17766 = vmatprep.subr.bf16.mxu1 %v19507_v8 }
0x2522   : > { %17808 = vmatprep.subr.bf16.mxu0 %v19507_v8  ;;  %17774 = vmatprep.mubr.msk.bf16.mxu1 %vm19508_vm7, %v19507_v8 }
0x2523   : > { %17816 = vmatprep.mubr.msk.bf16.mxu0 %vm19508_vm7, %v19507_v8 }
0x2524   : > { %17767 = vmatpush3.bf16.msra.mxu1 %v19471_v50  ;;  %v17531_v50 = vld [vmem:[%s24124_s12] ss:$0 sm:$0xff] }
0x2525   : > { %17809 = vmatpush3.bf16.msra.mxu0 %v19472_v61  ;;  %17768 = vmatprep.subr.bf16.mxu1 %v19507_v8 }
0x2526   : > { %17810 = vmatprep.subr.bf16.mxu0 %v19507_v8 }
0x2528   : > { %17769 = vmatpush3.bf16.msra.mxu1 %v19473_v62 }
0x2529   : > { %17811 = vmatpush3.bf16.msra.mxu0 %v19474_v63  ;;  %17770 = vmatprep.subr.bf16.mxu1 %v19507_v8 }
0x252a   : > { %17812 = vmatprep.subr.bf16.mxu0 %v19507_v8 }
0x252c   : > { %17771 = vmatpush3.bf16.msra.mxu1 %v19475_v44 }
0x252d   : > { %17813 = vmatpush3.bf16.msra.mxu0 %v19476_v0  ;;  %17772 = vmatprep.subr.bf16.mxu1 %v19507_v8 }
0x252e   : > { %17814 = vmatprep.subr.bf16.mxu0 %v19507_v8 }
0x2530   : > { %17773 = vmatpush3.bf16.msra.mxu1 %v19477_v45 }
0x2531   : > { %17815 = vmatpush3.bf16.msra.mxu0 %v19478_v1  ;;  %17792 = vmatprep.subr.bf16.mxu1 %v19507_v8 }
0x2532   : > { %17840 = vmatprep.subr.bf16.mxu0 %v19507_v8 }
0x2533   : > { %17775 = vmatmul.mubr.msk.bf16.vlgmr.msra.gmra.mxu1 %vm14680_vm6, %v14626_v40 }
0x2534   : > { %17817 = vmatmul.mubr.msk.bf16.vlgmr.msra.gmra.mxu0 %vm14680_vm6, %v14972_v4  ;;  %17793 = vmatpush3.bf16.msra.mxu1 %v19479_v58 }
0x2535   : > { %17802 = vmatprep.mubr.msk.bf16.mxu1 %vm19508_vm7, %v19507_v8  ;;  %17794 = vmatprep.subr.bf16.mxu1 %v19507_v8 }
0x2536   : > { %17852 = vmatprep.mubr.msk.bf16.mxu0 %vm19508_vm7, %v19507_v8  ;;  %17841 = vmatpush3.bf16.msra.mxu0 %v15239_v17 }
0x2537   : > { %17842 = vmatprep.subr.bf16.mxu0 %v19507_v8 }
0x2538   : > { %17795 = vmatpush3.bf16.msra.mxu1 %v19480_v57 }
0x2539   : > { %17796 = vmatprep.subr.bf16.mxu1 %v19507_v8 }
0x253a   : > { %17843 = vmatpush3.bf16.msra.mxu0 %v19493_v18 }
0x253b   : > { %17844 = vmatprep.subr.bf16.mxu0 %v19507_v8 }
0x253c   : > { %17797 = vmatpush3.bf16.msra.mxu1 %v19481_v52 }
0x253d   : > { %17798 = vmatprep.subr.bf16.mxu1 %v19507_v8 }
0x253e   : > { %17845 = vmatpush3.bf16.msra.mxu0 %v19494_v56 }
0x253f   : > { %17846 = vmatprep.subr.bf16.mxu0 %v19507_v8 }
0x2540   : > { %17799 = vmatpush3.bf16.msra.mxu1 %v19482_v5 }
0x2541   : > { %17800 = vmatprep.subr.bf16.mxu1 %v19507_v8 }
0x2542   : > { %17847 = vmatpush3.bf16.msra.mxu0 %v19495_v19 }
0x2543   : > { %17848 = vmatprep.subr.bf16.mxu0 %v19507_v8 }
0x2544   : > { %17801 = vmatpush3.bf16.msra.mxu1 %v19483_v55 }
0x2545   : > { %17820 = vmatprep.subr.bf16.mxu1 %v19507_v8 }
0x2546   : > { %17849 = vmatpush3.bf16.msra.mxu0 %v19496_v49 }
0x2547   : > { %17803 = vmatmul.mubr.msk.bf16.vlgmr.msra.gmra.mxu1 %vm14680_vm6, %v14885_v6  ;;  %17850 = vmatprep.subr.bf16.mxu0 %v19507_v8 }
0x2548   : > { %17836 = vmatprep.mubr.msk.bf16.mxu1 %vm19508_vm7, %v19507_v8  ;;  %17821 = vmatpush3.bf16.msra.mxu1 %v15140_v47 }
0x2549   : > { %17822 = vmatprep.subr.bf16.mxu1 %v19507_v8 }
0x254a   : > { %17851 = vmatpush3.bf16.msra.mxu0 %v19497_v2 }
0x254c   : > { %17823 = vmatpush3.bf16.msra.mxu1 %v19485_v10 }
0x254d   : > { %17824 = vmatprep.subr.bf16.mxu1 %v19507_v8 }
0x2550   : > { %17825 = vmatpush3.bf16.msra.mxu1 %v19486_v11 }
0x2551   : > { %17826 = vmatprep.subr.bf16.mxu1 %v19507_v8 }
0x2554   : > { %17827 = vmatpush3.bf16.msra.mxu1 %v19487_v51 }
0x2555   : > { %17828 = vmatprep.subr.bf16.mxu1 %v19507_v8 }
0x2558   : > { %17829 = vmatpush3.bf16.msra.mxu1 %v19488_v13 }
0x2559   : > { %17830 = vmatprep.subr.bf16.mxu1 %v19507_v8 }
0x255c   : > { %17831 = vmatpush3.bf16.msra.mxu1 %v19489_v14 }
0x255d   : > { %17832 = vmatprep.subr.bf16.mxu1 %v19507_v8 }
0x2560   : > { %17833 = vmatpush3.bf16.msra.mxu1 %v19490_v54 }
0x2561   : > { %17834 = vmatprep.subr.bf16.mxu1 %v19507_v8  ;;  %v17541_v8 = vld [vmem:[%s24126_s14] ss:$0 sm:$0xff] }
0x2564   : > { %17835 = vmatpush3.bf16.msra.mxu1 %v19491_v15 }
0x25df   : > { %v14718_v20 = vpop.f32.mrf.mxu1 }
0x25e0   : > { %v14877_v21 = vpop.f32.mrf.mxu0 }
0x25e1   : > { %v17762_v7 = vpop.f32.mrf.mxu1 }
0x25e2   : > { %v17790_v12 = vpop.f32.mrf.mxu0 }
0x25e3   : > { %v14721_v22 = vpop.f32.mrf.mxu1 }
0x25e4   : > { %v14880_v24 = vpop.f32.mrf.mxu0 }
0x25e5   : > { %v17763_v42 = vpop.f32.mrf.mxu1 }
0x25e6   : > { %v17791_v43 = vpop.f32.mrf.mxu0 }
0x25f3   : > { %v14791_v30 = vpop.f32.mrf.mxu1 }
0x25f4   : > { %v15051_v27 = vpop.f32.mrf.mxu0  ;;  %v14792_v31 = vadd.f32 %v14791_v30, %v14718_v20 }
0x25f5   : > { %v17776_v23 = vpop.f32.mrf.mxu1 }
0x25f6   : > { %v17818_v33 = vpop.f32.mrf.mxu0  ;;  %v14883_v34 = vadd.f32 %v14877_v21, %v14792_v31 }
0x25f7   : > { %v14794_v26 = vpop.f32.mrf.mxu1 }
0x25f8   : > { %v15054_v29 = vpop.f32.mrf.mxu0 }
0x25f9   : > { %v17777_v25 = vpop.f32.mrf.mxu1 }
0x25fa   : > { %v17819_v28 = vpop.f32.mrf.mxu0 }
0x2607   : > { %v14964_v37 = vpop.f32.mrf.mxu1 }
0x2608   : > { %v14970_v46 = vadd.f32 %v14964_v37, %v14883_v34 }
0x2609   : > { %v17804_v39 = vpop.f32.mrf.mxu1 }
0x260a   : > { %v15057_v36 = vadd.f32 %v15051_v27, %v14970_v46 }
0x260b   : > { %v14967_v60 = vpop.f32.mrf.mxu1 }
0x260c   : > { %v15065_v32 = vadd.f32 %v17530_v41, %v15057_v36 }
0x260d   : > { %v17805_v35 = vpop.f32.mrf.mxu1 }
0x260e   : > { %v15066_v38 = vmax.f32 %v15065_v32, 0.0 }
0x2610   : > { %v15067_v48 = vpack.c.bf16 %v15066_v38, %v15066_v38 }
0x2612   : > { %17837 = vmatmul.mubr.msk.bf16.vlgmr.msra.gmra.mxu1 %vm15135_vm3, %v15067_v48 }
0x26d2   : > { %v15176_v61 = vpop.f32.mrf.mxu1 }
0x26d3   : > { %v15177_v62 = vadd.f32 %v17531_v50, %v15176_v61 }
0x26d4   : > { %v17838_v63 = vpop.f32.mrf.mxu1 }
0x26d5   : > { %v15182_v44 = vmax.f32 %v15177_v62, 0.0 }
0x26d6   : > { %v15179_v0 = vpop.f32.mrf.mxu1 }
0x26d7   : > { %v15183_v45 = vpack.c.bf16 %v15182_v44, %v15182_v44 }
0x26d8   : > { %v17839_v1 = vpop.f32.mrf.mxu1 }
0x26d9   : > { %17853 = vmatmul.mubr.msk.bf16.vlgmr.msra.gmra.mxu0 %vm1545_vm10, %v15183_v45 }
0x2799   : > { %v15275_v59 = vpop.f32.mrf.mxu0 }
0x279a   : > { %v15276_v3 = vadd.f32 %v17541_v8, %v15275_v59 }
0x279b   : > { %v17854_v58 = vpop.f32.mrf.mxu0 }
0x279c   : > { %15281 = vst [vmem:[%s497_s27] sm:$0xff] %v15276_v3 }
0x279d   : > { %v15278_v40 = vpop.f32.mrf.mxu0 }
0x279f   : > { %v17855_v4 = vpop.f32.mrf.mxu0 }
0x27a0 PF: > { %s25_s18 = sadd.s32 1, %s19504_s18  }
0x27a1   : > { %p22_p5 = scmp.ge.s32.totalorder %s25_s18, 5  }
0x27a3   :  { %24 = sbr.rel (!%p22_p5) target bundleno = 1 (0x1), region = 133 }

</bundles_post_ra>
